<compile_context>
chip_gen: v6e
topology: v6e:2x2x1
jax: 0.10.0
libtpu: 0.0.40
codegen_flags: <defaults>
</compile_context>

<pallas_src>
import functools

import jax
import jax.numpy as jnp
from jax.experimental import pallas as pl
from jax.experimental.pallas import tpu as pltpu

C1 = 32 * 12 * 12   # 4608 : flattened output width of the external eq_model
C2 = 1152           # output width of the external autoencoder.encoder
F = C1 + C2         # 5760 : concatenated feature width fed to fully_net
P1 = 8              # padded output width of Linear(5760, 4)  (sublane multiple)
LANE = 128          # padded output width of Linear(4, 2) -> lane-dense store
BN_EPS = 1e-5


# ---------------------------------------------------------------------------
# Fused kernel
# ---------------------------------------------------------------------------
def _ymodel_fused_kernel(x_ref, w_eq_ref, w_enc_ref,
                         g1_ref, be1_ref, g2_ref, be2_ref,
                         w1a_ref, w1b_ref, b1_ref,
                         w2_ref, b2_ref, out_ref, *, hw):
    # ---- feature extraction stand-ins: relu(x @ W), bf16 MXU, f32 accum ----
    # TODO(synk): the real eq_model / autoencoder.encoder are external
    # torch.jit checkpoints and cannot be translated; these projections only
    # reproduce the feature widths (4608 / 1152) the head relies on.
    im = x_ref[:, :hw].astype(jnp.bfloat16)              # channel 0, flattened
    psf = x_ref[:, hw:].astype(jnp.bfloat16)             # channel 1, flattened
    x1 = jnp.maximum(
        jnp.dot(im, w_eq_ref[...], preferred_element_type=jnp.float32), 0.0)
    x2 = jnp.maximum(
        jnp.dot(psf, w_enc_ref[...], preferred_element_type=jnp.float32), 0.0)

    # ---- BatchNorm1d (training-mode batch stats, biased var, eps=1e-5) done
    # per feature segment; per-column stats are independent, so this is
    # numerically identical to normalizing the concatenated features. Then
    # ReLU.  All f32 (v5e-friendly). ----
    def bn_relu(x, g, b):
        mean = jnp.mean(x, axis=0, keepdims=True)
        var = jnp.mean((x - mean) ** 2, axis=0, keepdims=True)
        y = (x - mean) * jax.lax.rsqrt(var + BN_EPS)
        return jnp.maximum(y * g + b, 0.0)

    x1 = bn_relu(x1, g1_ref[...], be1_ref[...])
    x2 = bn_relu(x2, g2_ref[...], be2_ref[...])

    # ---- Linear(5760, 4) as a split contraction over the two segments,
    # output padded to 8 columns (padding entries are exact zeros). ----
    h = (jnp.dot(x1, w1a_ref[...], preferred_element_type=jnp.float32)
         + jnp.dot(x2, w1b_ref[...], preferred_element_type=jnp.float32)
         + b1_ref[...])
    h = jnp.maximum(h, 0.0)                               # ReLU (cols 4.. stay 0)

    # ---- Linear(4, 2), padded to (8, 128); lane-dense unmasked store, the
    # wrapper slices [:, :2]. ----
    y = jnp.dot(h, w2_ref[...], preferred_element_type=jnp.float32) + b2_ref[...]
    out_ref[...] = jnp.tanh(y)                            # Tanh


_VMEM = pl.BlockSpec(memory_space=pltpu.MemorySpace.VMEM)


# ---------------------------------------------------------------------------
# Parameter init (deterministic, torch-like Linear init; weights pre-transposed
# to (in, out) so the kernel computes y = x @ W + b).
# ---------------------------------------------------------------------------
def init_params(key, hw):
    ks = jax.random.split(key, 6)
    # Stand-in feature extractors, stored bf16 (weight streaming dominates the
    # byte traffic; MXU takes bf16 natively and accumulates in f32).
    w_eq = (jax.random.normal(ks[0], (hw, C1), jnp.float32) * 0.02).astype(jnp.bfloat16)
    w_enc = (jax.random.normal(ks[1], (hw, C2), jnp.float32) * 0.02).astype(jnp.bfloat16)

    # BatchNorm1d affine params, split per feature segment.
    gamma1 = jnp.ones((1, C1), jnp.float32)
    beta1 = jnp.zeros((1, C1), jnp.float32)
    gamma2 = jnp.ones((1, C2), jnp.float32)
    beta2 = jnp.zeros((1, C2), jnp.float32)

    bnd1 = 1.0 / (F ** 0.5)
    w1 = jax.random.uniform(ks[2], (F, 4), jnp.float32, -bnd1, bnd1)
    b1 = jax.random.uniform(ks[3], (1, 4), jnp.float32, -bnd1, bnd1)
    bnd2 = 1.0 / (4.0 ** 0.5)
    w2 = jax.random.uniform(ks[4], (4, 2), jnp.float32, -bnd2, bnd2)
    b2 = jax.random.uniform(ks[5], (1, 2), jnp.float32, -bnd2, bnd2)

    # Pad the narrow tails only as far as needed (8 cols / 128 lanes for the
    # final lane-dense store); padding entries are exact zeros so the padded
    # matmuls are numerically identical.
    w1p = jnp.zeros((F, P1), jnp.float32).at[:, :4].set(w1)
    w1a = w1p[:C1]                                        # (4608, 8)
    w1b = w1p[C1:]                                        # (1152, 8)
    b1p = jnp.zeros((1, P1), jnp.float32).at[:, :4].set(b1)
    w2p = jnp.zeros((P1, LANE), jnp.float32).at[:4, :2].set(w2)
    b2p = jnp.zeros((1, LANE), jnp.float32).at[:, :2].set(b2)

    return dict(w_eq=w_eq, w_enc=w_enc,
                gamma1=gamma1, beta1=beta1, gamma2=gamma2, beta2=beta2,
                w1a=w1a, w1b=w1b, b1p=b1p, w2p=w2p, b2p=b2p)


# ---------------------------------------------------------------------------
# Forward wrapper — a single pallas_call
# ---------------------------------------------------------------------------
@jax.jit
def ymodel_forward(x, params):
    # x: (B, 2, H, W), NCHW like the torch module (only channels 0/1 are used).
    B, _, H, W = x.shape
    hw = H * W
    # Contiguous reshape (no copy): each row is [chan0 flat | chan1 flat].
    x2d = x[:, :2, :, :].reshape(B, 2 * hw)

    param_order = ("w_eq", "w_enc", "gamma1", "beta1", "gamma2", "beta2",
                   "w1a", "w1b", "b1p", "w2p", "b2p")
    args = [params[k] for k in param_order]

    bytes_accessed = int(
        x2d.size * x2d.dtype.itemsize
        + sum(a.size * a.dtype.itemsize for a in args)
        + B * LANE * 4)
    flops = int(2 * B * hw * (C1 + C2)        # stand-in projections
                + 2 * B * F * P1              # Linear(5760,4) (padded to 8)
                + 2 * B * P1 * LANE           # Linear(4,2) (padded)
                + 10 * B * F)                 # BN / ReLU elementwise
    transcendentals = int(B * LANE + 2 * F)   # tanh + rsqrt

    kernel = functools.partial(_ymodel_fused_kernel, hw=hw)
    out_pad = pl.pallas_call(
        kernel,
        in_specs=[_VMEM] * (1 + len(args)),
        out_specs=_VMEM,
        out_shape=jax.ShapeDtypeStruct((B, LANE), jnp.float32),
        compiler_params=pltpu.CompilerParams(vmem_limit_bytes=32 * 1024 * 1024),
        cost_estimate=pl.CostEstimate(flops=flops,
                                      transcendentals=transcendentals,
                                      bytes_accessed=bytes_accessed),
    )(x2d, *args)

    return out_pad[:, :2]                     # lane-dense store, free slice here


if __name__ == "__main__":
    key = jax.random.PRNGKey(0)
    kx, kp = jax.random.split(key)
    B, H, W = 2, 16, 16
    x = jax.random.normal(kx, (B, 2, H, W), jnp.float32)
    params = init_params(kp, H * W)

    out = jax.block_until_ready(ymodel_forward(x, params))
    assert out.shape == (B, 2) and out.dtype == jnp.float32
    print("KERNEL_OK")
</pallas_src>

<mosaic_0001>
module attributes {stable_mosaic.version = 11 : i64} {
  func.func @_ymodel_fused_kernel(%arg0: memref<2x512xf32, #tpu.memory_space<vmem>>, %arg1: memref<256x4608xbf16, #tpu.memory_space<vmem>>, %arg2: memref<256x1152xbf16, #tpu.memory_space<vmem>>, %arg3: memref<1x4608xf32, #tpu.memory_space<vmem>>, %arg4: memref<1x4608xf32, #tpu.memory_space<vmem>>, %arg5: memref<1x1152xf32, #tpu.memory_space<vmem>>, %arg6: memref<1x1152xf32, #tpu.memory_space<vmem>>, %arg7: memref<4608x8xf32, #tpu.memory_space<vmem>>, %arg8: memref<1152x8xf32, #tpu.memory_space<vmem>>, %arg9: memref<1x8xf32, #tpu.memory_space<vmem>>, %arg10: memref<8x128xf32, #tpu.memory_space<vmem>>, %arg11: memref<1x128xf32, #tpu.memory_space<vmem>>, %arg12: memref<2x128xf32, #tpu.memory_space<vmem>>) attributes {dimension_semantics = [], scalar_prefetch = 0 : i64, scratch_operands = 0 : i64, tpu.core_type = #tpu.core_type<tc>} {
    %c0 = arith.constant 0 : index
    %c0_0 = arith.constant 0 : index
    %0 = vector.load %arg0[%c0, %c0_0] : memref<2x512xf32, #tpu.memory_space<vmem>>, vector<2x256xf32>
    %1 = arith.truncf %0 : vector<2x256xf32> to vector<2x256xbf16>
    %c0_1 = arith.constant 0 : index
    %c256 = arith.constant 256 : index
    %2 = vector.load %arg0[%c0_1, %c256] : memref<2x512xf32, #tpu.memory_space<vmem>>, vector<2x256xf32>
    %3 = arith.truncf %2 : vector<2x256xf32> to vector<2x256xbf16>
    %c0_2 = arith.constant 0 : index
    %c0_3 = arith.constant 0 : index
    %4 = vector.load %arg1[%c0_2, %c0_3] : memref<256x4608xbf16, #tpu.memory_space<vmem>>, vector<256x4608xbf16>
    %cst = arith.constant dense<0.000000e+00> : vector<2x4608xf32>
    %5 = tpu.matmul %1, %4, %cst {dimension_numbers = #tpu.dot_dimension_numbers<[1], [0], [0], [1], [0, 0, 1, 1], [], []>} : vector<2x256xbf16>, vector<256x4608xbf16>, vector<2x4608xf32> -> vector<2x4608xf32>
    %cst_4 = arith.constant 0.000000e+00 : f32
    %6 = vector.broadcast %cst_4 : f32 to vector<2x4608xf32>
    %7 = arith.maximumf %5, %6 : vector<2x4608xf32>
    %c0_5 = arith.constant 0 : index
    %c0_6 = arith.constant 0 : index
    %8 = vector.load %arg2[%c0_5, %c0_6] : memref<256x1152xbf16, #tpu.memory_space<vmem>>, vector<256x1152xbf16>
    %cst_7 = arith.constant dense<0.000000e+00> : vector<2x1152xf32>
    %9 = tpu.matmul %3, %8, %cst_7 {dimension_numbers = #tpu.dot_dimension_numbers<[1], [0], [0], [1], [0, 0, 1, 1], [], []>} : vector<2x256xbf16>, vector<256x1152xbf16>, vector<2x1152xf32> -> vector<2x1152xf32>
    %cst_8 = arith.constant 0.000000e+00 : f32
    %10 = vector.broadcast %cst_8 : f32 to vector<2x1152xf32>
    %11 = arith.maximumf %9, %10 : vector<2x1152xf32>
    %c0_9 = arith.constant 0 : index
    %c0_10 = arith.constant 0 : index
    %12 = vector.load %arg3[%c0_9, %c0_10] : memref<1x4608xf32, #tpu.memory_space<vmem>>, vector<1x4608xf32>
    %c0_11 = arith.constant 0 : index
    %c0_12 = arith.constant 0 : index
    %13 = vector.load %arg4[%c0_11, %c0_12] : memref<1x4608xf32, #tpu.memory_space<vmem>>, vector<1x4608xf32>
    %cst_13 = arith.constant dense<0.000000e+00> : vector<4608xf32>
    %14 = vector.multi_reduction <add>, %7, %cst_13 [0] : vector<2x4608xf32> to vector<4608xf32>
    %15 = vector.shape_cast %14 : vector<4608xf32> to vector<1x4608xf32>
    %cst_14 = arith.constant 2.000000e+00 : f32
    %16 = vector.broadcast %cst_14 : f32 to vector<1x4608xf32>
    %17 = arith.divf %15, %16 : vector<1x4608xf32>
    %18 = vector.broadcast %17 : vector<1x4608xf32> to vector<2x4608xf32>
    %19 = arith.subf %7, %18 : vector<2x4608xf32>
    %20 = arith.mulf %19, %19 : vector<2x4608xf32>
    %cst_15 = arith.constant dense<0.000000e+00> : vector<4608xf32>
    %21 = vector.multi_reduction <add>, %20, %cst_15 [0] : vector<2x4608xf32> to vector<4608xf32>
    %22 = vector.shape_cast %21 : vector<4608xf32> to vector<1x4608xf32>
    %cst_16 = arith.constant 2.000000e+00 : f32
    %23 = vector.broadcast %cst_16 : f32 to vector<1x4608xf32>
    %24 = arith.divf %22, %23 : vector<1x4608xf32>
    %25 = vector.broadcast %17 : vector<1x4608xf32> to vector<2x4608xf32>
    %26 = arith.subf %7, %25 : vector<2x4608xf32>
    %cst_17 = arith.constant 9.99999974E-6 : f32
    %27 = vector.broadcast %cst_17 : f32 to vector<1x4608xf32>
    %28 = arith.addf %24, %27 : vector<1x4608xf32>
    %29 = math.rsqrt %28 : vector<1x4608xf32>
    %30 = vector.broadcast %29 : vector<1x4608xf32> to vector<2x4608xf32>
    %31 = arith.mulf %26, %30 : vector<2x4608xf32>
    %32 = vector.broadcast %12 : vector<1x4608xf32> to vector<2x4608xf32>
    %33 = arith.mulf %31, %32 : vector<2x4608xf32>
    %34 = vector.broadcast %13 : vector<1x4608xf32> to vector<2x4608xf32>
    %35 = arith.addf %33, %34 : vector<2x4608xf32>
    %cst_18 = arith.constant 0.000000e+00 : f32
    %36 = vector.broadcast %cst_18 : f32 to vector<2x4608xf32>
    %37 = arith.maximumf %35, %36 : vector<2x4608xf32>
    %c0_19 = arith.constant 0 : index
    %c0_20 = arith.constant 0 : index
    %38 = vector.load %arg5[%c0_19, %c0_20] : memref<1x1152xf32, #tpu.memory_space<vmem>>, vector<1x1152xf32>
    %c0_21 = arith.constant 0 : index
    %c0_22 = arith.constant 0 : index
    %39 = vector.load %arg6[%c0_21, %c0_22] : memref<1x1152xf32, #tpu.memory_space<vmem>>, vector<1x1152xf32>
    %cst_23 = arith.constant dense<0.000000e+00> : vector<1152xf32>
    %40 = vector.multi_reduction <add>, %11, %cst_23 [0] : vector<2x1152xf32> to vector<1152xf32>
    %41 = vector.shape_cast %40 : vector<1152xf32> to vector<1x1152xf32>
    %cst_24 = arith.constant 2.000000e+00 : f32
    %42 = vector.broadcast %cst_24 : f32 to vector<1x1152xf32>
    %43 = arith.divf %41, %42 : vector<1x1152xf32>
    %44 = vector.broadcast %43 : vector<1x1152xf32> to vector<2x1152xf32>
    %45 = arith.subf %11, %44 : vector<2x1152xf32>
    %46 = arith.mulf %45, %45 : vector<2x1152xf32>
    %cst_25 = arith.constant dense<0.000000e+00> : vector<1152xf32>
    %47 = vector.multi_reduction <add>, %46, %cst_25 [0] : vector<2x1152xf32> to vector<1152xf32>
    %48 = vector.shape_cast %47 : vector<1152xf32> to vector<1x1152xf32>
    %cst_26 = arith.constant 2.000000e+00 : f32
    %49 = vector.broadcast %cst_26 : f32 to vector<1x1152xf32>
    %50 = arith.divf %48, %49 : vector<1x1152xf32>
    %51 = vector.broadcast %43 : vector<1x1152xf32> to vector<2x1152xf32>
    %52 = arith.subf %11, %51 : vector<2x1152xf32>
    %cst_27 = arith.constant 9.99999974E-6 : f32
    %53 = vector.broadcast %cst_27 : f32 to vector<1x1152xf32>
    %54 = arith.addf %50, %53 : vector<1x1152xf32>
    %55 = math.rsqrt %54 : vector<1x1152xf32>
    %56 = vector.broadcast %55 : vector<1x1152xf32> to vector<2x1152xf32>
    %57 = arith.mulf %52, %56 : vector<2x1152xf32>
    %58 = vector.broadcast %38 : vector<1x1152xf32> to vector<2x1152xf32>
    %59 = arith.mulf %57, %58 : vector<2x1152xf32>
    %60 = vector.broadcast %39 : vector<1x1152xf32> to vector<2x1152xf32>
    %61 = arith.addf %59, %60 : vector<2x1152xf32>
    %cst_28 = arith.constant 0.000000e+00 : f32
    %62 = vector.broadcast %cst_28 : f32 to vector<2x1152xf32>
    %63 = arith.maximumf %61, %62 : vector<2x1152xf32>
    %c0_29 = arith.constant 0 : index
    %c0_30 = arith.constant 0 : index
    %64 = vector.load %arg7[%c0_29, %c0_30] : memref<4608x8xf32, #tpu.memory_space<vmem>>, vector<4608x8xf32>
    %cst_31 = arith.constant dense<0.000000e+00> : vector<2x8xf32>
    %65 = tpu.matmul %37, %64, %cst_31 {dimension_numbers = #tpu.dot_dimension_numbers<[1], [0], [0], [1], [0, 0, 1, 1], [], []>} : vector<2x4608xf32>, vector<4608x8xf32>, vector<2x8xf32> -> vector<2x8xf32>
    %c0_32 = arith.constant 0 : index
    %c0_33 = arith.constant 0 : index
    %66 = vector.load %arg8[%c0_32, %c0_33] : memref<1152x8xf32, #tpu.memory_space<vmem>>, vector<1152x8xf32>
    %cst_34 = arith.constant dense<0.000000e+00> : vector<2x8xf32>
    %67 = tpu.matmul %63, %66, %cst_34 {dimension_numbers = #tpu.dot_dimension_numbers<[1], [0], [0], [1], [0, 0, 1, 1], [], []>} : vector<2x1152xf32>, vector<1152x8xf32>, vector<2x8xf32> -> vector<2x8xf32>
    %68 = arith.addf %65, %67 : vector<2x8xf32>
    %c0_35 = arith.constant 0 : index
    %c0_36 = arith.constant 0 : index
    %69 = vector.load %arg9[%c0_35, %c0_36] : memref<1x8xf32, #tpu.memory_space<vmem>>, vector<1x8xf32>
    %70 = vector.broadcast %69 : vector<1x8xf32> to vector<2x8xf32>
    %71 = arith.addf %68, %70 : vector<2x8xf32>
    %cst_37 = arith.constant 0.000000e+00 : f32
    %72 = vector.broadcast %cst_37 : f32 to vector<2x8xf32>
    %73 = arith.maximumf %71, %72 : vector<2x8xf32>
    %c0_38 = arith.constant 0 : index
    %c0_39 = arith.constant 0 : index
    %74 = vector.load %arg10[%c0_38, %c0_39] : memref<8x128xf32, #tpu.memory_space<vmem>>, vector<8x128xf32>
    %cst_40 = arith.constant dense<0.000000e+00> : vector<2x128xf32>
    %75 = tpu.matmul %73, %74, %cst_40 {dimension_numbers = #tpu.dot_dimension_numbers<[1], [0], [0], [1], [0, 0, 1, 1], [], []>} : vector<2x8xf32>, vector<8x128xf32>, vector<2x128xf32> -> vector<2x128xf32>
    %c0_41 = arith.constant 0 : index
    %c0_42 = arith.constant 0 : index
    %76 = vector.load %arg11[%c0_41, %c0_42] : memref<1x128xf32, #tpu.memory_space<vmem>>, vector<1x128xf32>
    %77 = vector.broadcast %76 : vector<1x128xf32> to vector<2x128xf32>
    %78 = arith.addf %75, %77 : vector<2x128xf32>
    %79 = math.tanh %78 : vector<2x128xf32>
    %c0_43 = arith.constant 0 : index
    %c0_44 = arith.constant 0 : index
    %80 = vector.load %arg12[%c0_43, %c0_44] : memref<2x128xf32, #tpu.memory_space<vmem>>, vector<2x128xf32>
    tpu.vector_store %arg12[%c0_43, %c0_44], %79 {strides = array<i32>} : memref<2x128xf32, #tpu.memory_space<vmem>>, vector<2x128xf32>,
    return
  }
}

</mosaic_0001>

<bundles_post_ra>
// kernel: ymodel_forward.1
= control target key start
LH: loop header
LB: loop body
LE: loop exit
PB: predicated region body
PF: predicated region fallthrough
CT: control target
= control target key end

     0   :  { %vm5420_vm0 = vcmask 1041408   ;;  %s17636_s0 = inlined_call_operand.vmem [shape: f32[2,512], index: 0, kind: input, shape index: {}]   ;;  %s17637_s1 = inlined_call_operand.vmem [shape: bf16[256,4608], index: 1, kind: input, shape index: {}]   ;;  %s17638_s2 = inlined_call_operand.vmem [shape: bf16[256,1152], index: 2, kind: input, shape index: {}]   ;;  %s17639_s3 = inlined_call_operand.vmem [shape: f32[1,4608], index: 3, kind: input, shape index: {}]   ;;  %s17640_s4 = inlined_call_operand.vmem [shape: f32[1,4608], index: 4, kind: input, shape index: {}]   ;;  %s17641_s5 = inlined_call_operand.vmem [shape: f32[1,1152], index: 5, kind: input, shape index: {}]   ;;  %s17642_s6 = inlined_call_operand.vmem [shape: f32[1,1152], index: 6, kind: input, shape index: {}]   ;;  %s17643_s7 = inlined_call_operand.vmem [shape: f32[4608,8], index: 7, kind: input, shape index: {}]   ;;  %s17644_s8 = inlined_call_operand.vmem [shape: f32[1152,8], index: 8, kind: input, shape index: {}]   ;;  %s17645_s9 = inlined_call_operand.vmem [shape: f32[1,8], index: 9, kind: input, shape index: {}]   ;;  %s17646_s10 = inlined_call_operand.vmem [shape: f32[8,128], index: 10, kind: input, shape index: {}]   ;;  %s17647_s11 = inlined_call_operand.vmem [shape: f32[1,128], index: 11, kind: input, shape index: {}]   ;;  %s17648_s12 = inlined_call_operand.hbm [shape: f32[2,128], index: 12, kind: output, shape index: {}]  }
   0x1   :  { %v10988_v0 = vld [vmem:[%s17637_s1 + $0x7e4] ss:$144 sps:$4 sm:$0xff]   ;;  %v10990_v1 = vld [vmem:[%s17637_s1 + $0x7ec] ss:$144 sps:$4 sm:$0xff]   ;;  %v10992_v2 = vld [vmem:[%s17637_s1 + $0x7e0] ss:$144 sps:$4 sm:$0xff]  }
   0x2   :  { %3527 = vmatprep.subr.bf16.mxu0 %v10988_v0  ;;  %v10993_v3 = vld [vmem:[%s17637_s1 + $0x7e8] ss:$144 sps:$4 sm:$0xff]   ;;  %3568 = vmatprep.subr.bf16.mxu1 %v10990_v1  ;;  %v10994_v4 = vld [vmem:[%s17637_s1 + $0x6c4] ss:$144 sps:$4 sm:$0xff]   ;;  %v10996_v5 = vld [vmem:[%s17637_s1 + $0x6cc] ss:$144 sps:$4 sm:$0xff]  }
   0x3   :  { %3528 = vmatpush1.bf16.msra.mxu0 %v10992_v2  ;;  %3569 = vmatpush1.bf16.msra.mxu1 %v10993_v3  ;;  %v10998_v6 = vld [vmem:[%s17637_s1 + $0x6c0] ss:$144 sps:$4 sm:$0xff]   ;;  %v10999_v7 = vld [vmem:[%s17637_s1 + $0x6c8] ss:$144 sps:$4 sm:$0xff]   ;;  %v11000_v8 = vld [vmem:[%s17637_s1 + $0x5a4] ss:$144 sps:$4 sm:$0xff]  }
   0x4   :  { %3529 = vmatprep.subr.bf16.mxu0 %v10994_v4  ;;  %3570 = vmatprep.subr.bf16.mxu1 %v10996_v5  ;;  %v11002_v9 = vld [vmem:[%s17637_s1 + $0x5ac] ss:$144 sps:$4 sm:$0xff]   ;;  %v11004_v10 = vld [vmem:[%s17637_s1 + $0x5a0] ss:$144 sps:$4 sm:$0xff]   ;;  %v11005_v11 = vld [vmem:[%s17637_s1 + $0x5a8] ss:$144 sps:$4 sm:$0xff]  }
   0x5   :  { %v11006_v12 = vld [vmem:[%s17637_s1 + $0x484] ss:$144 sps:$4 sm:$0xff]   ;;  %v11008_v13 = vld [vmem:[%s17637_s1 + $0x48c] ss:$144 sps:$4 sm:$0xff]   ;;  %v11010_v14 = vld [vmem:[%s17637_s1 + $0x480] ss:$144 sps:$4 sm:$0xff]  }
   0x6   :  { %v11011_v15 = vld [vmem:[%s17637_s1 + $0x488] ss:$144 sps:$4 sm:$0xff]   ;;  %v11012_v16 = vld [vmem:[%s17637_s1 + $0x364] ss:$144 sps:$4 sm:$0xff]   ;;  %v11014_v17 = vld [vmem:[%s17637_s1 + $0x36c] ss:$144 sps:$4 sm:$0xff]  }
   0x7   :  { %3530 = vmatpush1.bf16.msra.mxu0 %v10998_v6  ;;  %3571 = vmatpush1.bf16.msra.mxu1 %v10999_v7  ;;  %v11016_v18 = vld [vmem:[%s17637_s1 + $0x360] ss:$144 sps:$4 sm:$0xff]   ;;  %v11017_v19 = vld [vmem:[%s17637_s1 + $0x368] ss:$144 sps:$4 sm:$0xff]   ;;  %v11018_v20 = vld [vmem:[%s17637_s1 + $0x244] ss:$144 sps:$4 sm:$0xff]  }
   0x8   :  { %3531 = vmatprep.subr.bf16.mxu0 %v11000_v8  ;;  %3572 = vmatprep.subr.bf16.mxu1 %v11002_v9  ;;  %v11020_v21 = vld [vmem:[%s17637_s1 + $0x24c] ss:$144 sps:$4 sm:$0xff]   ;;  %v11022_v22 = vld [vmem:[%s17637_s1 + $0x240] ss:$144 sps:$4 sm:$0xff]   ;;  %v11023_v23 = vld [vmem:[%s17637_s1 + $0x248] ss:$144 sps:$4 sm:$0xff]  }
   0x9   :  { %v11024_v24 = vld [vmem:[%s17637_s1 + $0x124] ss:$144 sps:$4 sm:$0xff]   ;;  %v11026_v25 = vld [vmem:[%s17637_s1 + $0x12c] ss:$144 sps:$4 sm:$0xff]   ;;  %v11028_v26 = vld [vmem:[%s17637_s1 + $0x120] ss:$144 sps:$4 sm:$0xff]  }
   0xa   :  { %v11029_v27 = vld [vmem:[%s17637_s1 + $0x128] ss:$144 sps:$4 sm:$0xff]   ;;  %v11030_v28 = vld [vmem:[%s17637_s1 + $0x4] ss:$144 sps:$4 sm:$0xff]   ;;  %v11032_v29 = vld [vmem:[%s17637_s1 + $0xc] ss:$144 sps:$4 sm:$0xff]  }
   0xb   :  { %3532 = vmatpush1.bf16.msra.mxu0 %v11004_v10  ;;  %3573 = vmatpush1.bf16.msra.mxu1 %v11005_v11  ;;  %v11034_v30 = vld [vmem:[%s17637_s1] ss:$144 sps:$4 sm:$0xff]   ;;  %v11035_v31 = vld [vmem:[%s17637_s1 + $0x8] ss:$144 sps:$4 sm:$0xff]   ;;  %v11036_v32 = vld [vmem:[%s17637_s1 + $0x10e4] ss:$144 sps:$4 sm:$0xff]  }
   0xc   :  { %3533 = vmatprep.subr.bf16.mxu0 %v11006_v12  ;;  %3574 = vmatprep.subr.bf16.mxu1 %v11008_v13  ;;  %v11038_v33 = vld [vmem:[%s17637_s1 + $0x10ec] ss:$144 sps:$4 sm:$0xff]   ;;  %v11040_v34 = vld [vmem:[%s17637_s1 + $0x10e0] ss:$144 sps:$4 sm:$0xff]   ;;  %v11041_v35 = vld [vmem:[%s17637_s1 + $0x10e8] ss:$144 sps:$4 sm:$0xff]  }
   0xd   :  { %v11042_v36 = vld [vmem:[%s17637_s1 + $0xfc4] ss:$144 sps:$4 sm:$0xff]   ;;  %v11044_v37 = vld [vmem:[%s17637_s1 + $0xfcc] ss:$144 sps:$4 sm:$0xff]   ;;  %v11046_v38 = vld [vmem:[%s17637_s1 + $0xfc0] ss:$144 sps:$4 sm:$0xff]  }
   0xe   :  { %v11047_v39 = vld [vmem:[%s17637_s1 + $0xfc8] ss:$144 sps:$4 sm:$0xff]   ;;  %v11048_v40 = vld [vmem:[%s17637_s1 + $0xea4] ss:$144 sps:$4 sm:$0xff]   ;;  %v11050_v41 = vld [vmem:[%s17637_s1 + $0xeac] ss:$144 sps:$4 sm:$0xff]  }
   0xf   :  { %3534 = vmatpush1.bf16.msra.mxu0 %v11010_v14  ;;  %3575 = vmatpush1.bf16.msra.mxu1 %v11011_v15  ;;  %v11052_v42 = vld [vmem:[%s17637_s1 + $0xea0] ss:$144 sps:$4 sm:$0xff]   ;;  %v11053_v43 = vld [vmem:[%s17637_s1 + $0xea8] ss:$144 sps:$4 sm:$0xff]   ;;  %v11054_v44 = vld [vmem:[%s17637_s1 + $0xd84] ss:$144 sps:$4 sm:$0xff]  }
  0x10   :  { %3535 = vmatprep.subr.bf16.mxu0 %v11012_v16  ;;  %3576 = vmatprep.subr.bf16.mxu1 %v11014_v17  ;;  %v11056_v45 = vld [vmem:[%s17637_s1 + $0xd8c] ss:$144 sps:$4 sm:$0xff]   ;;  %v9407_v46 = vld.sshfl [vmem:[%s17636_s0] sm:$0x33 pattern:$0x76325410] }
  0x11   :  { %v11058_v47 = vld [vmem:[%s17637_s1 + $0xd80] ss:$144 sps:$4 sm:$0xff]   ;;  %v11059_v48 = vld [vmem:[%s17637_s1 + $0xd88] ss:$144 sps:$4 sm:$0xff]   ;;  %v52_v49 = vcombine.high %v9407_v46, %v9407_v46  ;;  %v11060_v50 = vld [vmem:[%s17637_s1 + $0xc64] ss:$144 sps:$4 sm:$0xff]   ;;  %v12457_v5 = vpack.c.bf16 %v9407_v46, %v9407_v46 }
  0x12   :  { %v11062_v51 = vld [vmem:[%s17637_s1 + $0xc6c] ss:$144 sps:$4 sm:$0xff]   ;;  %v11064_v53 = vld [vmem:[%s17637_s1 + $0xc60] ss:$144 sps:$4 sm:$0xff]   ;;  %v11065_v54 = vld [vmem:[%s17637_s1 + $0xc68] ss:$144 sps:$4 sm:$0xff]  }
  0x13   :  { %3536 = vmatpush1.bf16.msra.mxu0 %v11016_v18  ;;  %3577 = vmatpush1.bf16.msra.mxu1 %v11017_v19  ;;  %v12405_v52 = vpack.c.bf16 %v52_v49, %v52_v49  ;;  %v11066_v55 = vld [vmem:[%s17637_s1 + $0xb44] ss:$144 sps:$4 sm:$0xff]   ;;  %v11068_v56 = vld [vmem:[%s17637_s1 + $0xb4c] ss:$144 sps:$4 sm:$0xff]   ;;  %v11070_v57 = vld [vmem:[%s17637_s1 + $0xb40] ss:$144 sps:$4 sm:$0xff]  }
  0x14   :  { %3537 = vmatprep.subr.bf16.mxu0 %v11018_v20  ;;  %3578 = vmatprep.subr.bf16.mxu1 %v11020_v21  ;;  %v11071_v58 = vld [vmem:[%s17637_s1 + $0xb48] ss:$144 sps:$4 sm:$0xff]   ;;  %v11072_v59 = vld [vmem:[%s17637_s1 + $0xa24] ss:$144 sps:$4 sm:$0xff]   ;;  %v11074_v60 = vld [vmem:[%s17637_s1 + $0xa2c] ss:$144 sps:$4 sm:$0xff]  }
  0x15   :  { %3559 = vmatprep.mubr.bf16.mxu0 %v12405_v52  ;;  %3600 = vmatprep.mubr.bf16.mxu1 %v12405_v52  ;;  %v11076_v61 = vld [vmem:[%s17637_s1 + $0xa20] ss:$144 sps:$4 sm:$0xff]   ;;  %v11077_v62 = vld [vmem:[%s17637_s1 + $0xa28] ss:$144 sps:$4 sm:$0xff]   ;;  %v11078_v63 = vld [vmem:[%s17637_s1 + $0x904] ss:$144 sps:$4 sm:$0xff]  }
  0x16   :  { %v11080_v0 = vld [vmem:[%s17637_s1 + $0x90c] ss:$144 sps:$4 sm:$0xff]   ;;  %v11082_v1 = vld [vmem:[%s17637_s1 + $0x900] ss:$144 sps:$4 sm:$0xff]   ;;  %v11083_v2 = vld [vmem:[%s17637_s1 + $0x908] ss:$144 sps:$4 sm:$0xff]  }
  0x17   :  { %3538 = vmatpush1.bf16.msra.mxu0 %v11022_v22  ;;  %3579 = vmatpush1.bf16.msra.mxu1 %v11023_v23  ;;  %v11086_v3 = vld [vmem:[%s17637_s1 + $0x7f4] ss:$144 sps:$4 sm:$0xff]   ;;  %v11089_v4 = vld [vmem:[%s17637_s1 + $0x7fc] ss:$144 sps:$4 sm:$0xff]   ;;  %v11084_v6 = vld [vmem:[%s17637_s1 + $0x7f0] ss:$144 sps:$4 sm:$0xff]  }
  0x18   :  { %3539 = vmatprep.subr.bf16.mxu0 %v11024_v24  ;;  %3580 = vmatprep.subr.bf16.mxu1 %v11026_v25  ;;  %v11087_v7 = vld [vmem:[%s17637_s1 + $0x7f8] ss:$144 sps:$4 sm:$0xff]   ;;  %v11092_v8 = vld [vmem:[%s17637_s1 + $0x6d4] ss:$144 sps:$4 sm:$0xff]   ;;  %v11095_v9 = vld [vmem:[%s17637_s1 + $0x6dc] ss:$144 sps:$4 sm:$0xff]  }
  0x19   :  { %v11090_v10 = vld [vmem:[%s17637_s1 + $0x6d0] ss:$144 sps:$4 sm:$0xff]   ;;  %v11093_v11 = vld [vmem:[%s17637_s1 + $0x6d8] ss:$144 sps:$4 sm:$0xff]   ;;  %v11098_v12 = vld [vmem:[%s17637_s1 + $0x5b4] ss:$144 sps:$4 sm:$0xff]  }
  0x1a   :  { %v11101_v13 = vld [vmem:[%s17637_s1 + $0x5bc] ss:$144 sps:$4 sm:$0xff]   ;;  %v11096_v14 = vld [vmem:[%s17637_s1 + $0x5b0] ss:$144 sps:$4 sm:$0xff]   ;;  %v11099_v15 = vld [vmem:[%s17637_s1 + $0x5b8] ss:$144 sps:$4 sm:$0xff]  }
  0x1b   :  { %3540 = vmatpush1.bf16.msra.mxu0 %v11028_v26  ;;  %3581 = vmatpush1.bf16.msra.mxu1 %v11029_v27  ;;  %v11104_v16 = vld [vmem:[%s17637_s1 + $0x494] ss:$144 sps:$4 sm:$0xff]   ;;  %v11107_v17 = vld [vmem:[%s17637_s1 + $0x49c] ss:$144 sps:$4 sm:$0xff]   ;;  %v11102_v18 = vld [vmem:[%s17637_s1 + $0x490] ss:$144 sps:$4 sm:$0xff]  }
  0x1c   :  { %3541 = vmatprep.subr.bf16.mxu0 %v11030_v28  ;;  %3582 = vmatprep.subr.bf16.mxu1 %v11032_v29  ;;  %v11105_v19 = vld [vmem:[%s17637_s1 + $0x498] ss:$144 sps:$4 sm:$0xff]   ;;  %v11110_v20 = vld [vmem:[%s17637_s1 + $0x374] ss:$144 sps:$4 sm:$0xff]   ;;  %v11113_v21 = vld [vmem:[%s17637_s1 + $0x37c] ss:$144 sps:$4 sm:$0xff]  }
  0x1d   :  { %v11108_v22 = vld [vmem:[%s17637_s1 + $0x370] ss:$144 sps:$4 sm:$0xff]   ;;  %v11111_v23 = vld [vmem:[%s17637_s1 + $0x378] ss:$144 sps:$4 sm:$0xff]   ;;  %v11116_v24 = vld [vmem:[%s17637_s1 + $0x254] ss:$144 sps:$4 sm:$0xff]  }
  0x1e   :  { %v11119_v25 = vld [vmem:[%s17637_s1 + $0x25c] ss:$144 sps:$4 sm:$0xff]   ;;  %v11114_v26 = vld [vmem:[%s17637_s1 + $0x250] ss:$144 sps:$4 sm:$0xff]   ;;  %v11117_v27 = vld [vmem:[%s17637_s1 + $0x258] ss:$144 sps:$4 sm:$0xff]  }
  0x1f   :  { %3542 = vmatpush1.bf16.msra.mxu0 %v11034_v30  ;;  %3583 = vmatpush1.bf16.msra.mxu1 %v11035_v31  ;;  %v11122_v28 = vld [vmem:[%s17637_s1 + $0x134] ss:$144 sps:$4 sm:$0xff]   ;;  %v11125_v29 = vld [vmem:[%s17637_s1 + $0x13c] ss:$144 sps:$4 sm:$0xff]   ;;  %v11120_v30 = vld [vmem:[%s17637_s1 + $0x130] ss:$144 sps:$4 sm:$0xff]  }
  0x20   :  { %3543 = vmatprep.subr.bf16.mxu0 %v11036_v32  ;;  %3584 = vmatprep.subr.bf16.mxu1 %v11038_v33  ;;  %v11123_v31 = vld [vmem:[%s17637_s1 + $0x138] ss:$144 sps:$4 sm:$0xff]   ;;  %v11128_v32 = vld [vmem:[%s17637_s1 + $0x14] ss:$144 sps:$4 sm:$0xff]   ;;  %v11131_v33 = vld [vmem:[%s17637_s1 + $0x1c] ss:$144 sps:$4 sm:$0xff]  }
  0x21   :  { %v11144_v46 = vld [vmem:[%s17637_s1 + $0xeb0] ss:$144 sps:$4 sm:$0xff]   ;;  %v11155_v49 = vld [vmem:[%s17637_s1 + $0xd9c] ss:$144 sps:$4 sm:$0xff]  }
  0x23   :  { %3544 = vmatpush2.bf16.msra.mxu0 %v11040_v34  ;;  %3585 = vmatpush2.bf16.msra.mxu1 %v11041_v35  ;;  %v11126_v34 = vld [vmem:[%s17637_s1 + $0x10] ss:$144 sps:$4 sm:$0xff]   ;;  %v11129_v35 = vld [vmem:[%s17637_s1 + $0x18] ss:$144 sps:$4 sm:$0xff]  }
  0x24   :  { %3545 = vmatprep.subr.bf16.mxu0 %v11042_v36  ;;  %3586 = vmatprep.subr.bf16.mxu1 %v11044_v37  ;;  %v11134_v36 = vld [vmem:[%s17637_s1 + $0x10f4] ss:$144 sps:$4 sm:$0xff]   ;;  %v11137_v37 = vld [vmem:[%s17637_s1 + $0x10fc] ss:$144 sps:$4 sm:$0xff]  }
  0x27   :  { %3546 = vmatpush2.bf16.msra.mxu0 %v11046_v38  ;;  %3587 = vmatpush2.bf16.msra.mxu1 %v11047_v39  ;;  %v11132_v38 = vld [vmem:[%s17637_s1 + $0x10f0] ss:$144 sps:$4 sm:$0xff]   ;;  %v11135_v39 = vld [vmem:[%s17637_s1 + $0x10f8] ss:$144 sps:$4 sm:$0xff]  }
  0x28   :  { %3547 = vmatprep.subr.bf16.mxu0 %v11048_v40  ;;  %3588 = vmatprep.subr.bf16.mxu1 %v11050_v41  ;;  %v11140_v40 = vld [vmem:[%s17637_s1 + $0xfd4] ss:$144 sps:$4 sm:$0xff]   ;;  %v11143_v41 = vld [vmem:[%s17637_s1 + $0xfdc] ss:$144 sps:$4 sm:$0xff]  }
  0x2b   :  { %3548 = vmatpush2.bf16.msra.mxu0 %v11052_v42  ;;  %3589 = vmatpush2.bf16.msra.mxu1 %v11053_v43  ;;  %v11138_v42 = vld [vmem:[%s17637_s1 + $0xfd0] ss:$144 sps:$4 sm:$0xff]   ;;  %v11141_v43 = vld [vmem:[%s17637_s1 + $0xfd8] ss:$144 sps:$4 sm:$0xff]  }
  0x2c   :  { %3549 = vmatprep.subr.bf16.mxu0 %v11054_v44  ;;  %3590 = vmatprep.subr.bf16.mxu1 %v11056_v45  ;;  %v11146_v44 = vld [vmem:[%s17637_s1 + $0xeb4] ss:$144 sps:$4 sm:$0xff]   ;;  %v11149_v45 = vld [vmem:[%s17637_s1 + $0xebc] ss:$144 sps:$4 sm:$0xff]  }
  0x2f   :  { %3550 = vmatpush2.bf16.msra.mxu0 %v11058_v47  ;;  %3591 = vmatpush2.bf16.msra.mxu1 %v11059_v48  ;;  %v11147_v47 = vld [vmem:[%s17637_s1 + $0xeb8] ss:$144 sps:$4 sm:$0xff]   ;;  %v11152_v48 = vld [vmem:[%s17637_s1 + $0xd94] ss:$144 sps:$4 sm:$0xff]  }
  0x30   :  { %3551 = vmatprep.subr.bf16.mxu0 %v11060_v50  ;;  %3592 = vmatprep.subr.bf16.mxu1 %v11062_v51  ;;  %v11150_v50 = vld [vmem:[%s17637_s1 + $0xd90] ss:$144 sps:$4 sm:$0xff]   ;;  %v11153_v51 = vld [vmem:[%s17637_s1 + $0xd98] ss:$144 sps:$4 sm:$0xff]  }
  0x33   :  { %3552 = vmatpush2.bf16.msra.mxu0 %v11064_v53  ;;  %3593 = vmatpush2.bf16.msra.mxu1 %v11065_v54  ;;  %v11158_v53 = vld [vmem:[%s17637_s1 + $0xc74] ss:$144 sps:$4 sm:$0xff]   ;;  %v11161_v54 = vld [vmem:[%s17637_s1 + $0xc7c] ss:$144 sps:$4 sm:$0xff]  }
  0x34   :  { %3553 = vmatprep.subr.bf16.mxu0 %v11066_v55  ;;  %3594 = vmatprep.subr.bf16.mxu1 %v11068_v56  ;;  %v11156_v55 = vld [vmem:[%s17637_s1 + $0xc70] ss:$144 sps:$4 sm:$0xff]   ;;  %v11159_v56 = vld [vmem:[%s17637_s1 + $0xc78] ss:$144 sps:$4 sm:$0xff]  }
  0x37   :  { %3554 = vmatpush2.bf16.msra.mxu0 %v11070_v57  ;;  %3595 = vmatpush2.bf16.msra.mxu1 %v11071_v58  ;;  %v11164_v57 = vld [vmem:[%s17637_s1 + $0xb54] ss:$144 sps:$4 sm:$0xff]   ;;  %v11167_v58 = vld [vmem:[%s17637_s1 + $0xb5c] ss:$144 sps:$4 sm:$0xff]  }
  0x38   :  { %3555 = vmatprep.subr.bf16.mxu0 %v11072_v59  ;;  %3596 = vmatprep.subr.bf16.mxu1 %v11074_v60  ;;  %v11162_v59 = vld [vmem:[%s17637_s1 + $0xb50] ss:$144 sps:$4 sm:$0xff]   ;;  %v11165_v60 = vld [vmem:[%s17637_s1 + $0xb58] ss:$144 sps:$4 sm:$0xff]  }
  0x3b   :  { %3556 = vmatpush2.bf16.msra.mxu0 %v11076_v61  ;;  %3597 = vmatpush2.bf16.msra.mxu1 %v11077_v62  ;;  %v11170_v61 = vld [vmem:[%s17637_s1 + $0xa34] ss:$144 sps:$4 sm:$0xff]   ;;  %v11173_v62 = vld [vmem:[%s17637_s1 + $0xa3c] ss:$144 sps:$4 sm:$0xff]  }
  0x3c   :  { %3557 = vmatprep.subr.bf16.mxu0 %v11078_v63  ;;  %3598 = vmatprep.subr.bf16.mxu1 %v11080_v0  ;;  %v11168_v63 = vld [vmem:[%s17637_s1 + $0xa30] ss:$144 sps:$4 sm:$0xff]   ;;  %v11171_v0 = vld [vmem:[%s17637_s1 + $0xa38] ss:$144 sps:$4 sm:$0xff]  }
  0x3f   :  { %3558 = vmatpush2.bf16.msra.mxu0 %v11082_v1  ;;  %3599 = vmatpush2.bf16.msra.mxu1 %v11083_v2  ;;  %v11176_v1 = vld [vmem:[%s17637_s1 + $0x914] ss:$144 sps:$4 sm:$0xff]   ;;  %v11179_v2 = vld [vmem:[%s17637_s1 + $0x91c] ss:$144 sps:$4 sm:$0xff]  }
  0x40   :  { %3609 = vmatprep.subr.bf16.mxu0 %v11086_v3  ;;  %3650 = vmatprep.subr.bf16.mxu1 %v11089_v4  ;;  %v11174_v3 = vld [vmem:[%s17637_s1 + $0x910] ss:$144 sps:$4 sm:$0xff]   ;;  %v11177_v4 = vld [vmem:[%s17637_s1 + $0x918] ss:$144 sps:$4 sm:$0xff]  }
  0x42   :  { %3560 = vmatmul.mubr.bf16.vlgmr.msra.gmra.mxu0 %v12457_v5  ;;  %3601 = vmatmul.mubr.bf16.vlgmr.msra.gmra.mxu1 %v12457_v5 }
  0x43   :  { %3610 = vmatpush1.bf16.msra.mxu0 %v11084_v6  ;;  %3651 = vmatpush1.bf16.msra.mxu1 %v11087_v7  ;;  %v11182_v6 = vld [vmem:[%s17637_s1 + $0x804] ss:$144 sps:$4 sm:$0xff]   ;;  %v11185_v7 = vld [vmem:[%s17637_s1 + $0x80c] ss:$144 sps:$4 sm:$0xff]  }
  0x44   :  { %3611 = vmatprep.subr.bf16.mxu0 %v11092_v8  ;;  %3652 = vmatprep.subr.bf16.mxu1 %v11095_v9  ;;  %v11180_v8 = vld [vmem:[%s17637_s1 + $0x800] ss:$144 sps:$4 sm:$0xff]   ;;  %v11183_v9 = vld [vmem:[%s17637_s1 + $0x808] ss:$144 sps:$4 sm:$0xff]  }
  0x45   :  { %3641 = vmatprep.mubr.bf16.mxu0 %v12405_v52  ;;  %3682 = vmatprep.mubr.bf16.mxu1 %v12405_v52 }
  0x47   :  { %3612 = vmatpush1.bf16.msra.mxu0 %v11090_v10  ;;  %3653 = vmatpush1.bf16.msra.mxu1 %v11093_v11  ;;  %v11188_v10 = vld [vmem:[%s17637_s1 + $0x6e4] ss:$144 sps:$4 sm:$0xff]   ;;  %v11191_v11 = vld [vmem:[%s17637_s1 + $0x6ec] ss:$144 sps:$4 sm:$0xff]  }
  0x48   :  { %3613 = vmatprep.subr.bf16.mxu0 %v11098_v12  ;;  %3654 = vmatprep.subr.bf16.mxu1 %v11101_v13  ;;  %v11186_v12 = vld [vmem:[%s17637_s1 + $0x6e0] ss:$144 sps:$4 sm:$0xff]   ;;  %v11189_v13 = vld [vmem:[%s17637_s1 + $0x6e8] ss:$144 sps:$4 sm:$0xff]  }
  0x4b   :  { %3614 = vmatpush1.bf16.msra.mxu0 %v11096_v14  ;;  %3655 = vmatpush1.bf16.msra.mxu1 %v11099_v15  ;;  %v11194_v14 = vld [vmem:[%s17637_s1 + $0x5c4] ss:$144 sps:$4 sm:$0xff]   ;;  %v11197_v15 = vld [vmem:[%s17637_s1 + $0x5cc] ss:$144 sps:$4 sm:$0xff]  }
  0x4c   :  { %3615 = vmatprep.subr.bf16.mxu0 %v11104_v16  ;;  %3656 = vmatprep.subr.bf16.mxu1 %v11107_v17  ;;  %v11192_v16 = vld [vmem:[%s17637_s1 + $0x5c0] ss:$144 sps:$4 sm:$0xff]   ;;  %v11195_v17 = vld [vmem:[%s17637_s1 + $0x5c8] ss:$144 sps:$4 sm:$0xff]  }
  0x4f   :  { %3616 = vmatpush1.bf16.msra.mxu0 %v11102_v18  ;;  %3657 = vmatpush1.bf16.msra.mxu1 %v11105_v19  ;;  %v11200_v18 = vld [vmem:[%s17637_s1 + $0x4a4] ss:$144 sps:$4 sm:$0xff]   ;;  %v11203_v19 = vld [vmem:[%s17637_s1 + $0x4ac] ss:$144 sps:$4 sm:$0xff]  }
  0x50   :  { %3617 = vmatprep.subr.bf16.mxu0 %v11110_v20  ;;  %3658 = vmatprep.subr.bf16.mxu1 %v11113_v21  ;;  %v11198_v20 = vld [vmem:[%s17637_s1 + $0x4a0] ss:$144 sps:$4 sm:$0xff]   ;;  %v11201_v21 = vld [vmem:[%s17637_s1 + $0x4a8] ss:$144 sps:$4 sm:$0xff]  }
  0x53   :  { %3618 = vmatpush1.bf16.msra.mxu0 %v11108_v22  ;;  %3659 = vmatpush1.bf16.msra.mxu1 %v11111_v23  ;;  %v11206_v22 = vld [vmem:[%s17637_s1 + $0x384] ss:$144 sps:$4 sm:$0xff]   ;;  %v11209_v23 = vld [vmem:[%s17637_s1 + $0x38c] ss:$144 sps:$4 sm:$0xff]  }
  0x54   :  { %3619 = vmatprep.subr.bf16.mxu0 %v11116_v24  ;;  %3660 = vmatprep.subr.bf16.mxu1 %v11119_v25  ;;  %v11204_v24 = vld [vmem:[%s17637_s1 + $0x380] ss:$144 sps:$4 sm:$0xff]   ;;  %v11207_v25 = vld [vmem:[%s17637_s1 + $0x388] ss:$144 sps:$4 sm:$0xff]  }
  0x57   :  { %3620 = vmatpush1.bf16.msra.mxu0 %v11114_v26  ;;  %3661 = vmatpush1.bf16.msra.mxu1 %v11117_v27  ;;  %v11212_v26 = vld [vmem:[%s17637_s1 + $0x264] ss:$144 sps:$4 sm:$0xff]   ;;  %v11215_v27 = vld [vmem:[%s17637_s1 + $0x26c] ss:$144 sps:$4 sm:$0xff]  }
  0x58   :  { %3621 = vmatprep.subr.bf16.mxu0 %v11122_v28  ;;  %3662 = vmatprep.subr.bf16.mxu1 %v11125_v29  ;;  %v11210_v28 = vld [vmem:[%s17637_s1 + $0x260] ss:$144 sps:$4 sm:$0xff]   ;;  %v11213_v29 = vld [vmem:[%s17637_s1 + $0x268] ss:$144 sps:$4 sm:$0xff]  }
  0x5b   :  { %3622 = vmatpush1.bf16.msra.mxu0 %v11120_v30  ;;  %3663 = vmatpush1.bf16.msra.mxu1 %v11123_v31  ;;  %v11218_v30 = vld [vmem:[%s17637_s1 + $0x144] ss:$144 sps:$4 sm:$0xff]   ;;  %v11221_v31 = vld [vmem:[%s17637_s1 + $0x14c] ss:$144 sps:$4 sm:$0xff]  }
  0x5c   :  { %3623 = vmatprep.subr.bf16.mxu0 %v11128_v32  ;;  %3664 = vmatprep.subr.bf16.mxu1 %v11131_v33  ;;  %v11216_v32 = vld [vmem:[%s17637_s1 + $0x140] ss:$144 sps:$4 sm:$0xff]   ;;  %v11219_v33 = vld [vmem:[%s17637_s1 + $0x148] ss:$144 sps:$4 sm:$0xff]  }
  0x5f   :  { %3624 = vmatpush1.bf16.msra.mxu0 %v11126_v34  ;;  %3665 = vmatpush1.bf16.msra.mxu1 %v11129_v35  ;;  %v11224_v34 = vld [vmem:[%s17637_s1 + $0x24] ss:$144 sps:$4 sm:$0xff]   ;;  %v11227_v35 = vld [vmem:[%s17637_s1 + $0x2c] ss:$144 sps:$4 sm:$0xff]  }
  0x60   :  { %3625 = vmatprep.subr.bf16.mxu0 %v11134_v36  ;;  %3666 = vmatprep.subr.bf16.mxu1 %v11137_v37  ;;  %v11222_v36 = vld [vmem:[%s17637_s1 + $0x20] ss:$144 sps:$4 sm:$0xff]   ;;  %v11225_v37 = vld [vmem:[%s17637_s1 + $0x28] ss:$144 sps:$4 sm:$0xff]  }
  0x63   :  { %3626 = vmatpush2.bf16.msra.mxu0 %v11132_v38  ;;  %3667 = vmatpush2.bf16.msra.mxu1 %v11135_v39  ;;  %v11230_v38 = vld [vmem:[%s17637_s1 + $0x1104] ss:$144 sps:$4 sm:$0xff]   ;;  %v11233_v39 = vld [vmem:[%s17637_s1 + $0x110c] ss:$144 sps:$4 sm:$0xff]  }
  0x64   :  { %3627 = vmatprep.subr.bf16.mxu0 %v11140_v40  ;;  %3668 = vmatprep.subr.bf16.mxu1 %v11143_v41  ;;  %v11228_v40 = vld [vmem:[%s17637_s1 + $0x1100] ss:$144 sps:$4 sm:$0xff]   ;;  %v11231_v41 = vld [vmem:[%s17637_s1 + $0x1108] ss:$144 sps:$4 sm:$0xff]  }
  0x67   :  { %3628 = vmatpush2.bf16.msra.mxu0 %v11138_v42  ;;  %3669 = vmatpush2.bf16.msra.mxu1 %v11141_v43  ;;  %v11236_v42 = vld [vmem:[%s17637_s1 + $0xfe4] ss:$144 sps:$4 sm:$0xff]   ;;  %v11239_v43 = vld [vmem:[%s17637_s1 + $0xfec] ss:$144 sps:$4 sm:$0xff]  }
  0x68   :  { %3629 = vmatprep.subr.bf16.mxu0 %v11146_v44  ;;  %3670 = vmatprep.subr.bf16.mxu1 %v11149_v45  ;;  %v11234_v44 = vld [vmem:[%s17637_s1 + $0xfe0] ss:$144 sps:$4 sm:$0xff]   ;;  %v11237_v45 = vld [vmem:[%s17637_s1 + $0xfe8] ss:$144 sps:$4 sm:$0xff]  }
  0x6b   :  { %3630 = vmatpush2.bf16.msra.mxu0 %v11144_v46  ;;  %3671 = vmatpush2.bf16.msra.mxu1 %v11147_v47  ;;  %v11242_v46 = vld [vmem:[%s17637_s1 + $0xec4] ss:$144 sps:$4 sm:$0xff]   ;;  %v11245_v47 = vld [vmem:[%s17637_s1 + $0xecc] ss:$144 sps:$4 sm:$0xff]  }
  0x6c   :  { %3631 = vmatprep.subr.bf16.mxu0 %v11152_v48  ;;  %3672 = vmatprep.subr.bf16.mxu1 %v11155_v49  ;;  %v11240_v48 = vld [vmem:[%s17637_s1 + $0xec0] ss:$144 sps:$4 sm:$0xff]   ;;  %v11243_v49 = vld [vmem:[%s17637_s1 + $0xec8] ss:$144 sps:$4 sm:$0xff]  }
  0x6f   :  { %3632 = vmatpush2.bf16.msra.mxu0 %v11150_v50  ;;  %3673 = vmatpush2.bf16.msra.mxu1 %v11153_v51  ;;  %v11248_v50 = vld [vmem:[%s17637_s1 + $0xda4] ss:$144 sps:$4 sm:$0xff]   ;;  %v11251_v51 = vld [vmem:[%s17637_s1 + $0xdac] ss:$144 sps:$4 sm:$0xff]  }
  0x70   :  { %3633 = vmatprep.subr.bf16.mxu0 %v11158_v53  ;;  %3674 = vmatprep.subr.bf16.mxu1 %v11161_v54  ;;  %v11246_v53 = vld [vmem:[%s17637_s1 + $0xda0] ss:$144 sps:$4 sm:$0xff]   ;;  %v11249_v54 = vld [vmem:[%s17637_s1 + $0xda8] ss:$144 sps:$4 sm:$0xff]  }
  0x73   :  { %3634 = vmatpush2.bf16.msra.mxu0 %v11156_v55  ;;  %3675 = vmatpush2.bf16.msra.mxu1 %v11159_v56  ;;  %v11254_v55 = vld [vmem:[%s17637_s1 + $0xc84] ss:$144 sps:$4 sm:$0xff]   ;;  %v11257_v56 = vld [vmem:[%s17637_s1 + $0xc8c] ss:$144 sps:$4 sm:$0xff]  }
  0x74   :  { %3635 = vmatprep.subr.bf16.mxu0 %v11164_v57  ;;  %3676 = vmatprep.subr.bf16.mxu1 %v11167_v58  ;;  %v11252_v57 = vld [vmem:[%s17637_s1 + $0xc80] ss:$144 sps:$4 sm:$0xff]   ;;  %v11255_v58 = vld [vmem:[%s17637_s1 + $0xc88] ss:$144 sps:$4 sm:$0xff]  }
  0x77   :  { %3636 = vmatpush2.bf16.msra.mxu0 %v11162_v59  ;;  %3677 = vmatpush2.bf16.msra.mxu1 %v11165_v60  ;;  %v11260_v59 = vld [vmem:[%s17637_s1 + $0xb64] ss:$144 sps:$4 sm:$0xff]   ;;  %v11263_v60 = vld [vmem:[%s17637_s1 + $0xb6c] ss:$144 sps:$4 sm:$0xff]  }
  0x78   :  { %3637 = vmatprep.subr.bf16.mxu0 %v11170_v61  ;;  %3678 = vmatprep.subr.bf16.mxu1 %v11173_v62  ;;  %v11258_v61 = vld [vmem:[%s17637_s1 + $0xb60] ss:$144 sps:$4 sm:$0xff]   ;;  %v11261_v62 = vld [vmem:[%s17637_s1 + $0xb68] ss:$144 sps:$4 sm:$0xff]  }
  0x7b   :  { %3638 = vmatpush2.bf16.msra.mxu0 %v11168_v63  ;;  %3679 = vmatpush2.bf16.msra.mxu1 %v11171_v0  ;;  %v11266_v63 = vld [vmem:[%s17637_s1 + $0xa44] ss:$144 sps:$4 sm:$0xff]   ;;  %v11269_v0 = vld [vmem:[%s17637_s1 + $0xa4c] ss:$144 sps:$4 sm:$0xff]  }
  0x7c   :  { %3639 = vmatprep.subr.bf16.mxu0 %v11176_v1  ;;  %3680 = vmatprep.subr.bf16.mxu1 %v11179_v2  ;;  %v11264_v1 = vld [vmem:[%s17637_s1 + $0xa40] ss:$144 sps:$4 sm:$0xff]   ;;  %v11267_v2 = vld [vmem:[%s17637_s1 + $0xa48] ss:$144 sps:$4 sm:$0xff]  }
  0x7f   :  { %3640 = vmatpush2.bf16.msra.mxu0 %v11174_v3  ;;  %3681 = vmatpush2.bf16.msra.mxu1 %v11177_v4  ;;  %v11272_v3 = vld [vmem:[%s17637_s1 + $0x924] ss:$144 sps:$4 sm:$0xff]   ;;  %v11275_v4 = vld [vmem:[%s17637_s1 + $0x92c] ss:$144 sps:$4 sm:$0xff]  }
  0x80   :  { %3691 = vmatprep.subr.bf16.mxu0 %v11182_v6  ;;  %3732 = vmatprep.subr.bf16.mxu1 %v11185_v7  ;;  %v11270_v6 = vld [vmem:[%s17637_s1 + $0x920] ss:$144 sps:$4 sm:$0xff]   ;;  %v11273_v7 = vld [vmem:[%s17637_s1 + $0x928] ss:$144 sps:$4 sm:$0xff]  }
  0x82   :  { %3642 = vmatmul.mubr.bf16.vlgmr.msra.gmra.mxu0 %v12457_v5  ;;  %3683 = vmatmul.mubr.bf16.vlgmr.msra.gmra.mxu1 %v12457_v5 }
  0x83   :  { %3692 = vmatpush1.bf16.msra.mxu0 %v11180_v8  ;;  %3733 = vmatpush1.bf16.msra.mxu1 %v11183_v9  ;;  %v11278_v8 = vld [vmem:[%s17637_s1 + $0x814] ss:$144 sps:$4 sm:$0xff]   ;;  %v11281_v9 = vld [vmem:[%s17637_s1 + $0x81c] ss:$144 sps:$4 sm:$0xff]  }
  0x84   :  { %3693 = vmatprep.subr.bf16.mxu0 %v11188_v10  ;;  %3734 = vmatprep.subr.bf16.mxu1 %v11191_v11  ;;  %v11276_v10 = vld [vmem:[%s17637_s1 + $0x810] ss:$144 sps:$4 sm:$0xff]   ;;  %v11279_v11 = vld [vmem:[%s17637_s1 + $0x818] ss:$144 sps:$4 sm:$0xff]  }
  0x85   :  { %3723 = vmatprep.mubr.bf16.mxu0 %v12405_v52  ;;  %3764 = vmatprep.mubr.bf16.mxu1 %v12405_v52 }
  0x87   :  { %3694 = vmatpush1.bf16.msra.mxu0 %v11186_v12  ;;  %3735 = vmatpush1.bf16.msra.mxu1 %v11189_v13  ;;  %v11284_v12 = vld [vmem:[%s17637_s1 + $0x6f4] ss:$144 sps:$4 sm:$0xff]   ;;  %v11287_v13 = vld [vmem:[%s17637_s1 + $0x6fc] ss:$144 sps:$4 sm:$0xff]  }
  0x88   :  { %3695 = vmatprep.subr.bf16.mxu0 %v11194_v14  ;;  %3736 = vmatprep.subr.bf16.mxu1 %v11197_v15  ;;  %v11282_v14 = vld [vmem:[%s17637_s1 + $0x6f0] ss:$144 sps:$4 sm:$0xff]   ;;  %v11285_v15 = vld [vmem:[%s17637_s1 + $0x6f8] ss:$144 sps:$4 sm:$0xff]  }
  0x8b   :  { %3696 = vmatpush1.bf16.msra.mxu0 %v11192_v16  ;;  %3737 = vmatpush1.bf16.msra.mxu1 %v11195_v17  ;;  %v11290_v16 = vld [vmem:[%s17637_s1 + $0x5d4] ss:$144 sps:$4 sm:$0xff]   ;;  %v11293_v17 = vld [vmem:[%s17637_s1 + $0x5dc] ss:$144 sps:$4 sm:$0xff]  }
  0x8c   :  { %3697 = vmatprep.subr.bf16.mxu0 %v11200_v18  ;;  %3738 = vmatprep.subr.bf16.mxu1 %v11203_v19  ;;  %v11288_v18 = vld [vmem:[%s17637_s1 + $0x5d0] ss:$144 sps:$4 sm:$0xff]   ;;  %v11291_v19 = vld [vmem:[%s17637_s1 + $0x5d8] ss:$144 sps:$4 sm:$0xff]  }
  0x8f   :  { %3698 = vmatpush1.bf16.msra.mxu0 %v11198_v20  ;;  %3739 = vmatpush1.bf16.msra.mxu1 %v11201_v21  ;;  %v11296_v20 = vld [vmem:[%s17637_s1 + $0x4b4] ss:$144 sps:$4 sm:$0xff]   ;;  %v11299_v21 = vld [vmem:[%s17637_s1 + $0x4bc] ss:$144 sps:$4 sm:$0xff]  }
  0x90   :  { %3699 = vmatprep.subr.bf16.mxu0 %v11206_v22  ;;  %3740 = vmatprep.subr.bf16.mxu1 %v11209_v23  ;;  %v11294_v22 = vld [vmem:[%s17637_s1 + $0x4b0] ss:$144 sps:$4 sm:$0xff]   ;;  %v11297_v23 = vld [vmem:[%s17637_s1 + $0x4b8] ss:$144 sps:$4 sm:$0xff]  }
  0x93   :  { %3700 = vmatpush1.bf16.msra.mxu0 %v11204_v24  ;;  %3741 = vmatpush1.bf16.msra.mxu1 %v11207_v25  ;;  %v11302_v24 = vld [vmem:[%s17637_s1 + $0x394] ss:$144 sps:$4 sm:$0xff]   ;;  %v11305_v25 = vld [vmem:[%s17637_s1 + $0x39c] ss:$144 sps:$4 sm:$0xff]  }
  0x94   :  { %3701 = vmatprep.subr.bf16.mxu0 %v11212_v26  ;;  %3742 = vmatprep.subr.bf16.mxu1 %v11215_v27  ;;  %v11300_v26 = vld [vmem:[%s17637_s1 + $0x390] ss:$144 sps:$4 sm:$0xff]   ;;  %v11303_v27 = vld [vmem:[%s17637_s1 + $0x398] ss:$144 sps:$4 sm:$0xff]  }
  0x97   :  { %3702 = vmatpush1.bf16.msra.mxu0 %v11210_v28  ;;  %3743 = vmatpush1.bf16.msra.mxu1 %v11213_v29  ;;  %v11308_v28 = vld [vmem:[%s17637_s1 + $0x274] ss:$144 sps:$4 sm:$0xff]   ;;  %v11311_v29 = vld [vmem:[%s17637_s1 + $0x27c] ss:$144 sps:$4 sm:$0xff]  }
  0x98   :  { %3703 = vmatprep.subr.bf16.mxu0 %v11218_v30  ;;  %3744 = vmatprep.subr.bf16.mxu1 %v11221_v31  ;;  %v11306_v30 = vld [vmem:[%s17637_s1 + $0x270] ss:$144 sps:$4 sm:$0xff]   ;;  %v11309_v31 = vld [vmem:[%s17637_s1 + $0x278] ss:$144 sps:$4 sm:$0xff]  }
  0x9b   :  { %3704 = vmatpush1.bf16.msra.mxu0 %v11216_v32  ;;  %3745 = vmatpush1.bf16.msra.mxu1 %v11219_v33  ;;  %v11314_v32 = vld [vmem:[%s17637_s1 + $0x154] ss:$144 sps:$4 sm:$0xff]   ;;  %v11317_v33 = vld [vmem:[%s17637_s1 + $0x15c] ss:$144 sps:$4 sm:$0xff]  }
  0x9c   :  { %3705 = vmatprep.subr.bf16.mxu0 %v11224_v34  ;;  %3746 = vmatprep.subr.bf16.mxu1 %v11227_v35  ;;  %v11312_v34 = vld [vmem:[%s17637_s1 + $0x150] ss:$144 sps:$4 sm:$0xff]   ;;  %v11315_v35 = vld [vmem:[%s17637_s1 + $0x158] ss:$144 sps:$4 sm:$0xff]  }
  0x9f   :  { %3706 = vmatpush1.bf16.msra.mxu0 %v11222_v36  ;;  %3747 = vmatpush1.bf16.msra.mxu1 %v11225_v37  ;;  %v11320_v36 = vld [vmem:[%s17637_s1 + $0x34] ss:$144 sps:$4 sm:$0xff]   ;;  %v11323_v37 = vld [vmem:[%s17637_s1 + $0x3c] ss:$144 sps:$4 sm:$0xff]  }
  0xa0   :  { %3707 = vmatprep.subr.bf16.mxu0 %v11230_v38  ;;  %3748 = vmatprep.subr.bf16.mxu1 %v11233_v39  ;;  %v11318_v38 = vld [vmem:[%s17637_s1 + $0x30] ss:$144 sps:$4 sm:$0xff]   ;;  %v11321_v39 = vld [vmem:[%s17637_s1 + $0x38] ss:$144 sps:$4 sm:$0xff]  }
  0xa3   :  { %3708 = vmatpush2.bf16.msra.mxu0 %v11228_v40  ;;  %3749 = vmatpush2.bf16.msra.mxu1 %v11231_v41  ;;  %v11326_v40 = vld [vmem:[%s17637_s1 + $0x1114] ss:$144 sps:$4 sm:$0xff]   ;;  %v11329_v41 = vld [vmem:[%s17637_s1 + $0x111c] ss:$144 sps:$4 sm:$0xff]  }
  0xa4   :  { %3709 = vmatprep.subr.bf16.mxu0 %v11236_v42  ;;  %3750 = vmatprep.subr.bf16.mxu1 %v11239_v43  ;;  %v11324_v42 = vld [vmem:[%s17637_s1 + $0x1110] ss:$144 sps:$4 sm:$0xff]   ;;  %v11327_v43 = vld [vmem:[%s17637_s1 + $0x1118] ss:$144 sps:$4 sm:$0xff]  }
  0xa7   :  { %3710 = vmatpush2.bf16.msra.mxu0 %v11234_v44  ;;  %3751 = vmatpush2.bf16.msra.mxu1 %v11237_v45  ;;  %v11332_v44 = vld [vmem:[%s17637_s1 + $0xff4] ss:$144 sps:$4 sm:$0xff]   ;;  %v11335_v45 = vld [vmem:[%s17637_s1 + $0xffc] ss:$144 sps:$4 sm:$0xff]  }
  0xa8   :  { %3711 = vmatprep.subr.bf16.mxu0 %v11242_v46  ;;  %3752 = vmatprep.subr.bf16.mxu1 %v11245_v47  ;;  %v11330_v46 = vld [vmem:[%s17637_s1 + $0xff0] ss:$144 sps:$4 sm:$0xff]   ;;  %v11333_v47 = vld [vmem:[%s17637_s1 + $0xff8] ss:$144 sps:$4 sm:$0xff]  }
  0xab   :  { %3712 = vmatpush2.bf16.msra.mxu0 %v11240_v48  ;;  %3753 = vmatpush2.bf16.msra.mxu1 %v11243_v49  ;;  %v11338_v48 = vld [vmem:[%s17637_s1 + $0xed4] ss:$144 sps:$4 sm:$0xff]   ;;  %v11341_v49 = vld [vmem:[%s17637_s1 + $0xedc] ss:$144 sps:$4 sm:$0xff]  }
  0xac   :  { %3713 = vmatprep.subr.bf16.mxu0 %v11248_v50  ;;  %3754 = vmatprep.subr.bf16.mxu1 %v11251_v51  ;;  %v11336_v50 = vld [vmem:[%s17637_s1 + $0xed0] ss:$144 sps:$4 sm:$0xff]   ;;  %v11339_v51 = vld [vmem:[%s17637_s1 + $0xed8] ss:$144 sps:$4 sm:$0xff]  }
  0xaf   :  { %3714 = vmatpush2.bf16.msra.mxu0 %v11246_v53  ;;  %3755 = vmatpush2.bf16.msra.mxu1 %v11249_v54  ;;  %v11344_v53 = vld [vmem:[%s17637_s1 + $0xdb4] ss:$144 sps:$4 sm:$0xff]   ;;  %v11347_v54 = vld [vmem:[%s17637_s1 + $0xdbc] ss:$144 sps:$4 sm:$0xff]  }
  0xb0   :  { %3715 = vmatprep.subr.bf16.mxu0 %v11254_v55  ;;  %3756 = vmatprep.subr.bf16.mxu1 %v11257_v56  ;;  %v11342_v55 = vld [vmem:[%s17637_s1 + $0xdb0] ss:$144 sps:$4 sm:$0xff]   ;;  %v11345_v56 = vld [vmem:[%s17637_s1 + $0xdb8] ss:$144 sps:$4 sm:$0xff]  }
  0xb3   :  { %3716 = vmatpush2.bf16.msra.mxu0 %v11252_v57  ;;  %3757 = vmatpush2.bf16.msra.mxu1 %v11255_v58  ;;  %v11350_v57 = vld [vmem:[%s17637_s1 + $0xc94] ss:$144 sps:$4 sm:$0xff]   ;;  %v11353_v58 = vld [vmem:[%s17637_s1 + $0xc9c] ss:$144 sps:$4 sm:$0xff]  }
  0xb4   :  { %3717 = vmatprep.subr.bf16.mxu0 %v11260_v59  ;;  %3758 = vmatprep.subr.bf16.mxu1 %v11263_v60  ;;  %v11348_v59 = vld [vmem:[%s17637_s1 + $0xc90] ss:$144 sps:$4 sm:$0xff]   ;;  %v11351_v60 = vld [vmem:[%s17637_s1 + $0xc98] ss:$144 sps:$4 sm:$0xff]  }
  0xb7   :  { %3718 = vmatpush2.bf16.msra.mxu0 %v11258_v61  ;;  %3759 = vmatpush2.bf16.msra.mxu1 %v11261_v62  ;;  %v11356_v61 = vld [vmem:[%s17637_s1 + $0xb74] ss:$144 sps:$4 sm:$0xff]   ;;  %v11359_v62 = vld [vmem:[%s17637_s1 + $0xb7c] ss:$144 sps:$4 sm:$0xff]  }
  0xb8   :  { %3719 = vmatprep.subr.bf16.mxu0 %v11266_v63  ;;  %3760 = vmatprep.subr.bf16.mxu1 %v11269_v0  ;;  %v11354_v63 = vld [vmem:[%s17637_s1 + $0xb70] ss:$144 sps:$4 sm:$0xff]   ;;  %v11357_v0 = vld [vmem:[%s17637_s1 + $0xb78] ss:$144 sps:$4 sm:$0xff]  }
  0xbb   :  { %3720 = vmatpush2.bf16.msra.mxu0 %v11264_v1  ;;  %3761 = vmatpush2.bf16.msra.mxu1 %v11267_v2  ;;  %v11362_v1 = vld [vmem:[%s17637_s1 + $0xa54] ss:$144 sps:$4 sm:$0xff]   ;;  %v11365_v2 = vld [vmem:[%s17637_s1 + $0xa5c] ss:$144 sps:$4 sm:$0xff]  }
  0xbc   :  { %3721 = vmatprep.subr.bf16.mxu0 %v11272_v3  ;;  %3762 = vmatprep.subr.bf16.mxu1 %v11275_v4  ;;  %v11360_v3 = vld [vmem:[%s17637_s1 + $0xa50] ss:$144 sps:$4 sm:$0xff]   ;;  %v11363_v4 = vld [vmem:[%s17637_s1 + $0xa58] ss:$144 sps:$4 sm:$0xff]  }
  0xbf   :  { %3722 = vmatpush2.bf16.msra.mxu0 %v11270_v6  ;;  %3763 = vmatpush2.bf16.msra.mxu1 %v11273_v7  ;;  %v11368_v6 = vld [vmem:[%s17637_s1 + $0x934] ss:$144 sps:$4 sm:$0xff]   ;;  %v11371_v7 = vld [vmem:[%s17637_s1 + $0x93c] ss:$144 sps:$4 sm:$0xff]  }
  0xc0   :  { %3773 = vmatprep.subr.bf16.mxu0 %v11278_v8  ;;  %3814 = vmatprep.subr.bf16.mxu1 %v11281_v9  ;;  %v11366_v8 = vld [vmem:[%s17637_s1 + $0x930] ss:$144 sps:$4 sm:$0xff]   ;;  %v11369_v9 = vld [vmem:[%s17637_s1 + $0x938] ss:$144 sps:$4 sm:$0xff]  }
  0xc2   :  { %3724 = vmatmul.mubr.bf16.vlgmr.msra.gmra.mxu0 %v12457_v5  ;;  %3765 = vmatmul.mubr.bf16.vlgmr.msra.gmra.mxu1 %v12457_v5 }
  0xc3   :  { %3774 = vmatpush1.bf16.msra.mxu0 %v11276_v10  ;;  %3815 = vmatpush1.bf16.msra.mxu1 %v11279_v11  ;;  %v11374_v10 = vld [vmem:[%s17637_s1 + $0x824] ss:$144 sps:$4 sm:$0xff]   ;;  %v11377_v11 = vld [vmem:[%s17637_s1 + $0x82c] ss:$144 sps:$4 sm:$0xff]  }
  0xc4   :  { %3775 = vmatprep.subr.bf16.mxu0 %v11284_v12  ;;  %3816 = vmatprep.subr.bf16.mxu1 %v11287_v13  ;;  %v11372_v12 = vld [vmem:[%s17637_s1 + $0x820] ss:$144 sps:$4 sm:$0xff]   ;;  %v11375_v13 = vld [vmem:[%s17637_s1 + $0x828] ss:$144 sps:$4 sm:$0xff]  }
  0xc5   :  { %3805 = vmatprep.mubr.bf16.mxu0 %v12405_v52  ;;  %3846 = vmatprep.mubr.bf16.mxu1 %v12405_v52 }
  0xc7   :  { %3776 = vmatpush1.bf16.msra.mxu0 %v11282_v14  ;;  %3817 = vmatpush1.bf16.msra.mxu1 %v11285_v15  ;;  %v11380_v14 = vld [vmem:[%s17637_s1 + $0x704] ss:$144 sps:$4 sm:$0xff]   ;;  %v11383_v15 = vld [vmem:[%s17637_s1 + $0x70c] ss:$144 sps:$4 sm:$0xff]  }
  0xc8   :  { %3777 = vmatprep.subr.bf16.mxu0 %v11290_v16  ;;  %3818 = vmatprep.subr.bf16.mxu1 %v11293_v17  ;;  %v11378_v16 = vld [vmem:[%s17637_s1 + $0x700] ss:$144 sps:$4 sm:$0xff]  }
  0xcb   :  { %3778 = vmatpush1.bf16.msra.mxu0 %v11288_v18  ;;  %3819 = vmatpush1.bf16.msra.mxu1 %v11291_v19  ;;  %v11381_v19 = vld [vmem:[%s17637_s1 + $0x708] ss:$144 sps:$4 sm:$0xff]  }
  0xcc   :  { %3779 = vmatprep.subr.bf16.mxu0 %v11296_v20  ;;  %3820 = vmatprep.subr.bf16.mxu1 %v11299_v21  ;;  %v11386_v20 = vld [vmem:[%s17637_s1 + $0x5e4] ss:$144 sps:$4 sm:$0xff]   ;;  %v11389_v21 = vld [vmem:[%s17637_s1 + $0x5ec] ss:$144 sps:$4 sm:$0xff]  }
  0xcf   :  { %3780 = vmatpush1.bf16.msra.mxu0 %v11294_v22  ;;  %3821 = vmatpush1.bf16.msra.mxu1 %v11297_v23 }
  0xd0   :  { %3781 = vmatprep.subr.bf16.mxu0 %v11302_v24  ;;  %3822 = vmatprep.subr.bf16.mxu1 %v11305_v25  ;;  %v11384_v25 = vld [vmem:[%s17637_s1 + $0x5e0] ss:$144 sps:$4 sm:$0xff]  }
  0xd3   :  { %3782 = vmatpush1.bf16.msra.mxu0 %v11300_v26  ;;  %3823 = vmatpush1.bf16.msra.mxu1 %v11303_v27  ;;  %v11387_v26 = vld [vmem:[%s17637_s1 + $0x5e8] ss:$144 sps:$4 sm:$0xff]   ;;  %v11392_v27 = vld [vmem:[%s17637_s1 + $0x4c4] ss:$144 sps:$4 sm:$0xff]  }
  0xd4   :  { %3783 = vmatprep.subr.bf16.mxu0 %v11308_v28  ;;  %3824 = vmatprep.subr.bf16.mxu1 %v11311_v29  ;;  %v11395_v29 = vld [vmem:[%s17637_s1 + $0x4cc] ss:$144 sps:$4 sm:$0xff]  }
  0xd7   :  { %3784 = vmatpush1.bf16.msra.mxu0 %v11306_v30  ;;  %3825 = vmatpush1.bf16.msra.mxu1 %v11309_v31 }
  0xd8   :  { %3785 = vmatprep.subr.bf16.mxu0 %v11314_v32  ;;  %3826 = vmatprep.subr.bf16.mxu1 %v11317_v33  ;;  %v11390_v32 = vld [vmem:[%s17637_s1 + $0x4c0] ss:$144 sps:$4 sm:$0xff]   ;;  %v11393_v33 = vld [vmem:[%s17637_s1 + $0x4c8] ss:$144 sps:$4 sm:$0xff]  }
  0xdb   :  { %3786 = vmatpush1.bf16.msra.mxu0 %v11312_v34  ;;  %3827 = vmatpush1.bf16.msra.mxu1 %v11315_v35  ;;  %v11398_v34 = vld [vmem:[%s17637_s1 + $0x3a4] ss:$144 sps:$4 sm:$0xff]   ;;  %v11401_v35 = vld [vmem:[%s17637_s1 + $0x3ac] ss:$144 sps:$4 sm:$0xff]  }
  0xdc   :  { %3787 = vmatprep.subr.bf16.mxu0 %v11320_v36  ;;  %3828 = vmatprep.subr.bf16.mxu1 %v11323_v37  ;;  %v11396_v36 = vld [vmem:[%s17637_s1 + $0x3a0] ss:$144 sps:$4 sm:$0xff]   ;;  %v11399_v37 = vld [vmem:[%s17637_s1 + $0x3a8] ss:$144 sps:$4 sm:$0xff]  }
  0xdf   :  { %3788 = vmatpush1.bf16.msra.mxu0 %v11318_v38  ;;  %3829 = vmatpush1.bf16.msra.mxu1 %v11321_v39  ;;  %v11404_v38 = vld [vmem:[%s17637_s1 + $0x284] ss:$144 sps:$4 sm:$0xff]   ;;  %v11407_v39 = vld [vmem:[%s17637_s1 + $0x28c] ss:$144 sps:$4 sm:$0xff]  }
  0xe0   :  { %3789 = vmatprep.subr.bf16.mxu0 %v11326_v40  ;;  %3830 = vmatprep.subr.bf16.mxu1 %v11329_v41  ;;  %v11402_v40 = vld [vmem:[%s17637_s1 + $0x280] ss:$144 sps:$4 sm:$0xff]   ;;  %v11405_v41 = vld [vmem:[%s17637_s1 + $0x288] ss:$144 sps:$4 sm:$0xff]  }
  0xe3   :  { %3790 = vmatpush2.bf16.msra.mxu0 %v11324_v42  ;;  %3831 = vmatpush2.bf16.msra.mxu1 %v11327_v43  ;;  %v11410_v42 = vld [vmem:[%s17637_s1 + $0x164] ss:$144 sps:$4 sm:$0xff]   ;;  %v11413_v43 = vld [vmem:[%s17637_s1 + $0x16c] ss:$144 sps:$4 sm:$0xff]  }
  0xe4   :  { %3791 = vmatprep.subr.bf16.mxu0 %v11332_v44  ;;  %3832 = vmatprep.subr.bf16.mxu1 %v11335_v45  ;;  %v11408_v44 = vld [vmem:[%s17637_s1 + $0x160] ss:$144 sps:$4 sm:$0xff]   ;;  %v11411_v45 = vld [vmem:[%s17637_s1 + $0x168] ss:$144 sps:$4 sm:$0xff]  }
  0xe7   :  { %3792 = vmatpush2.bf16.msra.mxu0 %v11330_v46  ;;  %3833 = vmatpush2.bf16.msra.mxu1 %v11333_v47  ;;  %v11416_v46 = vld [vmem:[%s17637_s1 + $0x44] ss:$144 sps:$4 sm:$0xff]   ;;  %v11419_v47 = vld [vmem:[%s17637_s1 + $0x4c] ss:$144 sps:$4 sm:$0xff]  }
  0xe8   :  { %3793 = vmatprep.subr.bf16.mxu0 %v11338_v48  ;;  %3834 = vmatprep.subr.bf16.mxu1 %v11341_v49  ;;  %v11414_v48 = vld [vmem:[%s17637_s1 + $0x40] ss:$144 sps:$4 sm:$0xff]   ;;  %v11417_v49 = vld [vmem:[%s17637_s1 + $0x48] ss:$144 sps:$4 sm:$0xff]  }
  0xeb   :  { %3794 = vmatpush2.bf16.msra.mxu0 %v11336_v50  ;;  %3835 = vmatpush2.bf16.msra.mxu1 %v11339_v51  ;;  %v11422_v50 = vld [vmem:[%s17637_s1 + $0x1124] ss:$144 sps:$4 sm:$0xff]   ;;  %v11425_v51 = vld [vmem:[%s17637_s1 + $0x112c] ss:$144 sps:$4 sm:$0xff]  }
  0xec   :  { %3795 = vmatprep.subr.bf16.mxu0 %v11344_v53  ;;  %3836 = vmatprep.subr.bf16.mxu1 %v11347_v54  ;;  %v11420_v53 = vld [vmem:[%s17637_s1 + $0x1120] ss:$144 sps:$4 sm:$0xff]   ;;  %v11423_v54 = vld [vmem:[%s17637_s1 + $0x1128] ss:$144 sps:$4 sm:$0xff]  }
  0xef   :  { %3796 = vmatpush2.bf16.msra.mxu0 %v11342_v55  ;;  %3837 = vmatpush2.bf16.msra.mxu1 %v11345_v56  ;;  %v11428_v55 = vld [vmem:[%s17637_s1 + $0x1004] ss:$144 sps:$4 sm:$0xff]   ;;  %v11431_v56 = vld [vmem:[%s17637_s1 + $0x100c] ss:$144 sps:$4 sm:$0xff]  }
  0xf0   :  { %3797 = vmatprep.subr.bf16.mxu0 %v11350_v57  ;;  %3838 = vmatprep.subr.bf16.mxu1 %v11353_v58  ;;  %v11426_v57 = vld [vmem:[%s17637_s1 + $0x1000] ss:$144 sps:$4 sm:$0xff]   ;;  %v11429_v58 = vld [vmem:[%s17637_s1 + $0x1008] ss:$144 sps:$4 sm:$0xff]  }
  0xf3   :  { %3798 = vmatpush2.bf16.msra.mxu0 %v11348_v59  ;;  %3839 = vmatpush2.bf16.msra.mxu1 %v11351_v60  ;;  %v11434_v59 = vld [vmem:[%s17637_s1 + $0xee4] ss:$144 sps:$4 sm:$0xff]   ;;  %v11437_v60 = vld [vmem:[%s17637_s1 + $0xeec] ss:$144 sps:$4 sm:$0xff]  }
  0xf4   :  { %3799 = vmatprep.subr.bf16.mxu0 %v11356_v61  ;;  %3840 = vmatprep.subr.bf16.mxu1 %v11359_v62  ;;  %v11432_v61 = vld [vmem:[%s17637_s1 + $0xee0] ss:$144 sps:$4 sm:$0xff]   ;;  %v11435_v62 = vld [vmem:[%s17637_s1 + $0xee8] ss:$144 sps:$4 sm:$0xff]  }
  0xf7   :  { %3800 = vmatpush2.bf16.msra.mxu0 %v11354_v63  ;;  %3841 = vmatpush2.bf16.msra.mxu1 %v11357_v0  ;;  %v11440_v63 = vld [vmem:[%s17637_s1 + $0xdc4] ss:$144 sps:$4 sm:$0xff]   ;;  %v11443_v0 = vld [vmem:[%s17637_s1 + $0xdcc] ss:$144 sps:$4 sm:$0xff]  }
  0xf8   :  { %3801 = vmatprep.subr.bf16.mxu0 %v11362_v1  ;;  %3842 = vmatprep.subr.bf16.mxu1 %v11365_v2  ;;  %v11438_v1 = vld [vmem:[%s17637_s1 + $0xdc0] ss:$144 sps:$4 sm:$0xff]   ;;  %v11441_v2 = vld [vmem:[%s17637_s1 + $0xdc8] ss:$144 sps:$4 sm:$0xff]  }
  0xfb   :  { %3802 = vmatpush2.bf16.msra.mxu0 %v11360_v3  ;;  %3843 = vmatpush2.bf16.msra.mxu1 %v11363_v4  ;;  %v11446_v3 = vld [vmem:[%s17637_s1 + $0xca4] ss:$144 sps:$4 sm:$0xff]   ;;  %v11449_v4 = vld [vmem:[%s17637_s1 + $0xcac] ss:$144 sps:$4 sm:$0xff]  }
  0xfc   :  { %3803 = vmatprep.subr.bf16.mxu0 %v11368_v6  ;;  %3844 = vmatprep.subr.bf16.mxu1 %v11371_v7  ;;  %v11444_v6 = vld [vmem:[%s17637_s1 + $0xca0] ss:$144 sps:$4 sm:$0xff]   ;;  %v11447_v7 = vld [vmem:[%s17637_s1 + $0xca8] ss:$144 sps:$4 sm:$0xff]  }
  0xff   :  { %3804 = vmatpush2.bf16.msra.mxu0 %v11366_v8  ;;  %3845 = vmatpush2.bf16.msra.mxu1 %v11369_v9  ;;  %v11452_v8 = vld [vmem:[%s17637_s1 + $0xb84] ss:$144 sps:$4 sm:$0xff]   ;;  %v11455_v9 = vld [vmem:[%s17637_s1 + $0xb8c] ss:$144 sps:$4 sm:$0xff]  }
 0x100   :  { %3855 = vmatprep.subr.bf16.mxu0 %v11374_v10  ;;  %3896 = vmatprep.subr.bf16.mxu1 %v11377_v11  ;;  %v11450_v10 = vld [vmem:[%s17637_s1 + $0xb80] ss:$144 sps:$4 sm:$0xff]   ;;  %v11453_v11 = vld [vmem:[%s17637_s1 + $0xb88] ss:$144 sps:$4 sm:$0xff]  }
 0x102   :  { %v13062_v17 = vpop.f32.mrf.mxu0  ;;  %v13064_v18 = vpop.f32.mrf.mxu1  ;;  %3806 = vmatmul.mubr.bf16.vlgmr.msra.gmra.mxu0 %v12457_v5  ;;  %3847 = vmatmul.mubr.bf16.vlgmr.msra.gmra.mxu1 %v12457_v5 }
 0x103   :  { %3856 = vmatpush1.bf16.msra.mxu0 %v11372_v12  ;;  %3897 = vmatpush1.bf16.msra.mxu1 %v11375_v13  ;;  %v11458_v12 = vld [vmem:[%s17637_s1 + $0xa64] ss:$144 sps:$4 sm:$0xff]   ;;  %v11461_v13 = vld [vmem:[%s17637_s1 + $0xa6c] ss:$144 sps:$4 sm:$0xff]  }
 0x104   :  { %v13077_v22 = vpop.f32.mrf.mxu0  ;;  %v13079_v23 = vpop.f32.mrf.mxu1  ;;  %3857 = vmatprep.subr.bf16.mxu0 %v11380_v14  ;;  %3898 = vmatprep.subr.bf16.mxu1 %v11383_v15  ;;  %v11456_v14 = vld [vmem:[%s17637_s1 + $0xa60] ss:$144 sps:$4 sm:$0xff]   ;;  %v11459_v15 = vld [vmem:[%s17637_s1 + $0xa68] ss:$144 sps:$4 sm:$0xff]  }
 0x105   :  { %3887 = vmatprep.mubr.bf16.mxu0 %v12405_v52  ;;  %3928 = vmatprep.mubr.bf16.mxu1 %v12405_v52 }
 0x106   :  { %v3565_v24 = vpop.f32.mrf.mxu0  ;;  %v3606_v28 = vpop.f32.mrf.mxu1 }
 0x107   :  { %3858 = vmatpush1.bf16.msra.mxu0 %v11378_v16  ;;  %3899 = vmatpush1.bf16.msra.mxu1 %v11381_v19  ;;  %v11464_v16 = vld [vmem:[%s17637_s1 + $0x944] ss:$144 sps:$4 sm:$0xff]   ;;  %v11467_v19 = vld [vmem:[%s17637_s1 + $0x94c] ss:$144 sps:$4 sm:$0xff]  }
 0x108   :  { %v3566_v30 = vpop.f32.mrf.mxu0  ;;  %3859 = vmatprep.subr.bf16.mxu0 %v11386_v20  ;;  %3900 = vmatprep.subr.bf16.mxu1 %v11389_v21  ;;  %v3607_v31 = vpop.f32.mrf.mxu1  ;;  %v11462_v20 = vld [vmem:[%s17637_s1 + $0x940] ss:$144 sps:$4 sm:$0xff]   ;;  %v11465_v21 = vld [vmem:[%s17637_s1 + $0x948] ss:$144 sps:$4 sm:$0xff]   ;;  %v11470_v24 = vld [vmem:[%s17637_s1 + $0x834] ss:$144 sps:$4 sm:$0xff]  }
 0x109   :  { %v11476_v28 = vld [vmem:[%s17637_s1 + $0x714] ss:$144 sps:$4 sm:$0xff]   ;;  %v11474_v30 = vld [vmem:[%s17637_s1 + $0x710] ss:$144 sps:$4 sm:$0xff]   ;;  %v11477_v31 = vld [vmem:[%s17637_s1 + $0x718] ss:$144 sps:$4 sm:$0xff]  }
 0x10b   :  { %3860 = vmatpush1.bf16.msra.mxu0 %v11384_v25  ;;  %3901 = vmatpush1.bf16.msra.mxu1 %v11387_v26  ;;  %v11473_v25 = vld [vmem:[%s17637_s1 + $0x83c] ss:$144 sps:$4 sm:$0xff]   ;;  %v11468_v26 = vld [vmem:[%s17637_s1 + $0x830] ss:$144 sps:$4 sm:$0xff]  }
 0x10c   :  { %3861 = vmatprep.subr.bf16.mxu0 %v11392_v27  ;;  %3902 = vmatprep.subr.bf16.mxu1 %v11395_v29  ;;  %v11471_v27 = vld [vmem:[%s17637_s1 + $0x838] ss:$144 sps:$4 sm:$0xff]   ;;  %v11479_v29 = vld [vmem:[%s17637_s1 + $0x71c] ss:$144 sps:$4 sm:$0xff]  }
 0x10f   :  { %3862 = vmatpush1.bf16.msra.mxu0 %v11390_v32  ;;  %3903 = vmatpush1.bf16.msra.mxu1 %v11393_v33 }
 0x110   :  { %3863 = vmatprep.subr.bf16.mxu0 %v11398_v34  ;;  %3904 = vmatprep.subr.bf16.mxu1 %v11401_v35  ;;  %v11482_v34 = vld [vmem:[%s17637_s1 + $0x5f4] ss:$144 sps:$4 sm:$0xff]   ;;  %v11485_v35 = vld [vmem:[%s17637_s1 + $0x5fc] ss:$144 sps:$4 sm:$0xff]  }
 0x113   :  { %3864 = vmatpush1.bf16.msra.mxu0 %v11396_v36  ;;  %3905 = vmatpush1.bf16.msra.mxu1 %v11399_v37 }
 0x114   :  { %3865 = vmatprep.subr.bf16.mxu0 %v11404_v38  ;;  %3906 = vmatprep.subr.bf16.mxu1 %v11407_v39  ;;  %v11480_v39 = vld [vmem:[%s17637_s1 + $0x5f0] ss:$144 sps:$4 sm:$0xff]  }
 0x117   :  { %3866 = vmatpush1.bf16.msra.mxu0 %v11402_v40  ;;  %3907 = vmatpush1.bf16.msra.mxu1 %v11405_v41  ;;  %v11483_v40 = vld [vmem:[%s17637_s1 + $0x5f8] ss:$144 sps:$4 sm:$0xff]   ;;  %v11488_v41 = vld [vmem:[%s17637_s1 + $0x4d4] ss:$144 sps:$4 sm:$0xff]  }
 0x118   :  { %3867 = vmatprep.subr.bf16.mxu0 %v11410_v42  ;;  %3908 = vmatprep.subr.bf16.mxu1 %v11413_v43  ;;  %v11491_v43 = vld [vmem:[%s17637_s1 + $0x4dc] ss:$144 sps:$4 sm:$0xff]  }
 0x11b   :  { %3868 = vmatpush1.bf16.msra.mxu0 %v11408_v44  ;;  %3909 = vmatpush1.bf16.msra.mxu1 %v11411_v45 }
 0x11c   :  { %3869 = vmatprep.subr.bf16.mxu0 %v11416_v46  ;;  %3910 = vmatprep.subr.bf16.mxu1 %v11419_v47  ;;  %v11486_v46 = vld [vmem:[%s17637_s1 + $0x4d0] ss:$144 sps:$4 sm:$0xff]   ;;  %v11489_v47 = vld [vmem:[%s17637_s1 + $0x4d8] ss:$144 sps:$4 sm:$0xff]  }
 0x11f   :  { %3870 = vmatpush1.bf16.msra.mxu0 %v11414_v48  ;;  %3911 = vmatpush1.bf16.msra.mxu1 %v11417_v49  ;;  %v11494_v48 = vld [vmem:[%s17637_s1 + $0x3b4] ss:$144 sps:$4 sm:$0xff]   ;;  %v11497_v49 = vld [vmem:[%s17637_s1 + $0x3bc] ss:$144 sps:$4 sm:$0xff]  }
 0x120   :  { %3871 = vmatprep.subr.bf16.mxu0 %v11422_v50  ;;  %3912 = vmatprep.subr.bf16.mxu1 %v11425_v51  ;;  %v11492_v50 = vld [vmem:[%s17637_s1 + $0x3b0] ss:$144 sps:$4 sm:$0xff]   ;;  %v11495_v51 = vld [vmem:[%s17637_s1 + $0x3b8] ss:$144 sps:$4 sm:$0xff]  }
 0x123   :  { %3872 = vmatpush2.bf16.msra.mxu0 %v11420_v53  ;;  %3913 = vmatpush2.bf16.msra.mxu1 %v11423_v54  ;;  %v11500_v53 = vld [vmem:[%s17637_s1 + $0x294] ss:$144 sps:$4 sm:$0xff]   ;;  %v11503_v54 = vld [vmem:[%s17637_s1 + $0x29c] ss:$144 sps:$4 sm:$0xff]  }
 0x124   :  { %3873 = vmatprep.subr.bf16.mxu0 %v11428_v55  ;;  %3914 = vmatprep.subr.bf16.mxu1 %v11431_v56  ;;  %v11498_v55 = vld [vmem:[%s17637_s1 + $0x290] ss:$144 sps:$4 sm:$0xff]   ;;  %v11501_v56 = vld [vmem:[%s17637_s1 + $0x298] ss:$144 sps:$4 sm:$0xff]  }
 0x127   :  { %3874 = vmatpush2.bf16.msra.mxu0 %v11426_v57  ;;  %3915 = vmatpush2.bf16.msra.mxu1 %v11429_v58  ;;  %v11506_v57 = vld [vmem:[%s17637_s1 + $0x174] ss:$144 sps:$4 sm:$0xff]   ;;  %v11509_v58 = vld [vmem:[%s17637_s1 + $0x17c] ss:$144 sps:$4 sm:$0xff]  }
 0x128   :  { %3875 = vmatprep.subr.bf16.mxu0 %v11434_v59  ;;  %3916 = vmatprep.subr.bf16.mxu1 %v11437_v60  ;;  %v11504_v59 = vld [vmem:[%s17637_s1 + $0x170] ss:$144 sps:$4 sm:$0xff]   ;;  %v11507_v60 = vld [vmem:[%s17637_s1 + $0x178] ss:$144 sps:$4 sm:$0xff]  }
 0x12b   :  { %3876 = vmatpush2.bf16.msra.mxu0 %v11432_v61  ;;  %3917 = vmatpush2.bf16.msra.mxu1 %v11435_v62  ;;  %v11512_v61 = vld [vmem:[%s17637_s1 + $0x54] ss:$144 sps:$4 sm:$0xff]   ;;  %v11515_v62 = vld [vmem:[%s17637_s1 + $0x5c] ss:$144 sps:$4 sm:$0xff]  }
 0x12c   :  { %3877 = vmatprep.subr.bf16.mxu0 %v11440_v63  ;;  %3918 = vmatprep.subr.bf16.mxu1 %v11443_v0  ;;  %v11510_v63 = vld [vmem:[%s17637_s1 + $0x50] ss:$144 sps:$4 sm:$0xff]   ;;  %v11513_v0 = vld [vmem:[%s17637_s1 + $0x58] ss:$144 sps:$4 sm:$0xff]  }
 0x12f   :  { %3878 = vmatpush2.bf16.msra.mxu0 %v11438_v1  ;;  %3919 = vmatpush2.bf16.msra.mxu1 %v11441_v2  ;;  %v11518_v1 = vld [vmem:[%s17637_s1 + $0x1134] ss:$144 sps:$4 sm:$0xff]   ;;  %v11521_v2 = vld [vmem:[%s17637_s1 + $0x113c] ss:$144 sps:$4 sm:$0xff]  }
 0x130   :  { %3879 = vmatprep.subr.bf16.mxu0 %v11446_v3  ;;  %3920 = vmatprep.subr.bf16.mxu1 %v11449_v4  ;;  %v11516_v3 = vld [vmem:[%s17637_s1 + $0x1130] ss:$144 sps:$4 sm:$0xff]   ;;  %v11519_v4 = vld [vmem:[%s17637_s1 + $0x1138] ss:$144 sps:$4 sm:$0xff]  }
 0x133   :  { %3880 = vmatpush2.bf16.msra.mxu0 %v11444_v6  ;;  %3921 = vmatpush2.bf16.msra.mxu1 %v11447_v7  ;;  %v11524_v6 = vld [vmem:[%s17637_s1 + $0x1014] ss:$144 sps:$4 sm:$0xff]   ;;  %v11527_v7 = vld [vmem:[%s17637_s1 + $0x101c] ss:$144 sps:$4 sm:$0xff]  }
 0x134   :  { %3881 = vmatprep.subr.bf16.mxu0 %v11452_v8  ;;  %3922 = vmatprep.subr.bf16.mxu1 %v11455_v9  ;;  %v11522_v8 = vld [vmem:[%s17637_s1 + $0x1010] ss:$144 sps:$4 sm:$0xff]   ;;  %v11525_v9 = vld [vmem:[%s17637_s1 + $0x1018] ss:$144 sps:$4 sm:$0xff]  }
 0x137   :  { %3882 = vmatpush2.bf16.msra.mxu0 %v11450_v10  ;;  %3923 = vmatpush2.bf16.msra.mxu1 %v11453_v11  ;;  %v11530_v10 = vld [vmem:[%s17637_s1 + $0xef4] ss:$144 sps:$4 sm:$0xff]   ;;  %v11533_v11 = vld [vmem:[%s17637_s1 + $0xefc] ss:$144 sps:$4 sm:$0xff]  }
 0x138   :  { %3883 = vmatprep.subr.bf16.mxu0 %v11458_v12  ;;  %3924 = vmatprep.subr.bf16.mxu1 %v11461_v13  ;;  %v11528_v12 = vld [vmem:[%s17637_s1 + $0xef0] ss:$144 sps:$4 sm:$0xff]   ;;  %v11531_v13 = vld [vmem:[%s17637_s1 + $0xef8] ss:$144 sps:$4 sm:$0xff]  }
 0x13b   :  { %3884 = vmatpush2.bf16.msra.mxu0 %v11456_v14  ;;  %3925 = vmatpush2.bf16.msra.mxu1 %v11459_v15  ;;  %v11536_v14 = vld [vmem:[%s17637_s1 + $0xdd4] ss:$144 sps:$4 sm:$0xff]   ;;  %v11539_v15 = vld [vmem:[%s17637_s1 + $0xddc] ss:$144 sps:$4 sm:$0xff]  }
 0x13c   :  { %3885 = vmatprep.subr.bf16.mxu0 %v11464_v16  ;;  %3926 = vmatprep.subr.bf16.mxu1 %v11467_v19  ;;  %v11534_v16 = vld [vmem:[%s17637_s1 + $0xdd0] ss:$144 sps:$4 sm:$0xff]   ;;  %v11537_v19 = vld [vmem:[%s17637_s1 + $0xdd8] ss:$144 sps:$4 sm:$0xff]  }
 0x13f   :  { %3886 = vmatpush2.bf16.msra.mxu0 %v11462_v20  ;;  %3927 = vmatpush2.bf16.msra.mxu1 %v11465_v21  ;;  %v11542_v20 = vld [vmem:[%s17637_s1 + $0xcb4] ss:$144 sps:$4 sm:$0xff]   ;;  %v11545_v21 = vld [vmem:[%s17637_s1 + $0xcbc] ss:$144 sps:$4 sm:$0xff]  }
 0x140   :  { %3937 = vmatprep.subr.bf16.mxu0 %v11470_v24  ;;  %3978 = vmatprep.subr.bf16.mxu1 %v11473_v25  ;;  %v11540_v25 = vld [vmem:[%s17637_s1 + $0xcb0] ss:$144 sps:$4 sm:$0xff]  }
 0x142   :  { %v13269_v32 = vpop.f32.mrf.mxu0  ;;  %v13271_v33 = vpop.f32.mrf.mxu1  ;;  %3888 = vmatmul.mubr.bf16.vlgmr.msra.gmra.mxu0 %v12457_v5  ;;  %3929 = vmatmul.mubr.bf16.vlgmr.msra.gmra.mxu1 %v12457_v5 }
 0x143   :  { %3938 = vmatpush1.bf16.msra.mxu0 %v11468_v26  ;;  %3979 = vmatpush1.bf16.msra.mxu1 %v11471_v27  ;;  %v4269_v24 = vmax.f32 %v13269_v32, 0.0  ;;  %v11543_v26 = vld [vmem:[%s17637_s1 + $0xcb8] ss:$144 sps:$4 sm:$0xff]   ;;  %v4267_v27 = vmax.f32 %v13064_v18, 0.0  ;;  %v11602_v32 = vld [vmem:[%s17637_s1 + $0x184] ss:$144 sps:$4 sm:$0xff]  }
 0x144   :  { %v13281_v36 = vpop.f32.mrf.mxu0  ;;  %v13283_v37 = vpop.f32.mrf.mxu1  ;;  %3939 = vmatprep.subr.bf16.mxu0 %v11476_v28  ;;  %3980 = vmatprep.subr.bf16.mxu1 %v11479_v29  ;;  %v11548_v28 = vld [vmem:[%s17637_s1 + $0xb94] ss:$144 sps:$4 sm:$0xff]   ;;  %v11551_v29 = vld [vmem:[%s17637_s1 + $0xb9c] ss:$144 sps:$4 sm:$0xff]  }
 0x145   :  { %3969 = vmatprep.mubr.bf16.mxu0 %v12405_v52  ;;  %4010 = vmatprep.mubr.bf16.mxu1 %v12405_v52 }
 0x146   :  { %v3647_v38 = vpop.f32.mrf.mxu0  ;;  %v3688_v42 = vpop.f32.mrf.mxu1 }
 0x147   :  { %3940 = vmatpush1.bf16.msra.mxu0 %v11474_v30  ;;  %3981 = vmatpush1.bf16.msra.mxu1 %v11477_v31  ;;  %v5449_v30 = vsel %vm5420_vm0, %v4269_v24, 0.0  ;;  %v4271_v31 = vmax.f32 %v13271_v33, 0.0  ;;  %v5435_v38 = vsel %vm5420_vm0, %v4267_v27, 0.0  ;;  %v11608_v33 = vld [vmem:[%s17637_s1 + $0x64] ss:$144 sps:$4 sm:$0xff]  }
 0x148   :  { %v3648_v44 = vpop.f32.mrf.mxu0  ;;  %3941 = vmatprep.subr.bf16.mxu0 %v11482_v34  ;;  %3982 = vmatprep.subr.bf16.mxu1 %v11485_v35  ;;  %v3689_v45 = vpop.f32.mrf.mxu1  ;;  %v11546_v34 = vld [vmem:[%s17637_s1 + $0xb90] ss:$144 sps:$4 sm:$0xff]   ;;  %v11549_v35 = vld [vmem:[%s17637_s1 + $0xb98] ss:$144 sps:$4 sm:$0xff]   ;;  %v5450_v42 = vrot.slane %v5449_v30, 4 }
 0x149   :  { %v5463_v44 = vsel %vm5420_vm0, %v4271_v31, 0.0  ;;  %v11552_v45 = vld [vmem:[%s17637_s1 + $0xa70] ss:$144 sps:$4 sm:$0xff]  }
 0x14b   :  { %3942 = vmatpush1.bf16.msra.mxu0 %v11480_v39  ;;  %3983 = vmatpush1.bf16.msra.mxu1 %v11483_v40  ;;  %v4272_v39 = vmax.f32 %v13283_v37, 0.0  ;;  %v11554_v40 = vld [vmem:[%s17637_s1 + $0xa74] ss:$144 sps:$4 sm:$0xff]  }
 0x14c   :  { %3943 = vmatprep.subr.bf16.mxu0 %v11488_v41  ;;  %3984 = vmatprep.subr.bf16.mxu1 %v11491_v43  ;;  %v11557_v41 = vld [vmem:[%s17637_s1 + $0xa7c] ss:$144 sps:$4 sm:$0xff]   ;;  %v5436_v43 = vrot.slane %v5435_v38, 4 }
 0x14f   :  { %3944 = vmatpush1.bf16.msra.mxu0 %v11486_v46  ;;  %3985 = vmatpush1.bf16.msra.mxu1 %v11489_v47  ;;  %v11555_v46 = vld [vmem:[%s17637_s1 + $0xa78] ss:$144 sps:$4 sm:$0xff]   ;;  %v5470_v47 = vsel %vm5420_vm0, %v4272_v39, 0.0 }
 0x150   :  { %3945 = vmatprep.subr.bf16.mxu0 %v11494_v48  ;;  %3986 = vmatprep.subr.bf16.mxu1 %v11497_v49  ;;  %v11560_v48 = vld [vmem:[%s17637_s1 + $0x954] ss:$144 sps:$4 sm:$0xff]   ;;  %v11563_v49 = vld [vmem:[%s17637_s1 + $0x95c] ss:$144 sps:$4 sm:$0xff]  }
 0x153   :  { %3946 = vmatpush1.bf16.msra.mxu0 %v11492_v50  ;;  %3987 = vmatpush1.bf16.msra.mxu1 %v11495_v51  ;;  %v5451_v50 = vadd.f32 %v5450_v42, %v5449_v30  ;;  %v5464_v51 = vrot.slane %v5463_v44, 4 }
 0x154   :  { %3947 = vmatprep.subr.bf16.mxu0 %v11500_v53  ;;  %3988 = vmatprep.subr.bf16.mxu1 %v11503_v54  ;;  %v5437_v53 = vadd.f32 %v5436_v43, %v5435_v38  ;;  %v5471_v54 = vrot.slane %v5470_v47, 4 }
 0x157   :  { %3948 = vmatpush1.bf16.msra.mxu0 %v11498_v55  ;;  %3989 = vmatpush1.bf16.msra.mxu1 %v11501_v56  ;;  %v11558_v55 = vld [vmem:[%s17637_s1 + $0x950] ss:$144 sps:$4 sm:$0xff]   ;;  %v11561_v56 = vld [vmem:[%s17637_s1 + $0x958] ss:$144 sps:$4 sm:$0xff]  }
 0x158   :  { %3949 = vmatprep.subr.bf16.mxu0 %v11506_v57  ;;  %3990 = vmatprep.subr.bf16.mxu1 %v11509_v58  ;;  %v5452_v57 = vrot.slane %v5451_v50, 2  ;;  %v5465_v58 = vadd.f32 %v5464_v51, %v5463_v44  ;;  %v11582_v44 = vld [vmem:[%s17637_s1 + $0x4e0] ss:$144 sps:$4 sm:$0xff]  }
 0x15b   :  { %3950 = vmatpush1.bf16.msra.mxu0 %v11504_v59  ;;  %3991 = vmatpush1.bf16.msra.mxu1 %v11507_v60  ;;  %v11566_v59 = vld [vmem:[%s17637_s1 + $0x844] ss:$144 sps:$4 sm:$0xff]   ;;  %v11569_v60 = vld [vmem:[%s17637_s1 + $0x84c] ss:$144 sps:$4 sm:$0xff]  }
 0x15c   :  { %3951 = vmatprep.subr.bf16.mxu0 %v11512_v61  ;;  %3992 = vmatprep.subr.bf16.mxu1 %v11515_v62  ;;  %v5438_v61 = vrot.slane %v5437_v53, 2  ;;  %v5472_v62 = vadd.f32 %v5471_v54, %v5470_v47  ;;  %v11593_v47 = vld [vmem:[%s17637_s1 + $0x3cc] ss:$144 sps:$4 sm:$0xff]   ;;  %v11591_v54 = vld [vmem:[%s17637_s1 + $0x3c8] ss:$144 sps:$4 sm:$0xff]  }
 0x15f   :  { %3952 = vmatpush1.bf16.msra.mxu0 %v11510_v63  ;;  %3993 = vmatpush1.bf16.msra.mxu1 %v11513_v0  ;;  %v11564_v63 = vld [vmem:[%s17637_s1 + $0x840] ss:$144 sps:$4 sm:$0xff]   ;;  %v11567_v0 = vld [vmem:[%s17637_s1 + $0x848] ss:$144 sps:$4 sm:$0xff]  }
 0x160   :  { %3953 = vmatprep.subr.bf16.mxu0 %v11518_v1  ;;  %3994 = vmatprep.subr.bf16.mxu1 %v11521_v2  ;;  %v11572_v1 = vld [vmem:[%s17637_s1 + $0x724] ss:$144 sps:$4 sm:$0xff]   ;;  %v11575_v2 = vld [vmem:[%s17637_s1 + $0x72c] ss:$144 sps:$4 sm:$0xff]  }
 0x163   :  { %3954 = vmatpush2.bf16.msra.mxu0 %v11516_v3  ;;  %3995 = vmatpush2.bf16.msra.mxu1 %v11519_v4  ;;  %v5453_v3 = vadd.f32 %v5452_v57, %v5451_v50  ;;  %v5466_v4 = vrot.slane %v5465_v58, 2 }
 0x164   :  { %3955 = vmatprep.subr.bf16.mxu0 %v11524_v6  ;;  %3996 = vmatprep.subr.bf16.mxu1 %v11527_v7  ;;  %v5439_v6 = vadd.f32 %v5438_v61, %v5437_v53  ;;  %v5473_v7 = vrot.slane %v5472_v62, 2  ;;  %v11588_v53 = vld [vmem:[%s17637_s1 + $0x3c0] ss:$144 sps:$4 sm:$0xff]  }
 0x165   :  { %v11594_v61 = vld [vmem:[%s17637_s1 + $0x2a0] ss:$144 sps:$4 sm:$0xff]  }
 0x167   :  { %3956 = vmatpush2.bf16.msra.mxu0 %v11522_v8  ;;  %3997 = vmatpush2.bf16.msra.mxu1 %v11525_v9  ;;  %v11570_v8 = vld [vmem:[%s17637_s1 + $0x720] ss:$144 sps:$4 sm:$0xff]  }
 0x168   :  { %3957 = vmatprep.subr.bf16.mxu0 %v11530_v10  ;;  %3998 = vmatprep.subr.bf16.mxu1 %v11533_v11  ;;  %v11573_v11 = vld [vmem:[%s17637_s1 + $0x728] ss:$144 sps:$4 sm:$0xff]  }
 0x16b   :  { %3958 = vmatpush2.bf16.msra.mxu0 %v11528_v12  ;;  %3999 = vmatpush2.bf16.msra.mxu1 %v11531_v13  ;;  %v11578_v12 = vld [vmem:[%s17637_s1 + $0x604] ss:$144 sps:$4 sm:$0xff]   ;;  %v11581_v13 = vld [vmem:[%s17637_s1 + $0x60c] ss:$144 sps:$4 sm:$0xff]  }
 0x16c   :  { %3959 = vmatprep.subr.bf16.mxu0 %v11536_v14  ;;  %4000 = vmatprep.subr.bf16.mxu1 %v11539_v15  ;;  %v5454_v14 = vrot.slane %v5453_v3, 1  ;;  %v5467_v15 = vadd.f32 %v5466_v4, %v5465_v58 }
 0x16e   :  { %v5468_v38 = vrot.slane %v5467_v15, 1 }
 0x16f   :  { %3960 = vmatpush2.bf16.msra.mxu0 %v11534_v16  ;;  %4001 = vmatpush2.bf16.msra.mxu1 %v11537_v19 }
 0x170   :  { %3961 = vmatprep.subr.bf16.mxu0 %v11542_v20  ;;  %4002 = vmatprep.subr.bf16.mxu1 %v11545_v21  ;;  %v5440_v20 = vrot.slane %v5439_v6, 1  ;;  %v5474_v21 = vadd.f32 %v5473_v7, %v5472_v62  ;;  %v11597_v62 = vld [vmem:[%s17637_s1 + $0x2a8] ss:$144 sps:$4 sm:$0xff]  }
 0x171   :  { %v11609_v7 = vld [vmem:[%s17637_s1 + $0x68] ss:$144 sps:$4 sm:$0xff]  }
 0x172   :  { %v5441_v42 = vadd.f32 %v5440_v20, %v5439_v6  ;;  %v5475_v43 = vrot.slane %v5474_v21, 1  ;;  %v11606_v6 = vld [vmem:[%s17637_s1 + $0x60] ss:$144 sps:$4 sm:$0xff]  }
 0x173   :  { %3962 = vmatpush2.bf16.msra.mxu0 %v11540_v25  ;;  %4003 = vmatpush2.bf16.msra.mxu1 %v11543_v26  ;;  %v11576_v26 = vld [vmem:[%s17637_s1 + $0x600] ss:$144 sps:$4 sm:$0xff]  }
 0x174   :  { %3963 = vmatprep.subr.bf16.mxu0 %v11548_v28  ;;  %4004 = vmatprep.subr.bf16.mxu1 %v11551_v29  ;;  %v11579_v28 = vld [vmem:[%s17637_s1 + $0x608] ss:$144 sps:$4 sm:$0xff]   ;;  %v11584_v29 = vld [vmem:[%s17637_s1 + $0x4e4] ss:$144 sps:$4 sm:$0xff]   ;;  %v5676_v50 = vmul.f32 0.5, %v5441_v42  ;;  %v5476_v51 = vadd.f32 %v5475_v43, %v5474_v21 }
 0x175   :  { %v11612_v20 = vld [vmem:[%s17637_s1 + $0x1140] ss:$144 sps:$4 sm:$0xff]   ;;  %v11615_v21 = vld [vmem:[%s17637_s1 + $0x1148] ss:$144 sps:$4 sm:$0xff]  }
 0x177   :  { %3964 = vmatpush2.bf16.msra.mxu0 %v11546_v34  ;;  %4005 = vmatpush2.bf16.msra.mxu1 %v11549_v35  ;;  %v11587_v34 = vld [vmem:[%s17637_s1 + $0x4ec] ss:$144 sps:$4 sm:$0xff]   ;;  %v5455_v35 = vadd.f32 %v5454_v14, %v5453_v3 }
 0x178   :  { %3965 = vmatprep.subr.bf16.mxu0 %v11554_v40  ;;  %4006 = vmatprep.subr.bf16.mxu1 %v11557_v41 }
 0x17b   :  { %3966 = vmatpush2.bf16.msra.mxu0 %v11552_v45  ;;  %4007 = vmatpush2.bf16.msra.mxu1 %v11555_v46  ;;  %v11585_v45 = vld [vmem:[%s17637_s1 + $0x4e8] ss:$144 sps:$4 sm:$0xff]   ;;  %v11590_v46 = vld [vmem:[%s17637_s1 + $0x3c4] ss:$144 sps:$4 sm:$0xff]  }
 0x17c   :  { %3967 = vmatprep.subr.bf16.mxu0 %v11560_v48  ;;  %4008 = vmatprep.subr.bf16.mxu1 %v11563_v49  ;;  %v5678_v48 = vmul.f32 0.5, %v5455_v35  ;;  %v5469_v49 = vadd.f32 %v5468_v38, %v5467_v15  ;;  %v11618_v35 = vld [vmem:[%s17637_s1 + $0x1020] ss:$144 sps:$4 sm:$0xff]   ;;  %v11621_v38 = vld [vmem:[%s17637_s1 + $0x1028] ss:$144 sps:$4 sm:$0xff]  }
 0x17e   :  { %v13545_v57 = vsub.f32 %v4269_v24, %v5678_v48  ;;  %v5680_v58 = vmul.f32 0.5, %v5469_v49  ;;  %v11605_v24 = vld [vmem:[%s17637_s1 + $0x18c] ss:$144 sps:$4 sm:$0xff]  }
 0x17f   :  { %3968 = vmatpush2.bf16.msra.mxu0 %v11558_v55  ;;  %4009 = vmatpush2.bf16.msra.mxu1 %v11561_v56  ;;  %v11596_v55 = vld [vmem:[%s17637_s1 + $0x2a4] ss:$144 sps:$4 sm:$0xff]   ;;  %v11599_v56 = vld [vmem:[%s17637_s1 + $0x2ac] ss:$144 sps:$4 sm:$0xff]  }
 0x180   :  { %4019 = vmatprep.subr.bf16.mxu0 %v11566_v59  ;;  %4060 = vmatprep.subr.bf16.mxu1 %v11569_v60  ;;  %v13549_v59 = vsub.f32 %v4267_v27, %v5676_v50  ;;  %v5681_v60 = vmul.f32 0.5, %v5476_v51  ;;  %v5750_v18 = vmul.f32 %v13545_v57, %v13545_v57  ;;  %v13567_v27 = vsub.f32 %v4271_v31, %v5680_v58  ;;  %v11611_v31 = vld [vmem:[%s17637_s1 + $0x6c] ss:$144 sps:$4 sm:$0xff]   ;;  %v11632_v50 = vld [vmem:[%s17637_s1 + $0xde4] ss:$144 sps:$4 sm:$0xff]  }
 0x181   :  { %v11635_v51 = vld [vmem:[%s17637_s1 + $0xdec] ss:$144 sps:$4 sm:$0xff]   ;;  %v11638_v58 = vld [vmem:[%s17637_s1 + $0xcc4] ss:$144 sps:$4 sm:$0xff]  }
 0x182   :  { %v13486_v9 = vpop.f32.mrf.mxu0  ;;  %v13488_v10 = vpop.f32.mrf.mxu1  ;;  %3970 = vmatmul.mubr.bf16.vlgmr.msra.gmra.mxu0 %v12457_v5  ;;  %4011 = vmatmul.mubr.bf16.vlgmr.msra.gmra.mxu1 %v12457_v5  ;;  %v5810_v37 = vsel %vm5420_vm0, %v5750_v18, 0.0  ;;  %v11636_v18 = vld [vmem:[%s17637_s1 + $0xcc0] ss:$144 sps:$4 sm:$0xff]  }
 0x183   :  { %4020 = vmatpush1.bf16.msra.mxu0 %v11564_v63  ;;  %4061 = vmatpush1.bf16.msra.mxu1 %v11567_v0  ;;  %v5748_v63 = vmul.f32 %v13549_v59, %v13549_v59  ;;  %v13573_v0 = vsub.f32 %v4272_v39, %v5681_v60  ;;  %v5752_v39 = vmul.f32 %v13567_v27, %v13567_v27  ;;  %v11641_v60 = vld [vmem:[%s17637_s1 + $0xccc] ss:$144 sps:$4 sm:$0xff]  }
 0x184   :  { %v13501_v16 = vpop.f32.mrf.mxu0  ;;  %v13503_v19 = vpop.f32.mrf.mxu1  ;;  %4021 = vmatprep.subr.bf16.mxu0 %v11572_v1  ;;  %4062 = vmatprep.subr.bf16.mxu1 %v11575_v2  ;;  %v11600_v1 = vld [vmem:[%s17637_s1 + $0x180] ss:$144 sps:$4 sm:$0xff]   ;;  %v11603_v2 = vld [vmem:[%s17637_s1 + $0x188] ss:$144 sps:$4 sm:$0xff]  }
 0x185   :  { %4051 = vmatprep.mubr.bf16.mxu0 %v12405_v52  ;;  %4092 = vmatprep.mubr.bf16.mxu1 %v12405_v52  ;;  %v5796_v3 = vsel %vm5420_vm0, %v5748_v63, 0.0  ;;  %v5753_v4 = vmul.f32 %v13573_v0, %v13573_v0  ;;  %v11639_v63 = vld [vmem:[%s17637_s1 + $0xcc8] ss:$144 sps:$4 sm:$0xff]  }
 0x186   :  { %v3729_v25 = vpop.f32.mrf.mxu0  ;;  %v3770_v30 = vpop.f32.mrf.mxu1  ;;  %v5797_v14 = vrot.slane %v5796_v3, 4 }
 0x187   :  { %4022 = vmatpush1.bf16.msra.mxu0 %v11570_v8  ;;  %4063 = vmatpush1.bf16.msra.mxu1 %v11573_v11  ;;  %v11614_v8 = vld [vmem:[%s17637_s1 + $0x1144] ss:$144 sps:$4 sm:$0xff]   ;;  %v11617_v11 = vld [vmem:[%s17637_s1 + $0x114c] ss:$144 sps:$4 sm:$0xff]   ;;  %v5831_v15 = vsel %vm5420_vm0, %v5753_v4, 0.0 }
 0x188   :  { %v3730_v40 = vpop.f32.mrf.mxu0  ;;  %4023 = vmatprep.subr.bf16.mxu0 %v11578_v12  ;;  %4064 = vmatprep.subr.bf16.mxu1 %v11581_v13  ;;  %v3771_v41 = vpop.f32.mrf.mxu1  ;;  %v5811_v12 = vrot.slane %v5810_v37, 4  ;;  %v5824_v13 = vsel %vm5420_vm0, %v5752_v39, 0.0  ;;  %v11620_v25 = vld [vmem:[%s17637_s1 + $0x1024] ss:$144 sps:$4 sm:$0xff]   ;;  %v5832_v30 = vrot.slane %v5831_v15, 4 }
 0x189   :  { %v11626_v40 = vld [vmem:[%s17637_s1 + $0xf04] ss:$144 sps:$4 sm:$0xff]   ;;  %v11629_v41 = vld [vmem:[%s17637_s1 + $0xf0c] ss:$144 sps:$4 sm:$0xff]   ;;  %v11645_v4 = vld [vmem:[%s17637_s1 + $0xba8] ss:$144 sps:$4 sm:$0xff]  }
 0x18b   :  { %4024 = vmatpush1.bf16.msra.mxu0 %v11576_v26  ;;  %4065 = vmatpush1.bf16.msra.mxu1 %v11579_v28  ;;  %v11623_v26 = vld [vmem:[%s17637_s1 + $0x102c] ss:$144 sps:$4 sm:$0xff]   ;;  %v5812_v28 = vadd.f32 %v5811_v12, %v5810_v37 }
 0x18c   :  { %4025 = vmatprep.subr.bf16.mxu0 %v11584_v29  ;;  %4066 = vmatprep.subr.bf16.mxu1 %v11587_v34  ;;  %v5825_v29 = vrot.slane %v5824_v13, 4  ;;  %v5798_v34 = vadd.f32 %v5797_v14, %v5796_v3  ;;  %v11642_v3 = vld [vmem:[%s17637_s1 + $0xba0] ss:$144 sps:$4 sm:$0xff]  }
 0x18d   :  { %v5813_v42 = vrot.slane %v5812_v28, 2  ;;  %v11648_v14 = vld [vmem:[%s17637_s1 + $0xa80] ss:$144 sps:$4 sm:$0xff]  }
 0x18e   :  { %v5826_v43 = vadd.f32 %v5825_v29, %v5824_v13 }
 0x18f   :  { %4026 = vmatpush1.bf16.msra.mxu0 %v11582_v44  ;;  %4067 = vmatpush1.bf16.msra.mxu1 %v11585_v45  ;;  %v5833_v44 = vadd.f32 %v5832_v30, %v5831_v15  ;;  %v5799_v45 = vrot.slane %v5798_v34, 2  ;;  %v5814_v48 = vadd.f32 %v5813_v42, %v5812_v28  ;;  %v11651_v15 = vld [vmem:[%s17637_s1 + $0xa88] ss:$144 sps:$4 sm:$0xff]   ;;  %v11654_v30 = vld [vmem:[%s17637_s1 + $0x960] ss:$144 sps:$4 sm:$0xff]   ;;  %v6183_v42 = vlaneseq }
 0x190   :  { %4027 = vmatprep.subr.bf16.mxu0 %v11590_v46  ;;  %4068 = vmatprep.subr.bf16.mxu1 %v11593_v47  ;;  %v11624_v46 = vld [vmem:[%s17637_s1 + $0xf00] ss:$144 sps:$4 sm:$0xff]   ;;  %v11627_v47 = vld [vmem:[%s17637_s1 + $0xf08] ss:$144 sps:$4 sm:$0xff]   ;;  %v5827_v49 = vrot.slane %v5826_v43, 2 }
 0x193   :  { %4028 = vmatpush1.bf16.msra.mxu0 %v11588_v53  ;;  %4069 = vmatpush1.bf16.msra.mxu1 %v11591_v54  ;;  %v5834_v53 = vrot.slane %v5833_v44, 2  ;;  %v5800_v54 = vadd.f32 %v5799_v45, %v5798_v34  ;;  %v11657_v34 = vld [vmem:[%s17637_s1 + $0x968] ss:$144 sps:$4 sm:$0xff]   ;;  %v11668_v45 = vld [vmem:[%s17637_s1 + $0x734] ss:$144 sps:$4 sm:$0xff]  }
 0x194   :  { %4029 = vmatprep.subr.bf16.mxu0 %v11596_v55  ;;  %4070 = vmatprep.subr.bf16.mxu1 %v11599_v56  ;;  %v11630_v55 = vld [vmem:[%s17637_s1 + $0xde0] ss:$144 sps:$4 sm:$0xff]   ;;  %v11633_v56 = vld [vmem:[%s17637_s1 + $0xde8] ss:$144 sps:$4 sm:$0xff]  }
 0x197   :  { %4030 = vmatpush1.bf16.msra.mxu0 %v11594_v61  ;;  %4071 = vmatpush1.bf16.msra.mxu1 %v11597_v62  ;;  %v5815_v61 = vrot.slane %v5814_v48, 1  ;;  %v5828_v62 = vadd.f32 %v5827_v49, %v5826_v43  ;;  %v11660_v43 = vld [vmem:[%s17637_s1 + $0x850] ss:$144 sps:$4 sm:$0xff]  }
 0x198   :  { %4031 = vmatprep.subr.bf16.mxu0 %v11602_v32  ;;  %4072 = vmatprep.subr.bf16.mxu1 %v11605_v24  ;;  %v5835_v32 = vadd.f32 %v5834_v53, %v5833_v44  ;;  %v5801_v24 = vrot.slane %v5800_v54, 1  ;;  %v11663_v44 = vld [vmem:[%s17637_s1 + $0x858] ss:$144 sps:$4 sm:$0xff]   ;;  %v11674_v53 = vld [vmem:[%s17637_s1 + $0x614] ss:$144 sps:$4 sm:$0xff]  }
 0x19a   :  { %v5836_v37 = vrot.slane %v5835_v32, 1  ;;  %v5802_v39 = vadd.f32 %v5801_v24, %v5800_v54  ;;  %v11677_v54 = vld [vmem:[%s17637_s1 + $0x61c] ss:$144 sps:$4 sm:$0xff]   ;;  %v11680_v24 = vld [vmem:[%s17637_s1 + $0x4f4] ss:$144 sps:$4 sm:$0xff]  }
 0x19b   :  { %4032 = vmatpush1.bf16.msra.mxu0 %v11600_v1  ;;  %4073 = vmatpush1.bf16.msra.mxu1 %v11603_v2  ;;  %v11644_v1 = vld [vmem:[%s17637_s1 + $0xba4] ss:$144 sps:$4 sm:$0xff]   ;;  %v11647_v2 = vld [vmem:[%s17637_s1 + $0xbac] ss:$144 sps:$4 sm:$0xff]  }
 0x19c   :  { %4033 = vmatprep.subr.bf16.mxu0 %v11608_v33  ;;  %4074 = vmatprep.subr.bf16.mxu1 %v11611_v31  ;;  %v5816_v33 = vadd.f32 %v5815_v61, %v5814_v48  ;;  %v5829_v31 = vrot.slane %v5828_v62, 1  ;;  %v5837_v12 = vadd.f32 %v5836_v37, %v5835_v32  ;;  %v6036_v13 = vmul.f32 0.5, %v5802_v39  ;;  %v11666_v48 = vld [vmem:[%s17637_s1 + $0x730] ss:$144 sps:$4 sm:$0xff]   ;;  %v11675_v32 = vld [vmem:[%s17637_s1 + $0x618] ss:$144 sps:$4 sm:$0xff]  }
 0x19d   :  { %v11672_v61 = vld [vmem:[%s17637_s1 + $0x610] ss:$144 sps:$4 sm:$0xff]  }
 0x19e   :  { %v6041_v28 = vmul.f32 0.5, %v5837_v12  ;;  %v6072_v29 = vadd.f32 1e-05, %v6036_v13  ;;  %v5410_v37 = vld [vmem:[%s17639_s3] sm:$0xff] }
 0x19f   :  { %4034 = vmatpush1.bf16.msra.mxu0 %v11606_v6  ;;  %4075 = vmatpush1.bf16.msra.mxu1 %v11609_v7  ;;  %v11650_v6 = vld [vmem:[%s17637_s1 + $0xa84] ss:$144 sps:$4 sm:$0xff]   ;;  %v11653_v7 = vld [vmem:[%s17637_s1 + $0xa8c] ss:$144 sps:$4 sm:$0xff]   ;;  %v11678_v39 = vld [vmem:[%s17637_s1 + $0x4f0] ss:$144 sps:$4 sm:$0xff]  }
 0x1a0   :  { %4035 = vmatprep.subr.bf16.mxu0 %v11614_v8  ;;  %4076 = vmatprep.subr.bf16.mxu1 %v11617_v11  ;;  %v6038_v8 = vmul.f32 0.5, %v5816_v33  ;;  %v5830_v11 = vadd.f32 %v5829_v31, %v5828_v62 }
 0x1a3   :  { %4036 = vmatpush2.bf16.msra.mxu0 %v11612_v20  ;;  %4077 = vmatpush2.bf16.msra.mxu1 %v11615_v21  ;;  %v11656_v20 = vld [vmem:[%s17637_s1 + $0x964] ss:$144 sps:$4 sm:$0xff]   ;;  %v11659_v21 = vld [vmem:[%s17637_s1 + $0x96c] ss:$144 sps:$4 sm:$0xff]  }
 0x1a4   :  { %4037 = vmatprep.subr.bf16.mxu0 %v11620_v25  ;;  %4078 = vmatprep.subr.bf16.mxu1 %v11623_v26  ;;  %v6074_v25 = vadd.f32 1e-05, %v6038_v8  ;;  %v6040_v26 = vmul.f32 0.5, %v5830_v11  ;;  %v11689_v8 = vld [vmem:[%s17637_s1 + $0x3dc] ss:$144 sps:$4 sm:$0xff]  }
 0x1a6   :  { %12060 = vrsqrt.f32 %v6074_v25 }
 0x1a7   :  { %4038 = vmatpush2.bf16.msra.mxu0 %v11618_v35  ;;  %4079 = vmatpush2.bf16.msra.mxu1 %v11621_v38  ;;  %v11662_v35 = vld [vmem:[%s17637_s1 + $0x854] ss:$144 sps:$4 sm:$0xff]   ;;  %v11665_v38 = vld [vmem:[%s17637_s1 + $0x85c] ss:$144 sps:$4 sm:$0xff]   ;;  %12062 = vrsqrt.f32 %v6072_v29 }
 0x1a8   :  { %4039 = vmatprep.subr.bf16.mxu0 %v11626_v40  ;;  %4080 = vmatprep.subr.bf16.mxu1 %v11629_v41  ;;  %v6076_v40 = vadd.f32 1e-05, %v6040_v26  ;;  %v6077_v41 = vadd.f32 1e-05, %v6041_v28 }
 0x1aa   :  { %12064 = vrsqrt.f32 %v6077_v41 }
 0x1ab   :  { %4040 = vmatpush2.bf16.msra.mxu0 %v11624_v46  ;;  %4081 = vmatpush2.bf16.msra.mxu1 %v11627_v47  ;;  %v11671_v46 = vld [vmem:[%s17637_s1 + $0x73c] ss:$144 sps:$4 sm:$0xff]   ;;  %v13715_v47 = vshrl.u32 %v6183_v42, 7  ;;  %12066 = vrsqrt.f32 %v6076_v40 }
 0x1ac   :  { %4041 = vmatprep.subr.bf16.mxu0 %v11632_v50  ;;  %4082 = vmatprep.subr.bf16.mxu1 %v11635_v51  ;;  %v11669_v51 = vld [vmem:[%s17637_s1 + $0x738] ss:$144 sps:$4 sm:$0xff]  }
 0x1ad   :  { %v13757_v33 = vsub.s32 2, %v13715_v47 }
 0x1af   :  { %4042 = vmatpush2.bf16.msra.mxu0 %v11630_v55  ;;  %4083 = vmatpush2.bf16.msra.mxu1 %v11633_v56  ;;  %17675 = vst [vmem:[#allocation5_spill] sm:$0xff] %v13757_v33 }
 0x1b0   :  { %4043 = vmatprep.subr.bf16.mxu0 %v11638_v58  ;;  %4084 = vmatprep.subr.bf16.mxu1 %v11641_v60  ;;  %v13742_v58 = vsub.s32 4, %v13715_v47 }
 0x1b3   :  { %4044 = vmatpush2.bf16.msra.mxu0 %v11636_v18  ;;  %4085 = vmatpush2.bf16.msra.mxu1 %v11639_v63  ;;  %v12061_v18 = vpop.eup %12060 }
 0x1b4   :  { %4045 = vmatprep.subr.bf16.mxu0 %v11644_v1  ;;  %4086 = vmatprep.subr.bf16.mxu1 %v11647_v2  ;;  %v11683_v1 = vld [vmem:[%s17637_s1 + $0x4fc] ss:$144 sps:$4 sm:$0xff]   ;;  %v12063_v31 = vpop.eup %12062 }
 0x1b7   :  { %4046 = vmatpush2.bf16.msra.mxu0 %v11642_v3  ;;  %4087 = vmatpush2.bf16.msra.mxu1 %v11645_v4  ;;  %v11681_v3 = vld [vmem:[%s17637_s1 + $0x4f8] ss:$144 sps:$4 sm:$0xff]   ;;  %v6146_v4 = vmul.f32 %v12061_v18, %v13545_v57 }
 0x1b8   :  { %4047 = vmatprep.subr.bf16.mxu0 %v11650_v6  ;;  %4088 = vmatprep.subr.bf16.mxu1 %v11653_v7  ;;  %v6202_v6 = vrot.slane %v5410_v37, %v13742_v58  ;;  %v11686_v7 = vld [vmem:[%s17637_s1 + $0x3d4] ss:$144 sps:$4 sm:$0xff]  }
 0x1bb   :  { %4048 = vmatpush2.bf16.msra.mxu0 %v11648_v14  ;;  %4089 = vmatpush2.bf16.msra.mxu1 %v11651_v15 }
 0x1bc   :  { %4049 = vmatprep.subr.bf16.mxu0 %v11656_v20  ;;  %4090 = vmatprep.subr.bf16.mxu1 %v11659_v21 }
 0x1bf   :  { %4050 = vmatpush2.bf16.msra.mxu0 %v11654_v30  ;;  %4091 = vmatpush2.bf16.msra.mxu1 %v11657_v34 }
 0x1c0   :  { %4101 = vmatprep.subr.bf16.mxu0 %v11662_v35  ;;  %4142 = vmatprep.subr.bf16.mxu1 %v11665_v38 }
 0x1c2   :  { %v13720_v49 = vpop.f32.mrf.mxu0  ;;  %v13722_v50 = vpop.f32.mrf.mxu1  ;;  %4052 = vmatmul.mubr.bf16.vlgmr.msra.gmra.mxu0 %v12457_v5  ;;  %4093 = vmatmul.mubr.bf16.vlgmr.msra.gmra.mxu1 %v12457_v5 }
 0x1c3   :  { %4102 = vmatpush1.bf16.msra.mxu0 %v11660_v43  ;;  %4143 = vmatpush1.bf16.msra.mxu1 %v11663_v44 }
 0x1c4   :  { %v13735_v55 = vpop.f32.mrf.mxu0  ;;  %v13737_v56 = vpop.f32.mrf.mxu1  ;;  %4103 = vmatprep.subr.bf16.mxu0 %v11668_v45  ;;  %4144 = vmatprep.subr.bf16.mxu1 %v11671_v46 }
 0x1c5   :  { %4133 = vmatprep.mubr.bf16.mxu0 %v12405_v52  ;;  %4174 = vmatprep.mubr.bf16.mxu1 %v12405_v52 }
 0x1c6   :  { %v3811_v60 = vpop.f32.mrf.mxu0  ;;  %v3852_v62 = vpop.f32.mrf.mxu1 }
 0x1c7   :  { %4104 = vmatpush1.bf16.msra.mxu0 %v11666_v48  ;;  %4145 = vmatpush1.bf16.msra.mxu1 %v11669_v51 }
 0x1c8   :  { %v3812_v63 = vpop.f32.mrf.mxu0  ;;  %4105 = vmatprep.subr.bf16.mxu0 %v11674_v53  ;;  %4146 = vmatprep.subr.bf16.mxu1 %v11677_v54  ;;  %v3853_v2 = vpop.f32.mrf.mxu1 }
 0x1cb   :  { %4106 = vmatpush1.bf16.msra.mxu0 %v11672_v61  ;;  %4147 = vmatpush1.bf16.msra.mxu1 %v11675_v32 }
 0x1cc   :  { %4107 = vmatprep.subr.bf16.mxu0 %v11680_v24  ;;  %4148 = vmatprep.subr.bf16.mxu1 %v11683_v1 }
 0x1cd   :  { %17 = vsyncpa [#allocation3], 0  ;;  %v6144_v11 = vmul.f32 %v12063_v31, %v13549_v59  ;;  %v6194_v12 = vrot.slane %v5410_v37, %v13757_v33  ;;  %v13779_v57 = vsub.s32 7, %v13715_v47  ;;  %v12065_v13 = vpop.eup %12064  ;;  %v6367_v14 = vmul.f32 %v6202_v6, %v6146_v4  ;;  %v11684_v15 = vld [vmem:[%s17637_s1 + $0x3d0] ss:$144 sps:$4 sm:$0xff]   ;;  %s12186_s13 = smov [#allocation2]  }
 0x1ce   :  { %v11687_v20 = vld [vmem:[%s17637_s1 + $0x3d8] ss:$144 sps:$4 sm:$0xff]   ;;  %v13788_v21 = vsub.s32 6, %v13715_v47  ;;  %v11692_v59 = vld [vmem:[%s17637_s1 + $0x2b4] ss:$144 sps:$4 sm:$0xff]   ;;  %v12067_v28 = vpop.eup %12066  ;;  %v6149_v30 = vmul.f32 %v12065_v13, %v13573_v0  ;;  %vm12185_vm1 = vmmov 0  }
 0x1cf   :  { %4108 = vmatpush1.bf16.msra.mxu0 %v11678_v39  ;;  %4149 = vmatpush1.bf16.msra.mxu1 %v11681_v3  ;;  %v11695_v25 = vld [vmem:[%s17637_s1 + $0x2bc] ss:$144 sps:$4 sm:$0xff]   ;;  %v5415_v26 = vld [vmem:[%s17640_s4] sm:$0xff]  ;;  %v6365_v29 = vmul.f32 %v6194_v12, %v6144_v11  ;;  %v6214_v35 = vrot.slane %v5410_v37, %v13779_v57  ;;  %v11693_v40 = vld [vmem:[%s17637_s1 + $0x2b8] ss:$144 sps:$4 sm:$0xff]   ;;  %v6148_v0 = vmul.f32 %v12067_v28, %v13567_v27  ;;  %vm9317_vm2 = vcmask 64512  }
 0x1d0   :  { %4109 = vmatprep.subr.bf16.mxu0 %v11686_v7  ;;  %4150 = vmatprep.subr.bf16.mxu1 %v11689_v8  ;;  %v6423_v34 = vrot.slane %v5415_v26, %v13742_v58  ;;  %v11690_v38 = vld [vmem:[%s17637_s1 + $0x2b0] ss:$144 sps:$4 sm:$0xff]   ;;  %v6415_v42 = vrot.slane %v5415_v26, %v13757_v33  ;;  %v6210_v43 = vrot.slane %v5410_v37, %v13788_v21  ;;  %v11698_v44 = vld [vmem:[%s17637_s1 + $0x194] ss:$144 sps:$4 sm:$0xff]   ;;  %v11701_v45 = vld [vmem:[%s17637_s1 + $0x19c] ss:$144 sps:$4 sm:$0xff]  }
 0x1d1   :  { %v6370_v48 = vmul.f32 %v6214_v35, %v6149_v30  ;;  %v11696_v27 = vld [vmem:[%s17637_s1 + $0x190] ss:$144 sps:$4 sm:$0xff]   ;;  %v11699_v51 = vld [vmem:[%s17637_s1 + $0x198] ss:$144 sps:$4 sm:$0xff]   ;;  %v6435_v53 = vrot.slane %v5415_v26, %v13779_v57  ;;  %v11704_v60 = vld [vmem:[%s17637_s1 + $0x74] ss:$144 sps:$4 sm:$0xff]   ;;  %v6431_v32 = vrot.slane %v5415_v26, %v13788_v21 }
 0x1d2   :  { %v13808_v41 = vadd.f32 %v6423_v34, %v6367_v14  ;;  %v13819_v46 = vadd.f32 %v6415_v42, %v6365_v29  ;;  %v6369_v54 = vmul.f32 %v6210_v43, %v6148_v0  ;;  %v11707_v61 = vld [vmem:[%s17637_s1 + $0x7c] ss:$144 sps:$4 sm:$0xff]   ;;  %v11702_v24 = vld [vmem:[%s17637_s1 + $0x70] ss:$144 sps:$4 sm:$0xff]   ;;  %v11705_v18 = vld [vmem:[%s17637_s1 + $0x78] ss:$144 sps:$4 sm:$0xff]  }
 0x1d3   :  { %4110 = vmatpush1.bf16.msra.mxu0 %v11684_v15  ;;  %4151 = vmatpush1.bf16.msra.mxu1 %v11687_v20  ;;  %v13834_v62 = vadd.f32 %v6435_v53, %v6370_v48  ;;  %v11710_v63 = vld [vmem:[%s17637_s1 + $0x1154] ss:$144 sps:$4 sm:$0xff]   ;;  %v11713_v1 = vld [vmem:[%s17637_s1 + $0x115c] ss:$144 sps:$4 sm:$0xff]   ;;  %v11708_v31 = vld [vmem:[%s17637_s1 + $0x1150] ss:$144 sps:$4 sm:$0xff]  }
 0x1d4   :  { %4111 = vmatprep.subr.bf16.mxu0 %v11692_v59  ;;  %4152 = vmatprep.subr.bf16.mxu1 %v11695_v25  ;;  %17676 = vst [vmem:[#allocation6_spill] sm:$0xff] %v13819_v46  ;;  %v13849_v2 = vadd.f32 %v6431_v32, %v6369_v54  ;;  %v11711_v37 = vld [vmem:[%s17637_s1 + $0x1158] ss:$144 sps:$4 sm:$0xff]   ;;  %v11716_v39 = vld [vmem:[%s17637_s1 + $0x1034] ss:$144 sps:$4 sm:$0xff]   ;;  %s9399_s14 = sshll.u32 %s12186_s13, 4  ;;  %s9400_s14 = int_to_ptr.vmem [resolvable:$true] %s9399_s14 }
 0x1d5   :  { %17677 = vst [vmem:[#allocation7_spill] sm:$0xff] %v13834_v62  ;;  %v11719_v3 = vld [vmem:[%s17637_s1 + $0x103c] ss:$144 sps:$4 sm:$0xff]   ;;  %v11714_v4 = vld [vmem:[%s17637_s1 + $0x1030] ss:$144 sps:$4 sm:$0xff]   ;;  %p12167_p1 = scmp.lt.s32.totalorder %s9400_s14, %s9400_s14 }
 0x1d6   :  { %17678 = vst [vmem:[#allocation8_spill] sm:$0xff] %v13849_v2  ;;  %v11717_v6 = vld [vmem:[%s17637_s1 + $0x1038] ss:$144 sps:$4 sm:$0xff]   ;;  %v11722_v7 = vld [vmem:[%s17637_s1 + $0xf14] ss:$144 sps:$4 sm:$0xff]  }
 0x1d7   :  { %4112 = vmatpush1.bf16.msra.mxu0 %v11690_v38  ;;  %4153 = vmatpush1.bf16.msra.mxu1 %v11693_v40  ;;  %v11725_v8 = vld [vmem:[%s17637_s1 + $0xf1c] ss:$144 sps:$4 sm:$0xff]   ;;  %v11720_v11 = vld [vmem:[%s17637_s1 + $0xf10] ss:$144 sps:$4 sm:$0xff]   ;;  %v11723_v12 = vld [vmem:[%s17637_s1 + $0xf18] ss:$144 sps:$4 sm:$0xff]  }
 0x1d8   :  { %4113 = vmatprep.subr.bf16.mxu0 %v11698_v44  ;;  %4154 = vmatprep.subr.bf16.mxu1 %v11701_v45  ;;  %v11728_v13 = vld [vmem:[%s17637_s1 + $0xdf4] ss:$144 sps:$4 sm:$0xff]   ;;  %v11731_v14 = vld [vmem:[%s17637_s1 + $0xdfc] ss:$144 sps:$4 sm:$0xff]   ;;  %v11726_v15 = vld [vmem:[%s17637_s1 + $0xdf0] ss:$144 sps:$4 sm:$0xff]  }
 0x1d9   :  { %v11729_v20 = vld [vmem:[%s17637_s1 + $0xdf8] ss:$144 sps:$4 sm:$0xff]   ;;  %v11734_v59 = vld [vmem:[%s17637_s1 + $0xcd4] ss:$144 sps:$4 sm:$0xff]   ;;  %v11737_v25 = vld [vmem:[%s17637_s1 + $0xcdc] ss:$144 sps:$4 sm:$0xff]  }
 0x1da   :  { %v11732_v26 = vld [vmem:[%s17637_s1 + $0xcd0] ss:$144 sps:$4 sm:$0xff]   ;;  %v11735_v28 = vld [vmem:[%s17637_s1 + $0xcd8] ss:$144 sps:$4 sm:$0xff]   ;;  %v11740_v29 = vld [vmem:[%s17637_s1 + $0xbb4] ss:$144 sps:$4 sm:$0xff]  }
 0x1db   :  { %4114 = vmatpush1.bf16.msra.mxu0 %v11696_v27  ;;  %4155 = vmatpush1.bf16.msra.mxu1 %v11699_v51  ;;  %v11743_v30 = vld [vmem:[%s17637_s1 + $0xbbc] ss:$144 sps:$4 sm:$0xff]   ;;  %v11738_v34 = vld [vmem:[%s17637_s1 + $0xbb0] ss:$144 sps:$4 sm:$0xff]   ;;  %v11741_v35 = vld [vmem:[%s17637_s1 + $0xbb8] ss:$144 sps:$4 sm:$0xff]  }
 0x1dc   :  { %4115 = vmatprep.subr.bf16.mxu0 %v11704_v60  ;;  %4156 = vmatprep.subr.bf16.mxu1 %v11707_v61  ;;  %v11746_v38 = vld [vmem:[%s17637_s1 + $0xa94] ss:$144 sps:$4 sm:$0xff]   ;;  %v11749_v40 = vld [vmem:[%s17637_s1 + $0xa9c] ss:$144 sps:$4 sm:$0xff]   ;;  %v11744_v42 = vld [vmem:[%s17637_s1 + $0xa90] ss:$144 sps:$4 sm:$0xff]  }
 0x1dd   :  { %v11747_v0 = vld [vmem:[%s17637_s1 + $0xa98] ss:$144 sps:$4 sm:$0xff]   ;;  %v11752_v43 = vld [vmem:[%s17637_s1 + $0x974] ss:$144 sps:$4 sm:$0xff]   ;;  %v11755_v44 = vld [vmem:[%s17637_s1 + $0x97c] ss:$144 sps:$4 sm:$0xff]  }
 0x1de   :  { %v11750_v45 = vld [vmem:[%s17637_s1 + $0x970] ss:$144 sps:$4 sm:$0xff]   ;;  %v11753_v48 = vld [vmem:[%s17637_s1 + $0x978] ss:$144 sps:$4 sm:$0xff]   ;;  %v11758_v27 = vld [vmem:[%s17637_s1 + $0x864] ss:$144 sps:$4 sm:$0xff]  }
 0x1df   :  { %4116 = vmatpush1.bf16.msra.mxu0 %v11702_v24  ;;  %4157 = vmatpush1.bf16.msra.mxu1 %v11705_v18  ;;  %v11761_v51 = vld [vmem:[%s17637_s1 + $0x86c] ss:$144 sps:$4 sm:$0xff]   ;;  %v11756_v53 = vld [vmem:[%s17637_s1 + $0x860] ss:$144 sps:$4 sm:$0xff]   ;;  %v11759_v54 = vld [vmem:[%s17637_s1 + $0x868] ss:$144 sps:$4 sm:$0xff]  }
 0x1e0   :  { %4117 = vmatprep.subr.bf16.mxu0 %v11710_v63  ;;  %4158 = vmatprep.subr.bf16.mxu1 %v11713_v1  ;;  %v11764_v60 = vld [vmem:[%s17637_s1 + $0x744] ss:$144 sps:$4 sm:$0xff]   ;;  %v11767_v61 = vld [vmem:[%s17637_s1 + $0x74c] ss:$144 sps:$4 sm:$0xff]   ;;  %v11762_v18 = vld [vmem:[%s17637_s1 + $0x740] ss:$144 sps:$4 sm:$0xff]  }
 0x1e1   :  { %v11765_v63 = vld [vmem:[%s17637_s1 + $0x748] ss:$144 sps:$4 sm:$0xff]  }
 0x1e3   :  { %4118 = vmatpush2.bf16.msra.mxu0 %v11708_v31  ;;  %4159 = vmatpush2.bf16.msra.mxu1 %v11711_v37  ;;  %v11770_v37 = vld [vmem:[%s17637_s1 + $0x624] ss:$144 sps:$4 sm:$0xff]  }
 0x1e4   :  { %4119 = vmatprep.subr.bf16.mxu0 %v11716_v39  ;;  %4160 = vmatprep.subr.bf16.mxu1 %v11719_v3  ;;  %v11773_v39 = vld [vmem:[%s17637_s1 + $0x62c] ss:$144 sps:$4 sm:$0xff]  }
 0x1e7   :  { %4120 = vmatpush2.bf16.msra.mxu0 %v11714_v4  ;;  %4161 = vmatpush2.bf16.msra.mxu1 %v11717_v6  ;;  %v11768_v6 = vld [vmem:[%s17637_s1 + $0x620] ss:$144 sps:$4 sm:$0xff]  }
 0x1e8   :  { %4121 = vmatprep.subr.bf16.mxu0 %v11722_v7  ;;  %4162 = vmatprep.subr.bf16.mxu1 %v11725_v8  ;;  %v11771_v7 = vld [vmem:[%s17637_s1 + $0x628] ss:$144 sps:$4 sm:$0xff]  }
 0x1eb   :  { %4122 = vmatpush2.bf16.msra.mxu0 %v11720_v11  ;;  %4163 = vmatpush2.bf16.msra.mxu1 %v11723_v12  ;;  %v11776_v11 = vld [vmem:[%s17637_s1 + $0x504] ss:$144 sps:$4 sm:$0xff]  }
 0x1ec   :  { %4123 = vmatprep.subr.bf16.mxu0 %v11728_v13  ;;  %4164 = vmatprep.subr.bf16.mxu1 %v11731_v14  ;;  %v11774_v13 = vld [vmem:[%s17637_s1 + $0x500] ss:$144 sps:$4 sm:$0xff]   ;;  %v11777_v14 = vld [vmem:[%s17637_s1 + $0x508] ss:$144 sps:$4 sm:$0xff]  }
 0x1ef   :  { %4124 = vmatpush2.bf16.msra.mxu0 %v11726_v15  ;;  %4165 = vmatpush2.bf16.msra.mxu1 %v11729_v20  ;;  %v11782_v15 = vld [vmem:[%s17637_s1 + $0x3e4] ss:$144 sps:$4 sm:$0xff]   ;;  %v11785_v20 = vld [vmem:[%s17637_s1 + $0x3ec] ss:$144 sps:$4 sm:$0xff]  }
 0x1f0   :  { %4125 = vmatprep.subr.bf16.mxu0 %v11734_v59  ;;  %4166 = vmatprep.subr.bf16.mxu1 %v11737_v25  ;;  %v11780_v59 = vld [vmem:[%s17637_s1 + $0x3e0] ss:$144 sps:$4 sm:$0xff]   ;;  %v11783_v25 = vld [vmem:[%s17637_s1 + $0x3e8] ss:$144 sps:$4 sm:$0xff]  }
 0x1f3   :  { %4126 = vmatpush2.bf16.msra.mxu0 %v11732_v26  ;;  %4167 = vmatpush2.bf16.msra.mxu1 %v11735_v28  ;;  %v11788_v26 = vld [vmem:[%s17637_s1 + $0x2c4] ss:$144 sps:$4 sm:$0xff]   ;;  %v11791_v28 = vld [vmem:[%s17637_s1 + $0x2cc] ss:$144 sps:$4 sm:$0xff]  }
 0x1f4   :  { %4127 = vmatprep.subr.bf16.mxu0 %v11740_v29  ;;  %4168 = vmatprep.subr.bf16.mxu1 %v11743_v30  ;;  %v11786_v29 = vld [vmem:[%s17637_s1 + $0x2c0] ss:$144 sps:$4 sm:$0xff]   ;;  %v11789_v30 = vld [vmem:[%s17637_s1 + $0x2c8] ss:$144 sps:$4 sm:$0xff]  }
 0x1f7   :  { %4128 = vmatpush2.bf16.msra.mxu0 %v11738_v34  ;;  %4169 = vmatpush2.bf16.msra.mxu1 %v11741_v35  ;;  %v11794_v34 = vld [vmem:[%s17637_s1 + $0x1a4] ss:$144 sps:$4 sm:$0xff]   ;;  %v11797_v35 = vld [vmem:[%s17637_s1 + $0x1ac] ss:$144 sps:$4 sm:$0xff]  }
 0x1f8   :  { %4129 = vmatprep.subr.bf16.mxu0 %v11746_v38  ;;  %4170 = vmatprep.subr.bf16.mxu1 %v11749_v40  ;;  %v11792_v38 = vld [vmem:[%s17637_s1 + $0x1a0] ss:$144 sps:$4 sm:$0xff]   ;;  %v11795_v40 = vld [vmem:[%s17637_s1 + $0x1a8] ss:$144 sps:$4 sm:$0xff]  }
 0x1fb   :  { %4130 = vmatpush2.bf16.msra.mxu0 %v11744_v42  ;;  %4171 = vmatpush2.bf16.msra.mxu1 %v11747_v0  ;;  %v11800_v42 = vld [vmem:[%s17637_s1 + $0x84] ss:$144 sps:$4 sm:$0xff]   ;;  %v11803_v0 = vld [vmem:[%s17637_s1 + $0x8c] ss:$144 sps:$4 sm:$0xff]  }
 0x1fc   :  { %4131 = vmatprep.subr.bf16.mxu0 %v11752_v43  ;;  %4172 = vmatprep.subr.bf16.mxu1 %v11755_v44  ;;  %v11798_v43 = vld [vmem:[%s17637_s1 + $0x80] ss:$144 sps:$4 sm:$0xff]   ;;  %v11801_v44 = vld [vmem:[%s17637_s1 + $0x88] ss:$144 sps:$4 sm:$0xff]  }
 0x1ff   :  { %4132 = vmatpush2.bf16.msra.mxu0 %v11750_v45  ;;  %4173 = vmatpush2.bf16.msra.mxu1 %v11753_v48  ;;  %v11806_v45 = vld [vmem:[%s17637_s1 + $0x1164] ss:$144 sps:$4 sm:$0xff]   ;;  %v11809_v48 = vld [vmem:[%s17637_s1 + $0x116c] ss:$144 sps:$4 sm:$0xff]  }
 0x200   :  { %4183 = vmatprep.subr.bf16.mxu0 %v11758_v27  ;;  %4224 = vmatprep.subr.bf16.mxu1 %v11761_v51  ;;  %v11804_v27 = vld [vmem:[%s17637_s1 + $0x1160] ss:$144 sps:$4 sm:$0xff]   ;;  %v11807_v51 = vld [vmem:[%s17637_s1 + $0x1168] ss:$144 sps:$4 sm:$0xff]  }
 0x202   :  { %v13959_v32 = vpop.f32.mrf.mxu0  ;;  %v13961_v24 = vpop.f32.mrf.mxu1  ;;  %4134 = vmatmul.mubr.bf16.vlgmr.msra.gmra.mxu0 %v12457_v5  ;;  %4175 = vmatmul.mubr.bf16.vlgmr.msra.gmra.mxu1 %v12457_v5 }
 0x203   :  { %17679 = vst [vmem:[#allocation9_spill] sm:$0xff] %v13961_v24  ;;  %4184 = vmatpush1.bf16.msra.mxu0 %v11756_v53  ;;  %4225 = vmatpush1.bf16.msra.mxu1 %v11759_v54  ;;  %v11812_v53 = vld [vmem:[%s17637_s1 + $0x1044] ss:$144 sps:$4 sm:$0xff]   ;;  %v11815_v54 = vld [vmem:[%s17637_s1 + $0x104c] ss:$144 sps:$4 sm:$0xff]  }
 0x204   :  { %v13971_v1 = vpop.f32.mrf.mxu0  ;;  %v13973_v31 = vpop.f32.mrf.mxu1  ;;  %4185 = vmatprep.subr.bf16.mxu0 %v11764_v60  ;;  %4226 = vmatprep.subr.bf16.mxu1 %v11767_v61  ;;  %v11810_v60 = vld [vmem:[%s17637_s1 + $0x1040] ss:$144 sps:$4 sm:$0xff]   ;;  %v11813_v61 = vld [vmem:[%s17637_s1 + $0x1048] ss:$144 sps:$4 sm:$0xff]  }
 0x205   :  { %4215 = vmatprep.mubr.bf16.mxu0 %v12405_v52  ;;  %4256 = vmatprep.mubr.bf16.mxu1 %v12405_v52  ;;  %v11779_v52 = vld [vmem:[%s17637_s1 + $0x50c] ss:$144 sps:$4 sm:$0xff]  }
 0x206   :  { %v3893_v3 = vpop.f32.mrf.mxu0  ;;  %v3934_v4 = vpop.f32.mrf.mxu1 }
 0x207   :  { %4186 = vmatpush1.bf16.msra.mxu0 %v11762_v18  ;;  %4227 = vmatpush1.bf16.msra.mxu1 %v11765_v63  ;;  %v11818_v18 = vld [vmem:[%s17637_s1 + $0xf24] ss:$144 sps:$4 sm:$0xff]   ;;  %v11821_v63 = vld [vmem:[%s17637_s1 + $0xf2c] ss:$144 sps:$4 sm:$0xff]  }
 0x208   :  { %v3894_v8 = vpop.f32.mrf.mxu0  ;;  %4187 = vmatprep.subr.bf16.mxu0 %v11770_v37  ;;  %4228 = vmatprep.subr.bf16.mxu1 %v11773_v39  ;;  %v3935_v12 = vpop.f32.mrf.mxu1  ;;  %v11816_v37 = vld [vmem:[%s17637_s1 + $0xf20] ss:$144 sps:$4 sm:$0xff]   ;;  %v11819_v39 = vld [vmem:[%s17637_s1 + $0xf28] ss:$144 sps:$4 sm:$0xff]   ;;  %v11824_v3 = vld [vmem:[%s17637_s1 + $0xe04] ss:$144 sps:$4 sm:$0xff]  }
 0x209   :  { %v11827_v4 = vld [vmem:[%s17637_s1 + $0xe0c] ss:$144 sps:$4 sm:$0xff]   ;;  %v11830_v8 = vld [vmem:[%s17637_s1 + $0xce4] ss:$144 sps:$4 sm:$0xff]   ;;  %v11831_v12 = vld [vmem:[%s17637_s1 + $0xce8] ss:$144 sps:$4 sm:$0xff]  }
 0x20b   :  { %4188 = vmatpush1.bf16.msra.mxu0 %v11768_v6  ;;  %4229 = vmatpush1.bf16.msra.mxu1 %v11771_v7  ;;  %v11822_v6 = vld [vmem:[%s17637_s1 + $0xe00] ss:$144 sps:$4 sm:$0xff]   ;;  %v11825_v7 = vld [vmem:[%s17637_s1 + $0xe08] ss:$144 sps:$4 sm:$0xff]  }
 0x20c   :  { %4189 = vmatprep.subr.bf16.mxu0 %v11776_v11  ;;  %4230 = vmatprep.subr.bf16.mxu1 %v11779_v52  ;;  %v11833_v11 = vld [vmem:[%s17637_s1 + $0xcec] ss:$144 sps:$4 sm:$0xff]   ;;  %v11828_v52 = vld [vmem:[%s17637_s1 + $0xce0] ss:$144 sps:$4 sm:$0xff]  }
 0x20f   :  { %4190 = vmatpush1.bf16.msra.mxu0 %v11774_v13  ;;  %4231 = vmatpush1.bf16.msra.mxu1 %v11777_v14  ;;  %v11836_v13 = vld [vmem:[%s17637_s1 + $0xbc4] ss:$144 sps:$4 sm:$0xff]   ;;  %v11839_v14 = vld [vmem:[%s17637_s1 + $0xbcc] ss:$144 sps:$4 sm:$0xff]  }
 0x210   :  { %4191 = vmatprep.subr.bf16.mxu0 %v11782_v15  ;;  %4232 = vmatprep.subr.bf16.mxu1 %v11785_v20  ;;  %v11834_v15 = vld [vmem:[%s17637_s1 + $0xbc0] ss:$144 sps:$4 sm:$0xff]   ;;  %v11837_v20 = vld [vmem:[%s17637_s1 + $0xbc8] ss:$144 sps:$4 sm:$0xff]  }
 0x213   :  { %4192 = vmatpush1.bf16.msra.mxu0 %v11780_v59  ;;  %4233 = vmatpush1.bf16.msra.mxu1 %v11783_v25  ;;  %v11842_v59 = vld [vmem:[%s17637_s1 + $0xaa4] ss:$144 sps:$4 sm:$0xff]   ;;  %v11845_v25 = vld [vmem:[%s17637_s1 + $0xaac] ss:$144 sps:$4 sm:$0xff]  }
 0x214   :  { %4193 = vmatprep.subr.bf16.mxu0 %v11788_v26  ;;  %4234 = vmatprep.subr.bf16.mxu1 %v11791_v28  ;;  %v11840_v26 = vld [vmem:[%s17637_s1 + $0xaa0] ss:$144 sps:$4 sm:$0xff]   ;;  %v11843_v28 = vld [vmem:[%s17637_s1 + $0xaa8] ss:$144 sps:$4 sm:$0xff]  }
 0x217   :  { %4194 = vmatpush1.bf16.msra.mxu0 %v11786_v29  ;;  %4235 = vmatpush1.bf16.msra.mxu1 %v11789_v30  ;;  %v11848_v29 = vld [vmem:[%s17637_s1 + $0x984] ss:$144 sps:$4 sm:$0xff]   ;;  %v11851_v30 = vld [vmem:[%s17637_s1 + $0x98c] ss:$144 sps:$4 sm:$0xff]  }
 0x218   :  { %4195 = vmatprep.subr.bf16.mxu0 %v11794_v34  ;;  %4236 = vmatprep.subr.bf16.mxu1 %v11797_v35  ;;  %v14142_v34 = vld.sshfl [vmem:[%s17636_s0 + $0x4] sm:$0x33 pattern:$0x76325410]  ;;  %v11846_v35 = vld [vmem:[%s17637_s1 + $0x980] ss:$144 sps:$4 sm:$0xff]  }
 0x219   :  { %s12162_s0 = scalar_lea.vmem %s9400_s14, 32 }
 0x21a   :  { %p12163_p0 = scmp.ne.s32.totalorder %s9400_s14, %s12162_s0  ;;  %p12168_p2 = scmp.lt.s32.totalorder %s12162_s0, %s12162_s0 }
 0x21b   :  { %4196 = vmatpush1.bf16.msra.mxu0 %v11792_v38  ;;  %4237 = vmatpush1.bf16.msra.mxu1 %v11795_v40  ;;  %v11849_v38 = vld [vmem:[%s17637_s1 + $0x988] ss:$144 sps:$4 sm:$0xff]   ;;  %v11854_v40 = vld [vmem:[%s17638_s2 + $0x1fc] ss:$36 sps:$4 sm:$0xff]  }
 0x21c   :  { %4197 = vmatprep.subr.bf16.mxu0 %v11800_v42  ;;  %4238 = vmatprep.subr.bf16.mxu1 %v11803_v0  ;;  %v11857_v42 = vld [vmem:[%s17638_s2 + $0x204] ss:$36 sps:$4 sm:$0xff]   ;;  %v66_v0 = vcombine.high %v14142_v34, %v14142_v34  ;;  %p12169_p3 = por %p12168_p2, %p12167_p1 }
 0x21e   :  { %p12170_p4 = pnand %p12169_p3, %p12163_p0 }
 0x21f   :  { %4198 = vmatpush1.bf16.msra.mxu0 %v11798_v43  ;;  %4239 = vmatpush1.bf16.msra.mxu1 %v11801_v44  ;;  %v11852_v43 = vld [vmem:[%s17638_s2 + $0x1f8] ss:$36 sps:$4 sm:$0xff]   ;;  %v11855_v44 = vld [vmem:[%s17638_s2 + $0x200] ss:$36 sps:$4 sm:$0xff]  }
 0x220   :  { %4199 = vmatprep.subr.bf16.mxu0 %v11806_v45  ;;  %4240 = vmatprep.subr.bf16.mxu1 %v11809_v48  ;;  %v11860_v45 = vld [vmem:[%s17638_s2 + $0x1b4] ss:$36 sps:$4 sm:$0xff]   ;;  %v11863_v48 = vld [vmem:[%s17638_s2 + $0x1bc] ss:$36 sps:$4 sm:$0xff]  }
 0x223   :  { %4200 = vmatpush2.bf16.msra.mxu0 %v11804_v27  ;;  %4241 = vmatpush2.bf16.msra.mxu1 %v11807_v51  ;;  %v14170_v27 = vpack.c.bf16 %v66_v0, %v66_v0  ;;  %v11894_v0 = vld [vmem:[%s17638_s2] ss:$36 sps:$4 sm:$0xff]  }
 0x224   :  { %4201 = vmatprep.subr.bf16.mxu0 %v11812_v53  ;;  %4242 = vmatprep.subr.bf16.mxu1 %v11815_v54  ;;  %v11858_v54 = vld [vmem:[%s17638_s2 + $0x1b0] ss:$36 sps:$4 sm:$0xff]  }
 0x227   :  { %4202 = vmatpush2.bf16.msra.mxu0 %v11810_v60  ;;  %4243 = vmatpush2.bf16.msra.mxu1 %v11813_v61  ;;  %v11861_v60 = vld [vmem:[%s17638_s2 + $0x1b8] ss:$36 sps:$4 sm:$0xff]  }
 0x228   :  { %4203 = vmatprep.subr.bf16.mxu0 %v11818_v18  ;;  %4244 = vmatprep.subr.bf16.mxu1 %v11821_v63  ;;  %v11869_v63 = vld [vmem:[%s17638_s2 + $0x174] ss:$36 sps:$4 sm:$0xff]  }
 0x22b   :  { %4204 = vmatpush2.bf16.msra.mxu0 %v11816_v37  ;;  %4245 = vmatpush2.bf16.msra.mxu1 %v11819_v39 }
 0x22c   :  { %4205 = vmatprep.subr.bf16.mxu0 %v11824_v3  ;;  %4246 = vmatprep.subr.bf16.mxu1 %v11827_v4  ;;  %v11864_v3 = vld [vmem:[%s17638_s2 + $0x168] ss:$36 sps:$4 sm:$0xff]   ;;  %v11867_v4 = vld [vmem:[%s17638_s2 + $0x170] ss:$36 sps:$4 sm:$0xff]  }
 0x22f   :  { %4206 = vmatpush2.bf16.msra.mxu0 %v11822_v6  ;;  %4247 = vmatpush2.bf16.msra.mxu1 %v11825_v7  ;;  %v11872_v7 = vld [vmem:[%s17638_s2 + $0x124] ss:$36 sps:$4 sm:$0xff]  }
 0x230   :  { %4207 = vmatprep.subr.bf16.mxu0 %v11830_v8  ;;  %4248 = vmatprep.subr.bf16.mxu1 %v11833_v11  ;;  %v11875_v8 = vld [vmem:[%s17638_s2 + $0x12c] ss:$36 sps:$4 sm:$0xff]  }
 0x233   :  { %4208 = vmatpush2.bf16.msra.mxu0 %v11828_v52  ;;  %4249 = vmatpush2.bf16.msra.mxu1 %v11831_v12  ;;  %v11870_v52 = vld [vmem:[%s17638_s2 + $0x120] ss:$36 sps:$4 sm:$0xff]   ;;  %v11873_v12 = vld [vmem:[%s17638_s2 + $0x128] ss:$36 sps:$4 sm:$0xff]  }
 0x234   :  { %4209 = vmatprep.subr.bf16.mxu0 %v11836_v13  ;;  %4250 = vmatprep.subr.bf16.mxu1 %v11839_v14  ;;  %v11878_v13 = vld [vmem:[%s17638_s2 + $0xdc] ss:$36 sps:$4 sm:$0xff]   ;;  %v11881_v14 = vld [vmem:[%s17638_s2 + $0xe4] ss:$36 sps:$4 sm:$0xff]  }
 0x237   :  { %4210 = vmatpush2.bf16.msra.mxu0 %v11834_v15  ;;  %4251 = vmatpush2.bf16.msra.mxu1 %v11837_v20  ;;  %v11876_v15 = vld [vmem:[%s17638_s2 + $0xd8] ss:$36 sps:$4 sm:$0xff]   ;;  %v11879_v20 = vld [vmem:[%s17638_s2 + $0xe0] ss:$36 sps:$4 sm:$0xff]  }
 0x238   :  { %4211 = vmatprep.subr.bf16.mxu0 %v11842_v59  ;;  %4252 = vmatprep.subr.bf16.mxu1 %v11845_v25  ;;  %v11884_v59 = vld [vmem:[%s17638_s2 + $0x94] ss:$36 sps:$4 sm:$0xff]   ;;  %v11887_v25 = vld [vmem:[%s17638_s2 + $0x9c] ss:$36 sps:$4 sm:$0xff]  }
 0x23b   :  { %4212 = vmatpush2.bf16.msra.mxu0 %v11840_v26  ;;  %4253 = vmatpush2.bf16.msra.mxu1 %v11843_v28  ;;  %v11882_v26 = vld [vmem:[%s17638_s2 + $0x90] ss:$36 sps:$4 sm:$0xff]   ;;  %v11885_v28 = vld [vmem:[%s17638_s2 + $0x98] ss:$36 sps:$4 sm:$0xff]  }
 0x23c   :  { %4213 = vmatprep.subr.bf16.mxu0 %v11848_v29  ;;  %4254 = vmatprep.subr.bf16.mxu1 %v11851_v30  ;;  %v11890_v29 = vld [vmem:[%s17638_s2 + $0x4c] ss:$36 sps:$4 sm:$0xff]   ;;  %v11893_v30 = vld [vmem:[%s17638_s2 + $0x54] ss:$36 sps:$4 sm:$0xff]  }
 0x23f   :  { %4214 = vmatpush2.bf16.msra.mxu0 %v11846_v35  ;;  %4255 = vmatpush2.bf16.msra.mxu1 %v11849_v38  ;;  %v11888_v35 = vld [vmem:[%s17638_s2 + $0x48] ss:$36 sps:$4 sm:$0xff]   ;;  %v11891_v38 = vld [vmem:[%s17638_s2 + $0x50] ss:$36 sps:$4 sm:$0xff]  }
 0x240   :  { %5197 = vmatprep.subr.bf16.mxu0 %v11854_v40  ;;  %5238 = vmatprep.subr.bf16.mxu1 %v11857_v42  ;;  %v11896_v40 = vld [vmem:[%s17638_s2 + $0x4] ss:$36 sps:$4 sm:$0xff]   ;;  %v11899_v42 = vld [vmem:[%s17638_s2 + $0xc] ss:$36 sps:$4 sm:$0xff]  }
 0x242   :  { %v14172_v51 = vpop.f32.mrf.mxu0  ;;  %v14174_v53 = vpop.f32.mrf.mxu1  ;;  %4216 = vmatmul.mubr.bf16.vlgmr.msra.gmra.mxu0 %v12457_v5  ;;  %4257 = vmatmul.mubr.bf16.vlgmr.msra.gmra.mxu1 %v12457_v5  ;;  %v11866_v5 = vld [vmem:[%s17638_s2 + $0x16c] ss:$36 sps:$4 sm:$0xff]  }
 0x243   :  { %17680 = vst [vmem:[#allocation10_spill] sm:$0xff] %v14172_v51  ;;  %17681 = vst [vmem:[#allocation11_spill] sm:$0xff] %v14174_v53  ;;  %5198 = vmatpush1.bf16.msra.mxu0 %v11852_v43  ;;  %5239 = vmatpush1.bf16.msra.mxu1 %v11855_v44  ;;  %v11897_v43 = vld [vmem:[%s17638_s2 + $0x8] ss:$36 sps:$4 sm:$0xff]   ;;  %v11902_v44 = vld [vmem:[%s17638_s2 + $0x43c] ss:$36 sps:$4 sm:$0xff]  }
 0x244   :  { %v14184_v61 = vpop.f32.mrf.mxu0  ;;  %v14186_v18 = vpop.f32.mrf.mxu1  ;;  %5199 = vmatprep.subr.bf16.mxu0 %v11860_v45  ;;  %5240 = vmatprep.subr.bf16.mxu1 %v11863_v48  ;;  %v11905_v45 = vld [vmem:[%s17638_s2 + $0x444] ss:$36 sps:$4 sm:$0xff]   ;;  %v11900_v48 = vld [vmem:[%s17638_s2 + $0x438] ss:$36 sps:$4 sm:$0xff]  }
 0x245   :  { %17682 = vst [vmem:[#allocation12_spill] sm:$0xff] %v14186_v18  ;;  %5229 = vmatprep.mubr.bf16.mxu0 %v14170_v27  ;;  %5270 = vmatprep.mubr.bf16.mxu1 %v14170_v27  ;;  %v12184_v18 = vmov 0.0  }
 0x246   :  { %v3975_v37 = vpop.f32.mrf.mxu0  ;;  %v4016_v39 = vpop.f32.mrf.mxu1 }
 0x247   :  { %5200 = vmatpush1.bf16.msra.mxu0 %v11858_v54  ;;  %5241 = vmatpush1.bf16.msra.mxu1 %v11861_v60  ;;  %v11903_v54 = vld [vmem:[%s17638_s2 + $0x440] ss:$36 sps:$4 sm:$0xff]   ;;  %v11908_v60 = vld [vmem:[%s17638_s2 + $0x3f4] ss:$36 sps:$4 sm:$0xff]   ;;  %v11914_v39 = vld [vmem:[%s17638_s2 + $0x3ac] ss:$36 sps:$4 sm:$0xff]  }
 0x248   :  { %v3976_v6 = vpop.f32.mrf.mxu0  ;;  %5201 = vmatprep.subr.bf16.mxu0 %v11866_v5  ;;  %5242 = vmatprep.subr.bf16.mxu1 %v11869_v63  ;;  %v4017_v11 = vpop.f32.mrf.mxu1  ;;  %v11911_v5 = vld [vmem:[%s17638_s2 + $0x3fc] ss:$36 sps:$4 sm:$0xff]   ;;  %v11906_v63 = vld [vmem:[%s17638_s2 + $0x3f0] ss:$36 sps:$4 sm:$0xff]  }
 0x249   :  { %v11909_v37 = vld [vmem:[%s17638_s2 + $0x3f8] ss:$36 sps:$4 sm:$0xff]   ;;  %v11915_v6 = vld [vmem:[%s17638_s2 + $0x3b0] ss:$36 sps:$4 sm:$0xff]   ;;  %v11918_v11 = vld [vmem:[%s17638_s2 + $0x360] ss:$36 sps:$4 sm:$0xff]  }
 0x24b   :  { %5202 = vmatpush1.bf16.msra.mxu0 %v11864_v3  ;;  %5243 = vmatpush1.bf16.msra.mxu1 %v11867_v4  ;;  %v11917_v3 = vld [vmem:[%s17638_s2 + $0x3b4] ss:$36 sps:$4 sm:$0xff]   ;;  %v11912_v4 = vld [vmem:[%s17638_s2 + $0x3a8] ss:$36 sps:$4 sm:$0xff]  }
 0x24c   :  { %5203 = vmatprep.subr.bf16.mxu0 %v11872_v7  ;;  %5244 = vmatprep.subr.bf16.mxu1 %v11875_v8  ;;  %v11920_v7 = vld [vmem:[%s17638_s2 + $0x364] ss:$36 sps:$4 sm:$0xff]   ;;  %v11923_v8 = vld [vmem:[%s17638_s2 + $0x36c] ss:$36 sps:$4 sm:$0xff]  }
 0x24f   :  { %5204 = vmatpush1.bf16.msra.mxu0 %v11870_v52  ;;  %5245 = vmatpush1.bf16.msra.mxu1 %v11873_v12  ;;  %v11921_v52 = vld [vmem:[%s17638_s2 + $0x368] ss:$36 sps:$4 sm:$0xff]   ;;  %v11926_v12 = vld [vmem:[%s17638_s2 + $0x31c] ss:$36 sps:$4 sm:$0xff]  }
 0x250   :  { %5205 = vmatprep.subr.bf16.mxu0 %v11878_v13  ;;  %5246 = vmatprep.subr.bf16.mxu1 %v11881_v14  ;;  %v11929_v13 = vld [vmem:[%s17638_s2 + $0x324] ss:$36 sps:$4 sm:$0xff]   ;;  %v11924_v14 = vld [vmem:[%s17638_s2 + $0x318] ss:$36 sps:$4 sm:$0xff]  }
 0x253   :  { %5206 = vmatpush1.bf16.msra.mxu0 %v11876_v15  ;;  %5247 = vmatpush1.bf16.msra.mxu1 %v11879_v20  ;;  %v11927_v15 = vld [vmem:[%s17638_s2 + $0x320] ss:$36 sps:$4 sm:$0xff]   ;;  %v11932_v20 = vld [vmem:[%s17638_s2 + $0x2d4] ss:$36 sps:$4 sm:$0xff]  }
 0x254   :  { %5207 = vmatprep.subr.bf16.mxu0 %v11884_v59  ;;  %5248 = vmatprep.subr.bf16.mxu1 %v11887_v25  ;;  %v11935_v59 = vld [vmem:[%s17638_s2 + $0x2dc] ss:$36 sps:$4 sm:$0xff]   ;;  %v11930_v25 = vld [vmem:[%s17638_s2 + $0x2d0] ss:$36 sps:$4 sm:$0xff]  }
 0x257   :  { %5208 = vmatpush1.bf16.msra.mxu0 %v11882_v26  ;;  %5249 = vmatpush1.bf16.msra.mxu1 %v11885_v28  ;;  %v11933_v26 = vld [vmem:[%s17638_s2 + $0x2d8] ss:$36 sps:$4 sm:$0xff]   ;;  %v11938_v28 = vld [vmem:[%s17638_s2 + $0x28c] ss:$36 sps:$4 sm:$0xff]  }
 0x258   :  { %5209 = vmatprep.subr.bf16.mxu0 %v11890_v29  ;;  %5250 = vmatprep.subr.bf16.mxu1 %v11893_v30  ;;  %v11941_v29 = vld [vmem:[%s17638_s2 + $0x294] ss:$36 sps:$4 sm:$0xff]   ;;  %v11936_v30 = vld [vmem:[%s17638_s2 + $0x288] ss:$36 sps:$4 sm:$0xff]  }
 0x25b   :  { %5210 = vmatpush1.bf16.msra.mxu0 %v11888_v35  ;;  %5251 = vmatpush1.bf16.msra.mxu1 %v11891_v38  ;;  %v11939_v35 = vld [vmem:[%s17638_s2 + $0x290] ss:$36 sps:$4 sm:$0xff]   ;;  %v11944_v38 = vld [vmem:[%s17638_s2 + $0x244] ss:$36 sps:$4 sm:$0xff]  }
 0x25c   :  { %5211 = vmatprep.subr.bf16.mxu0 %v11896_v40  ;;  %5252 = vmatprep.subr.bf16.mxu1 %v11899_v42  ;;  %v11947_v40 = vld [vmem:[%s17638_s2 + $0x24c] ss:$36 sps:$4 sm:$0xff]   ;;  %v11942_v42 = vld [vmem:[%s17638_s2 + $0x240] ss:$36 sps:$4 sm:$0xff]  }
 0x25f   :  { %5212 = vmatpush1.bf16.msra.mxu0 %v11894_v0  ;;  %5253 = vmatpush1.bf16.msra.mxu1 %v11897_v43  ;;  %v11945_v0 = vld [vmem:[%s17638_s2 + $0x248] ss:$36 sps:$4 sm:$0xff]  }
 0x260   :  { %5213 = vmatprep.subr.bf16.mxu0 %v11902_v44  ;;  %5254 = vmatprep.subr.bf16.mxu1 %v11905_v45  ;;  %v11950_v43 = vld [vmem:[%s17638_s2 + $0x20c] ss:$36 sps:$4 sm:$0xff]   ;;  %v11953_v44 = vld [vmem:[%s17638_s2 + $0x214] ss:$36 sps:$4 sm:$0xff]   ;;  %v14366_v45 = vpack.c.bf16 %v14142_v34, %v14142_v34 }
 0x261   :  { %v11959_v34 = vld [vmem:[%s17638_s2 + $0x1cc] ss:$36 sps:$4 sm:$0xff]  }
 0x263   :  { %5214 = vmatpush2.bf16.msra.mxu0 %v11900_v48  ;;  %5255 = vmatpush2.bf16.msra.mxu1 %v11903_v54  ;;  %v11948_v48 = vld [vmem:[%s17638_s2 + $0x208] ss:$36 sps:$4 sm:$0xff]   ;;  %v11951_v54 = vld [vmem:[%s17638_s2 + $0x210] ss:$36 sps:$4 sm:$0xff]  }
 0x264   :  { %5215 = vmatprep.subr.bf16.mxu0 %v11908_v60  ;;  %5256 = vmatprep.subr.bf16.mxu1 %v11911_v5  ;;  %v11956_v60 = vld [vmem:[%s17638_s2 + $0x1c4] ss:$36 sps:$4 sm:$0xff]  }
 0x267   :  { %5216 = vmatpush2.bf16.msra.mxu0 %v11906_v63  ;;  %5257 = vmatpush2.bf16.msra.mxu1 %v11909_v37  ;;  %v11954_v37 = vld [vmem:[%s17638_s2 + $0x1c0] ss:$36 sps:$4 sm:$0xff]  }
 0x268   :  { %5217 = vmatprep.subr.bf16.mxu0 %v11914_v39  ;;  %5258 = vmatprep.subr.bf16.mxu1 %v11917_v3  ;;  %v11957_v39 = vld [vmem:[%s17638_s2 + $0x1c8] ss:$36 sps:$4 sm:$0xff]  }
 0x26b   :  { %5218 = vmatpush2.bf16.msra.mxu0 %v11912_v4  ;;  %5259 = vmatpush2.bf16.msra.mxu1 %v11915_v6  ;;  %v11962_v6 = vld [vmem:[%s17638_s2 + $0x17c] ss:$36 sps:$4 sm:$0xff]  }
 0x26c   :  { %5219 = vmatprep.subr.bf16.mxu0 %v11920_v7  ;;  %5260 = vmatprep.subr.bf16.mxu1 %v11923_v8  ;;  %v11965_v7 = vld [vmem:[%s17638_s2 + $0x184] ss:$36 sps:$4 sm:$0xff]  }
 0x26f   :  { %5220 = vmatpush2.bf16.msra.mxu0 %v11918_v11  ;;  %5261 = vmatpush2.bf16.msra.mxu1 %v11921_v52  ;;  %v11960_v52 = vld [vmem:[%s17638_s2 + $0x178] ss:$36 sps:$4 sm:$0xff]  }
 0x270   :  { %5221 = vmatprep.subr.bf16.mxu0 %v11926_v12  ;;  %5262 = vmatprep.subr.bf16.mxu1 %v11929_v13  ;;  %v11963_v12 = vld [vmem:[%s17638_s2 + $0x180] ss:$36 sps:$4 sm:$0xff]  }
 0x273   :  { %5222 = vmatpush2.bf16.msra.mxu0 %v11924_v14  ;;  %5263 = vmatpush2.bf16.msra.mxu1 %v11927_v15  ;;  %v11968_v14 = vld [vmem:[%s17638_s2 + $0x134] ss:$36 sps:$4 sm:$0xff]   ;;  %v11971_v15 = vld [vmem:[%s17638_s2 + $0x13c] ss:$36 sps:$4 sm:$0xff]  }
 0x274   :  { %5223 = vmatprep.subr.bf16.mxu0 %v11932_v20  ;;  %5264 = vmatprep.subr.bf16.mxu1 %v11935_v59  ;;  %v11966_v59 = vld [vmem:[%s17638_s2 + $0x130] ss:$36 sps:$4 sm:$0xff]  }
 0x277   :  { %5224 = vmatpush2.bf16.msra.mxu0 %v11930_v25  ;;  %5265 = vmatpush2.bf16.msra.mxu1 %v11933_v26  ;;  %v11969_v25 = vld [vmem:[%s17638_s2 + $0x138] ss:$36 sps:$4 sm:$0xff]   ;;  %v11974_v26 = vld [vmem:[%s17638_s2 + $0xec] ss:$36 sps:$4 sm:$0xff]  }
 0x278   :  { %5225 = vmatprep.subr.bf16.mxu0 %v11938_v28  ;;  %5266 = vmatprep.subr.bf16.mxu1 %v11941_v29  ;;  %v11977_v28 = vld [vmem:[%s17638_s2 + $0xf4] ss:$36 sps:$4 sm:$0xff]   ;;  %v11972_v29 = vld [vmem:[%s17638_s2 + $0xe8] ss:$36 sps:$4 sm:$0xff]  }
 0x27b   :  { %5226 = vmatpush2.bf16.msra.mxu0 %v11936_v30  ;;  %5267 = vmatpush2.bf16.msra.mxu1 %v11939_v35  ;;  %v11975_v30 = vld [vmem:[%s17638_s2 + $0xf0] ss:$36 sps:$4 sm:$0xff]   ;;  %v11980_v35 = vld [vmem:[%s17638_s2 + $0xa4] ss:$36 sps:$4 sm:$0xff]  }
 0x27c   :  { %5227 = vmatprep.subr.bf16.mxu0 %v11944_v38  ;;  %5268 = vmatprep.subr.bf16.mxu1 %v11947_v40  ;;  %v11983_v38 = vld [vmem:[%s17638_s2 + $0xac] ss:$36 sps:$4 sm:$0xff]   ;;  %v11978_v40 = vld [vmem:[%s17638_s2 + $0xa0] ss:$36 sps:$4 sm:$0xff]  }
 0x27f   :  { %5228 = vmatpush2.bf16.msra.mxu0 %v11942_v42  ;;  %5269 = vmatpush2.bf16.msra.mxu1 %v11945_v0  ;;  %v11981_v42 = vld [vmem:[%s17638_s2 + $0xa8] ss:$36 sps:$4 sm:$0xff]   ;;  %v11986_v0 = vld [vmem:[%s17638_s2 + $0x5c] ss:$36 sps:$4 sm:$0xff]  }
 0x280   :  { %5279 = vmatprep.subr.bf16.mxu0 %v11950_v43  ;;  %5320 = vmatprep.subr.bf16.mxu1 %v11953_v44  ;;  %v11989_v43 = vld [vmem:[%s17638_s2 + $0x64] ss:$36 sps:$4 sm:$0xff]   ;;  %v11984_v44 = vld [vmem:[%s17638_s2 + $0x58] ss:$36 sps:$4 sm:$0xff]  }
 0x282   :  { %v14380_v5 = vpop.f32.mrf.mxu0  ;;  %v14382_v63 = vpop.f32.mrf.mxu1  ;;  %5230 = vmatmul.mubr.bf16.vlgmr.msra.gmra.mxu0 %v14366_v45  ;;  %5271 = vmatmul.mubr.bf16.vlgmr.msra.gmra.mxu1 %v14366_v45 }
 0x283   :  { %17683 = vst [vmem:[#allocation13_spill] sm:$0xff] %v14380_v5  ;;  %17684 = vst [vmem:[#allocation14_spill] sm:$0xff] %v14382_v63  ;;  %5280 = vmatpush1.bf16.msra.mxu0 %v11948_v48  ;;  %5321 = vmatpush1.bf16.msra.mxu1 %v11951_v54  ;;  %v11987_v48 = vld [vmem:[%s17638_s2 + $0x60] ss:$36 sps:$4 sm:$0xff]   ;;  %v11992_v54 = vld [vmem:[%s17638_s2 + $0x14] ss:$36 sps:$4 sm:$0xff]  }
 0x284   :  { %v14392_v3 = vpop.f32.mrf.mxu0  ;;  %v14394_v4 = vpop.f32.mrf.mxu1  ;;  %5281 = vmatprep.subr.bf16.mxu0 %v11956_v60  ;;  %5322 = vmatprep.subr.bf16.mxu1 %v11959_v34  ;;  %v11995_v60 = vld [vmem:[%s17638_s2 + $0x1c] ss:$36 sps:$4 sm:$0xff]   ;;  %v11990_v34 = vld [vmem:[%s17638_s2 + $0x10] ss:$36 sps:$4 sm:$0xff]  }
 0x285   :  { %17685 = vst [vmem:[#allocation15_spill] sm:$0xff] %v14392_v3  ;;  %17686 = vst [vmem:[#allocation16_spill] sm:$0xff] %v14394_v4  ;;  %5311 = vmatprep.mubr.bf16.mxu0 %v14170_v27  ;;  %5352 = vmatprep.mubr.bf16.mxu1 %v14170_v27 }
 0x286   :  { %v4057_v8 = vpop.f32.mrf.mxu0  ;;  %v4098_v11 = vpop.f32.mrf.mxu1 }
 0x287   :  { %5282 = vmatpush1.bf16.msra.mxu0 %v11954_v37  ;;  %5323 = vmatpush1.bf16.msra.mxu1 %v11957_v39  ;;  %v11993_v37 = vld [vmem:[%s17638_s2 + $0x18] ss:$36 sps:$4 sm:$0xff]   ;;  %v11998_v39 = vld [vmem:[%s17638_s2 + $0x44c] ss:$36 sps:$4 sm:$0xff]   ;;  %v12004_v11 = vld [vmem:[%s17638_s2 + $0x404] ss:$36 sps:$4 sm:$0xff]  }
 0x288   :  { %v4058_v13 = vpop.f32.mrf.mxu0  ;;  %5283 = vmatprep.subr.bf16.mxu0 %v11962_v6  ;;  %5324 = vmatprep.subr.bf16.mxu1 %v11965_v7  ;;  %v4099_v20 = vpop.f32.mrf.mxu1  ;;  %v12001_v6 = vld [vmem:[%s17638_s2 + $0x454] ss:$36 sps:$4 sm:$0xff]   ;;  %v11996_v7 = vld [vmem:[%s17638_s2 + $0x448] ss:$36 sps:$4 sm:$0xff]  }
 0x289   :  { %v11999_v8 = vld [vmem:[%s17638_s2 + $0x450] ss:$36 sps:$4 sm:$0xff]   ;;  %v12005_v13 = vld [vmem:[%s17638_s2 + $0x408] ss:$36 sps:$4 sm:$0xff]   ;;  %v12008_v20 = vld [vmem:[%s17638_s2 + $0x3b8] ss:$36 sps:$4 sm:$0xff]  }
 0x28b   :  { %5284 = vmatpush1.bf16.msra.mxu0 %v11960_v52  ;;  %5325 = vmatpush1.bf16.msra.mxu1 %v11963_v12  ;;  %v12007_v52 = vld [vmem:[%s17638_s2 + $0x40c] ss:$36 sps:$4 sm:$0xff]   ;;  %v12002_v12 = vld [vmem:[%s17638_s2 + $0x400] ss:$36 sps:$4 sm:$0xff]  }
 0x28c   :  { %5285 = vmatprep.subr.bf16.mxu0 %v11968_v14  ;;  %5326 = vmatprep.subr.bf16.mxu1 %v11971_v15  ;;  %v12010_v14 = vld [vmem:[%s17638_s2 + $0x3bc] ss:$36 sps:$4 sm:$0xff]   ;;  %v12013_v15 = vld [vmem:[%s17638_s2 + $0x3c4] ss:$36 sps:$4 sm:$0xff]  }
 0x28f   :  { %5286 = vmatpush1.bf16.msra.mxu0 %v11966_v59  ;;  %5327 = vmatpush1.bf16.msra.mxu1 %v11969_v25  ;;  %v12011_v59 = vld [vmem:[%s17638_s2 + $0x3c0] ss:$36 sps:$4 sm:$0xff]   ;;  %v12016_v25 = vld [vmem:[%s17638_s2 + $0x374] ss:$36 sps:$4 sm:$0xff]  }
 0x290   :  { %5287 = vmatprep.subr.bf16.mxu0 %v11974_v26  ;;  %5328 = vmatprep.subr.bf16.mxu1 %v11977_v28  ;;  %v12019_v26 = vld [vmem:[%s17638_s2 + $0x37c] ss:$36 sps:$4 sm:$0xff]   ;;  %v12014_v28 = vld [vmem:[%s17638_s2 + $0x370] ss:$36 sps:$4 sm:$0xff]  }
 0x293   :  { %5288 = vmatpush1.bf16.msra.mxu0 %v11972_v29  ;;  %5329 = vmatpush1.bf16.msra.mxu1 %v11975_v30  ;;  %v12017_v29 = vld [vmem:[%s17638_s2 + $0x378] ss:$36 sps:$4 sm:$0xff]   ;;  %v12022_v30 = vld [vmem:[%s17638_s2 + $0x32c] ss:$36 sps:$4 sm:$0xff]  }
 0x294   :  { %5289 = vmatprep.subr.bf16.mxu0 %v11980_v35  ;;  %5330 = vmatprep.subr.bf16.mxu1 %v11983_v38  ;;  %v12025_v35 = vld [vmem:[%s17638_s2 + $0x334] ss:$36 sps:$4 sm:$0xff]   ;;  %v12020_v38 = vld [vmem:[%s17638_s2 + $0x328] ss:$36 sps:$4 sm:$0xff]  }
 0x297   :  { %5290 = vmatpush1.bf16.msra.mxu0 %v11978_v40  ;;  %5331 = vmatpush1.bf16.msra.mxu1 %v11981_v42  ;;  %v12023_v40 = vld [vmem:[%s17638_s2 + $0x330] ss:$36 sps:$4 sm:$0xff]   ;;  %v12028_v42 = vld [vmem:[%s17638_s2 + $0x2e4] ss:$36 sps:$4 sm:$0xff]  }
 0x298   :  { %5291 = vmatprep.subr.bf16.mxu0 %v11986_v0  ;;  %5332 = vmatprep.subr.bf16.mxu1 %v11989_v43  ;;  %v12031_v0 = vld [vmem:[%s17638_s2 + $0x2ec] ss:$36 sps:$4 sm:$0xff]   ;;  %v12026_v43 = vld [vmem:[%s17638_s2 + $0x2e0] ss:$36 sps:$4 sm:$0xff]  }
 0x29b   :  { %5292 = vmatpush1.bf16.msra.mxu0 %v11984_v44  ;;  %5333 = vmatpush1.bf16.msra.mxu1 %v11987_v48  ;;  %v12029_v44 = vld [vmem:[%s17638_s2 + $0x2e8] ss:$36 sps:$4 sm:$0xff]   ;;  %v12034_v48 = vld [vmem:[%s17638_s2 + $0x29c] ss:$36 sps:$4 sm:$0xff]  }
 0x29c   :  { %5293 = vmatprep.subr.bf16.mxu0 %v11992_v54  ;;  %5334 = vmatprep.subr.bf16.mxu1 %v11995_v60  ;;  %v12037_v54 = vld [vmem:[%s17638_s2 + $0x2a4] ss:$36 sps:$4 sm:$0xff]   ;;  %v12032_v60 = vld [vmem:[%s17638_s2 + $0x298] ss:$36 sps:$4 sm:$0xff]  }
 0x29f   :  { %5294 = vmatpush1.bf16.msra.mxu0 %v11990_v34  ;;  %5335 = vmatpush1.bf16.msra.mxu1 %v11993_v37  ;;  %v12035_v34 = vld [vmem:[%s17638_s2 + $0x2a0] ss:$36 sps:$4 sm:$0xff]   ;;  %v12040_v37 = vld [vmem:[%s17638_s2 + $0x254] ss:$36 sps:$4 sm:$0xff]  }
 0x2a0   :  { %5295 = vmatprep.subr.bf16.mxu0 %v11998_v39  ;;  %5336 = vmatprep.subr.bf16.mxu1 %v12001_v6  ;;  %v12043_v39 = vld [vmem:[%s17638_s2 + $0x25c] ss:$36 sps:$4 sm:$0xff]   ;;  %v12038_v6 = vld [vmem:[%s17638_s2 + $0x250] ss:$36 sps:$4 sm:$0xff]  }
 0x2a3   :  { %5296 = vmatpush2.bf16.msra.mxu0 %v11996_v7  ;;  %5337 = vmatpush2.bf16.msra.mxu1 %v11999_v8  ;;  %v12041_v7 = vld [vmem:[%s17638_s2 + $0x258] ss:$36 sps:$4 sm:$0xff]  }
 0x2a4   :  { %5297 = vmatprep.subr.bf16.mxu0 %v12004_v11  ;;  %5338 = vmatprep.subr.bf16.mxu1 %v12007_v52  ;;  %v12044_v8 = vld [vmem:[%s17638_s2 + $0x458] ss:$36 sps:$4 sm:$0xff]   ;;  %v12046_v52 = vld [vmem:[%s17638_s2 + $0x410] ss:$36 sps:$4 sm:$0xff]  }
 0x2a5   :  { %v12045_v11 = vld [vmem:[%s17638_s2 + $0x218] ss:$36 sps:$4 sm:$0xff]  }
 0x2a7   :  { %5298 = vmatpush2.bf16.msra.mxu0 %v12002_v12  ;;  %5339 = vmatpush2.bf16.msra.mxu1 %v12005_v13 }
 0x2a8   :  { %5299 = vmatprep.subr.bf16.mxu0 %v12010_v14  ;;  %5340 = vmatprep.subr.bf16.mxu1 %v12013_v15  ;;  %v12047_v14 = vld [vmem:[%s17638_s2 + $0x1d0] ss:$36 sps:$4 sm:$0xff]  }
 0x2ab   :  { %5300 = vmatpush2.bf16.msra.mxu0 %v12008_v20  ;;  %5341 = vmatpush2.bf16.msra.mxu1 %v12011_v59  ;;  %v12048_v59 = vld [vmem:[%s17638_s2 + $0x3c8] ss:$36 sps:$4 sm:$0xff]  }
 0x2ac   :  { %5301 = vmatprep.subr.bf16.mxu0 %v12016_v25  ;;  %5342 = vmatprep.subr.bf16.mxu1 %v12019_v26 }
 0x2af   :  { %5302 = vmatpush2.bf16.msra.mxu0 %v12014_v28  ;;  %5343 = vmatpush2.bf16.msra.mxu1 %v12017_v29  ;;  %v12049_v28 = vld [vmem:[%s17638_s2 + $0x188] ss:$36 sps:$4 sm:$0xff]  }
 0x2b0   :  { %5303 = vmatprep.subr.bf16.mxu0 %v12022_v30  ;;  %5344 = vmatprep.subr.bf16.mxu1 %v12025_v35  ;;  %v12051_v35 = vld [vmem:[%s17638_s2 + $0x140] ss:$36 sps:$4 sm:$0xff]  }
 0x2b3   :  { %5304 = vmatpush2.bf16.msra.mxu0 %v12020_v38  ;;  %5345 = vmatpush2.bf16.msra.mxu1 %v12023_v40  ;;  %v12052_v38 = vld [vmem:[%s17638_s2 + $0x338] ss:$36 sps:$4 sm:$0xff]  }
 0x2b4   :  { %5305 = vmatprep.subr.bf16.mxu0 %v12028_v42  ;;  %5346 = vmatprep.subr.bf16.mxu1 %v12031_v0  ;;  %v12053_v40 = vld [vmem:[%s17638_s2 + $0xf8] ss:$36 sps:$4 sm:$0xff]   ;;  %v12054_v42 = vld [vmem:[%s17638_s2 + $0x2f0] ss:$36 sps:$4 sm:$0xff]  }
 0x2b5   :  { %v12055_v0 = vld [vmem:[%s17638_s2 + $0xb0] ss:$36 sps:$4 sm:$0xff]  }
 0x2b7   :  { %5306 = vmatpush2.bf16.msra.mxu0 %v12026_v43  ;;  %5347 = vmatpush2.bf16.msra.mxu1 %v12029_v44  ;;  %v12056_v43 = vld [vmem:[%s17638_s2 + $0x2a8] ss:$36 sps:$4 sm:$0xff]  }
 0x2b8   :  { %5307 = vmatprep.subr.bf16.mxu0 %v12034_v48  ;;  %5348 = vmatprep.subr.bf16.mxu1 %v12037_v54  ;;  %v12057_v44 = vld [vmem:[%s17638_s2 + $0x68] ss:$36 sps:$4 sm:$0xff]   ;;  %v12058_v48 = vld [vmem:[%s17638_s2 + $0x260] ss:$36 sps:$4 sm:$0xff]  }
 0x2b9   :  { %v12059_v54 = vld [vmem:[%s17638_s2 + $0x20] ss:$36 sps:$4 sm:$0xff]  }
 0x2bb   :  { %5308 = vmatpush2.bf16.msra.mxu0 %v12032_v60  ;;  %5349 = vmatpush2.bf16.msra.mxu1 %v12035_v34  ;;  %v7577_v60 = vld [vmem:[%s17644_s8 + $0xf8] sm:$0xff] }
 0x2bc   :  { %5309 = vmatprep.subr.bf16.mxu0 %v12040_v37  ;;  %5350 = vmatprep.subr.bf16.mxu1 %v12043_v39  ;;  %v7609_v34 = vld [vmem:[%s17644_s8 + $0x1f8] sm:$0xff] }
 0x2bd   :  { %v7561_v37 = vld [vmem:[%s17644_s8 + $0x78] sm:$0xff] }
 0x2be   :  { %v7593_v39 = vld [vmem:[%s17644_s8 + $0x178] sm:$0xff] }
 0x2bf   :  { %5310 = vmatpush2.bf16.msra.mxu0 %v12038_v6  ;;  %5351 = vmatpush2.bf16.msra.mxu1 %v12041_v7  ;;  %v7608_v6 = vld [vmem:[%s17644_s8 + $0x1f0] sm:$0xff] }
 0x2c0   :  { %10134 = vmatprep.subr.bf16.mxu0 %v12044_v8  ;;  %10156 = vmatprep.subr.mxu1 %v7577_v60  ;;  %v7560_v7 = vld [vmem:[%s17644_s8 + $0x70] sm:$0xff]  ;;  %v7587_v60 = vld [vmem:[%s17644_s8 + $0x148] sm:$0xff] }
 0x2c1   :  { %v7592_v8 = vld [vmem:[%s17644_s8 + $0x170] sm:$0xff] }
 0x2c2   :  { %v14575_v12 = vpop.f32.mrf.mxu0  ;;  %v14577_v13 = vpop.f32.mrf.mxu1  ;;  %5312 = vmatmul.mubr.bf16.vlgmr.msra.gmra.mxu0 %v14366_v45  ;;  %5353 = vmatmul.mubr.bf16.vlgmr.msra.gmra.mxu1 %v14366_v45 }
 0x2c3   :  { %17687 = vst [vmem:[#allocation17_spill] sm:$0xff] %v14575_v12  ;;  %17688 = vst [vmem:[#allocation18_spill] sm:$0xff] %v14577_v13  ;;  %10135 = vmatpush3.bf16.msra.mxu0 %v12045_v11  ;;  %5393 = vmatprep.mubr.bf16.mxu0 %v14170_v27  ;;  %v12050_v27 = vld [vmem:[%s17638_s2 + $0x380] ss:$36 sps:$4 sm:$0xff]   ;;  %v7575_v11 = vld [vmem:[%s17644_s8 + $0xe8] sm:$0xff] }
 0x2c4   :  { %v14585_v15 = vpop.f32.mrf.mxu0  ;;  %v14587_v20 = vpop.f32.mrf.mxu1  ;;  %10136 = vmatprep.subr.bf16.mxu0 %v12046_v52  ;;  %10157 = vmatpush3.msra.mxu1 %v7561_v37  ;;  %v7607_v52 = vld [vmem:[%s17644_s8 + $0x1e8] sm:$0xff]  ;;  %v7602_v37 = vld [vmem:[%s17644_s8 + $0x1c0] sm:$0xff] }
 0x2c5   :  { %17689 = vst [vmem:[#allocation19_spill] sm:$0xff] %v14585_v15  ;;  %17690 = vst [vmem:[#allocation20_spill] sm:$0xff] %v14587_v20 }
 0x2c6   :  { %v4139_v25 = vpop.f32.mrf.mxu0  ;;  %v4180_v26 = vpop.f32.mrf.mxu1 }
 0x2c7   :  { %10137 = vmatpush3.bf16.msra.mxu0 %v12047_v14  ;;  %v7559_v14 = vld [vmem:[%s17644_s8 + $0x68] sm:$0xff]  ;;  %v7574_v25 = vld [vmem:[%s17644_s8 + $0xe0] sm:$0xff] }
 0x2c8   :  { %v4140_v29 = vpop.f32.mrf.mxu0  ;;  %10138 = vmatprep.subr.bf16.mxu0 %v12048_v59  ;;  %v4181_v30 = vpop.f32.mrf.mxu1  ;;  %v7591_v59 = vld [vmem:[%s17644_s8 + $0x168] sm:$0xff]  ;;  %v7606_v26 = vld [vmem:[%s17644_s8 + $0x1e0] sm:$0xff] }
 0x2c9   :  { %v7590_v29 = vld [vmem:[%s17644_s8 + $0x160] sm:$0xff]  ;;  %v7605_v30 = vld [vmem:[%s17644_s8 + $0x1d8] sm:$0xff] }
 0x2cb   :  { %10139 = vmatpush3.bf16.msra.mxu0 %v12049_v28  ;;  %v7558_v28 = vld [vmem:[%s17644_s8 + $0x60] sm:$0xff] }
 0x2cc   :  { %10140 = vmatprep.subr.bf16.mxu0 %v12050_v27  ;;  %v7573_v27 = vld [vmem:[%s17644_s8 + $0xd8] sm:$0xff] }
 0x2cf   :  { %10141 = vmatpush3.bf16.msra.mxu0 %v12051_v35  ;;  %v7557_v35 = vld [vmem:[%s17644_s8 + $0x58] sm:$0xff] }
 0x2d0   :  { %10142 = vmatprep.subr.bf16.mxu0 %v12052_v38  ;;  %v7589_v38 = vld [vmem:[%s17644_s8 + $0x158] sm:$0xff] }
 0x2d3   :  { %10143 = vmatpush3.bf16.msra.mxu0 %v12053_v40  ;;  %v7572_v40 = vld [vmem:[%s17644_s8 + $0xd0] sm:$0xff] }
 0x2d4   :  { %10144 = vmatprep.subr.bf16.mxu0 %v12054_v42  ;;  %v7604_v42 = vld [vmem:[%s17644_s8 + $0x1d0] sm:$0xff] }
 0x2d7   :  { %10145 = vmatpush3.bf16.msra.mxu0 %v12055_v0  ;;  %v7556_v0 = vld [vmem:[%s17644_s8 + $0x50] sm:$0xff] }
 0x2d8   :  { %10146 = vmatprep.subr.bf16.mxu0 %v12056_v43  ;;  %v7588_v43 = vld [vmem:[%s17644_s8 + $0x150] sm:$0xff] }
 0x2db   :  { %10147 = vmatpush3.bf16.msra.mxu0 %v12057_v44  ;;  %v7571_v44 = vld [vmem:[%s17644_s8 + $0xc8] sm:$0xff] }
 0x2dc   :  { %10148 = vmatprep.subr.bf16.mxu0 %v12058_v48  ;;  %v7603_v48 = vld [vmem:[%s17644_s8 + $0x1c8] sm:$0xff] }
 0x2df   :  { %10149 = vmatpush3.bf16.msra.mxu0 %v12059_v54  ;;  %v7555_v54 = vld [vmem:[%s17644_s8 + $0x48] sm:$0xff] }
 0x2e0   :  { %10191 = vmatprep.subr.mxu0 %v7609_v34  ;;  %v7570_v34 = vld [vmem:[%s17644_s8 + $0xc0] sm:$0xff] }
 0x2e2   :  { %5394 = vmatmul.mubr.bf16.vlgmr.msra.gmra.mxu0 %v14366_v45  ;;  %v7576_v45 = vld [vmem:[%s17644_s8 + $0xf0] sm:$0xff] }
 0x2e3   :  { %10192 = vmatpush3.msra.mxu0 %v7593_v39  ;;  %10158 = vmatprep.subr.mxu1 %v7576_v45  ;;  %v7554_v39 = vld [vmem:[%s17644_s8 + $0x40] sm:$0xff] }
 0x2e4   :  { %10193 = vmatprep.subr.mxu0 %v7608_v6  ;;  %10159 = vmatpush3.msra.mxu1 %v7560_v7  ;;  %v7586_v45 = vld [vmem:[%s17644_s8 + $0x140] sm:$0xff]  ;;  %v7569_v6 = vld [vmem:[%s17644_s8 + $0xb8] sm:$0xff] }
 0x2e5   :  { %10194 = vmatpush3.msra.mxu0 %v7592_v8  ;;  %10160 = vmatprep.subr.mxu1 %v7575_v11  ;;  %v7601_v7 = vld [vmem:[%s17644_s8 + $0x1b8] sm:$0xff] }
 0x2e6   :  { %10195 = vmatprep.subr.mxu0 %v7607_v52  ;;  %10161 = vmatpush3.msra.mxu1 %v7559_v14  ;;  %v7553_v8 = vld [vmem:[%s17644_s8 + $0x38] sm:$0xff]  ;;  %v7568_v52 = vld [vmem:[%s17644_s8 + $0xb0] sm:$0xff] }
 0x2e7   :  { %10196 = vmatpush3.msra.mxu0 %v7591_v59  ;;  %10162 = vmatprep.subr.mxu1 %v7574_v25  ;;  %v7585_v11 = vld [vmem:[%s17644_s8 + $0x138] sm:$0xff]  ;;  %v7600_v14 = vld [vmem:[%s17644_s8 + $0x1b0] sm:$0xff] }
 0x2e8   :  { %10197 = vmatprep.subr.mxu0 %v7606_v26  ;;  %10163 = vmatpush3.msra.mxu1 %v7558_v28  ;;  %v7552_v59 = vld [vmem:[%s17644_s8 + $0x30] sm:$0xff]  ;;  %v7567_v26 = vld [vmem:[%s17644_s8 + $0xa8] sm:$0xff] }
 0x2e9   :  { %10198 = vmatpush3.msra.mxu0 %v7590_v29  ;;  %10164 = vmatprep.subr.mxu1 %v7573_v27  ;;  %v7584_v25 = vld [vmem:[%s17644_s8 + $0x130] sm:$0xff]  ;;  %v7599_v28 = vld [vmem:[%s17644_s8 + $0x1a8] sm:$0xff] }
 0x2ea   :  { %10199 = vmatprep.subr.mxu0 %v7605_v30  ;;  %10165 = vmatpush3.msra.mxu1 %v7557_v35  ;;  %v7551_v29 = vld [vmem:[%s17644_s8 + $0x28] sm:$0xff]  ;;  %v7566_v30 = vld [vmem:[%s17644_s8 + $0xa0] sm:$0xff] }
 0x2eb   :  { %10200 = vmatpush3.msra.mxu0 %v7589_v38  ;;  %10166 = vmatprep.subr.mxu1 %v7572_v40  ;;  %v7583_v27 = vld [vmem:[%s17644_s8 + $0x128] sm:$0xff]  ;;  %v7598_v35 = vld [vmem:[%s17644_s8 + $0x1a0] sm:$0xff] }
 0x2ec   :  { %10201 = vmatprep.subr.mxu0 %v7604_v42  ;;  %10167 = vmatpush3.msra.mxu1 %v7556_v0  ;;  %v7550_v38 = vld [vmem:[%s17644_s8 + $0x20] sm:$0xff]  ;;  %v7565_v42 = vld [vmem:[%s17644_s8 + $0x98] sm:$0xff] }
 0x2ed   :  { %10202 = vmatpush3.msra.mxu0 %v7588_v43  ;;  %10168 = vmatprep.subr.mxu1 %v7571_v44  ;;  %v7582_v40 = vld [vmem:[%s17644_s8 + $0x120] sm:$0xff]  ;;  %v7597_v0 = vld [vmem:[%s17644_s8 + $0x198] sm:$0xff] }
 0x2ee   :  { %10203 = vmatprep.subr.mxu0 %v7603_v48  ;;  %10169 = vmatpush3.msra.mxu1 %v7555_v54  ;;  %v7549_v43 = vld [vmem:[%s17644_s8 + $0x18] sm:$0xff]  ;;  %v7564_v48 = vld [vmem:[%s17644_s8 + $0x90] sm:$0xff] }
 0x2ef   :  { %10204 = vmatpush3.msra.mxu0 %v7587_v60  ;;  %10170 = vmatprep.subr.mxu1 %v7570_v34  ;;  %v7581_v44 = vld [vmem:[%s17644_s8 + $0x118] sm:$0xff]  ;;  %v7596_v54 = vld [vmem:[%s17644_s8 + $0x190] sm:$0xff] }
 0x2f0   :  { %10205 = vmatprep.subr.mxu0 %v7602_v37  ;;  %10171 = vmatpush3.msra.mxu1 %v7554_v39  ;;  %v7548_v60 = vld [vmem:[%s17644_s8 + $0x10] sm:$0xff]  ;;  %v7563_v37 = vld [vmem:[%s17644_s8 + $0x88] sm:$0xff] }
 0x2f1   :  { %10206 = vmatpush3.msra.mxu0 %v7586_v45  ;;  %10172 = vmatprep.subr.mxu1 %v7569_v6  ;;  %v7580_v34 = vld [vmem:[%s17644_s8 + $0x110] sm:$0xff]  ;;  %v7595_v39 = vld [vmem:[%s17644_s8 + $0x188] sm:$0xff] }
 0x2f2   :  { %10207 = vmatprep.subr.mxu0 %v7601_v7  ;;  %10173 = vmatpush3.msra.mxu1 %v7553_v8  ;;  %v7547_v45 = vld [vmem:[%s17644_s8 + $0x8] sm:$0xff]  ;;  %v7562_v7 = vld [vmem:[%s17644_s8 + $0x80] sm:$0xff] }
 0x2f3   :  { %10208 = vmatpush3.msra.mxu0 %v7585_v11  ;;  %10174 = vmatprep.subr.mxu1 %v7568_v52  ;;  %v7579_v6 = vld [vmem:[%s17644_s8 + $0x108] sm:$0xff]  ;;  %v7594_v8 = vld [vmem:[%s17644_s8 + $0x180] sm:$0xff] }
 0x2f4   :  { %10209 = vmatprep.subr.mxu0 %v7600_v14  ;;  %10175 = vmatpush3.msra.mxu1 %v7552_v59  ;;  %v7546_v11 = vld [vmem:[%s17644_s8] sm:$0xff] }
 0x2f5   :  { %10210 = vmatpush3.msra.mxu0 %v7584_v25  ;;  %10176 = vmatprep.subr.mxu1 %v7567_v26  ;;  %v7578_v52 = vld [vmem:[%s17644_s8 + $0x100] sm:$0xff] }
 0x2f6   :  { %10211 = vmatprep.subr.mxu0 %v7599_v28  ;;  %10177 = vmatpush3.msra.mxu1 %v7551_v29 }
 0x2f7   :  { %10212 = vmatpush3.msra.mxu0 %v7583_v27  ;;  %10178 = vmatprep.subr.mxu1 %v7566_v30 }
 0x2f8   :  { %10213 = vmatprep.subr.mxu0 %v7598_v35  ;;  %10179 = vmatpush3.msra.mxu1 %v7550_v38 }
 0x2f9   :  { %10214 = vmatpush3.msra.mxu0 %v7582_v40  ;;  %10180 = vmatprep.subr.mxu1 %v7565_v42 }
 0x2fa   :  { %10215 = vmatprep.subr.mxu0 %v7597_v0  ;;  %10181 = vmatpush3.msra.mxu1 %v7549_v43 }
 0x2fb   :  { %10216 = vmatpush3.msra.mxu0 %v7581_v44  ;;  %10182 = vmatprep.subr.mxu1 %v7564_v48 }
 0x2fc   :  { %10217 = vmatprep.subr.mxu0 %v7596_v54  ;;  %10183 = vmatpush3.msra.mxu1 %v7548_v60 }
 0x2fd   :  { %10218 = vmatpush3.msra.mxu0 %v7580_v34  ;;  %10184 = vmatprep.subr.mxu1 %v7563_v37 }
 0x2fe   :  { %10219 = vmatprep.subr.mxu0 %v7595_v39  ;;  %10185 = vmatpush3.msra.mxu1 %v7547_v45 }
 0x2ff   :  { %10220 = vmatpush3.msra.mxu0 %v7579_v6  ;;  %10186 = vmatprep.subr.mxu1 %v7562_v7 }
 0x300   :  { %10221 = vmatprep.subr.mxu0 %v7594_v8  ;;  %10187 = vmatpush3.msra.mxu1 %v7546_v11  ;;  %v7673_v11 = vld [vmem:[%s17644_s8 + $0x3f8] sm:$0xff] }
 0x301   :  { %10222 = vmatpush3.msra.mxu0 %v7578_v52  ;;  %v7641_v52 = vld [vmem:[%s17644_s8 + $0x2f8] sm:$0xff] }
 0x302   :  { %v14818_v14 = vpop.f32.mrf.mxu0  ;;  %v4258_v59 = vpop.f32.mrf.mxu1  ;;  %10261 = vmatprep.subr.mxu0 %v7673_v11  ;;  %10226 = vmatprep.subr.mxu1 %v7641_v52 }
 0x303   :  { %17691 = vst [vmem:[#allocation21_spill] sm:$0xff] %v14818_v14  ;;  %v4299_v25 = vmax.f32 %v4258_v59, 0.0 }
 0x304   :  { %v14820_v26 = vpop.f32.mrf.mxu0  ;;  %v14822_v28 = vpop.f32.mrf.mxu1 }
 0x305   :  { %17692 = vst [vmem:[#allocation22_spill] sm:$0xff] %v14820_v26  ;;  %17693 = vst [vmem:[#allocation23_spill] sm:$0xff] %v14822_v28  ;;  %v5659_v29 = vsel %vm5420_vm0, %v4299_v25, 0.0 }
 0x306   :  { %v5660_v27 = vrot.slane %v5659_v29, 4  ;;  %v4221_v30 = vpop.f32.mrf.mxu0  ;;  %v4262_v35 = vpop.f32.mrf.mxu1 }
 0x308   :  { %v5661_v38 = vadd.f32 %v5660_v27, %v5659_v29  ;;  %v4222_v40 = vpop.f32.mrf.mxu0  ;;  %v4263_v42 = vpop.f32.mrf.mxu1  ;;  %v5414_v27 = vld [vmem:[%s17639_s3 + $0x20] sm:$0xf] }
 0x309   :  { %v6322_v30 = vrot.slane %v5414_v27, %v13757_v33 }
 0x30a   :  { %v5662_v0 = vrot.slane %v5661_v38, 2 }
 0x30c   :  { %v5663_v43 = vadd.f32 %v5662_v0, %v5661_v38 }
 0x30e   :  { %v5664_v44 = vrot.slane %v5663_v43, 1 }
 0x310   :  { %v5665_v48 = vadd.f32 %v5664_v44, %v5663_v43 }
 0x312   :  { %v5708_v54 = vmul.f32 0.5, %v5665_v48 }
 0x314   :  { %v5744_v60 = vsub.f32 %v4299_v25, %v5708_v54 }
 0x316   :  { %v5780_v34 = vmul.f32 %v5744_v60, %v5744_v60 }
 0x318   :  { %v6020_v37 = vsel %vm5420_vm0, %v5780_v34, 0.0 }
 0x319   :  { %v6021_v39 = vrot.slane %v6020_v37, 4 }
 0x31b   :  { %v6022_v45 = vadd.f32 %v6021_v39, %v6020_v37 }
 0x31d   :  { %v6023_v6 = vrot.slane %v6022_v45, 2 }
 0x31f   :  { %v6024_v7 = vadd.f32 %v6023_v6, %v6022_v45 }
 0x321   :  { %v6025_v8 = vrot.slane %v6024_v7, 1 }
 0x323   :  { %v6026_v59 = vadd.f32 %v6025_v8, %v6024_v7 }
 0x325   :  { %v6068_v25 = vmul.f32 0.5, %v6026_v59 }
 0x327   :  { %v6104_v29 = vadd.f32 1e-05, %v6068_v25 }
 0x329   :  { %12068 = vrsqrt.f32 %v6104_v29 }
 0x336   :  { %v12069_v35 = vpop.eup %12068 }
 0x337   :  { %v6176_v38 = vmul.f32 %v12069_v35, %v5744_v60 }
 0x339   :  { %v6397_v40 = vmul.f32 %v6322_v30, %v6176_v38 }
 0x342   :  { %v5231_v42 = vpop.f32.mrf.mxu0  ;;  %v5272_v0 = vpop.f32.mrf.mxu1 }
 0x343   :  { %v5401_v43 = vmax.f32 %v5231_v42, 0.0  ;;  %v5403_v44 = vmax.f32 %v5272_v0, 0.0 }
 0x344   :  { %v5233_v48 = vpop.f32.mrf.mxu0  ;;  %v5274_v54 = vpop.f32.mrf.mxu1 }
 0x345   :  { %v6660_v34 = vsel %vm5420_vm0, %v5401_v43, 0.0  ;;  %v6674_v37 = vsel %vm5420_vm0, %v5403_v44, 0.0  ;;  %v5402_v39 = vmax.f32 %v5233_v48, 0.0  ;;  %v5404_v45 = vmax.f32 %v5274_v54, 0.0 }
 0x346   :  { %v6661_v6 = vrot.slane %v6660_v34, 4  ;;  %v6675_v7 = vrot.slane %v6674_v37, 4  ;;  %v5235_v8 = vpop.f32.mrf.mxu0  ;;  %v5276_v11 = vpop.f32.mrf.mxu1 }
 0x347   :  { %v6667_v52 = vsel %vm5420_vm0, %v5402_v39, 0.0  ;;  %v6681_v60 = vsel %vm5420_vm0, %v5404_v45, 0.0  ;;  %v17655_v8 = vmax.f32 %v13077_v22, 0.0 }
 0x348   :  { %v6662_v59 = vadd.f32 %v6661_v6, %v6660_v34  ;;  %v6676_v25 = vadd.f32 %v6675_v7, %v6674_v37  ;;  %v6668_v29 = vrot.slane %v6667_v52, 4  ;;  %v6682_v27 = vrot.slane %v6681_v60, 4  ;;  %v5236_v30 = vpop.f32.mrf.mxu0  ;;  %v5277_v35 = vpop.f32.mrf.mxu1 }
 0x349   :  { %v5428_v30 = vsel %vm5420_vm0, %v17655_v8, 0.0 }
 0x34a   :  { %v6663_v38 = vrot.slane %v6662_v59, 2  ;;  %v6677_v42 = vrot.slane %v6676_v25, 2  ;;  %v6669_v0 = vadd.f32 %v6668_v29, %v6667_v52  ;;  %v6683_v28 = vadd.f32 %v6682_v27, %v6681_v60  ;;  %v5419_v29 = vld [vmem:[%s17640_s4 + $0x20] sm:$0xf] }
 0x34b   :  { %v6543_v27 = vrot.slane %v5419_v29, %v13757_v33  ;;  %v5429_v35 = vrot.slane %v5428_v30, 4 }
 0x34c   :  { %v6664_v48 = vadd.f32 %v6663_v38, %v6662_v59  ;;  %v6678_v54 = vadd.f32 %v6677_v42, %v6676_v25  ;;  %v6670_v14 = vrot.slane %v6669_v0, 2  ;;  %v6684_v13 = vrot.slane %v6683_v28, 2 }
 0x34e   :  { %v6665_v11 = vrot.slane %v6664_v48, 1  ;;  %v6679_v20 = vrot.slane %v6678_v54, 1  ;;  %v6671_v26 = vadd.f32 %v6670_v14, %v6669_v0  ;;  %v6685_v63 = vadd.f32 %v6684_v13, %v6683_v28 }
 0x34f   :  { %v14860_v0 = vadd.f32 %v6543_v27, %v6397_v40 }
 0x350   :  { %v6666_v34 = vadd.f32 %v6665_v11, %v6664_v48  ;;  %v6680_v37 = vadd.f32 %v6679_v20, %v6678_v54  ;;  %v6672_v6 = vrot.slane %v6671_v26, 1  ;;  %v6686_v7 = vrot.slane %v6685_v63, 1 }
 0x351   :  { %17694 = vst [vmem:[#allocation24_spill] sm:$0xff] %v14860_v0 }
 0x352   :  { %v6723_v52 = vmul.f32 0.5, %v6666_v34  ;;  %v6725_v60 = vmul.f32 0.5, %v6680_v37  ;;  %v6673_v59 = vadd.f32 %v6672_v6, %v6671_v26  ;;  %v6687_v25 = vadd.f32 %v6686_v7, %v6685_v63 }
 0x353   :  { %v5430_v37 = vadd.f32 %v5429_v35, %v5428_v30 }
 0x354   :  { %v14848_v14 = vsub.f32 %v5401_v43, %v6723_v52  ;;  %v14850_v13 = vsub.f32 %v5403_v44, %v6725_v60  ;;  %v6724_v20 = vmul.f32 0.5, %v6673_v59  ;;  %v6726_v28 = vmul.f32 0.5, %v6687_v25 }
 0x355   :  { %v5431_v27 = vrot.slane %v5430_v37, 2 }
 0x356   :  { %v6741_v38 = vmul.f32 %v14848_v14, %v14848_v14  ;;  %v6743_v26 = vmul.f32 %v14850_v13, %v14850_v13  ;;  %v14856_v63 = vsub.f32 %v5402_v39, %v6724_v20  ;;  %v14858_v42 = vsub.f32 %v5404_v45, %v6726_v28 }
 0x358   :  { %v6750_v43 = vsel %vm5420_vm0, %v6741_v38, 0.0  ;;  %v6764_v44 = vsel %vm5420_vm0, %v6743_v26, 0.0  ;;  %v6742_v48 = vmul.f32 %v14856_v63, %v14856_v63  ;;  %v6744_v54 = vmul.f32 %v14858_v42, %v14858_v42 }
 0x359   :  { %v6751_v11 = vrot.slane %v6750_v43, 4  ;;  %v6765_v34 = vrot.slane %v6764_v44, 4 }
 0x35a   :  { %v6757_v39 = vsel %vm5420_vm0, %v6742_v48, 0.0  ;;  %v6771_v45 = vsel %vm5420_vm0, %v6744_v54, 0.0  ;;  %v5432_v48 = vadd.f32 %v5431_v27, %v5430_v37  ;;  %v14875_v37 = vld [vmem:[%s17641_s5] sm:$0xff] }
 0x35b   :  { %v6752_v6 = vadd.f32 %v6751_v11, %v6750_v43  ;;  %v6766_v40 = vadd.f32 %v6765_v34, %v6764_v44  ;;  %v6758_v7 = vrot.slane %v6757_v39, 4  ;;  %v6772_v52 = vrot.slane %v6771_v45, 4 }
 0x35d   :  { %v6753_v60 = vrot.slane %v6752_v6, 2  ;;  %v6767_v59 = vrot.slane %v6766_v40, 2  ;;  %v6759_v25 = vadd.f32 %v6758_v7, %v6757_v39  ;;  %v6773_v29 = vadd.f32 %v6772_v52, %v6771_v45 }
 0x35e   :  { %v5433_v39 = vrot.slane %v5432_v48, 1 }
 0x35f   :  { %v6754_v20 = vadd.f32 %v6753_v60, %v6752_v6  ;;  %v6768_v28 = vadd.f32 %v6767_v59, %v6766_v40  ;;  %v6760_v38 = vrot.slane %v6759_v25, 2  ;;  %v6774_v26 = vrot.slane %v6773_v29, 2 }
 0x360   :  { %v5434_v59 = vadd.f32 %v5433_v39, %v5432_v48  ;;  %v14904_v48 = vsub.s32 3, %v13715_v47 }
 0x361   :  { %v6755_v8 = vrot.slane %v6754_v20, 1  ;;  %v6769_v0 = vrot.slane %v6768_v28, 1  ;;  %v6761_v30 = vadd.f32 %v6760_v38, %v6759_v25  ;;  %v6775_v35 = vadd.f32 %v6774_v26, %v6773_v29  ;;  %v14899_v26 = vld [vmem:[%s17642_s6] sm:$0xff] }
 0x362   :  { %v17695_v25 = vmax.f32 %v13077_v22, 0.0  ;;  %v14894_v38 = vsub.s32 1, %v13715_v47 }
 0x363   :  { %v6756_v12 = vadd.f32 %v6755_v8, %v6754_v20  ;;  %v6770_v54 = vadd.f32 %v6769_v0, %v6768_v28  ;;  %v6762_v43 = vrot.slane %v6761_v30, 1  ;;  %v6776_v44 = vrot.slane %v6775_v35, 1 }
 0x364   :  { %v17661_v8 = vmax.f32 %v13062_v17, 0.0  ;;  %v5675_v0 = vmul.f32 0.5, %v5434_v59  ;;  %v17659_v20 = vmax.f32 %v13281_v36, 0.0  ;;  %v6914_v59 = vrot.slane %v14899_v26, %v14894_v38 }
 0x365   :  { %v6813_v11 = vmul.f32 0.5, %v6756_v12  ;;  %v6815_v34 = vmul.f32 0.5, %v6770_v54  ;;  %v6763_v15 = vadd.f32 %v6762_v43, %v6761_v30  ;;  %v6777_v4 = vadd.f32 %v6776_v44, %v6775_v35 }
 0x366   :  { %v17660_v12 = vmax.f32 %v13079_v23, 0.0  ;;  %v14885_v29 = vsub.f32 %v17695_v25, %v5675_v0  ;;  %v6862_v35 = vrot.slane %v14875_v37, %v13757_v33  ;;  %v6918_v0 = vrot.slane %v14899_v26, %v13757_v33 }
 0x367   :  { %v6822_v45 = vadd.f32 1e-05, %v6813_v11  ;;  %v6824_v7 = vadd.f32 1e-05, %v6815_v34  ;;  %v6814_v6 = vmul.f32 0.5, %v6763_v15  ;;  %v6816_v40 = vmul.f32 0.5, %v6777_v4 }
 0x368   :  { %v5421_v4 = vsel %vm5420_vm0, %v17661_v8, 0.0  ;;  %v14881_v15 = vsub.s32 0, %v13715_v47  ;;  %v5442_v27 = vsel %vm5420_vm0, %v17660_v12, 0.0  ;;  %v5747_v43 = vmul.f32 %v14885_v29, %v14885_v29 }
 0x369   :  { %12070 = vrsqrt.f32 %v6822_v45  ;;  %v6823_v52 = vadd.f32 1e-05, %v6814_v6  ;;  %v6825_v60 = vadd.f32 1e-05, %v6816_v40  ;;  %v5422_v30 = vrot.slane %v5421_v4, 4 }
 0x36a   :  { %12072 = vrsqrt.f32 %v6824_v7  ;;  %v6854_v28 = vrot.slane %v14875_v37, %v14881_v15  ;;  %v5443_v44 = vrot.slane %v5442_v27, 4  ;;  %v6858_v34 = vrot.slane %v14875_v37, %v14894_v38 }
 0x36b   :  { %12074 = vrsqrt.f32 %v6823_v52  ;;  %v5456_v45 = vsel %vm5420_vm0, %v17659_v20, 0.0  ;;  %v6866_v6 = vrot.slane %v14875_v37, %v14904_v48  ;;  %v6910_v40 = vrot.slane %v14899_v26, %v14881_v15 }
 0x36c   :  { %12076 = vrsqrt.f32 %v6825_v60  ;;  %v5444_v20 = vadd.f32 %v5443_v44, %v5442_v27  ;;  %v5457_v8 = vrot.slane %v5456_v45, 4 }
 0x36e   :  { %v5445_v3 = vrot.slane %v5444_v20, 2 }
 0x370   :  { %v14951_v44 = vadd.f32 %v5445_v3, %v5444_v20 }
 0x376   :  { %v12071_v22 = vpop.eup %12070 }
 0x377   :  { %v12073_v54 = vpop.eup %12072  ;;  %v6840_v11 = vmul.f32 %v12071_v22, %v14848_v14 }
 0x378   :  { %v12075_v39 = vpop.eup %12074  ;;  %v6842_v7 = vmul.f32 %v12073_v54, %v14850_v13  ;;  %v6922_v13 = vrot.slane %v14899_v26, %v14904_v48  ;;  %v5423_v54 = vadd.f32 %v5422_v30, %v5421_v4  ;;  %v7625_v4 = vld [vmem:[%s17644_s8 + $0x278] sm:$0xff] }
 0x379   :  { %v12077_v52 = vpop.eup %12076  ;;  %v6896_v60 = vmul.f32 %v6854_v28, %v6840_v11  ;;  %v6841_v14 = vmul.f32 %v12075_v39, %v14856_v63  ;;  %v5789_v63 = vsel %vm5420_vm0, %v5747_v43, 0.0 }
 0x37a   :  { %v6898_v25 = vmul.f32 %v6862_v35, %v6842_v7  ;;  %v6843_v22 = vmul.f32 %v12077_v52, %v14858_v42  ;;  %v5424_v2 = vrot.slane %v5423_v54, 2  ;;  %v5790_v35 = vrot.slane %v5789_v63, 4 }
 0x37b   :  { %v6897_v12 = vmul.f32 %v6858_v34, %v6841_v14  ;;  %v6952_v28 = vadd.f32 %v6910_v40, %v6896_v60  ;;  %v14928_v7 = vadd.f32 %v5457_v8, %v5456_v45  ;;  %v7639_v40 = vld [vmem:[%s17644_s8 + $0x2e8] sm:$0xff] }
 0x37c   :  { %v6899_v5 = vmul.f32 %v6866_v6, %v6843_v22  ;;  %v6954_v39 = vadd.f32 %v6918_v0, %v6898_v25  ;;  %v14949_v43 = vadd.f32 %v5424_v2, %v5423_v54  ;;  %v7656_v6 = vld [vmem:[%s17644_s8 + $0x370] sm:$0xff]  ;;  %v14961_v60 = vadd.f32 %v5790_v35, %v5789_v63  ;;  %v7671_v14 = vld [vmem:[%s17644_s8 + $0x3e8] sm:$0xff] }
 0x37d   :  { %v6953_v11 = vadd.f32 %v6914_v59, %v6897_v12  ;;  %v6961_v52 = vmax.f32 %v6952_v28, 0.0  ;;  %v7657_v12 = vld [vmem:[%s17644_s8 + $0x378] sm:$0xff]  ;;  %v5459_v2 = vrot.slane %v14928_v7, 2  ;;  %v7623_v59 = vld [vmem:[%s17644_s8 + $0x268] sm:$0xff]  ;;  %v7638_v28 = vld [vmem:[%s17644_s8 + $0x2e0] sm:$0xff] }
 0x37e   :  { %v6955_v53 = vadd.f32 %v6922_v13, %v6899_v5  ;;  %v6963_v27 = vmax.f32 %v6954_v39, 0.0  ;;  %v7640_v5 = vld [vmem:[%s17644_s8 + $0x2f0] sm:$0xff]  ;;  %v7655_v54 = vld [vmem:[%s17644_s8 + $0x368] sm:$0xff] }
 0x37f   :  { %v6962_v33 = vmax.f32 %v6953_v11, 0.0 }
 0x380   :  { %v6964_v42 = vmax.f32 %v6955_v53, 0.0  ;;  %v7672_v53 = vld [vmem:[%s17644_s8 + $0x3f0] sm:$0xff] }
 0x381   :  { %7754 = vmatprep.mubr.f32.mxu1 %v6962_v33  ;;  %v7624_v33 = vld [vmem:[%s17644_s8 + $0x270] sm:$0xff] }
 0x382   :  { %7824 = vmatprep.mubr.f32.mxu0 %v6964_v42  ;;  %v14939_v30 = vpop.f32.mrf.mxu0  ;;  %v14941_v8 = vpop.f32.mrf.mxu1  ;;  %7755 = vmatmul.mubr.f32.vlgmr.msra.gmra.mxu1 %v6961_v52  ;;  %v7670_v42 = vld [vmem:[%s17644_s8 + $0x3e0] sm:$0xff] }
 0x383   :  { %v17670_v34 = vmax.f32 %v14939_v30, 0.0  ;;  %v17667_v45 = vmax.f32 %v14941_v8, 0.0  ;;  %7825 = vmatmul.mubr.f32.vlgmr.msra.gmra.mxu0 %v6963_v27  ;;  %10227 = vmatpush3.msra.mxu1 %v7625_v4  ;;  %v7622_v52 = vld [vmem:[%s17644_s8 + $0x260] sm:$0xff]  ;;  %v5426_v4 = vrot.slane %v14949_v43, 1  ;;  %v5447_v27 = vrot.slane %v14951_v44, 1 }
 0x384   :  { %v14964_v3 = vpop.f32.mrf.mxu0  ;;  %v14966_v20 = vpop.f32.mrf.mxu1  ;;  %10262 = vmatpush3.msra.mxu0 %v7657_v12  ;;  %10228 = vmatprep.subr.mxu1 %v7640_v5 }
 0x385   :  { %v6688_v0 = vsel %vm5420_vm0, %v17670_v34, 0.0  ;;  %v6702_v25 = vsel %vm5420_vm0, %v17667_v45, 0.0  ;;  %v17668_v22 = vmax.f32 %v14964_v3, 0.0  ;;  %v17669_v13 = vmax.f32 %v14966_v20, 0.0  ;;  %10263 = vmatprep.subr.mxu0 %v7672_v53  ;;  %10229 = vmatpush3.msra.mxu1 %v7624_v33  ;;  %v7654_v53 = vld [vmem:[%s17644_s8 + $0x360] sm:$0xff]  ;;  %v7637_v33 = vld [vmem:[%s17644_s8 + $0x2d8] sm:$0xff] }
 0x386   :  { %v6689_v63 = vrot.slane %v6688_v0, 4  ;;  %v6703_v11 = vrot.slane %v6702_v25, 4  ;;  %v5317_v39 = vpop.f32.mrf.mxu0  ;;  %v5358_v35 = vpop.f32.mrf.mxu1  ;;  %10264 = vmatpush3.msra.mxu0 %v7656_v6  ;;  %10230 = vmatprep.subr.mxu1 %v7639_v40  ;;  %v5460_v34 = vadd.f32 %v5459_v2, %v14928_v7  ;;  %v7668_v7 = vld [vmem:[%s17644_s8 + $0x3d0] sm:$0xff] }
 0x387   :  { %v6695_v12 = vsel %vm5420_vm0, %v17668_v22, 0.0  ;;  %v6709_v5 = vsel %vm5420_vm0, %v17669_v13, 0.0  ;;  %10265 = vmatprep.subr.mxu0 %v7671_v14  ;;  %10231 = vmatpush3.msra.mxu1 %v7623_v59  ;;  %v7669_v14 = vld [vmem:[%s17644_s8 + $0x3d8] sm:$0xff]  ;;  %v5792_v13 = vrot.slane %v14961_v60, 2  ;;  %v7620_v2 = vld [vmem:[%s17644_s8 + $0x250] sm:$0xff] }
 0x388   :  { %v6690_v6 = vadd.f32 %v6689_v63, %v6688_v0  ;;  %v6704_v40 = vadd.f32 %v6703_v11, %v6702_v25  ;;  %v6696_v39 = vrot.slane %v6695_v12, 4  ;;  %v6710_v35 = vrot.slane %v6709_v5, 4  ;;  %v5318_v45 = vpop.f32.mrf.mxu0  ;;  %v5359_v22 = vpop.f32.mrf.mxu1  ;;  %10266 = vmatpush3.msra.mxu0 %v7655_v54  ;;  %10232 = vmatprep.subr.mxu1 %v7638_v28  ;;  %v7621_v59 = vld [vmem:[%s17644_s8 + $0x258] sm:$0xff]  ;;  %v7636_v0 = vld [vmem:[%s17644_s8 + $0x2d0] sm:$0xff] }
 0x389   :  { %10267 = vmatprep.subr.mxu0 %v7670_v42  ;;  %10233 = vmatpush3.msra.mxu1 %v7622_v52  ;;  %v7653_v45 = vld [vmem:[%s17644_s8 + $0x358] sm:$0xff]  ;;  %v5427_v63 = vadd.f32 %v5426_v4, %v14949_v43  ;;  %v5448_v11 = vadd.f32 %v5447_v27, %v14951_v44  ;;  %v7652_v42 = vld [vmem:[%s17644_s8 + $0x350] sm:$0xff]  ;;  %v7635_v52 = vld [vmem:[%s17644_s8 + $0x2c8] sm:$0xff]  ;;  %v5793_v4 = vadd.f32 %v5792_v13, %v14961_v60  ;;  %v5461_v27 = vrot.slane %v5460_v34, 1 }
 0x38a   :  { %v6691_v25 = vrot.slane %v6690_v6, 2  ;;  %v6705_v22 = vrot.slane %v6704_v40, 2  ;;  %v6697_v54 = vadd.f32 %v6696_v39, %v6695_v12  ;;  %v6711_v28 = vadd.f32 %v6710_v35, %v6709_v5  ;;  %10268 = vmatpush3.msra.mxu0 %v7654_v53  ;;  %10234 = vmatprep.subr.mxu1 %v7637_v33  ;;  %v7667_v43 = vld [vmem:[%s17644_s8 + $0x3c8] sm:$0xff]  ;;  %v7666_v60 = vld [vmem:[%s17644_s8 + $0x3c0] sm:$0xff] }
 0x38b   :  { %10269 = vmatprep.subr.mxu0 %v7669_v14  ;;  %10235 = vmatpush3.msra.mxu1 %v7621_v59  ;;  %v7619_v44 = vld [vmem:[%s17644_s8 + $0x248] sm:$0xff]  ;;  %v7618_v13 = vld [vmem:[%s17644_s8 + $0x240] sm:$0xff] }
 0x38c   :  { %v6692_v12 = vadd.f32 %v6691_v25, %v6690_v6  ;;  %v6706_v5 = vadd.f32 %v6705_v22, %v6704_v40  ;;  %v6698_v53 = vrot.slane %v6697_v54, 2  ;;  %v6712_v33 = vrot.slane %v6711_v28, 2  ;;  %10270 = vmatpush3.msra.mxu0 %v7653_v45  ;;  %10236 = vmatprep.subr.mxu1 %v7636_v0  ;;  %v7651_v6 = vld [vmem:[%s17644_s8 + $0x348] sm:$0xff]  ;;  %v7634_v40 = vld [vmem:[%s17644_s8 + $0x2c0] sm:$0xff]  ;;  %v7633_v22 = vld [vmem:[%s17644_s8 + $0x2b8] sm:$0xff] }
 0x38d   :  { %10271 = vmatprep.subr.mxu0 %v7668_v7  ;;  %10237 = vmatpush3.msra.mxu1 %v7620_v2  ;;  %v5674_v45 = vmul.f32 0.5, %v5427_v63  ;;  %v5677_v0 = vmul.f32 0.5, %v5448_v11  ;;  %v7650_v25 = vld [vmem:[%s17644_s8 + $0x340] sm:$0xff]  ;;  %v7665_v63 = vld [vmem:[%s17644_s8 + $0x3b8] sm:$0xff] }
 0x38e   :  { %v6693_v39 = vrot.slane %v6692_v12, 1  ;;  %v6707_v35 = vrot.slane %v6706_v5, 1  ;;  %v6699_v14 = vadd.f32 %v6698_v53, %v6697_v54  ;;  %v6713_v59 = vadd.f32 %v6712_v33, %v6711_v28  ;;  %10272 = vmatpush3.msra.mxu0 %v7652_v42  ;;  %10238 = vmatprep.subr.mxu1 %v7635_v52  ;;  %v7617_v11 = vld [vmem:[%s17644_s8 + $0x238] sm:$0xff] }
 0x38f   :  { %10273 = vmatprep.subr.mxu0 %v7667_v43  ;;  %10239 = vmatpush3.msra.mxu1 %v7619_v44  ;;  %v5794_v42 = vrot.slane %v5793_v4, 1  ;;  %v5462_v52 = vadd.f32 %v5461_v27, %v5460_v34  ;;  %v7664_v34 = vld [vmem:[%s17644_s8 + $0x3b0] sm:$0xff] }
 0x390   :  { %v6694_v54 = vadd.f32 %v6693_v39, %v6692_v12  ;;  %v6708_v28 = vadd.f32 %v6707_v35, %v6706_v5  ;;  %v6700_v7 = vrot.slane %v6699_v14, 1  ;;  %v6714_v2 = vrot.slane %v6713_v59, 1  ;;  %10274 = vmatpush3.msra.mxu0 %v7651_v6  ;;  %10240 = vmatprep.subr.mxu1 %v7634_v40  ;;  %v7649_v12 = vld [vmem:[%s17644_s8 + $0x338] sm:$0xff]  ;;  %v7632_v5 = vld [vmem:[%s17644_s8 + $0x2b0] sm:$0xff] }
 0x391   :  { %10275 = vmatprep.subr.mxu0 %v7666_v60  ;;  %10241 = vmatpush3.msra.mxu1 %v7618_v13  ;;  %v7616_v27 = vld [vmem:[%s17644_s8 + $0x230] sm:$0xff]  ;;  %v17696_v6 = vmax.f32 %v13062_v17, 0.0  ;;  %v17697_v39 = vmax.f32 %v13079_v23, 0.0  ;;  %v17699_v13 = vmax.f32 %v14941_v8, 0.0  ;;  %v7663_v23 = vld [vmem:[%s17644_s8 + $0x3a8] sm:$0xff] }
 0x392   :  { %v6727_v53 = vmul.f32 0.5, %v6694_v54  ;;  %v6729_v33 = vmul.f32 0.5, %v6708_v28  ;;  %v6701_v43 = vadd.f32 %v6700_v7, %v6699_v14  ;;  %v6715_v44 = vadd.f32 %v6714_v2, %v6713_v59  ;;  %10276 = vmatpush3.msra.mxu0 %v7650_v25  ;;  %10242 = vmatprep.subr.mxu1 %v7633_v22  ;;  %v7648_v14 = vld [vmem:[%s17644_s8 + $0x330] sm:$0xff]  ;;  %v7647_v8 = vld [vmem:[%s17644_s8 + $0x328] sm:$0xff] }
 0x393   :  { %v15081_v40 = vsub.f32 %v17696_v6, %v5674_v45  ;;  %v15085_v35 = vsub.f32 %v17697_v39, %v5677_v0  ;;  %10277 = vmatprep.subr.mxu0 %v7665_v63  ;;  %10243 = vmatpush3.msra.mxu1 %v7617_v11  ;;  %v17698_v59 = vmax.f32 %v14939_v30, 0.0  ;;  %v7631_v0 = vld [vmem:[%s17644_s8 + $0x2a8] sm:$0xff]  ;;  %v5795_v22 = vadd.f32 %v5794_v42, %v5793_v4  ;;  %v7662_v42 = vld [vmem:[%s17644_s8 + $0x3a0] sm:$0xff] }
 0x394   :  { %v15096_v25 = vsub.f32 %v17699_v13, %v6729_v33  ;;  %v6728_v17 = vmul.f32 0.5, %v6701_v43  ;;  %v6730_v45 = vmul.f32 0.5, %v6715_v44  ;;  %10278 = vmatpush3.msra.mxu0 %v7649_v12  ;;  %10244 = vmatprep.subr.mxu1 %v7632_v5  ;;  %v5679_v30 = vmul.f32 0.5, %v5462_v52  ;;  %v7615_v54 = vld [vmem:[%s17644_s8 + $0x228] sm:$0xff]  ;;  %v7630_v52 = vld [vmem:[%s17644_s8 + $0x2a0] sm:$0xff]  ;;  %v7613_v13 = vld [vmem:[%s17644_s8 + $0x218] sm:$0xff] }
 0x395   :  { %v15092_v60 = vsub.f32 %v17698_v59, %v6727_v53  ;;  %10279 = vmatprep.subr.mxu0 %v7664_v34  ;;  %10245 = vmatpush3.msra.mxu1 %v7616_v27  ;;  %v17700_v2 = vmax.f32 %v14964_v3, 0.0  ;;  %v17701_v63 = vmax.f32 %v14966_v20, 0.0  ;;  %v5746_v12 = vmul.f32 %v15081_v40, %v15081_v40  ;;  %v7646_v20 = vld [vmem:[%s17644_s8 + $0x320] sm:$0xff]  ;;  %v7661_v34 = vld [vmem:[%s17644_s8 + $0x398] sm:$0xff] }
 0x396   :  { %v6747_v7 = vmul.f32 %v15096_v25, %v15096_v25  ;;  %10280 = vmatpush3.msra.mxu0 %v7648_v14  ;;  %v5749_v3 = vmul.f32 %v15085_v35, %v15085_v35  ;;  %10246 = vmatprep.subr.mxu1 %v7631_v0  ;;  %v7614_v5 = vld [vmem:[%s17644_s8 + $0x220] sm:$0xff]  ;;  %v7629_v27 = vld [vmem:[%s17644_s8 + $0x298] sm:$0xff]  ;;  %v6035_v6 = vmul.f32 0.5, %v5795_v22 }
 0x397   :  { %v6745_v28 = vmul.f32 %v15092_v60, %v15092_v60  ;;  %v15116_v4 = vsub.f32 %v17700_v2, %v6728_v17  ;;  %v15120_v11 = vsub.f32 %v17701_v63, %v6730_v45  ;;  %10281 = vmatprep.subr.mxu0 %v7663_v23  ;;  %10247 = vmatpush3.msra.mxu1 %v7615_v54  ;;  %v7645_v59 = vld [vmem:[%s17644_s8 + $0x318] sm:$0xff]  ;;  %v17702_v17 = vmax.f32 %v13281_v36, 0.0  ;;  %v7628_v54 = vld [vmem:[%s17644_s8 + $0x290] sm:$0xff] }
 0x398   :  { %v6792_v33 = vsel %vm5420_vm0, %v6747_v7, 0.0  ;;  %10282 = vmatpush3.msra.mxu0 %v7647_v8  ;;  %10248 = vmatprep.subr.mxu1 %v7630_v52  ;;  %v17671_v23 = vmax.f32 %v13501_v16, 0.0  ;;  %v7660_v8 = vld [vmem:[%s17644_s8 + $0x390] sm:$0xff]  ;;  %v5803_v52 = vsel %vm5420_vm0, %v5749_v3, 0.0  ;;  %v7611_v3 = vld [vmem:[%s17644_s8 + $0x208] sm:$0xff] }
 0x399   :  { %v6778_v53 = vsel %vm5420_vm0, %v6745_v28, 0.0  ;;  %v6746_v43 = vmul.f32 %v15116_v4, %v15116_v4  ;;  %v6748_v44 = vmul.f32 %v15120_v11, %v15120_v11  ;;  %v6793_v14 = vrot.slane %v6792_v33, 4  ;;  %10283 = vmatprep.subr.mxu0 %v7662_v42  ;;  %10249 = vmatpush3.msra.mxu1 %v7614_v5  ;;  %v7644_v2 = vld [vmem:[%s17644_s8 + $0x310] sm:$0xff]  ;;  %v7627_v5 = vld [vmem:[%s17644_s8 + $0x288] sm:$0xff] }
 0x39a   :  { %v6779_v39 = vrot.slane %v6778_v53, 4  ;;  %v15158_v45 = vsub.f32 %v17702_v17, %v5679_v30  ;;  %10284 = vmatpush3.msra.mxu0 %v7646_v20  ;;  %10250 = vmatprep.subr.mxu1 %v7629_v27  ;;  %v7612_v63 = vld [vmem:[%s17644_s8 + $0x210] sm:$0xff]  ;;  %v5782_v42 = vsel %vm5420_vm0, %v5746_v12, 0.0  ;;  %v7659_v20 = vld [vmem:[%s17644_s8 + $0x388] sm:$0xff] }
 0x39b   :  { %v6785_v0 = vsel %vm5420_vm0, %v6746_v43, 0.0  ;;  %v6799_v22 = vsel %vm5420_vm0, %v6748_v44, 0.0  ;;  %v6794_v36 = vadd.f32 %v6793_v14, %v6792_v33  ;;  %10285 = vmatprep.subr.mxu0 %v7661_v34  ;;  %10251 = vmatpush3.msra.mxu1 %v7613_v13  ;;  %v7643_v12 = vld [vmem:[%s17644_s8 + $0x308] sm:$0xff]  ;;  %v6071_v34 = vadd.f32 1e-05, %v6035_v6  ;;  %v7658_v14 = vld [vmem:[%s17644_s8 + $0x380] sm:$0xff] }
 0x39c   :  { %v6780_v28 = vadd.f32 %v6779_v39, %v6778_v53  ;;  %v6786_v30 = vrot.slane %v6785_v0, 4  ;;  %v6800_v7 = vrot.slane %v6799_v22, 4  ;;  %10286 = vmatpush3.msra.mxu0 %v7645_v59  ;;  %10252 = vmatprep.subr.mxu1 %v7628_v54  ;;  %v5751_v27 = vmul.f32 %v15158_v45, %v15158_v45  ;;  %v7626_v59 = vld [vmem:[%s17644_s8 + $0x280] sm:$0xff] }
 0x39d   :  { %v6795_v33 = vrot.slane %v6794_v36, 2  ;;  %10287 = vmatprep.subr.mxu0 %v7660_v8  ;;  %v5484_v39 = vsel %vm5420_vm0, %v17671_v23, 0.0  ;;  %10253 = vmatpush3.msra.mxu1 %v7612_v63  ;;  %v7610_v8 = vld [vmem:[%s17644_s8 + $0x200] sm:$0xff]  ;;  %v5783_v54 = vrot.slane %v5782_v42, 4  ;;  %12078 = vrsqrt.f32 %v6071_v34 }
 0x39e   :  { %v6781_v53 = vrot.slane %v6780_v28, 2  ;;  %v6787_v43 = vadd.f32 %v6786_v30, %v6785_v0  ;;  %v6801_v44 = vadd.f32 %v6800_v7, %v6799_v22  ;;  %10288 = vmatpush3.msra.mxu0 %v7644_v2  ;;  %10254 = vmatprep.subr.mxu1 %v7627_v5  ;;  %v7642_v22 = vld [vmem:[%s17644_s8 + $0x300] sm:$0xff]  ;;  %v5804_v30 = vrot.slane %v5803_v52, 4 }
 0x39f   :  { %v6796_v17 = vadd.f32 %v6795_v33, %v6794_v36  ;;  %10289 = vmatprep.subr.mxu0 %v7659_v20  ;;  %10255 = vmatpush3.msra.mxu1 %v7611_v3  ;;  %v5817_v20 = vsel %vm5420_vm0, %v5751_v27, 0.0  ;;  %v5485_v5 = vrot.slane %v5484_v39, 4  ;;  %v5784_v51 = vadd.f32 %v5783_v54, %v5782_v42 }
 0x3a0   :  { %v6782_v13 = vadd.f32 %v6781_v53, %v6780_v28  ;;  %v6788_v6 = vrot.slane %v6787_v43, 2  ;;  %v6802_v0 = vrot.slane %v6801_v44, 2  ;;  %10290 = vmatpush3.msra.mxu0 %v7643_v12  ;;  %v7001_v28 = vld [vmem:[%s17643_s7 + $0xf8] sm:$0xff]  ;;  %10256 = vmatprep.subr.mxu1 %v7626_v59  ;;  %v5818_v27 = vrot.slane %v5817_v20, 4 }
 0x3a1   :  { %v6797_v7 = vrot.slane %v6796_v17, 1  ;;  %10291 = vmatprep.subr.mxu0 %v7658_v14  ;;  %10257 = vmatpush3.msra.mxu1 %v7610_v8 }
 0x3a2   :  { %v6783_v36 = vrot.slane %v6782_v13, 1  ;;  %v6789_v2 = vadd.f32 %v6788_v6, %v6787_v43  ;;  %v6803_v63 = vadd.f32 %v6802_v0, %v6801_v44  ;;  %v10150_v53 = vpop.f32.mrf.mxu0  ;;  %10292 = vmatpush3.msra.mxu0 %v7642_v22  ;;  %10945 = vmatprep.subr.mxu1 %v12184_v18  ;;  %v5805_v43 = vadd.f32 %v5804_v30, %v5803_v52 }
 0x3a3   :  { %v6798_v12 = vadd.f32 %v6797_v7, %v6796_v17  ;;  %10313 = vmatprep.subr.mxu0 %v7001_v28  ;;  %v5486_v0 = vadd.f32 %v5485_v5, %v5484_v39  ;;  %v5785_v7 = vrot.slane %v5784_v51, 2  ;;  %v5819_v54 = vadd.f32 %v5818_v27, %v5817_v20 }
 0x3a4   :  { %v6784_v33 = vadd.f32 %v6783_v36, %v6782_v13  ;;  %v6790_v3 = vrot.slane %v6789_v2, 1  ;;  %v6804_v23 = vrot.slane %v6803_v63, 1  ;;  %v10151_v44 = vpop.f32.mrf.mxu0  ;;  %v5806_v46 = vrot.slane %v5805_v43, 2 }
 0x3a5   :  { %v6819_v59 = vmul.f32 0.5, %v6798_v12  ;;  %v10152_v24 = vadd.f32 %v10151_v44, %v10150_v53  ;;  %v5820_v53 = vrot.slane %v5819_v54, 2 }
 0x3a6   :  { %v6817_v14 = vmul.f32 0.5, %v6784_v33  ;;  %v6791_v34 = vadd.f32 %v6790_v3, %v6789_v2  ;;  %v6805_v6 = vadd.f32 %v6804_v23, %v6803_v63  ;;  %v10153_v22 = vpop.f32.mrf.mxu0  ;;  %v5487_v23 = vrot.slane %v5486_v0, 2 }
 0x3a7   :  { %v6828_v13 = vadd.f32 1e-05, %v6819_v59  ;;  %v5409_v28 = vmax.f32 %v10152_v24, 0.0  ;;  %v5786_v2 = vadd.f32 %v5785_v7, %v5784_v51  ;;  %v5807_v63 = vadd.f32 %v5806_v46, %v5805_v43 }
 0x3a8   :  { %v6826_v8 = vadd.f32 1e-05, %v6817_v14  ;;  %v6818_v17 = vmul.f32 0.5, %v6791_v34  ;;  %v6820_v36 = vmul.f32 0.5, %v6805_v6  ;;  %v10154_v62 = vpop.f32.mrf.mxu0  ;;  %v5488_v12 = vadd.f32 %v5487_v23, %v5486_v0  ;;  %v15217_v34 = vld [vmem:[%s17639_s3] sm:$0xff] }
 0x3a9   :  { %v6716_v30 = vsel %vm5420_vm0, %v5409_v28, 0.0  ;;  %v5787_v62 = vrot.slane %v5786_v2, 1  ;;  %v5808_v3 = vrot.slane %v5807_v63, 1  ;;  %v5821_v20 = vadd.f32 %v5820_v53, %v5819_v54 }
 0x3aa   :  { %12080 = vrsqrt.f32 %v6826_v8  ;;  %v6827_v42 = vadd.f32 1e-05, %v6818_v17  ;;  %v6829_v52 = vadd.f32 1e-05, %v6820_v36  ;;  %v6717_v39 = vrot.slane %v6716_v30, 4  ;;  %v12079_v33 = vpop.eup %12078 }
 0x3ab   :  { %12082 = vrsqrt.f32 %v6828_v13  ;;  %v6143_v14 = vmul.f32 %v12079_v33, %v14885_v29  ;;  %v4273_v59 = vmax.f32 %v13486_v9, 0.0  ;;  %v6190_v46 = vrot.slane %v15217_v34, %v14894_v38  ;;  %v6972_v9 = vld [vmem:[%s17643_s7 + $0x10] sm:$0xff] }
 0x3ac   :  { %12084 = vrsqrt.f32 %v6827_v42  ;;  %v6718_v5 = vadd.f32 %v6717_v39, %v6716_v30  ;;  %v5489_v51 = vrot.slane %v5488_v12, 1  ;;  %v15222_v6 = vsub.s32 5, %v13715_v47 }
 0x3ad   :  { %12086 = vrsqrt.f32 %v6829_v52  ;;  %v5788_v27 = vadd.f32 %v5787_v62, %v5786_v2  ;;  %v5809_v0 = vadd.f32 %v5808_v3, %v5807_v63  ;;  %v6870_v29 = vrot.slane %v14875_v37, %v13742_v58  ;;  %v15252_v3 = vld [vmem:[%s17640_s4] sm:$0xff] }
 0x3ae   :  { %v6719_v24 = vrot.slane %v6718_v5, 2  ;;  %v5822_v13 = vrot.slane %v5821_v20, 1  ;;  %v5477_v17 = vsel %vm5420_vm0, %v4273_v59, 0.0  ;;  %v6878_v36 = vrot.slane %v14875_v37, %v13788_v21 }
 0x3af   :  { %v6364_v7 = vmul.f32 %v6190_v46, %v6143_v14  ;;  %v5490_v52 = vadd.f32 %v5489_v51, %v5488_v12  ;;  %v6874_v30 = vrot.slane %v14875_v37, %v15222_v6  ;;  %v6882_v2 = vrot.slane %v14875_v37, %v13779_v57 }
 0x3b0   :  { %v6720_v44 = vadd.f32 %v6719_v24, %v6718_v5  ;;  %v6926_v63 = vrot.slane %v14899_v26, %v13742_v58  ;;  %v6934_v5 = vrot.slane %v14899_v26, %v13788_v21  ;;  %v6930_v24 = vrot.slane %v14899_v26, %v15222_v6 }
 0x3b1   :  { %v6938_v37 = vrot.slane %v14899_v26, %v13779_v57  ;;  %v6034_v51 = vmul.f32 0.5, %v5788_v27  ;;  %v5478_v26 = vrot.slane %v5477_v17, 4 }
 0x3b2   :  { %v6721_v43 = vrot.slane %v6720_v44, 1 }
 0x3b4   :  { %v6722_v22 = vadd.f32 %v6721_v43, %v6720_v44  ;;  %v6411_v44 = vrot.slane %v15252_v3, %v14894_v38 }
 0x3b6   :  { %v6731_v54 = vmul.f32 0.5, %v6722_v22 }
 0x3b7   :  { %v12081_v8 = vpop.eup %12080 }
 0x3b8   :  { %v12083_v42 = vpop.eup %12082  ;;  %v6844_v47 = vmul.f32 %v12081_v8, %v15092_v60  ;;  %v15242_v12 = vsub.f32 %v5409_v28, %v6731_v54  ;;  %v5683_v28 = vmul.f32 0.5, %v5490_v52 }
 0x3b9   :  { %v12085_v23 = vpop.eup %12084  ;;  %v6846_v39 = vmul.f32 %v12083_v42, %v15096_v25  ;;  %v4278_v42 = vmax.f32 %v13735_v55, 0.0  ;;  %v7049_v55 = vld [vmem:[%s17643_s7 + $0x278] sm:$0xff] }
 0x3ba   :  { %v12087_v53 = vpop.eup %12086  ;;  %v6900_v33 = vmul.f32 %v6870_v29, %v6844_v47  ;;  %v6845_v60 = vmul.f32 %v12085_v23, %v15116_v4  ;;  %v5823_v4 = vadd.f32 %v5822_v13, %v5821_v20  ;;  %v6749_v14 = vmul.f32 %v15242_v12, %v15242_v12 }
 0x3bb   :  { %v6902_v62 = vmul.f32 %v6878_v36, %v6846_v39  ;;  %v6847_v25 = vmul.f32 %v12087_v53, %v15120_v11  ;;  %v4276_v11 = vmax.f32 %v13503_v19, 0.0  ;;  %v6585_v20 = vadd.f32 %v6411_v44, %v6364_v7 }
 0x3bc   :  { %v6901_v46 = vmul.f32 %v6874_v30, %v6845_v60  ;;  %v6956_v29 = vadd.f32 %v6926_v63, %v6900_v33  ;;  %v6806_v22 = vsel %vm5420_vm0, %v6749_v14, 0.0  ;;  %v6037_v13 = vmul.f32 0.5, %v5809_v0 }
 0x3bd   :  { %v6903_v43 = vmul.f32 %v6882_v2, %v6847_v25  ;;  %v6958_v36 = vadd.f32 %v6934_v5, %v6902_v62  ;;  %v6807_v47 = vrot.slane %v6806_v22, 4  ;;  %v6039_v52 = vmul.f32 0.5, %v5823_v4  ;;  %v7689_v5 = vld [vmem:[%s17644_s8 + $0x478] sm:$0xff]  ;;  %v7000_v62 = vld [vmem:[%s17643_s7 + $0xf0] sm:$0xff] }
 0x3be   :  { %v6957_v8 = vadd.f32 %v6930_v24, %v6901_v46  ;;  %v17703_v23 = vmax.f32 %v13501_v16, 0.0  ;;  %v5498_v39 = vsel %vm5420_vm0, %v4276_v11, 0.0  ;;  %v6965_v53 = vmax.f32 %v6956_v29, 0.0  ;;  %v6985_v16 = vld [vmem:[%s17643_s7 + $0x78] sm:$0xff]  ;;  %v6983_v29 = vld [vmem:[%s17643_s7 + $0x68] sm:$0xff] }
 0x3bf   :  { %v6959_v54 = vadd.f32 %v6938_v37, %v6903_v43  ;;  %v6808_v2 = vadd.f32 %v6807_v47, %v6806_v22  ;;  %v6070_v33 = vadd.f32 1e-05, %v6034_v51  ;;  %v6967_v0 = vmax.f32 %v6958_v36, 0.0  ;;  %v6999_v51 = vld [vmem:[%s17643_s7 + $0xe8] sm:$0xff]  ;;  %v6998_v36 = vld [vmem:[%s17643_s7 + $0xe0] sm:$0xff] }
 0x3c0   :  { %v15263_v30 = vsub.f32 %v17703_v23, %v5683_v28  ;;  %v6966_v27 = vmax.f32 %v6957_v8, 0.0  ;;  %v5479_v7 = vadd.f32 %v5478_v26, %v5477_v17  ;;  %v5512_v60 = vsel %vm5420_vm0, %v4278_v42, 0.0  ;;  %v6984_v17 = vld [vmem:[%s17643_s7 + $0x70] sm:$0xff]  ;;  %v7687_v26 = vld [vmem:[%s17644_s8 + $0x468] sm:$0xff]  ;;  %v6997_v23 = vld [vmem:[%s17643_s7 + $0xd8] sm:$0xff] }
 0x3c1   :  { %v6968_v63 = vmax.f32 %v6959_v54, 0.0  ;;  %v6809_v24 = vrot.slane %v6808_v2, 2  ;;  %v6621_v25 = vmax.f32 %v6585_v20, 0.0  ;;  %v6075_v37 = vadd.f32 1e-05, %v6039_v52  ;;  %v7688_v28 = vld [vmem:[%s17644_s8 + $0x470] sm:$0xff] }
 0x3c2   :  { %7894 = vmatprep.mubr.f32.mxu1 %v6966_v27  ;;  %v5755_v44 = vmul.f32 %v15263_v30, %v15263_v30  ;;  %v5499_v4 = vrot.slane %v5498_v39, 4  ;;  %v6073_v14 = vadd.f32 1e-05, %v6037_v13  ;;  %12088 = vrsqrt.f32 %v6070_v33  ;;  %v6982_v20 = vld [vmem:[%s17643_s7 + $0x60] sm:$0xff]  ;;  %v6996_v33 = vld [vmem:[%s17643_s7 + $0xd0] sm:$0xff] }
 0x3c3   :  { %7964 = vmatprep.mubr.f32.mxu0 %v6968_v63  ;;  %7895 = vmatmul.mubr.f32.vlgmr.msra.gmra.mxu1 %v6965_v53  ;;  %v6810_v46 = vadd.f32 %v6809_v24, %v6808_v2  ;;  %v5513_v43 = vrot.slane %v5512_v60, 4  ;;  %v5480_v22 = vrot.slane %v5479_v7, 2  ;;  %12090 = vrsqrt.f32 %v6075_v37  ;;  %v7686_v13 = vld [vmem:[%s17644_s8 + $0x460] sm:$0xff]  ;;  %v7685_v2 = vld [vmem:[%s17644_s8 + $0x458] sm:$0xff]  ;;  %v6995_v24 = vld [vmem:[%s17643_s7 + $0xc8] sm:$0xff] }
 0x3c4   :  { %7965 = vmatmul.mubr.f32.vlgmr.msra.gmra.mxu0 %v6967_v0  ;;  %10946 = vmatpush3.msra.mxu1 %v7689_v5  ;;  %v5845_v47 = vsel %vm5420_vm0, %v5755_v44, 0.0  ;;  %v5500_v54 = vadd.f32 %v5499_v4, %v5498_v39  ;;  %12092 = vrsqrt.f32 %v6073_v14  ;;  %v6981_v39 = vld [vmem:[%s17643_s7 + $0x58] sm:$0xff]  ;;  %v7683_v37 = vld [vmem:[%s17644_s8 + $0x448] sm:$0xff]  ;;  %v4282_v19 = vmax.f32 %v13971_v1, 0.0 }
 0x3c5   :  { %10314 = vmatpush3.msra.mxu0 %v6985_v16  ;;  %8104 = vmatprep.mubr.f32.mxu0 %v6621_v25  ;;  %v6811_v8 = vrot.slane %v6810_v46, 1  ;;  %v5514_v27 = vadd.f32 %v5513_v43, %v5512_v60  ;;  %v5481_v63 = vadd.f32 %v5480_v22, %v5479_v7  ;;  %v5846_v53 = vrot.slane %v5845_v47, 4  ;;  %v6980_v16 = vld [vmem:[%s17643_s7 + $0x50] sm:$0xff]  ;;  %v6979_v25 = vld [vmem:[%s17643_s7 + $0x48] sm:$0xff]  ;;  %v6993_v43 = vld [vmem:[%s17643_s7 + $0xb8] sm:$0xff] }
 0x3c6   :  { %10315 = vmatprep.subr.mxu0 %v7000_v62  ;;  %10947 = vmatprep.subr.mxu1 %v12184_v18  ;;  %v5501_v0 = vrot.slane %v5500_v54, 2  ;;  %v7684_v7 = vld [vmem:[%s17644_s8 + $0x450] sm:$0xff]  ;;  %v7681_v22 = vld [vmem:[%s17644_s8 + $0x438] sm:$0xff] }
 0x3c7   :  { %10316 = vmatpush3.msra.mxu0 %v6984_v17  ;;  %10948 = vmatpush3.msra.mxu1 %v7688_v28  ;;  %v6812_v52 = vadd.f32 %v6811_v8, %v6810_v46  ;;  %v5515_v62 = vrot.slane %v5514_v27, 2  ;;  %v5482_v44 = vrot.slane %v5481_v63, 1  ;;  %v5847_v4 = vadd.f32 %v5846_v53, %v5845_v47  ;;  %v6994_v17 = vld [vmem:[%s17643_s7 + $0xc0] sm:$0xff]  ;;  %v7097_v1 = vld [vmem:[%s17643_s7 + $0x3f8] sm:$0xff] }
 0x3c8   :  { %10317 = vmatprep.subr.mxu0 %v6999_v51  ;;  %10949 = vmatprep.subr.mxu1 %v12184_v18  ;;  %v4275_v28 = vmax.f32 %v13488_v10, 0.0  ;;  %v5502_v14 = vadd.f32 %v5501_v0, %v5500_v54  ;;  %v6978_v46 = vld [vmem:[%s17643_s7 + $0x40] sm:$0xff]  ;;  %v6992_v54 = vld [vmem:[%s17643_s7 + $0xb0] sm:$0xff]  ;;  %v6186_v53 = vrot.slane %v15217_v34, %v14881_v15  ;;  %v7679_v0 = vld [vmem:[%s17644_s8 + $0x428] sm:$0xff] }
 0x3c9   :  { %10318 = vmatpush3.msra.mxu0 %v6983_v29  ;;  %10950 = vmatpush3.msra.mxu1 %v7687_v26  ;;  %v6821_v5 = vmul.f32 0.5, %v6812_v52  ;;  %v7682_v51 = vld [vmem:[%s17644_s8 + $0x440] sm:$0xff]  ;;  %v5516_v29 = vadd.f32 %v5515_v62, %v5514_v27  ;;  %v6977_v26 = vld [vmem:[%s17643_s7 + $0x38] sm:$0xff]  ;;  %v5848_v47 = vrot.slane %v5847_v4, 2  ;;  %v6976_v52 = vld [vmem:[%s17643_s7 + $0x30] sm:$0xff] }
 0x3ca   :  { %10319 = vmatprep.subr.mxu0 %v6998_v36  ;;  %10951 = vmatprep.subr.mxu1 %v12184_v18  ;;  %v5483_v36 = vadd.f32 %v5482_v44, %v5481_v63  ;;  %v6206_v44 = vrot.slane %v15217_v34, %v15222_v6  ;;  %v7025_v10 = vld [vmem:[%s17643_s7 + $0x1b8] sm:$0xff] }
 0x3cb   :  { %10320 = vmatpush3.msra.mxu0 %v6982_v20  ;;  %10952 = vmatpush3.msra.mxu1 %v7686_v13  ;;  %v6830_v60 = vadd.f32 1e-05, %v6821_v5  ;;  %v5491_v20 = vsel %vm5420_vm0, %v4275_v28, 0.0  ;;  %v5503_v13 = vrot.slane %v5502_v14, 1  ;;  %v5517_v5 = vrot.slane %v5516_v29, 1 }
 0x3cc   :  { %10321 = vmatprep.subr.mxu0 %v6997_v23  ;;  %10953 = vmatprep.subr.mxu1 %v12184_v18  ;;  %v7680_v23 = vld [vmem:[%s17644_s8 + $0x430] sm:$0xff] }
 0x3cd   :  { %10322 = vmatpush3.msra.mxu0 %v6981_v39  ;;  %10954 = vmatpush3.msra.mxu1 %v7685_v2  ;;  %12094 = vrsqrt.f32 %v6830_v60  ;;  %v6991_v39 = vld [vmem:[%s17643_s7 + $0xa8] sm:$0xff]  ;;  %v5849_v60 = vadd.f32 %v5848_v47, %v5847_v4  ;;  %v5504_v62 = vadd.f32 %v5503_v13, %v5502_v14  ;;  %v6427_v13 = vrot.slane %v15252_v3, %v15222_v6 }
 0x3ce   :  { %10323 = vmatprep.subr.mxu0 %v6996_v33  ;;  %10955 = vmatprep.subr.mxu1 %v12184_v18  ;;  %v6975_v33 = vld [vmem:[%s17643_s7 + $0x28] sm:$0xff] }
 0x3cf   :  { %10324 = vmatpush3.msra.mxu0 %v6980_v16  ;;  %10956 = vmatpush3.msra.mxu1 %v7684_v7  ;;  %v12089_v8 = vpop.eup %12088  ;;  %v5682_v16 = vmul.f32 0.5, %v5483_v36  ;;  %v5492_v7 = vrot.slane %v5491_v20, 4  ;;  %v5685_v47 = vmul.f32 0.5, %v5504_v62  ;;  %v6986_v62 = vld [vmem:[%s17643_s7 + $0x80] sm:$0xff] }
 0x3d0   :  { %10325 = vmatprep.subr.mxu0 %v6995_v24  ;;  %10957 = vmatprep.subr.mxu1 %v12184_v18  ;;  %v12091_v27 = vpop.eup %12090  ;;  %v6142_v63 = vmul.f32 %v12089_v8, %v15081_v40  ;;  %v6990_v40 = vld [vmem:[%s17643_s7 + $0xa0] sm:$0xff]  ;;  %v6988_v8 = vld [vmem:[%s17643_s7 + $0x90] sm:$0xff] }
 0x3d1   :  { %10326 = vmatpush3.msra.mxu0 %v6979_v25  ;;  %10958 = vmatpush3.msra.mxu1 %v7683_v37  ;;  %v12093_v2 = vpop.eup %12092  ;;  %v6147_v24 = vmul.f32 %v12091_v27, %v15158_v45  ;;  %v6974_v25 = vld [vmem:[%s17643_s7 + $0x20] sm:$0xff]  ;;  %v6989_v45 = vld [vmem:[%s17643_s7 + $0x98] sm:$0xff]  ;;  %v6987_v27 = vld [vmem:[%s17643_s7 + $0x88] sm:$0xff] }
 0x3d2   :  { %10327 = vmatprep.subr.mxu0 %v6994_v17  ;;  %10959 = vmatprep.subr.mxu1 %v12184_v18  ;;  %v7678_v37 = vld [vmem:[%s17644_s8 + $0x420] sm:$0xff]  ;;  %v6145_v4 = vmul.f32 %v12093_v2, %v15085_v35  ;;  %v6198_v17 = vrot.slane %v15217_v34, %v14904_v48  ;;  %v6363_v14 = vmul.f32 %v6186_v53, %v6142_v63  ;;  %v6973_v35 = vld [vmem:[%s17643_s7 + $0x18] sm:$0xff]  ;;  %v6971_v53 = vld [vmem:[%s17643_s7 + $0x8] sm:$0xff] }
 0x3d3   :  { %10328 = vmatpush3.msra.mxu0 %v6978_v46  ;;  %10960 = vmatpush3.msra.mxu1 %v7682_v51  ;;  %v4277_v46 = vmax.f32 %v13720_v49, 0.0  ;;  %v5518_v51 = vadd.f32 %v5517_v5, %v5516_v29  ;;  %v15417_v34 = vsub.f32 %v4273_v59, %v5682_v16  ;;  %v5850_v29 = vrot.slane %v5849_v60, 1  ;;  %v7676_v59 = vld [vmem:[%s17644_s8 + $0x410] sm:$0xff] }
 0x3d4   :  { %10329 = vmatprep.subr.mxu0 %v6993_v43  ;;  %10961 = vmatprep.subr.mxu1 %v12184_v18  ;;  %v7677_v43 = vld [vmem:[%s17644_s8 + $0x418] sm:$0xff]  ;;  %v7020_v49 = vld [vmem:[%s17643_s7 + $0x190] sm:$0xff] }
 0x3d5   :  { %10330 = vmatpush3.msra.mxu0 %v6977_v26  ;;  %10962 = vmatpush3.msra.mxu1 %v7681_v22  ;;  %v6407_v26 = vrot.slane %v15252_v3, %v14881_v15  ;;  %v5493_v22 = vadd.f32 %v5492_v7, %v5491_v20  ;;  %v6368_v20 = vmul.f32 %v6206_v44, %v6147_v24  ;;  %v5505_v2 = vsel %vm5420_vm0, %v4277_v46, 0.0 }
 0x3d6   :  { %10331 = vmatprep.subr.mxu0 %v6992_v54  ;;  %10963 = vmatprep.subr.mxu1 %v12184_v18  ;;  %v10129_v54 = vld [vmem:[%s17641_s5 + $0x8] ss:$0 sm:$0xff]  ;;  %v5687_v63 = vmul.f32 0.5, %v5518_v51  ;;  %v5754_v16 = vmul.f32 %v15417_v34, %v15417_v34  ;;  %v5506_v44 = vrot.slane %v5505_v2, 4  ;;  %v7033_v51 = vld [vmem:[%s17643_s7 + $0x1f8] sm:$0xff] }
 0x3d7   :  { %10332 = vmatpush3.msra.mxu0 %v6976_v52  ;;  %10964 = vmatpush3.msra.mxu1 %v7680_v23  ;;  %v4280_v52 = vmax.f32 %v13737_v56, 0.0  ;;  %v6584_v5 = vadd.f32 %v6407_v26, %v6363_v14  ;;  %v5494_v7 = vrot.slane %v5493_v22, 2  ;;  %v7018_v56 = vld [vmem:[%s17643_s7 + $0x180] sm:$0xff] }
 0x3d8   :  { %10333 = vmatprep.subr.mxu0 %v6991_v39  ;;  %10965 = vmatprep.subr.mxu1 %v12184_v18  ;;  %v6366_v39 = vmul.f32 %v6198_v17, %v6145_v4  ;;  %v15479_v17 = vsub.f32 %v4278_v42, %v5687_v63 }
 0x3d9   :  { %10334 = vmatpush3.msra.mxu0 %v6975_v33  ;;  %10966 = vmatpush3.msra.mxu1 %v7679_v0  ;;  %v10130_v33 = vld [vmem:[%s17642_s6 + $0x8] ss:$0 sm:$0xff]  ;;  %v6419_v0 = vrot.slane %v15252_v3, %v14904_v48  ;;  %v6970_v3 = vld [vmem:[%s17643_s7] sm:$0xff]  ;;  %v5526_v4 = vsel %vm5420_vm0, %v4280_v52, 0.0  ;;  %v6620_v14 = vmax.f32 %v6584_v5, 0.0  ;;  %v5495_v26 = vadd.f32 %v5494_v7, %v5493_v22 }
 0x3da   :  { %10335 = vmatprep.subr.mxu0 %v6990_v40  ;;  %10967 = vmatprep.subr.mxu1 %v12184_v18  ;;  %v12095_v36 = vpop.eup %12094  ;;  %v5851_v40 = vadd.f32 %v5850_v29, %v5849_v60  ;;  %v7674_v60 = vld [vmem:[%s17644_s8 + $0x400] sm:$0xff]  ;;  %v5527_v22 = vrot.slane %v5526_v4, 4 }
 0x3db   :  { %10336 = vmatpush3.msra.mxu0 %v6974_v25  ;;  %10968 = vmatpush3.msra.mxu1 %v7678_v37  ;;  %v6848_v23 = vmul.f32 %v12095_v36, %v15242_v12  ;;  %v7675_v12 = vld [vmem:[%s17644_s8 + $0x408] sm:$0xff]  ;;  %v15461_v25 = vsub.f32 %v4276_v11, %v5685_v47  ;;  %v6589_v37 = vadd.f32 %v6427_v13, %v6368_v20  ;;  %v7065_v11 = vld [vmem:[%s17643_s7 + $0x2f8] sm:$0xff]  ;;  %v7064_v36 = vld [vmem:[%s17643_s7 + $0x2f0] sm:$0xff] }
 0x3dc   :  { %10337 = vmatprep.subr.mxu0 %v6989_v45  ;;  %10969 = vmatprep.subr.mxu1 %v12184_v18  ;;  %v6043_v29 = vmul.f32 0.5, %v5851_v40  ;;  %v5759_v13 = vmul.f32 %v15479_v17, %v15479_v17  ;;  %v5528_v40 = vadd.f32 %v5527_v22, %v5526_v4 }
 0x3dd   :  { %10338 = vmatpush3.msra.mxu0 %v6973_v35  ;;  %10970 = vmatpush3.msra.mxu1 %v7677_v43  ;;  %v6904_v24 = vmul.f32 %v10129_v54, %v6848_v23  ;;  %v6587_v35 = vadd.f32 %v6419_v0, %v6366_v39  ;;  %v5838_v43 = vsel %vm5420_vm0, %v5754_v16, 0.0  ;;  %v5757_v47 = vmul.f32 %v15461_v25, %v15461_v25  ;;  %v7032_v23 = vld [vmem:[%s17643_s7 + $0x1f0] sm:$0xff]  ;;  %v7047_v0 = vld [vmem:[%s17643_s7 + $0x268] sm:$0xff] }
 0x3de   :  { %10339 = vmatprep.subr.mxu0 %v6988_v8  ;;  %10971 = vmatprep.subr.mxu1 %v12184_v18  ;;  %v6625_v8 = vmax.f32 %v6589_v37, 0.0  ;;  %v5507_v54 = vadd.f32 %v5506_v44, %v5505_v2  ;;  %v5839_v20 = vrot.slane %v5838_v43, 4  ;;  %v7048_v39 = vld [vmem:[%s17643_s7 + $0x270] sm:$0xff]  ;;  %v5496_v2 = vrot.slane %v5495_v26, 1  ;;  %v7030_v37 = vld [vmem:[%s17643_s7 + $0x1e0] sm:$0xff] }
 0x3df   :  { %10340 = vmatpush3.msra.mxu0 %v6972_v9  ;;  %10972 = vmatpush3.msra.mxu1 %v7676_v59  ;;  %v6960_v45 = vadd.f32 %v10130_v33, %v6904_v24  ;;  %v5540_v9 = vsel %vm5420_vm0, %v4282_v19, 0.0  ;;  %v7017_v59 = vld [vmem:[%s17643_s7 + $0x178] sm:$0xff]  ;;  %v6079_v63 = vadd.f32 1e-05, %v6043_v29  ;;  %v7031_v33 = vld [vmem:[%s17643_s7 + $0x1e8] sm:$0xff]  ;;  %v5859_v16 = vsel %vm5420_vm0, %v5757_v47, 0.0 }
 0x3e0   :  { %10341 = vmatprep.subr.mxu0 %v6987_v27  ;;  %10973 = vmatprep.subr.mxu1 %v12184_v18  ;;  %v6623_v27 = vmax.f32 %v6587_v35, 0.0  ;;  %v5541_v5 = vrot.slane %v5540_v9, 4  ;;  %v5508_v7 = vrot.slane %v5507_v54, 2  ;;  %v7015_v24 = vld [vmem:[%s17643_s7 + $0x168] sm:$0xff]  ;;  %v7046_v44 = vld [vmem:[%s17643_s7 + $0x260] sm:$0xff]  ;;  %v5497_v4 = vadd.f32 %v5496_v2, %v5495_v26  ;;  %v7029_v35 = vld [vmem:[%s17643_s7 + $0x1d8] sm:$0xff] }
 0x3e1   :  { %10342 = vmatpush3.msra.mxu0 %v6971_v53  ;;  %10974 = vmatpush3.msra.mxu1 %v7675_v12  ;;  %v6969_v42 = vmax.f32 %v6960_v45, 0.0  ;;  %v7016_v53 = vld [vmem:[%s17643_s7 + $0x170] sm:$0xff]  ;;  %v7063_v12 = vld [vmem:[%s17643_s7 + $0x2e8] sm:$0xff]  ;;  %12096 = vrsqrt.f32 %v6079_v63  ;;  %v7061_v45 = vld [vmem:[%s17643_s7 + $0x2d8] sm:$0xff] }
 0x3e2   :  { %10343 = vmatprep.subr.mxu0 %v6986_v62  ;;  %10975 = vmatprep.subr.mxu1 %v12184_v18  ;;  %v7062_v62 = vld [vmem:[%s17643_s7 + $0x2e0] sm:$0xff]  ;;  %v5509_v26 = vadd.f32 %v5508_v7, %v5507_v54  ;;  %v7028_v47 = vld [vmem:[%s17643_s7 + $0x1d0] sm:$0xff]  ;;  %v5684_v22 = vmul.f32 0.5, %v5497_v4  ;;  %v7009_v4 = vld [vmem:[%s17643_s7 + $0x138] sm:$0xff] }
 0x3e3   :  { %10344 = vmatpush3.msra.mxu0 %v6970_v3  ;;  %10976 = vmatpush3.msra.mxu1 %v7674_v60  ;;  %v5840_v3 = vadd.f32 %v5839_v20, %v5838_v43  ;;  %v5873_v60 = vsel %vm5420_vm0, %v5759_v13, 0.0  ;;  %v7045_v43 = vld [vmem:[%s17643_s7 + $0x258] sm:$0xff]  ;;  %v7044_v54 = vld [vmem:[%s17643_s7 + $0x250] sm:$0xff]  ;;  %v7010_v7 = vld [vmem:[%s17643_s7 + $0x140] sm:$0xff] }
 0x3e4   :  { %8105 = vmatmul.mubr.f32.vlgmr.msra.gmra.mxu0 %v6620_v14  ;;  %10383 = vmatprep.subr.mxu0 %v7065_v11  ;;  %v7014_v11 = vld [vmem:[%s17643_s7 + $0x160] sm:$0xff]  ;;  %v5860_v14 = vrot.slane %v5859_v16, 4  ;;  %v5874_v29 = vrot.slane %v5873_v60, 4 }
 0x3e5   :  { %10977 = vmatprep.mubr.msk.f32.mxu1 %vm12185_vm1, %v12184_v18  ;;  %10348 = vmatprep.subr.mxu1 %v7033_v51  ;;  %v5542_v51 = vadd.f32 %v5541_v5, %v5540_v9  ;;  %v7012_v9 = vld [vmem:[%s17643_s7 + $0x150] sm:$0xff] }
 0x3e6   :  { %10384 = vmatpush3.msra.mxu0 %v7049_v55  ;;  %8244 = vmatprep.mubr.f32.mxu0 %v6625_v8  ;;  %v5529_v55 = vrot.slane %v5528_v40, 2  ;;  %v7060_v8 = vld [vmem:[%s17643_s7 + $0x2d0] sm:$0xff]  ;;  %v5861_v20 = vadd.f32 %v5860_v14, %v5859_v16  ;;  %v5875_v2 = vadd.f32 %v5874_v29, %v5873_v60  ;;  %v15586_v16 = vsub.f32 %v4275_v28, %v5684_v22  ;;  %v7041_v28 = vld [vmem:[%s17643_s7 + $0x238] sm:$0xff] }
 0x3e7   :  { %10978 = vmatmul.mubr.f32.vlgmr.msra.gmra.mxu1 %v6969_v42  ;;  %10385 = vmatprep.subr.mxu0 %v7064_v36  ;;  %v7013_v42 = vld [vmem:[%s17643_s7 + $0x158] sm:$0xff]  ;;  %v5841_v36 = vrot.slane %v5840_v3, 2  ;;  %v5543_v13 = vrot.slane %v5542_v51, 2  ;;  %v7024_v14 = vld [vmem:[%s17643_s7 + $0x1b0] sm:$0xff] }
 0x3e8   :  { %10349 = vmatpush3.msra.mxu1 %v7017_v59  ;;  %8174 = vmatprep.mubr.f32.mxu1 %v6623_v27  ;;  %v7059_v59 = vld [vmem:[%s17643_s7 + $0x2c8] sm:$0xff]  ;;  %v5530_v63 = vadd.f32 %v5529_v55, %v5528_v40  ;;  %v7057_v40 = vld [vmem:[%s17643_s7 + $0x2b8] sm:$0xff] }
 0x3e9   :  { %10350 = vmatprep.subr.mxu1 %v7032_v23  ;;  %10386 = vmatpush3.msra.mxu0 %v7048_v39  ;;  %v7027_v23 = vld [vmem:[%s17643_s7 + $0x1c8] sm:$0xff]  ;;  %v5510_v39 = vrot.slane %v5509_v26, 1  ;;  %v5842_v5 = vadd.f32 %v5841_v36, %v5840_v3  ;;  %v5544_v3 = vadd.f32 %v5543_v13, %v5542_v51  ;;  %v7040_v51 = vld [vmem:[%s17643_s7 + $0x230] sm:$0xff] }
 0x3ea   :  { %10351 = vmatpush3.msra.mxu1 %v7016_v53  ;;  %10387 = vmatprep.subr.mxu0 %v7063_v12  ;;  %v7043_v27 = vld [vmem:[%s17643_s7 + $0x248] sm:$0xff]  ;;  %v7058_v12 = vld [vmem:[%s17643_s7 + $0x2c0] sm:$0xff] }
 0x3eb   :  { %10352 = vmatprep.subr.mxu1 %v7031_v33  ;;  %10388 = vmatpush3.msra.mxu0 %v7047_v0  ;;  %v7011_v53 = vld [vmem:[%s17643_s7 + $0x148] sm:$0xff]  ;;  %v7026_v33 = vld [vmem:[%s17643_s7 + $0x1c0] sm:$0xff]  ;;  %v5511_v60 = vadd.f32 %v5510_v39, %v5509_v26 }
 0x3ec   :  { %10353 = vmatpush3.msra.mxu1 %v7015_v24  ;;  %10389 = vmatprep.subr.mxu0 %v7062_v62  ;;  %v7042_v0 = vld [vmem:[%s17643_s7 + $0x240] sm:$0xff]  ;;  %v5862_v24 = vrot.slane %v5861_v20, 2  ;;  %v4279_v62 = vmax.f32 %v13722_v50, 0.0  ;;  %v7055_v26 = vld [vmem:[%s17643_s7 + $0x2a8] sm:$0xff]  ;;  %v7088_v50 = vld [vmem:[%s17643_s7 + $0x3b0] sm:$0xff] }
 0x3ed   :  { %10354 = vmatprep.subr.mxu1 %v7030_v37  ;;  %10390 = vmatpush3.msra.mxu0 %v7046_v44  ;;  %v5876_v37 = vrot.slane %v5875_v2, 2  ;;  %v5531_v44 = vrot.slane %v5530_v63, 1  ;;  %v7023_v36 = vld [vmem:[%s17643_s7 + $0x1a8] sm:$0xff]  ;;  %v7038_v39 = vld [vmem:[%s17643_s7 + $0x220] sm:$0xff] }
 0x3ee   :  { %10355 = vmatpush3.msra.mxu1 %v7014_v11  ;;  %10391 = vmatprep.subr.mxu0 %v7061_v45  ;;  %v7056_v11 = vld [vmem:[%s17643_s7 + $0x2b0] sm:$0xff]  ;;  %v5843_v45 = vrot.slane %v5842_v5, 1  ;;  %v12097_v29 = vpop.eup %12096  ;;  %v5863_v55 = vadd.f32 %v5862_v24, %v5861_v20  ;;  %v7054_v20 = vld [vmem:[%s17643_s7 + $0x2a0] sm:$0xff]  ;;  %v15639_v13 = vld [vmem:[%s17639_s3 + $0x8] sm:$0xff] }
 0x3ef   :  { %10356 = vmatprep.subr.mxu1 %v7029_v35  ;;  %10392 = vmatpush3.msra.mxu0 %v7045_v43  ;;  %v5756_v35 = vmul.f32 %v15586_v16, %v15586_v16  ;;  %v7008_v43 = vld [vmem:[%s17643_s7 + $0x130] sm:$0xff]  ;;  %v5877_v22 = vadd.f32 %v5876_v37, %v5875_v2 }
 0x3f0   :  { %10357 = vmatpush3.msra.mxu1 %v7013_v42  ;;  %10393 = vmatprep.subr.mxu0 %v7060_v8  ;;  %v5519_v42 = vsel %vm5420_vm0, %v4279_v62, 0.0  ;;  %v5545_v8 = vrot.slane %v5544_v3, 1 }
 0x3f1   :  { %10358 = vmatprep.subr.mxu1 %v7028_v47  ;;  %10394 = vmatpush3.msra.mxu0 %v7044_v54  ;;  %v7039_v47 = vld [vmem:[%s17643_s7 + $0x228] sm:$0xff]  ;;  %v5686_v54 = vmul.f32 0.5, %v5511_v60  ;;  %v5852_v2 = vsel %vm5420_vm0, %v5756_v35, 0.0  ;;  %v7052_v60 = vld [vmem:[%s17643_s7 + $0x290] sm:$0xff] }
 0x3f2   :  { %10359 = vmatpush3.msra.mxu1 %v7012_v9  ;;  %10395 = vmatprep.subr.mxu0 %v7059_v59  ;;  %v5532_v9 = vadd.f32 %v5531_v44, %v5530_v63  ;;  %v7007_v59 = vld [vmem:[%s17643_s7 + $0x128] sm:$0xff]  ;;  %v6151_v63 = vmul.f32 %v12097_v29, %v15263_v30  ;;  %v7021_v30 = vld [vmem:[%s17643_s7 + $0x198] sm:$0xff]  ;;  %v5853_v44 = vrot.slane %v5852_v2, 4 }
 0x3f3   :  { %10360 = vmatprep.subr.mxu1 %v7027_v23  ;;  %10396 = vmatpush3.msra.mxu0 %v7043_v27  ;;  %v5844_v23 = vadd.f32 %v5843_v45, %v5842_v5  ;;  %v7022_v27 = vld [vmem:[%s17643_s7 + $0x1a0] sm:$0xff]  ;;  %v7053_v5 = vld [vmem:[%s17643_s7 + $0x298] sm:$0xff]  ;;  %v15665_v24 = vsub.f32 %v4277_v46, %v5686_v54  ;;  %v7036_v46 = vld [vmem:[%s17643_s7 + $0x210] sm:$0xff] }
 0x3f4   :  { %10361 = vmatpush3.msra.mxu1 %v7011_v53  ;;  %10397 = vmatprep.subr.mxu0 %v7058_v12  ;;  %v5520_v53 = vrot.slane %v5519_v42, 4  ;;  %v7006_v12 = vld [vmem:[%s17643_s7 + $0x120] sm:$0xff] }
 0x3f5   :  { %10362 = vmatprep.subr.mxu1 %v7026_v33  ;;  %10398 = vmatpush3.msra.mxu0 %v7042_v0  ;;  %v6222_v33 = vrot.slane %v15639_v13, %v14894_v38  ;;  %v5864_v0 = vrot.slane %v5863_v55, 1  ;;  %v6042_v37 = vmul.f32 0.5, %v5844_v23 }
 0x3f6   :  { %10363 = vmatpush3.msra.mxu1 %v7010_v7  ;;  %10399 = vmatprep.subr.mxu0 %v7057_v40  ;;  %v5546_v7 = vadd.f32 %v5545_v8, %v5544_v3  ;;  %v7037_v40 = vld [vmem:[%s17643_s7 + $0x218] sm:$0xff]  ;;  %v5521_v45 = vadd.f32 %v5520_v53, %v5519_v42  ;;  %v7019_v42 = vld [vmem:[%s17643_s7 + $0x188] sm:$0xff] }
 0x3f7   :  { %10364 = vmatprep.subr.mxu1 %v7025_v10  ;;  %10400 = vmatpush3.msra.mxu0 %v7041_v28  ;;  %v5878_v10 = vrot.slane %v5877_v22, 1  ;;  %v5689_v28 = vmul.f32 0.5, %v5532_v9  ;;  %v7005_v3 = vld [vmem:[%s17643_s7 + $0x118] sm:$0xff]  ;;  %v6372_v35 = vmul.f32 %v6222_v33, %v6151_v63  ;;  %v7035_v8 = vld [vmem:[%s17643_s7 + $0x208] sm:$0xff]  ;;  %v7050_v9 = vld [vmem:[%s17643_s7 + $0x280] sm:$0xff] }
 0x3f8   :  { %10365 = vmatpush3.msra.mxu1 %v7009_v4  ;;  %10401 = vmatprep.subr.mxu0 %v7056_v11  ;;  %v4281_v4 = vmax.f32 %v13959_v32, 0.0  ;;  %v15683_v11 = vld [vmem:[%s17640_s4 + $0x8] sm:$0xff]  ;;  %v5691_v29 = vmul.f32 0.5, %v5546_v7  ;;  %v5522_v23 = vrot.slane %v5521_v45, 2  ;;  %v7129_v33 = vld [vmem:[%s17643_s7 + $0x4f8] sm:$0xff] }
 0x3f9   :  { %10366 = vmatprep.subr.mxu1 %v7024_v14  ;;  %10402 = vmatpush3.msra.mxu0 %v7040_v51  ;;  %v7004_v14 = vld [vmem:[%s17643_s7 + $0x110] sm:$0xff]  ;;  %v7051_v51 = vld [vmem:[%s17643_s7 + $0x288] sm:$0xff]  ;;  %v15703_v54 = vsub.f32 %v4280_v52, %v5689_v28  ;;  %v7034_v52 = vld [vmem:[%s17643_s7 + $0x200] sm:$0xff] }
 0x3fa   :  { %10367 = vmatpush3.msra.mxu1 %v7008_v43  ;;  %10403 = vmatprep.subr.mxu0 %v7055_v26  ;;  %v6443_v43 = vrot.slane %v15683_v11, %v14894_v38  ;;  %v5865_v26 = vadd.f32 %v5864_v0, %v5863_v55  ;;  %v7003_v55 = vld [vmem:[%s17643_s7 + $0x108] sm:$0xff] }
 0x3fb   :  { %10368 = vmatprep.subr.mxu1 %v7023_v36  ;;  %10404 = vmatpush3.msra.mxu0 %v7039_v47  ;;  %v5758_v36 = vmul.f32 %v15665_v24, %v15665_v24  ;;  %v5879_v47 = vadd.f32 %v5878_v10, %v5877_v22  ;;  %v5533_v22 = vsel %vm5420_vm0, %v4281_v4, 0.0  ;;  %v17704_v0 = vld [vmem:[#allocation6_spill] sm:$0xff]  ;;  %v5761_v10 = vmul.f32 %v15703_v54, %v15703_v54 }
 0x3fc   :  { %10369 = vmatpush3.msra.mxu1 %v7007_v59  ;;  %10405 = vmatprep.subr.mxu0 %v7054_v20  ;;  %v6078_v59 = vadd.f32 1e-05, %v6042_v37  ;;  %v15711_v20 = vadd.f32 %v5853_v44, %v5852_v2  ;;  %v7002_v2 = vld [vmem:[%s17643_s7 + $0x100] sm:$0xff]  ;;  %v6593_v63 = vadd.f32 %v6443_v43, %v6372_v35  ;;  %v6045_v53 = vmul.f32 0.5, %v5865_v26  ;;  %v7096_v43 = vld [vmem:[%s17643_s7 + $0x3f0] sm:$0xff] }
 0x3fd   :  { %10370 = vmatprep.subr.mxu1 %v7022_v27  ;;  %10406 = vmatpush3.msra.mxu0 %v7038_v39  ;;  %v4284_v27 = vmax.f32 %v13973_v31, 0.0  ;;  %v4286_v39 = vmax.f32 %v14184_v61, 0.0  ;;  %v6622_v7 = vmax.f32 %v17704_v0, 0.0  ;;  %v5534_v28 = vrot.slane %v5533_v22, 4  ;;  %v7112_v26 = vld [vmem:[%s17643_s7 + $0x470] sm:$0xff]  ;;  %v7110_v0 = vld [vmem:[%s17643_s7 + $0x460] sm:$0xff] }
 0x3fe   :  { %10371 = vmatpush3.msra.mxu1 %v7006_v12  ;;  %10407 = vmatprep.subr.mxu0 %v7053_v5  ;;  %v15729_v12 = vsub.f32 %v4282_v19, %v5691_v29  ;;  %v6624_v5 = vmax.f32 %v13808_v41, 0.0  ;;  %v7113_v41 = vld [vmem:[%s17643_s7 + $0x478] sm:$0xff]  ;;  %12098 = vrsqrt.f32 %v6078_v59  ;;  %v6629_v44 = vmax.f32 %v6593_v63, 0.0 }
 0x3ff   :  { %10372 = vmatprep.subr.mxu1 %v7021_v30  ;;  %10408 = vmatpush3.msra.mxu0 %v7037_v40  ;;  %v5866_v30 = vsel %vm5420_vm0, %v5758_v36, 0.0  ;;  %v6047_v40 = vmul.f32 0.5, %v5879_v47  ;;  %v7081_v19 = vld [vmem:[%s17643_s7 + $0x378] sm:$0xff]  ;;  %v5568_v37 = vsel %vm5420_vm0, %v4286_v39, 0.0  ;;  %v5855_v29 = vrot.slane %v15711_v20, 2  ;;  %v7080_v47 = vld [vmem:[%s17643_s7 + $0x370] sm:$0xff] }
 0x400   :  { %10373 = vmatpush3.msra.mxu1 %v7005_v3  ;;  %10409 = vmatprep.subr.mxu0 %v7052_v60  ;;  %v5523_v3 = vadd.f32 %v5522_v23, %v5521_v45  ;;  %v5554_v60 = vsel %vm5420_vm0, %v4284_v27, 0.0  ;;  %v5763_v45 = vmul.f32 %v15729_v12, %v15729_v12  ;;  %v5535_v36 = vadd.f32 %v5534_v28, %v5533_v22  ;;  %v7111_v22 = vld [vmem:[%s17643_s7 + $0x468] sm:$0xff] }
 0x401   :  { %10374 = vmatprep.subr.mxu1 %v7020_v49  ;;  %10410 = vmatpush3.msra.mxu0 %v7036_v46  ;;  %v7128_v49 = vld [vmem:[%s17643_s7 + $0x4f0] sm:$0xff]  ;;  %v6081_v46 = vadd.f32 1e-05, %v6045_v53  ;;  %v5569_v59 = vrot.slane %v5568_v37, 4  ;;  %v7079_v23 = vld [vmem:[%s17643_s7 + $0x368] sm:$0xff] }
 0x402   :  { %10375 = vmatpush3.msra.mxu1 %v7004_v14  ;;  %10411 = vmatprep.subr.mxu0 %v7051_v51  ;;  %v5867_v14 = vrot.slane %v5866_v30, 4  ;;  %v17705_v51 = vld [vmem:[#allocation7_spill] sm:$0xff] }
 0x403   :  { %10376 = vmatprep.subr.mxu1 %v7019_v42  ;;  %10412 = vmatpush3.msra.mxu0 %v7035_v8  ;;  %v6627_v35 = vmax.f32 %v17705_v51, 0.0  ;;  %v6083_v42 = vadd.f32 1e-05, %v6047_v40  ;;  %v5887_v8 = vsel %vm5420_vm0, %v5761_v10, 0.0  ;;  %12100 = vrsqrt.f32 %v6081_v46  ;;  %v7125_v10 = vld [vmem:[%s17643_s7 + $0x4d8] sm:$0xff] }
 0x404   :  { %10377 = vmatpush3.msra.mxu1 %v7003_v55  ;;  %10413 = vmatprep.subr.mxu0 %v7050_v9  ;;  %v7127_v55 = vld [vmem:[%s17643_s7 + $0x4e8] sm:$0xff]  ;;  %v5555_v9 = vrot.slane %v5554_v60, 4  ;;  %v5868_v63 = vadd.f32 %v5867_v14, %v5866_v30  ;;  %v5888_v53 = vrot.slane %v5887_v8, 4  ;;  %v5536_v40 = vrot.slane %v5535_v36, 2  ;;  %v7078_v30 = vld [vmem:[%s17643_s7 + $0x360] sm:$0xff]  ;;  %v7092_v14 = vld [vmem:[%s17643_s7 + $0x3d0] sm:$0xff] }
 0x405   :  { %10378 = vmatprep.subr.mxu1 %v7018_v56  ;;  %10414 = vmatpush3.msra.mxu0 %v7034_v52  ;;  %v7095_v56 = vld [vmem:[%s17643_s7 + $0x3e8] sm:$0xff]  ;;  %v5524_v52 = vrot.slane %v5523_v3, 1  ;;  %12102 = vrsqrt.f32 %v6083_v42 }
 0x406   :  { %10379 = vmatpush3.msra.mxu1 %v7002_v2  ;;  %8245 = vmatmul.mubr.f32.vlgmr.msra.gmra.mxu0 %v6624_v5  ;;  %v7126_v2 = vld [vmem:[%s17643_s7 + $0x4e0] sm:$0xff]  ;;  %v5901_v5 = vsel %vm5420_vm0, %v5763_v45, 0.0  ;;  %v5556_v28 = vadd.f32 %v5555_v9, %v5554_v60  ;;  %v7124_v60 = vld [vmem:[%s17643_s7 + $0x4d0] sm:$0xff]  ;;  %v5889_v46 = vadd.f32 %v5888_v53, %v5887_v8  ;;  %v5537_v51 = vadd.f32 %v5536_v40, %v5535_v36  ;;  %v7091_v42 = vld [vmem:[%s17643_s7 + $0x3c8] sm:$0xff] }
 0x407   :  { %10453 = vmatprep.subr.mxu0 %v7129_v33  ;;  %8175 = vmatmul.mubr.f32.vlgmr.msra.gmra.mxu1 %v6622_v7  ;;  %v7094_v33 = vld [vmem:[%s17643_s7 + $0x3e0] sm:$0xff]  ;;  %v5856_v7 = vadd.f32 %v5855_v29, %v15711_v20  ;;  %v7093_v20 = vld [vmem:[%s17643_s7 + $0x3d8] sm:$0xff]  ;;  %v7107_v8 = vld [vmem:[%s17643_s7 + $0x448] sm:$0xff] }
 0x408   :  { %10418 = vmatprep.subr.mxu1 %v7097_v1  ;;  %10454 = vmatpush3.msra.mxu0 %v7113_v41  ;;  %v5570_v1 = vadd.f32 %v5569_v59, %v5568_v37  ;;  %v7109_v41 = vld [vmem:[%s17643_s7 + $0x458] sm:$0xff]  ;;  %v5869_v37 = vrot.slane %v5868_v63, 2  ;;  %v7075_v9 = vld [vmem:[%s17643_s7 + $0x348] sm:$0xff]  ;;  %v7122_v59 = vld [vmem:[%s17643_s7 + $0x4c0] sm:$0xff] }
 0x409   :  { %8384 = vmatprep.mubr.f32.mxu0 %v6629_v44  ;;  %10419 = vmatpush3.msra.mxu1 %v7081_v19  ;;  %v5525_v19 = vadd.f32 %v5524_v52, %v5523_v3  ;;  %v5902_v44 = vrot.slane %v5901_v5, 4  ;;  %v7108_v3 = vld [vmem:[%s17643_s7 + $0x450] sm:$0xff]  ;;  %v5857_v45 = vrot.slane %v5856_v7, 1  ;;  %v7090_v52 = vld [vmem:[%s17643_s7 + $0x3c0] sm:$0xff] }
 0x40a   :  { %8314 = vmatprep.mubr.f32.mxu1 %v6627_v35  ;;  %10455 = vmatprep.subr.mxu0 %v7128_v49  ;;  %v7077_v49 = vld [vmem:[%s17643_s7 + $0x358] sm:$0xff]  ;;  %v7076_v35 = vld [vmem:[%s17643_s7 + $0x350] sm:$0xff]  ;;  %v5571_v29 = vrot.slane %v5570_v1, 2 }
 0x40b   :  { %10420 = vmatprep.subr.mxu1 %v7096_v43  ;;  %10456 = vmatpush3.msra.mxu0 %v7112_v26  ;;  %v7123_v43 = vld [vmem:[%s17643_s7 + $0x4c8] sm:$0xff]  ;;  %v5557_v26 = vrot.slane %v5556_v28, 2  ;;  %v12099_v36 = vpop.eup %12098  ;;  %v5858_v53 = vadd.f32 %v5857_v45, %v5856_v7  ;;  %v7089_v7 = vld [vmem:[%s17643_s7 + $0x3b8] sm:$0xff] }
 0x40c   :  { %10421 = vmatpush3.msra.mxu1 %v7080_v47  ;;  %10457 = vmatprep.subr.mxu0 %v7127_v55  ;;  %v5688_v47 = vmul.f32 0.5, %v5525_v19  ;;  %v5903_v55 = vadd.f32 %v5902_v44, %v5901_v5  ;;  %v5538_v5 = vrot.slane %v5537_v51, 1 }
 0x40d   :  { %10422 = vmatprep.subr.mxu1 %v7095_v56  ;;  %10458 = vmatpush3.msra.mxu0 %v7111_v22  ;;  %v5870_v56 = vadd.f32 %v5869_v37, %v5868_v63  ;;  %v5890_v22 = vrot.slane %v5889_v46, 2  ;;  %v7074_v63 = vld [vmem:[%s17643_s7 + $0x340] sm:$0xff]  ;;  %v5558_v40 = vadd.f32 %v5557_v26, %v5556_v28  ;;  %v7120_v28 = vld [vmem:[%s17643_s7 + $0x4b0] sm:$0xff]  ;;  %v7119_v37 = vld [vmem:[%s17643_s7 + $0x4a8] sm:$0xff] }
 0x40e   :  { %10423 = vmatpush3.msra.mxu1 %v7079_v23  ;;  %10459 = vmatprep.subr.mxu0 %v7126_v2  ;;  %v7106_v23 = vld [vmem:[%s17643_s7 + $0x440] sm:$0xff]  ;;  %v6218_v2 = vrot.slane %v15639_v13, %v14881_v15 }
 0x40f   :  { %10424 = vmatprep.subr.mxu1 %v7094_v33  ;;  %10460 = vmatpush3.msra.mxu0 %v7110_v0  ;;  %v7121_v33 = vld [vmem:[%s17643_s7 + $0x4b8] sm:$0xff]  ;;  %v6150_v0 = vmul.f32 %v12099_v36, %v15417_v34  ;;  %v5891_v19 = vadd.f32 %v5890_v22, %v5889_v46  ;;  %v5559_v45 = vrot.slane %v5558_v40, 1  ;;  %v7071_v36 = vld [vmem:[%s17643_s7 + $0x328] sm:$0xff] }
 0x410   :  { %10425 = vmatpush3.msra.mxu1 %v7078_v30  ;;  %10461 = vmatprep.subr.mxu0 %v7125_v10  ;;  %v5572_v30 = vadd.f32 %v5571_v29, %v5570_v1  ;;  %v7105_v10 = vld [vmem:[%s17643_s7 + $0x438] sm:$0xff]  ;;  %v5871_v1 = vrot.slane %v5870_v56, 1  ;;  %v12101_v44 = vpop.eup %12100  ;;  %v17706_v29 = vld [vmem:[#allocation9_spill] sm:$0xff] }
 0x411   :  { %10426 = vmatprep.subr.mxu1 %v7093_v20  ;;  %10462 = vmatpush3.msra.mxu0 %v7109_v41  ;;  %v15859_v20 = vsub.f32 %v4279_v62, %v5688_v47  ;;  %v5904_v41 = vrot.slane %v5903_v55, 2  ;;  %v7073_v34 = vld [vmem:[%s17643_s7 + $0x338] sm:$0xff]  ;;  %v7104_v62 = vld [vmem:[%s17643_s7 + $0x430] sm:$0xff]  ;;  %v7118_v47 = vld [vmem:[%s17643_s7 + $0x4a0] sm:$0xff] }
 0x412   :  { %10427 = vmatpush3.msra.mxu1 %v7077_v49  ;;  %10463 = vmatprep.subr.mxu0 %v7124_v60  ;;  %v5539_v49 = vadd.f32 %v5538_v5, %v5537_v51  ;;  %v7072_v60 = vld [vmem:[%s17643_s7 + $0x330] sm:$0xff]  ;;  %v12103_v46 = vpop.eup %12102  ;;  %v7087_v51 = vld [vmem:[%s17643_s7 + $0x3a8] sm:$0xff]  ;;  %v5872_v22 = vadd.f32 %v5871_v1, %v5870_v56  ;;  %v7117_v56 = vld [vmem:[%s17643_s7 + $0x498] sm:$0xff] }
 0x413   :  { %10428 = vmatprep.subr.mxu1 %v7092_v14  ;;  %10464 = vmatpush3.msra.mxu0 %v7108_v3  ;;  %v6371_v14 = vmul.f32 %v6218_v2, %v6150_v0  ;;  %v6044_v3 = vmul.f32 0.5, %v5858_v53  ;;  %v5760_v26 = vmul.f32 %v15859_v20, %v15859_v20  ;;  %v6230_v2 = vrot.slane %v15639_v13, %v14904_v48 }
 0x414   :  { %10429 = vmatpush3.msra.mxu1 %v7076_v35  ;;  %10465 = vmatprep.subr.mxu0 %v7123_v43  ;;  %v5573_v35 = vrot.slane %v5572_v30, 1  ;;  %v7103_v43 = vld [vmem:[%s17643_s7 + $0x428] sm:$0xff]  ;;  %v6155_v53 = vmul.f32 %v12103_v46, %v15479_v17  ;;  %v5690_v5 = vmul.f32 0.5, %v5539_v49  ;;  %v5560_v0 = vadd.f32 %v5559_v45, %v5558_v40  ;;  %v7085_v17 = vld [vmem:[%s17643_s7 + $0x398] sm:$0xff] }
 0x415   :  { %10430 = vmatprep.subr.mxu1 %v7091_v42  ;;  %10466 = vmatpush3.msra.mxu0 %v7107_v8  ;;  %v4283_v42 = vmax.f32 %v17706_v29, 0.0  ;;  %v5905_v8 = vadd.f32 %v5904_v41, %v5903_v55  ;;  %v7086_v55 = vld [vmem:[%s17643_s7 + $0x3a0] sm:$0xff]  ;;  %v7115_v45 = vld [vmem:[%s17643_s7 + $0x488] sm:$0xff] }
 0x416   :  { %10431 = vmatpush3.msra.mxu1 %v7075_v9  ;;  %10467 = vmatprep.subr.mxu0 %v7122_v59  ;;  %v6439_v9 = vrot.slane %v15683_v11, %v14881_v15  ;;  %v6153_v59 = vmul.f32 %v12101_v44, %v15461_v25  ;;  %v7070_v25 = vld [vmem:[%s17643_s7 + $0x320] sm:$0xff]  ;;  %v5574_v41 = vadd.f32 %v5573_v35, %v5572_v30  ;;  %v7069_v30 = vld [vmem:[%s17643_s7 + $0x318] sm:$0xff]  ;;  %v6046_v44 = vmul.f32 0.5, %v5872_v22 }
 0x417   :  { %10432 = vmatprep.subr.mxu1 %v7090_v52  ;;  %10468 = vmatpush3.msra.mxu0 %v7106_v23  ;;  %v5892_v52 = vrot.slane %v5891_v19, 1  ;;  %v7102_v23 = vld [vmem:[%s17643_s7 + $0x420] sm:$0xff]  ;;  %v5547_v1 = vsel %vm5420_vm0, %v4283_v42, 0.0  ;;  %v5906_v40 = vrot.slane %v5905_v8, 1 }
 0x418   :  { %10433 = vmatpush3.msra.mxu1 %v7074_v63  ;;  %10469 = vmatprep.subr.mxu0 %v7121_v33  ;;  %v6238_v63 = vrot.slane %v15639_v13, %v15222_v6  ;;  %v6080_v33 = vadd.f32 1e-05, %v6044_v3  ;;  %v6374_v46 = vmul.f32 %v6230_v2, %v6153_v59  ;;  %v6451_v3 = vrot.slane %v15683_v11, %v14904_v48  ;;  %v17708_v22 = vld [vmem:[#allocation12_spill] sm:$0xff] }
 0x419   :  { %10434 = vmatprep.subr.mxu1 %v7089_v7  ;;  %10470 = vmatpush3.msra.mxu0 %v7105_v10  ;;  %v17707_v7 = vld [vmem:[#allocation10_spill] sm:$0xff]  ;;  %v5893_v49 = vadd.f32 %v5892_v52, %v5891_v19  ;;  %v5907_v59 = vadd.f32 %v5906_v40, %v5905_v8  ;;  %v4288_v52 = vmax.f32 %v17708_v22, 0.0  ;;  %v6082_v2 = vadd.f32 1e-05, %v6046_v44  ;;  %v7082_v8 = vld [vmem:[%s17643_s7 + $0x380] sm:$0xff]  ;;  %v7193_v44 = vld [vmem:[%s17643_s7 + $0x6f8] sm:$0xff] }
 0x41a   :  { %10435 = vmatpush3.msra.mxu1 %v7073_v34  ;;  %10471 = vmatprep.subr.mxu0 %v7120_v28  ;;  %v4285_v10 = vmax.f32 %v17707_v7, 0.0  ;;  %v7101_v34 = vld [vmem:[%s17643_s7 + $0x418] sm:$0xff]  ;;  %v5880_v28 = vsel %vm5420_vm0, %v5760_v26, 0.0  ;;  %v7068_v19 = vld [vmem:[%s17643_s7 + $0x310] sm:$0xff]  ;;  %v6376_v35 = vmul.f32 %v6238_v63, %v6155_v53  ;;  %v5693_v26 = vmul.f32 0.5, %v5560_v0 }
 0x41b   :  { %10436 = vmatprep.subr.mxu1 %v7088_v50  ;;  %10472 = vmatpush3.msra.mxu0 %v7104_v62  ;;  %v7116_v50 = vld [vmem:[%s17643_s7 + $0x490] sm:$0xff]  ;;  %v15931_v62 = vadd.f32 %v6439_v9, %v6371_v14  ;;  %v15943_v14 = vsub.f32 %v4281_v4, %v5690_v5  ;;  %v5695_v4 = vmul.f32 0.5, %v5574_v41  ;;  %v5881_v9 = vrot.slane %v5880_v28, 4  ;;  %v7098_v5 = vld [vmem:[%s17643_s7 + $0x400] sm:$0xff] }
 0x41c   :  { %10437 = vmatpush3.msra.mxu1 %v7072_v60  ;;  %10473 = vmatprep.subr.mxu0 %v7119_v37  ;;  %v7084_v60 = vld [vmem:[%s17643_s7 + $0x390] sm:$0xff]  ;;  %v5561_v32 = vsel %vm5420_vm0, %v4285_v10, 0.0  ;;  %12104 = vrsqrt.f32 %v6080_v33  ;;  %v6049_v53 = vmul.f32 0.5, %v5893_v49  ;;  %v7066_v33 = vld [vmem:[%s17643_s7 + $0x300] sm:$0xff]  ;;  %v15983_v40 = vsub.f32 %v4284_v27, %v5693_v26 }
 0x41d   :  { %10438 = vmatprep.subr.mxu1 %v7087_v51  ;;  %10474 = vmatpush3.msra.mxu0 %v7103_v43  ;;  %v7100_v37 = vld [vmem:[%s17643_s7 + $0x410] sm:$0xff]  ;;  %v6459_v51 = vrot.slane %v15683_v11, %v15222_v6  ;;  %v5548_v43 = vrot.slane %v5547_v1, 4  ;;  %v5562_v63 = vrot.slane %v5561_v32, 4  ;;  %v5882_v49 = vadd.f32 %v5881_v9, %v5880_v28  ;;  %v17710_v27 = vld [vmem:[#allocation8_spill] sm:$0xff] }
 0x41e   :  { %10439 = vmatpush3.msra.mxu1 %v7071_v36  ;;  %10475 = vmatprep.subr.mxu0 %v7118_v47  ;;  %v7083_v36 = vld [vmem:[%s17643_s7 + $0x388] sm:$0xff]  ;;  %v17709_v0 = vld [vmem:[#allocation15_spill] sm:$0xff]  ;;  %v5582_v31 = vsel %vm5420_vm0, %v4288_v52, 0.0  ;;  %v6626_v61 = vmax.f32 %v17710_v27, 0.0  ;;  %12106 = vrsqrt.f32 %v6082_v2 }
 0x41f   :  { %10440 = vmatprep.subr.mxu1 %v7086_v55  ;;  %10476 = vmatpush3.msra.mxu0 %v7102_v23  ;;  %v7099_v47 = vld [vmem:[%s17643_s7 + $0x408] sm:$0xff]  ;;  %v7114_v23 = vld [vmem:[%s17643_s7 + $0x480] sm:$0xff]  ;;  %v4290_v41 = vmax.f32 %v17709_v0, 0.0  ;;  %v7145_v28 = vld [vmem:[%s17643_s7 + $0x578] sm:$0xff] }
 0x420   :  { %10441 = vmatpush3.msra.mxu1 %v7070_v25  ;;  %10477 = vmatprep.subr.mxu0 %v7117_v56  ;;  %v7067_v55 = vld [vmem:[%s17643_s7 + $0x308] sm:$0xff]  ;;  %v6595_v25 = vadd.f32 %v6451_v3, %v6374_v46  ;;  %v5762_v56 = vmul.f32 %v15943_v14, %v15943_v14  ;;  %v5563_v3 = vadd.f32 %v5562_v63, %v5561_v32  ;;  %v7160_v32 = vld [vmem:[%s17643_s7 + $0x5f0] sm:$0xff] }
 0x421   :  { %10442 = vmatprep.subr.mxu1 %v7085_v17  ;;  %10478 = vmatpush3.msra.mxu0 %v7101_v34  ;;  %v6597_v17 = vadd.f32 %v6459_v51, %v6376_v35  ;;  %v5549_v34 = vadd.f32 %v5548_v43, %v5547_v1  ;;  %v7177_v1 = vld [vmem:[%s17643_s7 + $0x678] sm:$0xff]  ;;  %v7192_v35 = vld [vmem:[%s17643_s7 + $0x6f0] sm:$0xff]  ;;  %v5765_v43 = vmul.f32 %v15983_v40, %v15983_v40 }
 0x422   :  { %10443 = vmatpush3.msra.mxu1 %v7069_v30  ;;  %10479 = vmatprep.subr.mxu0 %v7116_v50  ;;  %v15987_v30 = vsub.f32 %v4286_v39, %v5695_v4  ;;  %v6628_v50 = vmax.f32 %v15931_v62, 0.0  ;;  %v7161_v39 = vld [vmem:[%s17643_s7 + $0x5f8] sm:$0xff]  ;;  %v6085_v62 = vadd.f32 1e-05, %v6049_v53  ;;  %v5894_v46 = vsel %vm5420_vm0, %v5762_v56, 0.0  ;;  %v7159_v53 = vld [vmem:[%s17643_s7 + $0x5e8] sm:$0xff] }
 0x423   :  { %10444 = vmatprep.subr.mxu1 %v7084_v60  ;;  %10480 = vmatpush3.msra.mxu0 %v7100_v37  ;;  %v6051_v60 = vmul.f32 0.5, %v5907_v59  ;;  %v6631_v37 = vmax.f32 %v6595_v25, 0.0  ;;  %v5550_v51 = vrot.slane %v5549_v34, 2  ;;  %v5583_v4 = vrot.slane %v5582_v31, 4  ;;  %v7144_v59 = vld [vmem:[%s17643_s7 + $0x570] sm:$0xff]  ;;  %v7143_v25 = vld [vmem:[%s17643_s7 + $0x568] sm:$0xff] }
 0x424   :  { %10445 = vmatpush3.msra.mxu1 %v7068_v19  ;;  %10481 = vmatprep.subr.mxu0 %v7115_v45  ;;  %v5596_v19 = vsel %vm5420_vm0, %v4290_v41, 0.0  ;;  %v6633_v45 = vmax.f32 %v6597_v17, 0.0  ;;  %v5767_v26 = vmul.f32 %v15987_v30, %v15987_v30  ;;  %12108 = vrsqrt.f32 %v6085_v62  ;;  %v7190_v56 = vld [vmem:[%s17643_s7 + $0x6e0] sm:$0xff]  ;;  %v17715_v22 = vld [vmem:[#allocation19_spill] sm:$0xff] }
 0x425   :  { %10446 = vmatprep.subr.mxu1 %v7083_v36  ;;  %10482 = vmatpush3.msra.mxu0 %v7099_v47  ;;  %v7176_v36 = vld [vmem:[%s17643_s7 + $0x670] sm:$0xff]  ;;  %v5883_v47 = vrot.slane %v5882_v49, 2  ;;  %v6087_v9 = vadd.f32 1e-05, %v6051_v60  ;;  %v5597_v2 = vrot.slane %v5596_v19, 4  ;;  %v5551_v63 = vadd.f32 %v5550_v51, %v5549_v34  ;;  %v7174_v60 = vld [vmem:[%s17643_s7 + $0x660] sm:$0xff] }
 0x426   :  { %10447 = vmatpush3.msra.mxu1 %v7067_v55  ;;  %10483 = vmatprep.subr.mxu0 %v7114_v23  ;;  %v7191_v55 = vld [vmem:[%s17643_s7 + $0x6e8] sm:$0xff]  ;;  %v5895_v23 = vrot.slane %v5894_v46, 4  ;;  %v5929_v17 = vsel %vm5420_vm0, %v5767_v26, 0.0  ;;  %v7142_v34 = vld [vmem:[%s17643_s7 + $0x560] sm:$0xff] }
 0x427   :  { %10448 = vmatprep.subr.mxu1 %v7082_v8  ;;  %10484 = vmatpush3.msra.mxu0 %v7098_v5  ;;  %v7175_v8 = vld [vmem:[%s17643_s7 + $0x668] sm:$0xff]  ;;  %v5564_v5 = vrot.slane %v5563_v3, 2  ;;  %v5884_v27 = vadd.f32 %v5883_v47, %v5882_v49  ;;  %12110 = vrsqrt.f32 %v6087_v9  ;;  %v7173_v49 = vld [vmem:[%s17643_s7 + $0x658] sm:$0xff] }
 0x428   :  { %10449 = vmatpush3.msra.mxu1 %v7066_v33  ;;  %8385 = vmatmul.mubr.f32.vlgmr.msra.gmra.mxu0 %v6628_v50  ;;  %v5915_v33 = vsel %vm5420_vm0, %v5765_v43, 0.0  ;;  %v5584_v50 = vadd.f32 %v5583_v4, %v5582_v31  ;;  %v7189_v31 = vld [vmem:[%s17643_s7 + $0x6d8] sm:$0xff]  ;;  %v7156_v43 = vld [vmem:[%s17643_s7 + $0x5d0] sm:$0xff]  ;;  %v7155_v9 = vld [vmem:[%s17643_s7 + $0x5c8] sm:$0xff] }
 0x429   :  { %10523 = vmatprep.subr.mxu0 %v7193_v44  ;;  %8315 = vmatmul.mubr.f32.vlgmr.msra.gmra.mxu1 %v6626_v61  ;;  %v7158_v44 = vld [vmem:[%s17643_s7 + $0x5e0] sm:$0xff]  ;;  %v5896_v61 = vadd.f32 %v5895_v23, %v5894_v46  ;;  %v12105_v62 = vpop.eup %12104  ;;  %v7141_v46 = vld [vmem:[%s17643_s7 + $0x558] sm:$0xff]  ;;  %v5885_v26 = vrot.slane %v5884_v27, 1  ;;  %v7140_v4 = vld [vmem:[%s17643_s7 + $0x550] sm:$0xff] }
 0x42a   :  { %10488 = vmatprep.subr.mxu1 %v7161_v39  ;;  %10524 = vmatpush3.msra.mxu0 %v7177_v1  ;;  %v5598_v39 = vadd.f32 %v5597_v2, %v5596_v19  ;;  %v7157_v1 = vld [vmem:[%s17643_s7 + $0x5d8] sm:$0xff]  ;;  %v7188_v19 = vld [vmem:[%s17643_s7 + $0x6d0] sm:$0xff]  ;;  %v5585_v51 = vrot.slane %v5584_v50, 2 }
 0x42b   :  { %8524 = vmatprep.mubr.f32.mxu0 %v6633_v45  ;;  %10489 = vmatpush3.msra.mxu1 %v7145_v28  ;;  %v5916_v28 = vrot.slane %v5915_v33, 4  ;;  %v5930_v45 = vrot.slane %v5929_v17, 4 }
 0x42c   :  { %8454 = vmatprep.mubr.f32.mxu1 %v6631_v37  ;;  %10525 = vmatprep.subr.mxu0 %v7192_v35  ;;  %v5565_v37 = vadd.f32 %v5564_v5, %v5563_v3  ;;  %v5552_v35 = vrot.slane %v5551_v63, 1  ;;  %v7172_v3 = vld [vmem:[%s17643_s7 + $0x650] sm:$0xff]  ;;  %v5599_v47 = vrot.slane %v5598_v39, 2  ;;  %v7186_v5 = vld [vmem:[%s17643_s7 + $0x6c0] sm:$0xff] }
 0x42d   :  { %10490 = vmatprep.subr.mxu1 %v7160_v32  ;;  %10526 = vmatpush3.msra.mxu0 %v7176_v36  ;;  %v7187_v32 = vld [vmem:[%s17643_s7 + $0x6c8] sm:$0xff]  ;;  %v5897_v36 = vrot.slane %v5896_v61, 2  ;;  %v5917_v23 = vadd.f32 %v5916_v28, %v5915_v33  ;;  %v7154_v33 = vld [vmem:[%s17643_s7 + $0x5c0] sm:$0xff] }
 0x42e   :  { %10491 = vmatpush3.msra.mxu1 %v7144_v59  ;;  %10527 = vmatprep.subr.mxu0 %v7191_v55  ;;  %v7171_v59 = vld [vmem:[%s17643_s7 + $0x648] sm:$0xff]  ;;  %v12107_v55 = vpop.eup %12106  ;;  %v5566_v2 = vrot.slane %v5565_v37, 1 }
 0x42f   :  { %10492 = vmatprep.subr.mxu1 %v7159_v53  ;;  %10528 = vmatpush3.msra.mxu0 %v7175_v8  ;;  %v5931_v53 = vadd.f32 %v5930_v45, %v5929_v17  ;;  %v7139_v8 = vld [vmem:[%s17643_s7 + $0x548] sm:$0xff]  ;;  %v7170_v17 = vld [vmem:[%s17643_s7 + $0x640] sm:$0xff]  ;;  %v5898_v28 = vadd.f32 %v5897_v36, %v5896_v61  ;;  %v16109_v45 = vadd.f32 %v5599_v47, %v5598_v39  ;;  %v7184_v61 = vld [vmem:[%s17643_s7 + $0x6b0] sm:$0xff] }
 0x430   :  { %10493 = vmatpush3.msra.mxu1 %v7143_v25  ;;  %10529 = vmatprep.subr.mxu0 %v7190_v56  ;;  %v17711_v25 = vld [vmem:[#allocation5_spill] sm:$0xff]  ;;  %v7136_v36 = vld [vmem:[%s17643_s7 + $0x530] sm:$0xff] }
 0x431   :  { %10494 = vmatprep.subr.mxu1 %v7158_v44  ;;  %10530 = vmatpush3.msra.mxu0 %v7174_v60  ;;  %v6226_v56 = vrot.slane %v15639_v13, %v17711_v25  ;;  %v5553_v44 = vadd.f32 %v5552_v35, %v5551_v63  ;;  %v5586_v60 = vadd.f32 %v5585_v51, %v5584_v50  ;;  %v7138_v63 = vld [vmem:[%s17643_s7 + $0x540] sm:$0xff]  ;;  %v7185_v50 = vld [vmem:[%s17643_s7 + $0x6b8] sm:$0xff]  ;;  %v5932_v35 = vrot.slane %v5931_v53, 2  ;;  %v7183_v47 = vld [vmem:[%s17643_s7 + $0x6a8] sm:$0xff] }
 0x432   :  { %10495 = vmatpush3.msra.mxu1 %v7142_v34  ;;  %10531 = vmatprep.subr.mxu0 %v7189_v31  ;;  %v6152_v34 = vmul.f32 %v12105_v62, %v15586_v16  ;;  %v6234_v31 = vrot.slane %v15639_v13, %v13742_v58  ;;  %v7153_v16 = vld [vmem:[%s17643_s7 + $0x5b8] sm:$0xff]  ;;  %v12109_v62 = vpop.eup %12108 }
 0x433   :  { %10496 = vmatprep.subr.mxu1 %v7157_v1  ;;  %10532 = vmatpush3.msra.mxu0 %v7173_v49  ;;  %v5886_v1 = vadd.f32 %v5885_v26, %v5884_v27  ;;  %v6154_v49 = vmul.f32 %v12107_v55, %v15665_v24  ;;  %v7169_v27 = vld [vmem:[%s17643_s7 + $0x638] sm:$0xff]  ;;  %v5692_v39 = vmul.f32 0.5, %v5553_v44  ;;  %v5587_v51 = vrot.slane %v5586_v60, 1  ;;  %v7167_v44 = vld [vmem:[%s17643_s7 + $0x628] sm:$0xff] }
 0x434   :  { %10497 = vmatpush3.msra.mxu1 %v7141_v46  ;;  %10533 = vmatprep.subr.mxu0 %v7188_v19  ;;  %v5918_v46 = vrot.slane %v5917_v23, 2  ;;  %v5567_v19 = vadd.f32 %v5566_v2, %v5565_v37  ;;  %v7137_v24 = vld [vmem:[%s17643_s7 + $0x538] sm:$0xff]  ;;  %v7168_v37 = vld [vmem:[%s17643_s7 + $0x630] sm:$0xff]  ;;  %v6157_v2 = vmul.f32 %v12109_v62, %v15703_v54  ;;  %v7135_v54 = vld [vmem:[%s17643_s7 + $0x528] sm:$0xff] }
 0x435   :  { %10498 = vmatprep.subr.mxu1 %v7156_v43  ;;  %10534 = vmatpush3.msra.mxu0 %v7172_v3  ;;  %v7152_v43 = vld [vmem:[%s17643_s7 + $0x5b0] sm:$0xff]  ;;  %v6373_v3 = vmul.f32 %v6226_v56, %v6152_v34  ;;  %v6048_v26 = vmul.f32 0.5, %v5886_v1  ;;  %v6375_v55 = vmul.f32 %v6234_v31, %v6154_v49  ;;  %v7151_v56 = vld [vmem:[%s17643_s7 + $0x5a8] sm:$0xff]  ;;  %v16148_v34 = vadd.f32 %v5932_v35, %v5931_v53  ;;  %v7182_v31 = vld [vmem:[%s17643_s7 + $0x6a0] sm:$0xff] }
 0x436   :  { %10499 = vmatpush3.msra.mxu1 %v7140_v4  ;;  %10535 = vmatprep.subr.mxu0 %v7187_v32  ;;  %v17712_v4 = vld [vmem:[#allocation11_spill] sm:$0xff]  ;;  %v6455_v1 = vrot.slane %v15683_v11, %v13742_v58  ;;  %v16165_v53 = vsub.f32 %v4283_v42, %v5692_v39  ;;  %v7166_v49 = vld [vmem:[%s17643_s7 + $0x620] sm:$0xff] }
 0x437   :  { %10500 = vmatprep.subr.mxu1 %v7155_v9  ;;  %10536 = vmatpush3.msra.mxu0 %v7171_v59  ;;  %v4287_v32 = vmax.f32 %v17712_v4, 0.0  ;;  %v6447_v9 = vrot.slane %v15683_v11, %v17711_v25  ;;  %v12111_v59 = vpop.eup %12110  ;;  %v7134_v42 = vld [vmem:[%s17643_s7 + $0x520] sm:$0xff]  ;;  %v7165_v39 = vld [vmem:[%s17643_s7 + $0x618] sm:$0xff] }
 0x438   :  { %10501 = vmatpush3.msra.mxu1 %v7139_v8  ;;  %10537 = vmatprep.subr.mxu0 %v7186_v5  ;;  %v5899_v8 = vrot.slane %v5898_v28, 1  ;;  %v5601_v5 = vrot.slane %v16109_v45, 1  ;;  %v7214_v4 = vld [vmem:[%s17643_s7 + $0x7a0] sm:$0xff] }
 0x439   :  { %10502 = vmatprep.subr.mxu1 %v7154_v33  ;;  %10538 = vmatpush3.msra.mxu0 %v7170_v17  ;;  %v16146_v33 = vadd.f32 %v5918_v46, %v5917_v23  ;;  %v5694_v17 = vmul.f32 0.5, %v5567_v19  ;;  %v16161_v23 = vld [vmem:[%s17639_s3 + $0x10] sm:$0xff]  ;;  %v5575_v29 = vsel %vm5420_vm0, %v4287_v32, 0.0  ;;  %v16185_v62 = vadd.f32 %v6447_v9, %v6373_v3  ;;  %v17713_v19 = vld [vmem:[#allocation13_spill] sm:$0xff] }
 0x43a   :  { %10503 = vmatpush3.msra.mxu1 %v7138_v63  ;;  %10539 = vmatprep.subr.mxu0 %v7185_v50  ;;  %v5588_v63 = vadd.f32 %v5587_v51, %v5586_v60  ;;  %v7150_v50 = vld [vmem:[%s17643_s7 + $0x5a0] sm:$0xff]  ;;  %v7181_v60 = vld [vmem:[%s17643_s7 + $0x698] sm:$0xff]  ;;  %v5900_v46 = vadd.f32 %v5899_v8, %v5898_v28  ;;  %v4289_v35 = vmax.f32 %v17713_v19, 0.0  ;;  %v5934_v28 = vrot.slane %v16148_v34, 1  ;;  %v16222_v9 = vld [vmem:[%s17640_s4 + $0x10] sm:$0xff] }
 0x43b   :  { %10504 = vmatprep.subr.mxu1 %v7153_v16  ;;  %10540 = vmatpush3.msra.mxu0 %v7169_v27  ;;  %v6246_v16 = vrot.slane %v15639_v13, %v13779_v57  ;;  %v6159_v27 = vmul.f32 %v12111_v59, %v15729_v12  ;;  %v6254_v13 = vrot.slane %v16161_v23, %v14894_v38  ;;  %v6084_v12 = vadd.f32 1e-05, %v6048_v26  ;;  %v7179_v8 = vld [vmem:[%s17643_s7 + $0x688] sm:$0xff]  ;;  %v7212_v19 = vld [vmem:[%s17643_s7 + $0x790] sm:$0xff] }
 0x43c   :  { %10505 = vmatpush3.msra.mxu1 %v7137_v24  ;;  %10541 = vmatprep.subr.mxu0 %v7184_v61  ;;  %v5602_v24 = vadd.f32 %v5601_v5, %v16109_v45  ;;  %v7149_v61 = vld [vmem:[%s17643_s7 + $0x598] sm:$0xff]  ;;  %v5920_v51 = vrot.slane %v16146_v33, 1  ;;  %v16209_v3 = vadd.f32 %v6455_v1, %v6375_v55  ;;  %v5764_v26 = vmul.f32 %v16165_v53, %v16165_v53  ;;  %v7132_v55 = vld [vmem:[%s17643_s7 + $0x510] sm:$0xff] }
 0x43d   :  { %10506 = vmatprep.subr.mxu1 %v7152_v43  ;;  %10542 = vmatpush3.msra.mxu0 %v7168_v37  ;;  %v16200_v43 = vsub.f32 %v4285_v10, %v5694_v17  ;;  %v7133_v45 = vld [vmem:[%s17643_s7 + $0x518] sm:$0xff]  ;;  %v7180_v37 = vld [vmem:[%s17643_s7 + $0x690] sm:$0xff]  ;;  %v5576_v7 = vrot.slane %v5575_v29, 4  ;;  %v5697_v10 = vmul.f32 0.5, %v5588_v63  ;;  %v6378_v59 = vmul.f32 %v6246_v16, %v6157_v2 }
 0x43e   :  { %10507 = vmatpush3.msra.mxu1 %v7136_v36  ;;  %10543 = vmatprep.subr.mxu0 %v7183_v47  ;;  %v7148_v36 = vld [vmem:[%s17643_s7 + $0x590] sm:$0xff]  ;;  %v6467_v17 = vrot.slane %v15683_v11, %v13779_v57  ;;  %v5589_v2 = vsel %vm5420_vm0, %v4289_v35, 0.0  ;;  %v17714_v1 = vld [vmem:[#allocation16_spill] sm:$0xff]  ;;  %12112 = vrsqrt.f32 %v6084_v12  ;;  %v5921_v11 = vadd.f32 %v5920_v51, %v16146_v33 }
 0x43f   :  { %10508 = vmatprep.subr.mxu1 %v7151_v56  ;;  %10544 = vmatpush3.msra.mxu0 %v7167_v44  ;;  %v7164_v47 = vld [vmem:[%s17643_s7 + $0x610] sm:$0xff]  ;;  %v6380_v56 = vmul.f32 %v6254_v13, %v6159_v27  ;;  %v6475_v44 = vrot.slane %v16222_v9, %v14894_v38  ;;  %v4292_v63 = vmax.f32 %v17714_v1, 0.0  ;;  %v5766_v16 = vmul.f32 %v16200_v43, %v16200_v43  ;;  %v7162_v12 = vld [vmem:[%s17643_s7 + $0x600] sm:$0xff] }
 0x440   :  { %10509 = vmatpush3.msra.mxu1 %v7135_v54  ;;  %10545 = vmatprep.subr.mxu0 %v7182_v31  ;;  %v6050_v54 = vmul.f32 0.5, %v5900_v46  ;;  %v5699_v31 = vmul.f32 0.5, %v5602_v24  ;;  %v5935_v27 = vadd.f32 %v5934_v28, %v16148_v34  ;;  %v16254_v46 = vadd.f32 %v5576_v7, %v5575_v29  ;;  %v7146_v34 = vld [vmem:[%s17643_s7 + $0x580] sm:$0xff] }
 0x441   :  { %10510 = vmatprep.subr.mxu1 %v7150_v50  ;;  %10546 = vmatpush3.msra.mxu0 %v7166_v49  ;;  %v7147_v50 = vld [vmem:[%s17643_s7 + $0x588] sm:$0xff]  ;;  %v16258_v33 = vsub.f32 %v4288_v52, %v5697_v10  ;;  %v6632_v24 = vmax.f32 %v16209_v3, 0.0  ;;  %v5908_v29 = vsel %vm5420_vm0, %v5764_v26, 0.0  ;;  %v4294_v52 = vmax.f32 %v17715_v22, 0.0  ;;  %v7130_v51 = vld [vmem:[%s17643_s7 + $0x500] sm:$0xff]  ;;  %v7257_v26 = vld [vmem:[%s17643_s7 + $0x8f8] sm:$0xff] }
 0x442   :  { %10511 = vmatpush3.msra.mxu1 %v7134_v42  ;;  %10547 = vmatprep.subr.mxu0 %v7181_v60  ;;  %v10188_v5 = vpop.f32.mrf.mxu1  ;;  %v7163_v49 = vld [vmem:[%s17643_s7 + $0x608] sm:$0xff]  ;;  %v7178_v60 = vld [vmem:[%s17643_s7 + $0x680] sm:$0xff]  ;;  %v6601_v28 = vadd.f32 %v6475_v44, %v6380_v56  ;;  %v5610_v3 = vsel %vm5420_vm0, %v4292_v63, 0.0  ;;  %v6599_v7 = vadd.f32 %v6467_v17, %v6378_v59  ;;  %v5922_v10 = vsel %vm5420_vm0, %v5766_v16, 0.0  ;;  %v7240_v16 = vld [vmem:[%s17643_s7 + $0x870] sm:$0xff] }
 0x443   :  { %10512 = vmatprep.subr.mxu1 %v7149_v61  ;;  %10548 = vmatpush3.msra.mxu0 %v7165_v39  ;;  %v7131_v42 = vld [vmem:[%s17643_s7 + $0x508] sm:$0xff]  ;;  %v5590_v39 = vrot.slane %v5589_v2, 4  ;;  %v6630_v0 = vmax.f32 %v16185_v62, 0.0  ;;  %v5769_v59 = vmul.f32 %v16258_v33, %v16258_v33  ;;  %v7209_v62 = vld [vmem:[%s17643_s7 + $0x778] sm:$0xff]  ;;  %v5611_v44 = vrot.slane %v5610_v3, 4  ;;  %v7210_v1 = vld [vmem:[%s17643_s7 + $0x780] sm:$0xff] }
 0x444   :  { %10513 = vmatpush3.msra.mxu1 %v7133_v45  ;;  %10549 = vmatprep.subr.mxu0 %v7180_v37  ;;  %v10189_v13 = vpop.f32.mrf.mxu1  ;;  %v6086_v45 = vadd.f32 1e-05, %v6050_v54  ;;  %v16276_v37 = vsub.f32 %v4290_v41, %v5699_v31  ;;  %v7225_v41 = vld [vmem:[%s17643_s7 + $0x7f8] sm:$0xff]  ;;  %v5624_v17 = vsel %vm5420_vm0, %v4294_v52, 0.0  ;;  %v6637_v54 = vmax.f32 %v6601_v28, 0.0  ;;  %v7256_v31 = vld [vmem:[%s17643_s7 + $0x8f0] sm:$0xff] }
 0x445   :  { %10514 = vmatprep.subr.mxu1 %v7148_v36  ;;  %10550 = vmatpush3.msra.mxu0 %v7164_v47  ;;  %v16267_v61 = vadd.f32 %v10189_v13, %v10188_v5  ;;  %v6055_v36 = vmul.f32 0.5, %v5935_v27  ;;  %v7241_v47 = vld [vmem:[%s17643_s7 + $0x878] sm:$0xff]  ;;  %v5578_v5 = vrot.slane %v16254_v46, 2  ;;  %v5591_v56 = vadd.f32 %v5590_v39, %v5589_v2  ;;  %v7223_v39 = vld [vmem:[%s17643_s7 + $0x7e8] sm:$0xff] }
 0x446   :  { %10515 = vmatpush3.msra.mxu1 %v7132_v55  ;;  %10551 = vmatprep.subr.mxu0 %v7179_v8  ;;  %v5909_v55 = vrot.slane %v5908_v29, 4  ;;  %v6053_v8 = vmul.f32 0.5, %v5921_v11  ;;  %12114 = vrsqrt.f32 %v6086_v45  ;;  %v6635_v2 = vmax.f32 %v6599_v7, 0.0  ;;  %v7224_v11 = vld [vmem:[%s17643_s7 + $0x7f0] sm:$0xff]  ;;  %v7254_v7 = vld [vmem:[%s17643_s7 + $0x8e0] sm:$0xff]  ;;  %v7289_v22 = vld [vmem:[%s17643_s7 + $0x9f8] sm:$0xff] }
 0x447   :  { %10516 = vmatprep.subr.mxu1 %v7147_v50  ;;  %10552 = vmatpush3.msra.mxu0 %v7163_v49  ;;  %v5923_v50 = vrot.slane %v5922_v10, 4  ;;  %v5771_v49 = vmul.f32 %v16276_v37, %v16276_v37  ;;  %v6091_v27 = vadd.f32 1e-05, %v6055_v36  ;;  %v5579_v28 = vadd.f32 %v5578_v5, %v16254_v46  ;;  %v7222_v46 = vld [vmem:[%s17643_s7 + $0x7e0] sm:$0xff] }
 0x448   :  { %10517 = vmatpush3.msra.mxu1 %v7131_v42  ;;  %10553 = vmatprep.subr.mxu0 %v7178_v60  ;;  %v7208_v42 = vld [vmem:[%s17643_s7 + $0x770] sm:$0xff]  ;;  %v7255_v60 = vld [vmem:[%s17643_s7 + $0x8e8] sm:$0xff]  ;;  %v5910_v13 = vadd.f32 %v5909_v55, %v5908_v29  ;;  %v5592_v45 = vrot.slane %v5591_v56, 2 }
 0x449   :  { %10518 = vmatprep.subr.mxu1 %v7146_v34  ;;  %10554 = vmatpush3.msra.mxu0 %v7162_v12  ;;  %v6089_v34 = vadd.f32 1e-05, %v6053_v8  ;;  %v5943_v12 = vsel %vm5420_vm0, %v5769_v59, 0.0  ;;  %v7207_v29 = vld [vmem:[%s17643_s7 + $0x768] sm:$0xff]  ;;  %v5924_v36 = vadd.f32 %v5923_v50, %v5922_v10  ;;  %12116 = vrsqrt.f32 %v6091_v27  ;;  %v7206_v10 = vld [vmem:[%s17643_s7 + $0x760] sm:$0xff]  ;;  %v7221_v59 = vld [vmem:[%s17643_s7 + $0x7d8] sm:$0xff] }
 0x44a   :  { %10519 = vmatpush3.msra.mxu1 %v7130_v51  ;;  %8525 = vmatmul.mubr.f32.vlgmr.msra.gmra.mxu0 %v6632_v24  ;;  %v5625_v24 = vrot.slane %v5624_v17, 4  ;;  %v7239_v51 = vld [vmem:[%s17643_s7 + $0x868] sm:$0xff]  ;;  %v5911_v8 = vrot.slane %v5910_v13, 2  ;;  %v7204_v27 = vld [vmem:[%s17643_s7 + $0x750] sm:$0xff] }
 0x44b   :  { %10593 = vmatprep.subr.mxu0 %v7257_v26  ;;  %8455 = vmatmul.mubr.f32.vlgmr.msra.gmra.mxu1 %v6630_v0  ;;  %v5612_v26 = vadd.f32 %v5611_v44, %v5610_v3  ;;  %v5957_v0 = vsel %vm5420_vm0, %v5771_v49, 0.0  ;;  %v7238_v3 = vld [vmem:[%s17643_s7 + $0x860] sm:$0xff]  ;;  %v12113_v55 = vpop.eup %12112  ;;  %12118 = vrsqrt.f32 %v6089_v34  ;;  %v5580_v44 = vrot.slane %v5579_v28, 1  ;;  %v7252_v49 = vld [vmem:[%s17643_s7 + $0x8d0] sm:$0xff]  ;;  %v12154_v34 = vld [vmem:[%s17639_s3 + $0x8] sm:$0xff] }
 0x44c   :  { %10558 = vmatprep.subr.mxu1 %v7225_v41  ;;  %10594 = vmatpush3.msra.mxu0 %v7241_v47  ;;  %v5944_v41 = vrot.slane %v5943_v12, 4  ;;  %v7253_v47 = vld [vmem:[%s17643_s7 + $0x8d8] sm:$0xff]  ;;  %v5626_v5 = vadd.f32 %v5625_v24, %v5624_v17  ;;  %v6242_v24 = vrot.slane %v12154_v34, %v13788_v21  ;;  %v7232_v34 = vld [vmem:[%s17643_s7 + $0x830] sm:$0xff] }
 0x44d   :  { %8664 = vmatprep.mubr.f32.mxu0 %v6637_v54  ;;  %10559 = vmatpush3.msra.mxu1 %v7209_v62  ;;  %v7237_v62 = vld [vmem:[%s17643_s7 + $0x858] sm:$0xff]  ;;  %v5593_v54 = vadd.f32 %v5592_v45, %v5591_v56  ;;  %v5613_v50 = vrot.slane %v5612_v26, 2  ;;  %v7236_v56 = vld [vmem:[%s17643_s7 + $0x850] sm:$0xff]  ;;  %v7235_v45 = vld [vmem:[%s17643_s7 + $0x848] sm:$0xff] }
 0x44e   :  { %8594 = vmatprep.mubr.f32.mxu1 %v6635_v2  ;;  %10595 = vmatprep.subr.mxu0 %v7256_v31  ;;  %v5958_v31 = vrot.slane %v5957_v0, 4  ;;  %v7205_v17 = vld [vmem:[%s17643_s7 + $0x758] sm:$0xff]  ;;  %v5925_v2 = vrot.slane %v5924_v36, 2 }
 0x44f   :  { %10560 = vmatprep.subr.mxu1 %v7224_v11  ;;  %10596 = vmatpush3.msra.mxu0 %v7240_v16  ;;  %v7220_v11 = vld [vmem:[%s17643_s7 + $0x7d0] sm:$0xff]  ;;  %v5945_v16 = vadd.f32 %v5944_v41, %v5943_v12  ;;  %v5627_v12 = vrot.slane %v5626_v5, 2 }
 0x450   :  { %10561 = vmatpush3.msra.mxu1 %v7208_v42  ;;  %10597 = vmatprep.subr.mxu0 %v7255_v60  ;;  %v7251_v42 = vld [vmem:[%s17643_s7 + $0x8c8] sm:$0xff]  ;;  %v6156_v60 = vmul.f32 %v12113_v55, %v15859_v20  ;;  %v5594_v20 = vrot.slane %v5593_v54, 1  ;;  %v5926_v41 = vadd.f32 %v5925_v2, %v5924_v36  ;;  %v7249_v36 = vld [vmem:[%s17643_s7 + $0x8b8] sm:$0xff] }
 0x451   :  { %10562 = vmatprep.subr.mxu1 %v7223_v39  ;;  %10598 = vmatpush3.msra.mxu0 %v7239_v51  ;;  %v5912_v39 = vadd.f32 %v5911_v8, %v5910_v13  ;;  %v7219_v51 = vld [vmem:[%s17643_s7 + $0x7c8] sm:$0xff] }
 0x452   :  { %10563 = vmatpush3.msra.mxu1 %v7207_v29  ;;  %10599 = vmatprep.subr.mxu0 %v7254_v7  ;;  %v5581_v29 = vadd.f32 %v5580_v44, %v5579_v28  ;;  %v5959_v7 = vadd.f32 %v5958_v31, %v5957_v0  ;;  %v7203_v13 = vld [vmem:[%s17643_s7 + $0x748] sm:$0xff]  ;;  %v7218_v28 = vld [vmem:[%s17643_s7 + $0x7c0] sm:$0xff]  ;;  %v6377_v55 = vmul.f32 %v6242_v24, %v6156_v60  ;;  %v7233_v44 = vld [vmem:[%s17643_s7 + $0x838] sm:$0xff]  ;;  %v5927_v60 = vrot.slane %v5926_v41, 1 }
 0x453   :  { %10564 = vmatprep.subr.mxu1 %v7222_v46  ;;  %10600 = vmatpush3.msra.mxu0 %v7238_v3  ;;  %v5614_v46 = vadd.f32 %v5613_v50, %v5612_v26  ;;  %v7250_v3 = vld [vmem:[%s17643_s7 + $0x8c0] sm:$0xff]  ;;  %v12115_v0 = vpop.eup %12114  ;;  %v5913_v8 = vrot.slane %v5912_v39, 1  ;;  %v12155_v31 = vld [vmem:[%s17640_s4 + $0x8] sm:$0xff] }
 0x454   :  { %10565 = vmatpush3.msra.mxu1 %v7206_v10  ;;  %10601 = vmatprep.subr.mxu0 %v7253_v47  ;;  %v7234_v26 = vld [vmem:[%s17643_s7 + $0x840] sm:$0xff]  ;;  %v5946_v10 = vrot.slane %v5945_v16, 2  ;;  %v6463_v50 = vrot.slane %v12155_v31, %v13788_v21  ;;  %v5960_v2 = vrot.slane %v5959_v7, 2 }
 0x455   :  { %10566 = vmatprep.subr.mxu1 %v7221_v59  ;;  %10602 = vmatpush3.msra.mxu0 %v7237_v62  ;;  %v7202_v47 = vld [vmem:[%s17643_s7 + $0x740] sm:$0xff]  ;;  %v5628_v59 = vadd.f32 %v5627_v12, %v5626_v5  ;;  %v7217_v62 = vld [vmem:[%s17643_s7 + $0x7b8] sm:$0xff]  ;;  %v5615_v5 = vrot.slane %v5614_v46, 1  ;;  %v7247_v12 = vld [vmem:[%s17643_s7 + $0x8a8] sm:$0xff] }
 0x456   :  { %10567 = vmatpush3.msra.mxu1 %v7205_v17  ;;  %10603 = vmatprep.subr.mxu0 %v7252_v49  ;;  %v5696_v17 = vmul.f32 0.5, %v5581_v29  ;;  %v5595_v49 = vadd.f32 %v5594_v20, %v5593_v54  ;;  %v7216_v54 = vld [vmem:[%s17643_s7 + $0x7b0] sm:$0xff]  ;;  %v5947_v24 = vadd.f32 %v5946_v10, %v5945_v16  ;;  %v7215_v20 = vld [vmem:[%s17643_s7 + $0x7a8] sm:$0xff] }
 0x457   :  { %10568 = vmatprep.subr.mxu1 %v7220_v11  ;;  %10604 = vmatpush3.msra.mxu0 %v7236_v56  ;;  %v7201_v11 = vld [vmem:[%s17643_s7 + $0x738] sm:$0xff]  ;;  %v7248_v56 = vld [vmem:[%s17643_s7 + $0x8b0] sm:$0xff]  ;;  %v5629_v29 = vrot.slane %v5628_v59, 1  ;;  %v7231_v16 = vld [vmem:[%s17643_s7 + $0x828] sm:$0xff] }
 0x458   :  { %10569 = vmatpush3.msra.mxu1 %v7204_v27  ;;  %10605 = vmatprep.subr.mxu0 %v7251_v42  ;;  %v6158_v27 = vmul.f32 %v12115_v0, %v15943_v14  ;;  %v6250_v42 = vrot.slane %v16161_v23, %v14881_v15  ;;  %v7200_v14 = vld [vmem:[%s17643_s7 + $0x730] sm:$0xff]  ;;  %v5616_v0 = vadd.f32 %v5615_v5, %v5614_v46  ;;  %v7199_v10 = vld [vmem:[%s17643_s7 + $0x728] sm:$0xff] }
 0x459   :  { %10570 = vmatprep.subr.mxu1 %v7219_v51  ;;  %10606 = vmatpush3.msra.mxu0 %v7235_v45  ;;  %v12117_v51 = vpop.eup %12116  ;;  %v5914_v45 = vadd.f32 %v5913_v8, %v5912_v39  ;;  %v5961_v39 = vadd.f32 %v5960_v2, %v5959_v7  ;;  %v6471_v7 = vrot.slane %v16222_v9, %v14881_v15  ;;  %v5948_v8 = vrot.slane %v5947_v24, 1 }
 0x45a   :  { %10571 = vmatpush3.msra.mxu1 %v7203_v13  ;;  %10607 = vmatprep.subr.mxu0 %v7250_v3  ;;  %v16435_v13 = vadd.f32 %v6463_v50, %v6377_v55  ;;  %v12119_v3 = vpop.eup %12118  ;;  %v5928_v55 = vadd.f32 %v5927_v60, %v5926_v41  ;;  %v6163_v46 = vmul.f32 %v12117_v51, %v15987_v30  ;;  %v7198_v41 = vld [vmem:[%s17643_s7 + $0x720] sm:$0xff]  ;;  %v7213_v30 = vld [vmem:[%s17643_s7 + $0x798] sm:$0xff]  ;;  %v17717_v51 = vld [vmem:[#allocation14_spill] sm:$0xff] }
 0x45b   :  { %10572 = vmatprep.subr.mxu1 %v7218_v28  ;;  %10608 = vmatpush3.msra.mxu0 %v7234_v26  ;;  %v16439_v28 = vsub.f32 %v4287_v32, %v5696_v17  ;;  %v5698_v26 = vmul.f32 0.5, %v5595_v49  ;;  %v7230_v32 = vld [vmem:[%s17643_s7 + $0x820] sm:$0xff]  ;;  %v6052_v31 = vmul.f32 0.5, %v5914_v45  ;;  %v6161_v50 = vmul.f32 %v12119_v3, %v15983_v40  ;;  %v7229_v49 = vld [vmem:[%s17643_s7 + $0x818] sm:$0xff] }
 0x45c   :  { %10573 = vmatpush3.msra.mxu1 %v7202_v47  ;;  %10609 = vmatprep.subr.mxu0 %v7249_v36  ;;  %v7246_v47 = vld [vmem:[%s17643_s7 + $0x8a0] sm:$0xff]  ;;  %v6379_v36 = vmul.f32 %v6250_v42, %v6158_v27  ;;  %v5630_v17 = vadd.f32 %v5629_v29, %v5628_v59  ;;  %v6262_v2 = vrot.slane %v16161_v23, %v14904_v48  ;;  %v5962_v59 = vrot.slane %v5961_v39, 1  ;;  %v7244_v27 = vld [vmem:[%s17643_s7 + $0x890] sm:$0xff] }
 0x45d   :  { %10574 = vmatprep.subr.mxu1 %v7217_v62  ;;  %10610 = vmatpush3.msra.mxu0 %v7233_v44  ;;  %v7245_v62 = vld [vmem:[%s17643_s7 + $0x898] sm:$0xff]  ;;  %v6270_v44 = vrot.slane %v16161_v23, %v15222_v6  ;;  %v5768_v5 = vmul.f32 %v16439_v28, %v16439_v28  ;;  %v16477_v40 = vsub.f32 %v4289_v35, %v5698_v26  ;;  %v6054_v42 = vmul.f32 0.5, %v5928_v55  ;;  %v17716_v60 = vld [vmem:[#allocation17_spill] sm:$0xff]  ;;  %v7228_v35 = vld [vmem:[%s17643_s7 + $0x810] sm:$0xff] }
 0x45e   :  { %10575 = vmatpush3.msra.mxu1 %v7201_v11  ;;  %10611 = vmatprep.subr.mxu0 %v7248_v56  ;;  %v5701_v11 = vmul.f32 0.5, %v5616_v0  ;;  %v7197_v56 = vld [vmem:[%s17643_s7 + $0x718] sm:$0xff]  ;;  %v4291_v45 = vmax.f32 %v17717_v51, 0.0  ;;  %v7196_v29 = vld [vmem:[%s17643_s7 + $0x710] sm:$0xff]  ;;  %v6491_v3 = vrot.slane %v16222_v9, %v15222_v6  ;;  %v6088_v26 = vadd.f32 1e-05, %v6052_v31 }
 0x45f   :  { %10576 = vmatprep.subr.mxu1 %v7216_v54  ;;  %10612 = vmatpush3.msra.mxu0 %v7232_v34  ;;  %v4293_v54 = vmax.f32 %v17716_v60, 0.0  ;;  %v6600_v34 = vadd.f32 %v6471_v7, %v6379_v36  ;;  %v5703_v0 = vmul.f32 0.5, %v5630_v17  ;;  %v5936_v36 = vsel %vm5420_vm0, %v5768_v5, 0.0  ;;  %v7195_v7 = vld [vmem:[%s17643_s7 + $0x708] sm:$0xff]  ;;  %v7194_v17 = vld [vmem:[%s17643_s7 + $0x700] sm:$0xff] }
 0x460   :  { %10577 = vmatpush3.msra.mxu1 %v7200_v14  ;;  %10613 = vmatprep.subr.mxu0 %v7247_v12  ;;  %v6634_v14 = vmax.f32 %v16435_v13, 0.0  ;;  %v5949_v12 = vadd.f32 %v5948_v8, %v5947_v24  ;;  %v7211_v24 = vld [vmem:[%s17643_s7 + $0x788] sm:$0xff]  ;;  %v5770_v55 = vmul.f32 %v16477_v40, %v16477_v40  ;;  %v6090_v8 = vadd.f32 1e-05, %v6054_v42  ;;  %v17719_v5 = vld [vmem:[#allocation20_spill] sm:$0xff] }
 0x461   :  { %10578 = vmatprep.subr.mxu1 %v7215_v20  ;;  %10614 = vmatpush3.msra.mxu0 %v7231_v16  ;;  %v7243_v20 = vld [vmem:[%s17643_s7 + $0x888] sm:$0xff]  ;;  %v6384_v16 = vmul.f32 %v6270_v44, %v6163_v46  ;;  %v7242_v46 = vld [vmem:[%s17643_s7 + $0x880] sm:$0xff]  ;;  %v5603_v44 = vsel %vm5420_vm0, %v4291_v45, 0.0 }
 0x462   :  { %10579 = vmatpush3.msra.mxu1 %v7199_v10  ;;  %10615 = vmatprep.subr.mxu0 %v7246_v47  ;;  %v7227_v13 = vld [vmem:[%s17643_s7 + $0x808] sm:$0xff]  ;;  %v6382_v10 = vmul.f32 %v6262_v2, %v6161_v50  ;;  %v6483_v47 = vrot.slane %v16222_v9, %v14904_v48  ;;  %v16541_v2 = vsub.f32 %v4294_v52, %v5703_v0  ;;  %v7305_v52 = vld [vmem:[%s17643_s7 + $0xa78] sm:$0xff]  ;;  %12120 = vrsqrt.f32 %v6090_v8  ;;  %v7258_v51 = vld [vmem:[%s17643_s7 + $0x900] sm:$0xff] }
 0x463   :  { %10580 = vmatprep.subr.mxu1 %v7214_v4  ;;  %10616 = vmatpush3.msra.mxu0 %v7230_v32  ;;  %v5963_v4 = vadd.f32 %v5962_v59, %v5961_v39  ;;  %v16515_v32 = vsub.f32 %v4292_v63, %v5701_v11  ;;  %v7226_v63 = vld [vmem:[%s17643_s7 + $0x800] sm:$0xff]  ;;  %v6636_v39 = vmax.f32 %v6600_v34, 0.0  ;;  %v17718_v31 = vld [vmem:[#allocation22_spill] sm:$0xff]  ;;  %v4296_v59 = vmax.f32 %v17719_v5, 0.0  ;;  %v7321_v11 = vld [vmem:[%s17643_s7 + $0xaf8] sm:$0xff] }
 0x464   :  { %10581 = vmatpush3.msra.mxu1 %v7198_v41  ;;  %10617 = vmatprep.subr.mxu0 %v7245_v62  ;;  %v5617_v41 = vsel %vm5420_vm0, %v4293_v54, 0.0  ;;  %v6057_v62 = vmul.f32 0.5, %v5949_v12  ;;  %v4298_v50 = vmax.f32 %v17718_v31, 0.0  ;;  %v5604_v34 = vrot.slane %v5603_v44, 4  ;;  %v7273_v12 = vld [vmem:[%s17643_s7 + $0x978] sm:$0xff]  ;;  %v7319_v8 = vld [vmem:[%s17643_s7 + $0xae8] sm:$0xff] }
 0x465   :  { %10582 = vmatprep.subr.mxu1 %v7213_v30  ;;  %10618 = vmatpush3.msra.mxu0 %v7229_v49  ;;  %v6605_v30 = vadd.f32 %v6491_v3, %v6384_v16  ;;  %v5937_v49 = vrot.slane %v5936_v36, 4  ;;  %v6059_v42 = vmul.f32 0.5, %v5963_v4  ;;  %12122 = vrsqrt.f32 %v6088_v26  ;;  %v7320_v3 = vld [vmem:[%s17643_s7 + $0xaf0] sm:$0xff]  ;;  %v7353_v31 = vld [vmem:[%s17643_s7 + $0xbf8] sm:$0xff] }
 0x466   :  { %10583 = vmatpush3.msra.mxu1 %v7197_v56  ;;  %10619 = vmatprep.subr.mxu0 %v7244_v27  ;;  %v6603_v56 = vadd.f32 %v6483_v47, %v6382_v10  ;;  %v5950_v27 = vsel %vm5420_vm0, %v5770_v55, 0.0  ;;  %v5638_v26 = vsel %vm5420_vm0, %v4296_v59, 0.0  ;;  %v7304_v10 = vld [vmem:[%s17643_s7 + $0xa70] sm:$0xff] }
 0x467   :  { %10584 = vmatprep.subr.mxu1 %v7212_v19  ;;  %10620 = vmatpush3.msra.mxu0 %v7228_v35  ;;  %v5773_v19 = vmul.f32 %v16515_v32, %v16515_v32  ;;  %v5618_v35 = vrot.slane %v5617_v41, 4  ;;  %v6641_v16 = vmax.f32 %v6605_v30, 0.0  ;;  %v5951_v0 = vrot.slane %v5950_v27, 4 }
 0x468   :  { %10585 = vmatpush3.msra.mxu1 %v7196_v29  ;;  %10621 = vmatprep.subr.mxu0 %v7243_v20  ;;  %v6093_v29 = vadd.f32 1e-05, %v6057_v62  ;;  %v5652_v20 = vsel %vm5420_vm0, %v4298_v50, 0.0  ;;  %v5938_v47 = vadd.f32 %v5937_v49, %v5936_v36  ;;  %v6095_v55 = vadd.f32 1e-05, %v6059_v42  ;;  %v7287_v36 = vld [vmem:[%s17643_s7 + $0x9e8] sm:$0xff] }
 0x469   :  { %10586 = vmatprep.subr.mxu1 %v7211_v24  ;;  %10622 = vmatpush3.msra.mxu0 %v7227_v13  ;;  %v5775_v24 = vmul.f32 %v16541_v2, %v16541_v2  ;;  %v6639_v13 = vmax.f32 %v6603_v56, 0.0  ;;  %v5971_v4 = vsel %vm5420_vm0, %v5773_v19, 0.0  ;;  %v7271_v62 = vld [vmem:[%s17643_s7 + $0x968] sm:$0xff]  ;;  %v7302_v56 = vld [vmem:[%s17643_s7 + $0xa60] sm:$0xff] }
 0x46a   :  { %10587 = vmatpush3.msra.mxu1 %v7195_v7  ;;  %10623 = vmatprep.subr.mxu0 %v7242_v46  ;;  %v5619_v7 = vadd.f32 %v5618_v35, %v5617_v41  ;;  %v7272_v46 = vld [vmem:[%s17643_s7 + $0x970] sm:$0xff]  ;;  %v7303_v41 = vld [vmem:[%s17643_s7 + $0xa68] sm:$0xff]  ;;  %12124 = vrsqrt.f32 %v6093_v29  ;;  %v5972_v30 = vrot.slane %v5971_v4, 4  ;;  %v5939_v42 = vrot.slane %v5938_v47, 2  ;;  %v7317_v35 = vld [vmem:[%s17643_s7 + $0xad8] sm:$0xff] }
 0x46b   :  { %10588 = vmatprep.subr.mxu1 %v7210_v1  ;;  %10624 = vmatpush3.msra.mxu0 %v7226_v63  ;;  %v5605_v1 = vadd.f32 %v5604_v34, %v5603_v44  ;;  %v5653_v63 = vrot.slane %v5652_v20, 4  ;;  %v7318_v44 = vld [vmem:[%s17643_s7 + $0xae0] sm:$0xff]  ;;  %v5985_v49 = vsel %vm5420_vm0, %v5775_v24, 0.0  ;;  %12126 = vrsqrt.f32 %v6095_v55  ;;  %v7285_v34 = vld [vmem:[%s17643_s7 + $0x9d8] sm:$0xff]  ;;  %v7268_v55 = vld [vmem:[%s17643_s7 + $0x950] sm:$0xff] }
 0x46c   :  { %10589 = vmatpush3.msra.mxu1 %v7194_v17  ;;  %8665 = vmatmul.mubr.f32.vlgmr.msra.gmra.mxu0 %v6636_v39  ;;  %v5639_v39 = vrot.slane %v5638_v26, 4  ;;  %v5952_v17 = vadd.f32 %v5951_v0, %v5950_v27  ;;  %v5620_v19 = vrot.slane %v5619_v7, 2  ;;  %v7270_v27 = vld [vmem:[%s17643_s7 + $0x960] sm:$0xff]  ;;  %v5986_v29 = vrot.slane %v5985_v49, 4 }
 0x46d   :  { %10663 = vmatprep.subr.mxu0 %v7321_v11  ;;  %8595 = vmatmul.mubr.f32.vlgmr.msra.gmra.mxu1 %v6634_v14  ;;  %v7288_v14 = vld [vmem:[%s17643_s7 + $0x9f0] sm:$0xff]  ;;  %v7286_v11 = vld [vmem:[%s17643_s7 + $0x9e0] sm:$0xff]  ;;  %v5973_v24 = vadd.f32 %v5972_v30, %v5971_v4  ;;  %v7315_v4 = vld [vmem:[%s17643_s7 + $0xac8] sm:$0xff] }
 0x46e   :  { %10628 = vmatprep.subr.mxu1 %v7289_v22  ;;  %10664 = vmatpush3.msra.mxu0 %v7305_v52  ;;  %v5606_v22 = vrot.slane %v5605_v1, 2  ;;  %v5654_v52 = vadd.f32 %v5653_v63, %v5652_v20  ;;  %v7316_v20 = vld [vmem:[%s17643_s7 + $0xad0] sm:$0xff]  ;;  %v5953_v0 = vrot.slane %v5952_v17, 2  ;;  %v7283_v63 = vld [vmem:[%s17643_s7 + $0x9c8] sm:$0xff] }
 0x46f   :  { %8804 = vmatprep.mubr.f32.mxu0 %v6641_v16  ;;  %10629 = vmatpush3.msra.mxu1 %v7273_v12  ;;  %v7301_v12 = vld [vmem:[%s17643_s7 + $0xa58] sm:$0xff]  ;;  %v5640_v16 = vadd.f32 %v5639_v39, %v5638_v26  ;;  %v7300_v26 = vld [vmem:[%s17643_s7 + $0xa50] sm:$0xff]  ;;  %v7314_v39 = vld [vmem:[%s17643_s7 + $0xac0] sm:$0xff]  ;;  %v5974_v30 = vrot.slane %v5973_v24, 2 }
 0x470   :  { %8734 = vmatprep.mubr.f32.mxu1 %v6639_v13  ;;  %10665 = vmatprep.subr.mxu0 %v7320_v3  ;;  %v7269_v3 = vld [vmem:[%s17643_s7 + $0x958] sm:$0xff]  ;;  %v7284_v13 = vld [vmem:[%s17643_s7 + $0x9d0] sm:$0xff] }
 0x471   :  { %10630 = vmatprep.subr.mxu1 %v7288_v14  ;;  %10666 = vmatpush3.msra.mxu0 %v7304_v10  ;;  %v5940_v14 = vadd.f32 %v5939_v42, %v5938_v47  ;;  %v5621_v10 = vadd.f32 %v5620_v19, %v5619_v7  ;;  %v7299_v47 = vld [vmem:[%s17643_s7 + $0xa48] sm:$0xff]  ;;  %v12121_v7 = vpop.eup %12120  ;;  %v10223_v19 = vpop.f32.mrf.mxu0 }
 0x472   :  { %10631 = vmatpush3.msra.mxu1 %v7272_v46  ;;  %10667 = vmatprep.subr.mxu0 %v7319_v8  ;;  %v5607_v46 = vadd.f32 %v5606_v22, %v5605_v1  ;;  %v5655_v8 = vrot.slane %v5654_v52, 2  ;;  %v7267_v1 = vld [vmem:[%s17643_s7 + $0x948] sm:$0xff]  ;;  %v6266_v22 = vrot.slane %v16161_v23, %v13742_v58 }
 0x473   :  { %10632 = vmatprep.subr.mxu1 %v7287_v36  ;;  %10668 = vmatpush3.msra.mxu0 %v7303_v41  ;;  %v5987_v36 = vadd.f32 %v5986_v29, %v5985_v49  ;;  %v5641_v41 = vrot.slane %v5640_v16, 2  ;;  %v7282_v49 = vld [vmem:[%s17643_s7 + $0x9c0] sm:$0xff]  ;;  %v5622_v42 = vrot.slane %v5621_v10, 1  ;;  %v7281_v29 = vld [vmem:[%s17643_s7 + $0x9b8] sm:$0xff] }
 0x474   :  { %10633 = vmatpush3.msra.mxu1 %v7271_v62  ;;  %10669 = vmatprep.subr.mxu0 %v7318_v44  ;;  %v12123_v62 = vpop.eup %12122  ;;  %v5954_v44 = vadd.f32 %v5953_v0, %v5952_v17  ;;  %v7266_v17 = vld [vmem:[%s17643_s7 + $0x940] sm:$0xff] }
 0x475   :  { %10634 = vmatprep.subr.mxu1 %v7286_v11  ;;  %10670 = vmatpush3.msra.mxu0 %v7302_v56  ;;  %v7298_v11 = vld [vmem:[%s17643_s7 + $0xa40] sm:$0xff]  ;;  %v5941_v56 = vrot.slane %v5940_v14, 1  ;;  %v16667_v0 = vadd.f32 %v5641_v41, %v5640_v16  ;;  %v7280_v16 = vld [vmem:[%s17643_s7 + $0x9b0] sm:$0xff]  ;;  %v10224_v41 = vpop.f32.mrf.mxu0 }
 0x476   :  { %10635 = vmatpush3.msra.mxu1 %v7270_v27  ;;  %10671 = vmatprep.subr.mxu0 %v7317_v35  ;;  %v7313_v27 = vld [vmem:[%s17643_s7 + $0xab8] sm:$0xff]  ;;  %v6162_v35 = vmul.f32 %v12121_v7, %v16200_v43  ;;  %v5623_v7 = vadd.f32 %v5622_v42, %v5621_v10  ;;  %v7295_v10 = vld [vmem:[%s17643_s7 + $0xa28] sm:$0xff] }
 0x477   :  { %10636 = vmatprep.subr.mxu1 %v7285_v34  ;;  %10672 = vmatpush3.msra.mxu0 %v7301_v12  ;;  %v5608_v34 = vrot.slane %v5607_v46, 1  ;;  %v16659_v12 = vadd.f32 %v5655_v8, %v5654_v52  ;;  %v7265_v43 = vld [vmem:[%s17643_s7 + $0x938] sm:$0xff]  ;;  %v7312_v52 = vld [vmem:[%s17643_s7 + $0xab0] sm:$0xff]  ;;  %v16678_v8 = vadd.f32 %v5974_v30, %v5973_v24  ;;  %v7311_v24 = vld [vmem:[%s17643_s7 + $0xaa8] sm:$0xff] }
 0x478   :  { %10637 = vmatpush3.msra.mxu1 %v7269_v3  ;;  %10673 = vmatprep.subr.mxu0 %v7316_v20  ;;  %v7297_v3 = vld [vmem:[%s17643_s7 + $0xa38] sm:$0xff]  ;;  %v5988_v20 = vrot.slane %v5987_v36, 2  ;;  %v7263_v42 = vld [vmem:[%s17643_s7 + $0x928] sm:$0xff] }
 0x479   :  { %10638 = vmatprep.subr.mxu1 %v7284_v13  ;;  %10674 = vmatpush3.msra.mxu0 %v7300_v26  ;;  %v12125_v13 = vpop.eup %12124  ;;  %v6160_v26 = vmul.f32 %v12123_v62, %v16165_v53  ;;  %v7264_v53 = vld [vmem:[%s17643_s7 + $0x930] sm:$0xff]  ;;  %v5609_v62 = vadd.f32 %v5608_v34, %v5607_v46  ;;  %v5657_v30 = vrot.slane %v16659_v12, 1  ;;  %v5643_v46 = vrot.slane %v16667_v0, 1 }
 0x47a   :  { %10639 = vmatpush3.msra.mxu1 %v7268_v55  ;;  %10675 = vmatprep.subr.mxu0 %v7315_v4  ;;  %v6258_v55 = vrot.slane %v16161_v23, %v17711_v25  ;;  %v5955_v4 = vrot.slane %v5954_v44, 1  ;;  %v10225_v34 = vadd.f32 %v10224_v41, %v10223_v19  ;;  %v7309_v19 = vld [vmem:[%s17643_s7 + $0xa98] sm:$0xff] }
 0x47b   :  { %10640 = vmatprep.subr.mxu1 %v7283_v63  ;;  %10676 = vmatpush3.msra.mxu0 %v7299_v47  ;;  %v7296_v63 = vld [vmem:[%s17643_s7 + $0xa30] sm:$0xff]  ;;  %v5942_v47 = vadd.f32 %v5941_v56, %v5940_v14  ;;  %v7279_v14 = vld [vmem:[%s17643_s7 + $0x9a8] sm:$0xff]  ;;  %v16702_v56 = vadd.f32 %v5988_v20, %v5987_v36  ;;  %v5702_v20 = vmul.f32 0.5, %v5623_v7  ;;  %v5644_v41 = vadd.f32 %v5643_v46, %v16667_v0 }
 0x47c   :  { %10641 = vmatpush3.msra.mxu1 %v7267_v1  ;;  %10677 = vmatprep.subr.mxu0 %v7314_v39  ;;  %v12127_v1 = vpop.eup %12126  ;;  %v6383_v39 = vmul.f32 %v6266_v22, %v6162_v35  ;;  %v16713_v35 = vmul.f32 %v6258_v55, %v6160_v26  ;;  %v5956_v36 = vadd.f32 %v5955_v4, %v5954_v44  ;;  %v5976_v22 = vrot.slane %v16678_v8, 1  ;;  %v7262_v44 = vld [vmem:[%s17643_s7 + $0x920] sm:$0xff]  ;;  %v7277_v4 = vld [vmem:[%s17643_s7 + $0x998] sm:$0xff] }
 0x47d   :  { %10642 = vmatprep.subr.mxu1 %v7282_v49  ;;  %10678 = vmatpush3.msra.mxu0 %v7298_v11  ;;  %v6487_v49 = vrot.slane %v16222_v9, %v13742_v58  ;;  %v6165_v11 = vmul.f32 %v12125_v13, %v16258_v33  ;;  %v16718_v33 = vld [vmem:[%s17639_s3 + $0x18] sm:$0xff]  ;;  %v6056_v26 = vmul.f32 0.5, %v5942_v47  ;;  %v5658_v55 = vadd.f32 %v5657_v30, %v16659_v12  ;;  %v7308_v47 = vld [vmem:[%s17643_s7 + $0xa90] sm:$0xff] }
 0x47e   :  { %10643 = vmatpush3.msra.mxu1 %v7266_v17  ;;  %10679 = vmatprep.subr.mxu0 %v7313_v27  ;;  %v7310_v17 = vld [vmem:[%s17643_s7 + $0xaa0] sm:$0xff]  ;;  %v6278_v27 = vrot.slane %v16161_v23, %v13779_v57  ;;  %v6286_v13 = vrot.slane %v16718_v33, %v14894_v38  ;;  %v5990_v7 = vrot.slane %v16702_v56, 1  ;;  %v7261_v12 = vld [vmem:[%s17643_s7 + $0x918] sm:$0xff]  ;;  %v7827_v0 = vadd.f32 %v10225_v34, %v16267_v61  ;;  %v7276_v30 = vld [vmem:[%s17643_s7 + $0x990] sm:$0xff] }
 0x47f   :  { %10644 = vmatprep.subr.mxu1 %v7281_v29  ;;  %10680 = vmatpush3.msra.mxu0 %v7297_v3  ;;  %v7278_v29 = vld [vmem:[%s17643_s7 + $0x9a0] sm:$0xff]  ;;  %v6167_v3 = vmul.f32 %v12127_v1, %v16276_v37  ;;  %v5700_v37 = vmul.f32 0.5, %v5609_v62  ;;  %v5977_v62 = vadd.f32 %v5976_v22, %v16678_v8  ;;  %v16772_v8 = vsub.f32 %v4293_v54, %v5702_v20  ;;  %v7260_v61 = vld [vmem:[%s17643_s7 + $0x910] sm:$0xff]  ;;  %v7291_v22 = vld [vmem:[%s17643_s7 + $0xa08] sm:$0xff] }
 0x480   :  { %10645 = vmatpush3.msra.mxu1 %v7265_v43  ;;  %10681 = vmatprep.subr.mxu0 %v7312_v52  ;;  %v7294_v23 = vld [vmem:[%s17643_s7 + $0xa20] sm:$0xff]  ;;  %v6479_v52 = vrot.slane %v16222_v9, %v17711_v25  ;;  %v5707_v54 = vmul.f32 0.5, %v5658_v55  ;;  %v7259_v20 = vld [vmem:[%s17643_s7 + $0x908] sm:$0xff] }
 0x481   :  { %10646 = vmatprep.subr.mxu1 %v7280_v16  ;;  %10682 = vmatpush3.msra.mxu0 %v7296_v63  ;;  %v7293_v16 = vld [vmem:[%s17643_s7 + $0xa18] sm:$0xff]  ;;  %v16745_v63 = vadd.f32 %v6487_v49, %v6383_v39  ;;  %v6058_v39 = vmul.f32 0.5, %v5956_v36  ;;  %v7307_v49 = vld [vmem:[%s17643_s7 + $0xa88] sm:$0xff] }
 0x482   :  { %10647 = vmatpush3.msra.mxu1 %v7264_v53  ;;  %10683 = vmatprep.subr.mxu0 %v7311_v24  ;;  %v6386_v53 = vmul.f32 %v6278_v27, %v6165_v11  ;;  %v6499_v24 = vrot.slane %v16222_v9, %v13779_v57  ;;  %v16768_v9 = vld [vmem:[%s17640_s4 + $0x18] sm:$0xff]  ;;  %v6388_v11 = vmul.f32 %v6286_v13, %v6167_v3  ;;  %v17721_v27 = vld [vmem:[#allocation21_spill] sm:$0xff]  ;;  %v5705_v3 = vmul.f32 0.5, %v5644_v41 }
 0x483   :  { %10648 = vmatprep.subr.mxu1 %v7279_v14  ;;  %10684 = vmatpush3.msra.mxu0 %v7295_v10  ;;  %v10258_v43 = vpop.f32.mrf.mxu1  ;;  %v7292_v14 = vld [vmem:[%s17643_s7 + $0xa10] sm:$0xff]  ;;  %v6507_v46 = vrot.slane %v16768_v9, %v14894_v38  ;;  %v4297_v60 = vmax.f32 %v17721_v27, 0.0  ;;  %v7275_v36 = vld [vmem:[%s17643_s7 + $0x988] sm:$0xff]  ;;  %v16802_v13 = vsub.f32 %v4291_v45, %v5700_v37  ;;  %v6640_v45 = vmax.f32 %v16745_v63, 0.0 }
 0x484   :  { %10649 = vmatpush3.msra.mxu1 %v7263_v42  ;;  %10685 = vmatprep.subr.mxu0 %v7310_v17  ;;  %v17720_v42 = vld [vmem:[#allocation18_spill] sm:$0xff]  ;;  %v16825_v41 = vsub.f32 %v4298_v50, %v5707_v54  ;;  %v6607_v63 = vadd.f32 %v6499_v24, %v6386_v53  ;;  %v7369_v50 = vld [vmem:[%s17643_s7 + $0xc78] sm:$0xff] }
 0x485   :  { %10650 = vmatprep.subr.mxu1 %v7278_v29  ;;  %10686 = vmatpush3.msra.mxu0 %v7294_v23  ;;  %v10259_v1 = vpop.f32.mrf.mxu1  ;;  %v4295_v17 = vmax.f32 %v17720_v42, 0.0  ;;  %v6092_v29 = vadd.f32 1e-05, %v6056_v26  ;;  %v5991_v23 = vadd.f32 %v5990_v7, %v16702_v56  ;;  %v6061_v26 = vmul.f32 0.5, %v5977_v62  ;;  %v17722_v56 = vld [vmem:[#allocation23_spill] sm:$0xff]  ;;  %v7338_v42 = vld [vmem:[%s17643_s7 + $0xb80] sm:$0xff] }
 0x486   :  { %10651 = vmatpush3.msra.mxu1 %v7262_v44  ;;  %10687 = vmatprep.subr.mxu0 %v7309_v19  ;;  %v10260_v10 = vadd.f32 %v10259_v1, %v10258_v43  ;;  %v7306_v44 = vld [vmem:[%s17643_s7 + $0xa80] sm:$0xff]  ;;  %v6602_v19 = vadd.f32 %v6479_v52, %v16713_v35  ;;  %v6094_v43 = vadd.f32 1e-05, %v6058_v39  ;;  %v4300_v55 = vmax.f32 %v17722_v56, 0.0 }
 0x487   :  { %10652 = vmatprep.subr.mxu1 %v7277_v4  ;;  %10688 = vmatpush3.msra.mxu0 %v7293_v16  ;;  %v7274_v4 = vld [vmem:[%s17643_s7 + $0x980] sm:$0xff]  ;;  %v5774_v35 = vmul.f32 %v16772_v8, %v16772_v8  ;;  %v6609_v52 = vadd.f32 %v6507_v46, %v6388_v11  ;;  %v5631_v37 = vsel %vm5420_vm0, %v4295_v17, 0.0  ;;  %v5645_v7 = vsel %vm5420_vm0, %v4297_v60, 0.0  ;;  %v7352_v11 = vld [vmem:[%s17643_s7 + $0xbf0] sm:$0xff] }
 0x488   :  { %10653 = vmatpush3.msra.mxu1 %v7261_v12  ;;  %10689 = vmatprep.subr.mxu0 %v7308_v47  ;;  %v16790_v34 = vadd.f32 %v10260_v10, %v7827_v0  ;;  %v7290_v16 = vld [vmem:[%s17643_s7 + $0xa00] sm:$0xff]  ;;  %v7385_v12 = vld [vmem:[%s17643_s7 + $0xcf8] sm:$0xff]  ;;  %12128 = vrsqrt.f32 %v6092_v29  ;;  %v6063_v47 = vmul.f32 0.5, %v5991_v23  ;;  %v16832_v1 = vsub.f32 %v4296_v59, %v5705_v3  ;;  %v7384_v10 = vld [vmem:[%s17643_s7 + $0xcf0] sm:$0xff] }
 0x489   :  { %10654 = vmatprep.subr.mxu1 %v7276_v30  ;;  %10690 = vmatpush3.msra.mxu0 %v7292_v14  ;;  %v6638_v39 = vmax.f32 %v6602_v19, 0.0  ;;  %12130 = vrsqrt.f32 %v6094_v43  ;;  %v5772_v53 = vmul.f32 %v16802_v13, %v16802_v13  ;;  %v6097_v24 = vadd.f32 1e-05, %v6061_v26  ;;  %v7337_v59 = vld [vmem:[%s17643_s7 + $0xb78] sm:$0xff]  ;;  %v7368_v46 = vld [vmem:[%s17643_s7 + $0xc70] sm:$0xff]  ;;  %v7383_v23 = vld [vmem:[%s17643_s7 + $0xce8] sm:$0xff] }
 0x48a   :  { %10655 = vmatpush3.msra.mxu1 %v7260_v61  ;;  %10691 = vmatprep.subr.mxu0 %v7307_v49  ;;  %v5666_v5 = vsel %vm5420_vm0, %v4300_v55, 0.0  ;;  %v5978_v62 = vsel %vm5420_vm0, %v5774_v35, 0.0  ;;  %v5632_v0 = vrot.slane %v5631_v37, 4  ;;  %v5646_v30 = vrot.slane %v5645_v7, 4  ;;  %v7336_v29 = vld [vmem:[%s17643_s7 + $0xb70] sm:$0xff]  ;;  %v7367_v19 = vld [vmem:[%s17643_s7 + $0xc68] sm:$0xff] }
 0x48b   :  { %10656 = vmatprep.subr.mxu1 %v7275_v36  ;;  %10692 = vmatpush3.msra.mxu0 %v7291_v22  ;;  %v6645_v14 = vmax.f32 %v6609_v52, 0.0  ;;  %v5779_v61 = vmul.f32 %v16825_v41, %v16825_v41  ;;  %v6643_v49 = vmax.f32 %v6607_v63, 0.0  ;;  %v6099_v54 = vadd.f32 1e-05, %v6063_v47  ;;  %v7381_v63 = vld [vmem:[%s17643_s7 + $0xcd8] sm:$0xff] }
 0x48c   :  { %10657 = vmatpush3.msra.mxu1 %v7259_v20  ;;  %10693 = vmatprep.subr.mxu0 %v7306_v44  ;;  %v5777_v36 = vmul.f32 %v16832_v1, %v16832_v1  ;;  %v5667_v22 = vrot.slane %v5666_v5, 4  ;;  %v5964_v3 = vsel %vm5420_vm0, %v5772_v53, 0.0  ;;  %12132 = vrsqrt.f32 %v6097_v24  ;;  %v7351_v44 = vld [vmem:[%s17643_s7 + $0xbe8] sm:$0xff] }
 0x48d   :  { %10658 = vmatprep.subr.mxu1 %v7274_v4  ;;  %10694 = vmatpush3.msra.mxu0 %v7290_v16  ;;  %v5979_v20 = vrot.slane %v5978_v62, 4  ;;  %v5633_v43 = vadd.f32 %v5632_v0, %v5631_v37  ;;  %v5647_v26 = vadd.f32 %v5646_v30, %v5645_v7  ;;  %v7335_v4 = vld [vmem:[%s17643_s7 + $0xb68] sm:$0xff]  ;;  %v7382_v16 = vld [vmem:[%s17643_s7 + $0xce0] sm:$0xff]  ;;  %v6013_v35 = vsel %vm5420_vm0, %v5779_v61, 0.0  ;;  %v7348_v0 = vld [vmem:[%s17643_s7 + $0xbd0] sm:$0xff] }
 0x48e   :  { %10659 = vmatpush3.msra.mxu1 %v7258_v51  ;;  %8805 = vmatmul.mubr.f32.vlgmr.msra.gmra.mxu0 %v6640_v45  ;;  %v7350_v51 = vld [vmem:[%s17643_s7 + $0xbe0] sm:$0xff]  ;;  %v5965_v52 = vrot.slane %v5964_v3, 4  ;;  %12134 = vrsqrt.f32 %v6099_v54  ;;  %v5999_v37 = vsel %vm5420_vm0, %v5777_v36, 0.0  ;;  %v5668_v7 = vadd.f32 %v5667_v22, %v5666_v5  ;;  %v7333_v5 = vld [vmem:[%s17643_s7 + $0xb58] sm:$0xff]  ;;  %v7364_v30 = vld [vmem:[%s17643_s7 + $0xc50] sm:$0xff] }
 0x48f   :  { %10733 = vmatprep.subr.mxu0 %v7385_v12  ;;  %8735 = vmatmul.mubr.f32.vlgmr.msra.gmra.mxu1 %v6638_v39  ;;  %v7366_v45 = vld [vmem:[%s17643_s7 + $0xc60] sm:$0xff]  ;;  %v5980_v47 = vadd.f32 %v5979_v20, %v5978_v62  ;;  %v7349_v39 = vld [vmem:[%s17643_s7 + $0xbd8] sm:$0xff]  ;;  %v5648_v53 = vrot.slane %v5647_v26, 2  ;;  %v6014_v24 = vrot.slane %v6013_v35, 4  ;;  %v6000_v62 = vrot.slane %v5999_v37, 4  ;;  %v7332_v61 = vld [vmem:[%s17643_s7 + $0xb50] sm:$0xff] }
 0x490   :  { %10698 = vmatprep.subr.mxu1 %v7353_v31  ;;  %10734 = vmatpush3.msra.mxu0 %v7369_v50  ;;  %v7334_v12 = vld [vmem:[%s17643_s7 + $0xb60] sm:$0xff]  ;;  %v7365_v31 = vld [vmem:[%s17643_s7 + $0xc58] sm:$0xff]  ;;  %v5634_v50 = vrot.slane %v5633_v43, 2  ;;  %v7347_v54 = vld [vmem:[%s17643_s7 + $0xbc8] sm:$0xff] }
 0x491   :  { %8944 = vmatprep.mubr.f32.mxu0 %v6645_v14  ;;  %10699 = vmatpush3.msra.mxu1 %v7337_v59  ;;  %v7380_v59 = vld [vmem:[%s17643_s7 + $0xcd0] sm:$0xff]  ;;  %v5966_v14 = vadd.f32 %v5965_v52, %v5964_v3  ;;  %v7363_v36 = vld [vmem:[%s17643_s7 + $0xc48] sm:$0xff]  ;;  %v6015_v3 = vadd.f32 %v6014_v24, %v6013_v35  ;;  %v10293_v52 = vpop.f32.mrf.mxu0 }
 0x492   :  { %8874 = vmatprep.mubr.f32.mxu1 %v6643_v49  ;;  %10735 = vmatprep.subr.mxu0 %v7384_v10  ;;  %v5669_v10 = vrot.slane %v5668_v7, 2  ;;  %v7379_v49 = vld [vmem:[%s17643_s7 + $0xcc8] sm:$0xff] }
 0x493   :  { %10700 = vmatprep.subr.mxu1 %v7352_v11  ;;  %10736 = vmatpush3.msra.mxu0 %v7368_v46  ;;  %v5981_v46 = vrot.slane %v5980_v47, 2  ;;  %v7331_v20 = vld [vmem:[%s17643_s7 + $0xb48] sm:$0xff] }
 0x494   :  { %10701 = vmatpush3.msra.mxu1 %v7336_v29  ;;  %10737 = vmatprep.subr.mxu0 %v7383_v23  ;;  %v5635_v29 = vadd.f32 %v5634_v50, %v5633_v43  ;;  %v5649_v23 = vadd.f32 %v5648_v53, %v5647_v26  ;;  %v7362_v43 = vld [vmem:[%s17643_s7 + $0xc40] sm:$0xff] }
 0x495   :  { %10702 = vmatprep.subr.mxu1 %v7351_v44  ;;  %10738 = vmatpush3.msra.mxu0 %v7367_v19  ;;  %v12129_v11 = vpop.eup %12128  ;;  %v7378_v44 = vld [vmem:[%s17643_s7 + $0xcc0] sm:$0xff]  ;;  %v6001_v19 = vadd.f32 %v6000_v62, %v5999_v37  ;;  %v7344_v62 = vld [vmem:[%s17643_s7 + $0xbb0] sm:$0xff] }
 0x496   :  { %10703 = vmatpush3.msra.mxu1 %v7335_v4  ;;  %10739 = vmatprep.subr.mxu0 %v7382_v16  ;;  %v12131_v22 = vpop.eup %12130  ;;  %v7346_v4 = vld [vmem:[%s17643_s7 + $0xbc0] sm:$0xff]  ;;  %v6164_v26 = vmul.f32 %v12129_v11, %v16439_v28  ;;  %v12156_v16 = vld [vmem:[%s17639_s3 + $0x10] sm:$0xff]  ;;  %v5636_v53 = vrot.slane %v5635_v29, 1  ;;  %v5650_v24 = vrot.slane %v5649_v23, 1 }
 0x497   :  { %10704 = vmatprep.subr.mxu1 %v7350_v51  ;;  %10740 = vmatpush3.msra.mxu0 %v7366_v45  ;;  %v6274_v35 = vrot.slane %v12156_v16, %v13788_v21  ;;  %v5967_v51 = vrot.slane %v5966_v14, 2  ;;  %v5670_v45 = vadd.f32 %v5669_v10, %v5668_v7  ;;  %v7330_v37 = vld [vmem:[%s17643_s7 + $0xb40] sm:$0xff]  ;;  %v6166_v28 = vmul.f32 %v12131_v22, %v16477_v40  ;;  %v7345_v7 = vld [vmem:[%s17643_s7 + $0xbb8] sm:$0xff]  ;;  %v7328_v11 = vld [vmem:[%s17643_s7 + $0xb30] sm:$0xff] }
 0x498   :  { %10705 = vmatpush3.msra.mxu1 %v7334_v12  ;;  %10741 = vmatprep.subr.mxu0 %v7381_v63  ;;  %v7377_v12 = vld [vmem:[%s17643_s7 + $0xcb8] sm:$0xff]  ;;  %v6282_v63 = vrot.slane %v16718_v33, %v14881_v15 }
 0x499   :  { %10706 = vmatprep.subr.mxu1 %v7349_v39  ;;  %10742 = vmatpush3.msra.mxu0 %v7365_v31  ;;  %v5982_v39 = vadd.f32 %v5981_v46, %v5980_v47  ;;  %v7361_v31 = vld [vmem:[%s17643_s7 + $0xc38] sm:$0xff]  ;;  %v12133_v50 = vpop.eup %12132  ;;  %v7376_v47 = vld [vmem:[%s17643_s7 + $0xcb0] sm:$0xff]  ;;  %v5968_v10 = vadd.f32 %v5967_v51, %v5966_v14  ;;  %v7375_v46 = vld [vmem:[%s17643_s7 + $0xca8] sm:$0xff] }
 0x49a   :  { %10707 = vmatpush3.msra.mxu1 %v7333_v5  ;;  %10743 = vmatprep.subr.mxu0 %v7380_v59  ;;  %v6016_v5 = vrot.slane %v6015_v3, 2  ;;  %v7329_v40 = vld [vmem:[%s17643_s7 + $0xb38] sm:$0xff]  ;;  %v6002_v59 = vrot.slane %v6001_v19, 2  ;;  %v16978_v22 = vmul.f32 %v12133_v50, %v16515_v32  ;;  %v7343_v14 = vld [vmem:[%s17643_s7 + $0xba8] sm:$0xff]  ;;  %v5651_v32 = vadd.f32 %v5650_v24, %v5649_v23  ;;  %v7374_v51 = vld [vmem:[%s17643_s7 + $0xca0] sm:$0xff] }
 0x49b   :  { %10708 = vmatprep.subr.mxu1 %v7348_v0  ;;  %10744 = vmatpush3.msra.mxu0 %v7364_v30  ;;  %v7360_v0 = vld [vmem:[%s17643_s7 + $0xc30] sm:$0xff]  ;;  %v6385_v30 = vmul.f32 %v6274_v35, %v6164_v26  ;;  %v5637_v26 = vadd.f32 %v5636_v53, %v5635_v29  ;;  %v7327_v35 = vld [vmem:[%s17643_s7 + $0xb28] sm:$0xff]  ;;  %v7342_v29 = vld [vmem:[%s17643_s7 + $0xba0] sm:$0xff]  ;;  %v6294_v24 = vrot.slane %v16718_v33, %v14904_v48 }
 0x49c   :  { %10709 = vmatpush3.msra.mxu1 %v7332_v61  ;;  %10745 = vmatprep.subr.mxu0 %v7379_v49  ;;  %v5671_v61 = vrot.slane %v5670_v45, 1  ;;  %v10294_v49 = vpop.f32.mrf.mxu0  ;;  %v6017_v16 = vadd.f32 %v6016_v5, %v6015_v3  ;;  %v7358_v23 = vld [vmem:[%s17643_s7 + $0xc20] sm:$0xff]  ;;  %v6503_v3 = vrot.slane %v16768_v9, %v14881_v15 }
 0x49d   :  { %10710 = vmatprep.subr.mxu1 %v7347_v54  ;;  %10746 = vmatpush3.msra.mxu0 %v7363_v36  ;;  %v12135_v54 = vpop.eup %12134  ;;  %v16975_v36 = vmul.f32 %v6282_v63, %v6166_v28  ;;  %v5969_v28 = vrot.slane %v5968_v10, 1  ;;  %v5704_v5 = vmul.f32 0.5, %v5637_v26 }
 0x49e   :  { %10711 = vmatpush3.msra.mxu1 %v7331_v20  ;;  %10747 = vmatprep.subr.mxu0 %v7378_v44  ;;  %v5983_v20 = vrot.slane %v5982_v39, 1  ;;  %v7359_v44 = vld [vmem:[%s17643_s7 + $0xc28] sm:$0xff]  ;;  %v6171_v63 = vmul.f32 %v12135_v54, %v16541_v2  ;;  %v7341_v2 = vld [vmem:[%s17643_s7 + $0xb98] sm:$0xff] }
 0x49f   :  { %10712 = vmatprep.subr.mxu1 %v7346_v4  ;;  %10748 = vmatpush3.msra.mxu0 %v7362_v43  ;;  %v12157_v4 = vld [vmem:[%s17640_s4 + $0x10] sm:$0xff] }
 0x4a0   :  { %10713 = vmatpush3.msra.mxu1 %v7330_v37  ;;  %10749 = vmatprep.subr.mxu0 %v7377_v12  ;;  %v6495_v43 = vrot.slane %v12157_v4, %v13788_v21  ;;  %v6003_v37 = vadd.f32 %v6002_v59, %v6001_v19  ;;  %v10295_v12 = vadd.f32 %v10294_v49, %v10293_v52  ;;  %v7326_v19 = vld [vmem:[%s17643_s7 + $0xb20] sm:$0xff]  ;;  %v7373_v52 = vld [vmem:[%s17643_s7 + $0xc98] sm:$0xff]  ;;  %v7372_v59 = vld [vmem:[%s17643_s7 + $0xc90] sm:$0xff] }
 0x4a1   :  { %10714 = vmatprep.subr.mxu1 %v7345_v7  ;;  %10750 = vmatpush3.msra.mxu0 %v7361_v31  ;;  %v5672_v7 = vadd.f32 %v5671_v61, %v5670_v45  ;;  %v6302_v31 = vrot.slane %v16718_v33, %v15222_v6  ;;  %v5984_v50 = vadd.f32 %v5983_v20, %v5982_v39  ;;  %v7357_v45 = vld [vmem:[%s17643_s7 + $0xc18] sm:$0xff]  ;;  %v7356_v61 = vld [vmem:[%s17643_s7 + $0xc10] sm:$0xff] }
 0x4a2   :  { %10715 = vmatpush3.msra.mxu1 %v7329_v40  ;;  %10751 = vmatprep.subr.mxu0 %v7376_v47  ;;  %v7967_v53 = vadd.f32 %v10295_v12, %v16790_v34  ;;  %v5706_v40 = vmul.f32 0.5, %v5651_v32  ;;  %v6018_v47 = vrot.slane %v6017_v16, 1  ;;  %v7325_v39 = vld [vmem:[%s17643_s7 + $0xb18] sm:$0xff]  ;;  %v7340_v34 = vld [vmem:[%s17643_s7 + $0xb90] sm:$0xff]  ;;  %v6606_v49 = vadd.f32 %v6495_v43, %v6385_v30  ;;  %v7355_v43 = vld [vmem:[%s17643_s7 + $0xc08] sm:$0xff] }
 0x4a3   :  { %10716 = vmatprep.subr.mxu1 %v7344_v62  ;;  %10752 = vmatpush3.msra.mxu0 %v7360_v0  ;;  %v6004_v0 = vrot.slane %v6003_v37, 1  ;;  %v5709_v54 = vmul.f32 0.5, %v5672_v7  ;;  %v7324_v20 = vld [vmem:[%s17643_s7 + $0xb10] sm:$0xff]  ;;  %v6523_v4 = vrot.slane %v16768_v9, %v15222_v6  ;;  %v6062_v30 = vmul.f32 0.5, %v5984_v50  ;;  %v7433_v50 = vld [vmem:[%s17643_s7 + $0xe78] sm:$0xff] }
 0x4a4   :  { %10717 = vmatpush3.msra.mxu1 %v7328_v11  ;;  %10753 = vmatprep.subr.mxu0 %v7375_v46  ;;  %v5970_v46 = vadd.f32 %v5969_v28, %v5968_v10  ;;  %v7339_v10 = vld [vmem:[%s17643_s7 + $0xb88] sm:$0xff]  ;;  %v6608_v32 = vadd.f32 %v6503_v3, %v16975_v36  ;;  %v17056_v6 = vsub.f32 %v4295_v17, %v5704_v5  ;;  %v7354_v17 = vld [vmem:[%s17643_s7 + $0xc00] sm:$0xff] }
 0x4a5   :  { %10718 = vmatprep.subr.mxu1 %v7343_v14  ;;  %10754 = vmatpush3.msra.mxu0 %v7359_v44  ;;  %v7371_v14 = vld [vmem:[%s17643_s7 + $0xc88] sm:$0xff]  ;;  %v6392_v44 = vmul.f32 %v6302_v31, %v6171_v63  ;;  %v17060_v12 = vsub.f32 %v4297_v60, %v5706_v40  ;;  %v17076_v60 = vsub.f32 %v4300_v55, %v5709_v54  ;;  %v6098_v3 = vadd.f32 1e-05, %v6062_v30  ;;  %v7449_v63 = vld [vmem:[%s17643_s7 + $0xef8] sm:$0xff]  ;;  %v7448_v40 = vld [vmem:[%s17643_s7 + $0xef0] sm:$0xff] }
 0x4a6   :  { %10719 = vmatpush3.msra.mxu1 %v7327_v35  ;;  %10755 = vmatprep.subr.mxu0 %v7374_v51  ;;  %v6390_v35 = vmul.f32 %v6294_v24, %v16978_v22  ;;  %v6515_v51 = vrot.slane %v16768_v9, %v14904_v48  ;;  %v7323_v36 = vld [vmem:[%s17643_s7 + $0xb08] sm:$0xff]  ;;  %v7370_v22 = vld [vmem:[%s17643_s7 + $0xc80] sm:$0xff]  ;;  %v6060_v27 = vmul.f32 0.5, %v5970_v46  ;;  %v6644_v28 = vmax.f32 %v6608_v32, 0.0  ;;  %v7417_v31 = vld [vmem:[%s17643_s7 + $0xdf8] sm:$0xff] }
 0x4a7   :  { %10720 = vmatprep.subr.mxu1 %v7342_v29  ;;  %10756 = vmatpush3.msra.mxu0 %v7358_v23  ;;  %v8036_v62 = vpop.f32.mrf.mxu1  ;;  %v6019_v29 = vadd.f32 %v6018_v47, %v6017_v16  ;;  %v6005_v23 = vadd.f32 %v6004_v0, %v6003_v37  ;;  %v7322_v16 = vld [vmem:[%s17643_s7 + $0xb00] sm:$0xff]  ;;  %v6613_v37 = vadd.f32 %v6523_v4, %v6392_v44  ;;  %12136 = vrsqrt.f32 %v6098_v3  ;;  %v7415_v54 = vld [vmem:[%s17643_s7 + $0xde8] sm:$0xff] }
 0x4a8   :  { %10721 = vmatpush3.msra.mxu1 %v7326_v19  ;;  %10757 = vmatprep.subr.mxu0 %v7373_v52  ;;  %v17034_v11 = vadd.f32 %v8036_v62, %v7967_v53  ;;  %v6611_v7 = vadd.f32 %v6515_v51, %v6390_v35  ;;  %v5776_v56 = vmul.f32 %v17056_v6, %v17056_v6  ;;  %v6642_v52 = vmax.f32 %v6606_v49, 0.0  ;;  %v7447_v49 = vld [vmem:[%s17643_s7 + $0xee8] sm:$0xff]  ;;  %v7446_v4 = vld [vmem:[%s17643_s7 + $0xee0] sm:$0xff]  ;;  %v7445_v35 = vld [vmem:[%s17643_s7 + $0xed8] sm:$0xff] }
 0x4a9   :  { %10722 = vmatprep.subr.mxu1 %v7341_v2  ;;  %10758 = vmatpush3.msra.mxu0 %v7357_v45  ;;  %v10979_v26 = vpop.f32.mrf.mxu1  ;;  %v5778_v55 = vmul.f32 %v17060_v12, %v17060_v12  ;;  %v6067_v19 = vmul.f32 0.5, %v6019_v29  ;;  %v6065_v2 = vmul.f32 0.5, %v6005_v23  ;;  %v7401_v45 = vld [vmem:[%s17643_s7 + $0xd78] sm:$0xff]  ;;  %v6096_v53 = vadd.f32 1e-05, %v6060_v27  ;;  %v7399_v44 = vld [vmem:[%s17643_s7 + $0xd68] sm:$0xff] }
 0x4aa   :  { %10723 = vmatpush3.msra.mxu1 %v7325_v39  ;;  %10759 = vmatprep.subr.mxu0 %v7372_v59  ;;  %v5781_v24 = vmul.f32 %v17076_v60, %v17076_v60  ;;  %v6649_v5 = vmax.f32 %v6613_v37, 0.0  ;;  %v6647_v47 = vmax.f32 %v6611_v7, 0.0  ;;  %v7416_v39 = vld [vmem:[%s17643_s7 + $0xdf0] sm:$0xff]  ;;  %v5992_v62 = vsel %vm5420_vm0, %v5776_v56, 0.0  ;;  %v7398_v32 = vld [vmem:[%s17643_s7 + $0xd60] sm:$0xff]  ;;  %v7413_v29 = vld [vmem:[%s17643_s7 + $0xdd8] sm:$0xff] }
 0x4ab   :  { %10724 = vmatprep.subr.mxu1 %v7340_v34  ;;  %10760 = vmatpush3.msra.mxu0 %v7356_v61  ;;  %v7432_v59 = vld [vmem:[%s17643_s7 + $0xe70] sm:$0xff]  ;;  %v6006_v0 = vsel %vm5420_vm0, %v5778_v55, 0.0  ;;  %v6103_v34 = vadd.f32 1e-05, %v6067_v19  ;;  %v6101_v46 = vadd.f32 1e-05, %v6065_v2  ;;  %12138 = vrsqrt.f32 %v6096_v53 }
 0x4ac   :  { %10725 = vmatpush3.msra.mxu1 %v7324_v20  ;;  %10761 = vmatprep.subr.mxu0 %v7371_v14  ;;  %v7400_v61 = vld [vmem:[%s17643_s7 + $0xd70] sm:$0xff]  ;;  %v7431_v20 = vld [vmem:[%s17643_s7 + $0xe68] sm:$0xff]  ;;  %v6027_v14 = vsel %vm5420_vm0, %v5781_v24, 0.0  ;;  %v5993_v26 = vrot.slane %v5992_v62, 4  ;;  %v6007_v30 = vrot.slane %v6006_v0, 4  ;;  %v7442_v55 = vld [vmem:[%s17643_s7 + $0xec0] sm:$0xff] }
 0x4ad   :  { %10726 = vmatprep.subr.mxu1 %v7339_v10  ;;  %10762 = vmatpush3.msra.mxu0 %v7355_v43  ;;  %v7414_v10 = vld [vmem:[%s17643_s7 + $0xde0] sm:$0xff]  ;;  %12140 = vrsqrt.f32 %v6103_v34  ;;  %v6028_v51 = vrot.slane %v6027_v14, 4  ;;  %v7444_v23 = vld [vmem:[%s17643_s7 + $0xed0] sm:$0xff]  ;;  %v7443_v3 = vld [vmem:[%s17643_s7 + $0xec8] sm:$0xff] }
 0x4ae   :  { %10727 = vmatpush3.msra.mxu1 %v7323_v36  ;;  %10763 = vmatprep.subr.mxu0 %v7370_v22  ;;  %v7430_v43 = vld [vmem:[%s17643_s7 + $0xe60] sm:$0xff]  ;;  %12142 = vrsqrt.f32 %v6101_v46  ;;  %v7429_v36 = vld [vmem:[%s17643_s7 + $0xe58] sm:$0xff]  ;;  %v7412_v27 = vld [vmem:[%s17643_s7 + $0xdd0] sm:$0xff] }
 0x4af   :  { %10728 = vmatprep.subr.mxu1 %v7338_v42  ;;  %10764 = vmatpush3.msra.mxu0 %v7354_v17  ;;  %v7397_v22 = vld [vmem:[%s17643_s7 + $0xd58] sm:$0xff]  ;;  %v5994_v42 = vadd.f32 %v5993_v26, %v5992_v62  ;;  %v6008_v17 = vadd.f32 %v6007_v30, %v6006_v0  ;;  %v7396_v37 = vld [vmem:[%s17643_s7 + $0xd50] sm:$0xff]  ;;  %v7427_v7 = vld [vmem:[%s17643_s7 + $0xe48] sm:$0xff] }
 0x4b0   :  { %10729 = vmatpush3.msra.mxu1 %v7322_v16  ;;  %8945 = vmatmul.mubr.f32.vlgmr.msra.gmra.mxu0 %v6644_v28  ;;  %v7428_v16 = vld [vmem:[%s17643_s7 + $0xe50] sm:$0xff]  ;;  %v6029_v28 = vadd.f32 %v6028_v51, %v6027_v14  ;;  %v7395_v56 = vld [vmem:[%s17643_s7 + $0xd48] sm:$0xff]  ;;  %v7441_v53 = vld [vmem:[%s17643_s7 + $0xeb8] sm:$0xff] }
 0x4b1   :  { %10803 = vmatprep.subr.mxu0 %v7449_v63  ;;  %8875 = vmatmul.mubr.f32.vlgmr.msra.gmra.mxu1 %v6642_v52  ;;  %v7411_v63 = vld [vmem:[%s17643_s7 + $0xdc8] sm:$0xff]  ;;  %v5995_v19 = vrot.slane %v5994_v42, 2  ;;  %v6009_v52 = vrot.slane %v6008_v17, 2  ;;  %v7424_v46 = vld [vmem:[%s17643_s7 + $0xe30] sm:$0xff] }
 0x4b2   :  { %10768 = vmatprep.subr.mxu1 %v7417_v31  ;;  %10804 = vmatpush3.msra.mxu0 %v7433_v50  ;;  %v7410_v31 = vld [vmem:[%s17643_s7 + $0xdc0] sm:$0xff]  ;;  %v6030_v24 = vrot.slane %v6029_v28, 2 }
 0x4b3   :  { %9084 = vmatprep.mubr.f32.mxu0 %v6649_v5  ;;  %10769 = vmatpush3.msra.mxu1 %v7401_v45  ;;  %v7426_v50 = vld [vmem:[%s17643_s7 + $0xe40] sm:$0xff]  ;;  %v7409_v5 = vld [vmem:[%s17643_s7 + $0xdb8] sm:$0xff]  ;;  %v5996_v34 = vadd.f32 %v5995_v19, %v5994_v42 }
 0x4b4   :  { %9014 = vmatprep.mubr.f32.mxu1 %v6647_v47  ;;  %10805 = vmatprep.subr.mxu0 %v7448_v40  ;;  %v12137_v2 = vpop.eup %12136  ;;  %v7394_v45 = vld [vmem:[%s17643_s7 + $0xd40] sm:$0xff]  ;;  %v7425_v40 = vld [vmem:[%s17643_s7 + $0xe38] sm:$0xff]  ;;  %v6298_v47 = vrot.slane %v16718_v33, %v13742_v58  ;;  %v6031_v14 = vadd.f32 %v6030_v24, %v6029_v28  ;;  %v6310_v28 = vrot.slane %v16718_v33, %v13779_v57 }
 0x4b5   :  { %10770 = vmatprep.subr.mxu1 %v7416_v39  ;;  %10806 = vmatpush3.msra.mxu0 %v7432_v59  ;;  %v7393_v39 = vld [vmem:[%s17643_s7 + $0xd38] sm:$0xff]  ;;  %v7440_v59 = vld [vmem:[%s17643_s7 + $0xeb0] sm:$0xff]  ;;  %v6170_v0 = vmul.f32 %v12137_v2, %v16772_v8  ;;  %v7439_v8 = vld [vmem:[%s17643_s7 + $0xea8] sm:$0xff]  ;;  %v5997_v51 = vrot.slane %v5996_v34, 1 }
 0x4b6   :  { %10771 = vmatpush3.msra.mxu1 %v7400_v61  ;;  %10807 = vmatprep.subr.mxu0 %v7447_v49  ;;  %v6010_v61 = vadd.f32 %v6009_v52, %v6008_v17  ;;  %v7408_v49 = vld [vmem:[%s17643_s7 + $0xdb0] sm:$0xff]  ;;  %v7437_v42 = vld [vmem:[%s17643_s7 + $0xe98] sm:$0xff]  ;;  %v6519_v17 = vrot.slane %v16768_v9, %v13742_v58 }
 0x4b7   :  { %10772 = vmatprep.subr.mxu1 %v7415_v54  ;;  %10808 = vmatpush3.msra.mxu0 %v7431_v20  ;;  %v7392_v54 = vld [vmem:[%s17643_s7 + $0xd30] sm:$0xff]  ;;  %v7421_v58 = vld [vmem:[%s17643_s7 + $0xe18] sm:$0xff] }
 0x4b8   :  { %10773 = vmatpush3.msra.mxu1 %v7399_v44  ;;  %10809 = vmatprep.subr.mxu0 %v7446_v4  ;;  %v12139_v62 = vpop.eup %12138  ;;  %v7407_v44 = vld [vmem:[%s17643_s7 + $0xda8] sm:$0xff]  ;;  %v7420_v52 = vld [vmem:[%s17643_s7 + $0xe10] sm:$0xff] }
 0x4b9   :  { %10774 = vmatprep.subr.mxu1 %v7414_v10  ;;  %10810 = vmatpush3.msra.mxu0 %v7430_v43  ;;  %v7423_v4 = vld [vmem:[%s17643_s7 + $0xe28] sm:$0xff]  ;;  %v6168_v30 = vmul.f32 %v12139_v62, %v16802_v13  ;;  %v6290_v10 = vrot.slane %v16718_v33, %v17711_v25  ;;  %v7406_v13 = vld [vmem:[%s17643_s7 + $0xda0] sm:$0xff]  ;;  %v7404_v33 = vld [vmem:[%s17643_s7 + $0xd90] sm:$0xff] }
 0x4ba   :  { %10775 = vmatpush3.msra.mxu1 %v7398_v32  ;;  %10811 = vmatprep.subr.mxu0 %v7445_v35  ;;  %v12141_v20 = vpop.eup %12140  ;;  %v7391_v43 = vld [vmem:[%s17643_s7 + $0xd28] sm:$0xff]  ;;  %v7438_v32 = vld [vmem:[%s17643_s7 + $0xea0] sm:$0xff]  ;;  %v6391_v35 = vmul.f32 %v6298_v47, %v6170_v0 }
 0x4bb   :  { %10776 = vmatprep.subr.mxu1 %v7413_v29  ;;  %10812 = vmatpush3.msra.mxu0 %v7429_v36  ;;  %v12143_v26 = vpop.eup %12142  ;;  %v6011_v29 = vrot.slane %v6010_v61, 1  ;;  %v7422_v36 = vld [vmem:[%s17643_s7 + $0xe20] sm:$0xff] }
 0x4bc   :  { %10777 = vmatpush3.msra.mxu1 %v7397_v22  ;;  %10813 = vmatprep.subr.mxu0 %v7444_v23  ;;  %v6175_v22 = vmul.f32 %v12141_v20, %v16825_v41  ;;  %v7390_v23 = vld [vmem:[%s17643_s7 + $0xd20] sm:$0xff] }
 0x4bd   :  { %10778 = vmatprep.subr.mxu1 %v7412_v27  ;;  %10814 = vmatpush3.msra.mxu0 %v7428_v16  ;;  %v17249_v27 = vld [vmem:[%s17639_s3 + $0x20] sm:$0xf]  ;;  %v6173_v16 = vmul.f32 %v12143_v26, %v16832_v1  ;;  %v7389_v1 = vld [vmem:[%s17643_s7 + $0xd18] sm:$0xff]  ;;  %v6012_v19 = vadd.f32 %v6011_v29, %v6010_v61  ;;  %v7480_v29 = vld [vmem:[%s17643_s7 + $0xff0] sm:$0xff] }
 0x4be   :  { %10779 = vmatpush3.msra.mxu1 %v7396_v37  ;;  %10815 = vmatprep.subr.mxu0 %v7443_v3  ;;  %v6318_v41 = vrot.slane %v17249_v27, %v14894_v38  ;;  %v6032_v37 = vrot.slane %v6031_v14, 1  ;;  %v7405_v3 = vld [vmem:[%s17643_s7 + $0xd98] sm:$0xff]  ;;  %v7386_v61 = vld [vmem:[%s17643_s7 + $0xd00] sm:$0xff] }
 0x4bf   :  { %10780 = vmatprep.subr.mxu1 %v7411_v63  ;;  %10816 = vmatpush3.msra.mxu0 %v7427_v7  ;;  %v6389_v63 = vmul.f32 %v6290_v10, %v6168_v30  ;;  %v7436_v7 = vld [vmem:[%s17643_s7 + $0xe90] sm:$0xff]  ;;  %v6394_v47 = vmul.f32 %v6310_v28, %v6173_v16  ;;  %v6066_v0 = vmul.f32 0.5, %v6012_v19  ;;  %v7465_v30 = vld [vmem:[%s17643_s7 + $0xf78] sm:$0xff]  ;;  %v7478_v16 = vld [vmem:[%s17643_s7 + $0xfe0] sm:$0xff] }
 0x4c0   :  { %10781 = vmatpush3.msra.mxu1 %v7395_v56  ;;  %10817 = vmatprep.subr.mxu0 %v7442_v55  ;;  %v6511_v56 = vrot.slane %v16768_v9, %v17711_v25  ;;  %v5998_v55 = vadd.f32 %v5997_v51, %v5996_v34  ;;  %v7435_v25 = vld [vmem:[%s17643_s7 + $0xe88] sm:$0xff]  ;;  %v6396_v2 = vmul.f32 %v6318_v41, %v6175_v22  ;;  %v7402_v34 = vld [vmem:[%s17643_s7 + $0xd80] sm:$0xff]  ;;  %v7477_v28 = vld [vmem:[%s17643_s7 + $0xfd8] sm:$0xff] }
 0x4c1   :  { %10782 = vmatprep.subr.mxu1 %v7410_v31  ;;  %10818 = vmatpush3.msra.mxu0 %v7426_v50  ;;  %v7388_v31 = vld [vmem:[%s17643_s7 + $0xd10] sm:$0xff]  ;;  %v6612_v50 = vadd.f32 %v6519_v17, %v6391_v35  ;;  %v6033_v24 = vadd.f32 %v6032_v37, %v6031_v14  ;;  %v6102_v26 = vadd.f32 1e-05, %v6066_v0  ;;  %v7511_v22 = vld [vmem:[%s17643_s7 + $0x10e8] sm:$0xff]  ;;  %v7510_v41 = vld [vmem:[%s17643_s7 + $0x10e0] sm:$0xff] }
 0x4c2   :  { %10783 = vmatpush3.msra.mxu1 %v7394_v45  ;;  %10819 = vmatprep.subr.mxu0 %v7441_v53  ;;  %v17285_v45 = vld [vmem:[%s17640_s4 + $0x20] sm:$0xf]  ;;  %v6610_v62 = vadd.f32 %v6511_v56, %v6389_v63  ;;  %v7463_v17 = vld [vmem:[%s17643_s7 + $0xf68] sm:$0xff]  ;;  %v7493_v63 = vld [vmem:[%s17643_s7 + $0x1058] sm:$0xff] }
 0x4c3   :  { %10784 = vmatprep.subr.mxu1 %v7409_v5  ;;  %10820 = vmatpush3.msra.mxu0 %v7425_v40  ;;  %v6539_v53 = vrot.slane %v17285_v45, %v14894_v38  ;;  %v7403_v5 = vld [vmem:[%s17643_s7 + $0xd88] sm:$0xff]  ;;  %12144 = vrsqrt.f32 %v6102_v26  ;;  %v7494_v37 = vld [vmem:[%s17643_s7 + $0x1060] sm:$0xff]  ;;  %v7476_v56 = vld [vmem:[%s17643_s7 + $0xfd0] sm:$0xff] }
 0x4c4   :  { %10785 = vmatpush3.msra.mxu1 %v7393_v39  ;;  %10821 = vmatprep.subr.mxu0 %v7440_v59  ;;  %v7419_v40 = vld [vmem:[%s17643_s7 + $0xe08] sm:$0xff]  ;;  %v6531_v39 = vrot.slane %v16768_v9, %v13779_v57  ;;  %v7434_v59 = vld [vmem:[%s17643_s7 + $0xe80] sm:$0xff]  ;;  %v6064_v9 = vmul.f32 0.5, %v5998_v55  ;;  %v6646_v14 = vmax.f32 %v6610_v62, 0.0  ;;  %v7492_v55 = vld [vmem:[%s17643_s7 + $0x1050] sm:$0xff] }
 0x4c5   :  { %10786 = vmatprep.subr.mxu1 %v7408_v49  ;;  %10822 = vmatpush3.msra.mxu0 %v7424_v46  ;;  %v7387_v38 = vld [vmem:[%s17643_s7 + $0xd08] sm:$0xff]  ;;  %v7418_v57 = vld [vmem:[%s17643_s7 + $0xe00] sm:$0xff]  ;;  %v6617_v49 = vadd.f32 %v6539_v53, %v6396_v2  ;;  %v6069_v46 = vmul.f32 0.5, %v6033_v24  ;;  %v7460_v19 = vld [vmem:[%s17643_s7 + $0xf50] sm:$0xff] }
 0x4c6   :  { %10787 = vmatpush3.msra.mxu1 %v7392_v54  ;;  %10823 = vmatprep.subr.mxu0 %v7439_v8  ;;  %v6648_v54 = vmax.f32 %v6612_v50, 0.0  ;;  %v7513_v8 = vld [vmem:[%s17643_s7 + $0x10f8] sm:$0xff]  ;;  %v6615_v20 = vadd.f32 %v6531_v39, %v6394_v47  ;;  %v6100_v10 = vadd.f32 1e-05, %v6064_v9  ;;  %v7506_v50 = vld [vmem:[%s17643_s7 + $0x10c0] sm:$0xff]  ;;  %v7472_v0 = vld [vmem:[%s17643_s7 + $0xfb0] sm:$0xff] }
 0x4c7   :  { %10788 = vmatprep.subr.mxu1 %v7407_v44  ;;  %10824 = vmatpush3.msra.mxu0 %v7423_v4  ;;  %v7481_v44 = vld [vmem:[%s17643_s7 + $0xff8] sm:$0xff]  ;;  %v6105_v35 = vadd.f32 1e-05, %v6069_v46  ;;  %v7474_v2 = vld [vmem:[%s17643_s7 + $0xfc0] sm:$0xff]  ;;  %v7456_v9 = vld [vmem:[%s17643_s7 + $0xf30] sm:$0xff]  ;;  %v6314_v46 = vrot.slane %v17249_v27, %v14881_v15 }
 0x4c8   :  { %10789 = vmatpush3.msra.mxu1 %v7391_v43  ;;  %10825 = vmatprep.subr.mxu0 %v7438_v32  ;;  %v7497_v4 = vld [vmem:[%s17643_s7 + $0x1078] sm:$0xff]  ;;  %v6653_v43 = vmax.f32 %v6617_v49, 0.0  ;;  %v7512_v32 = vld [vmem:[%s17643_s7 + $0x10f0] sm:$0xff]  ;;  %v6651_v51 = vmax.f32 %v6615_v20, 0.0  ;;  %12146 = vrsqrt.f32 %v6100_v10  ;;  %v7490_v53 = vld [vmem:[%s17643_s7 + $0x1040] sm:$0xff]  ;;  %v6326_v10 = vrot.slane %v17249_v27, %v14904_v48 }
 0x4c9   :  { %10790 = vmatprep.subr.mxu1 %v7406_v13  ;;  %10826 = vmatpush3.msra.mxu0 %v7422_v36  ;;  %v7496_v13 = vld [vmem:[%s17643_s7 + $0x1070] sm:$0xff]  ;;  %12148 = vrsqrt.f32 %v6105_v35  ;;  %v7458_v24 = vld [vmem:[%s17643_s7 + $0xf40] sm:$0xff]  ;;  %v7489_v47 = vld [vmem:[%s17643_s7 + $0x1038] sm:$0xff] }
 0x4ca   :  { %10791 = vmatpush3.msra.mxu1 %v7390_v23  ;;  %10827 = vmatprep.subr.mxu0 %v7437_v42  ;;  %v7464_v36 = vld [vmem:[%s17643_s7 + $0xf70] sm:$0xff]  ;;  %v7479_v23 = vld [vmem:[%s17643_s7 + $0xfe8] sm:$0xff]  ;;  %v7469_v35 = vld [vmem:[%s17643_s7 + $0xf98] sm:$0xff] }
 0x4cb   :  { %10792 = vmatprep.subr.mxu1 %v7405_v3  ;;  %10828 = vmatpush3.msra.mxu0 %v7421_v58  ;;  %v7495_v42 = vld [vmem:[%s17643_s7 + $0x1068] sm:$0xff]  ;;  %v7462_v3 = vld [vmem:[%s17643_s7 + $0xf60] sm:$0xff]  ;;  %v7509_v58 = vld [vmem:[%s17643_s7 + $0x10d8] sm:$0xff] }
 0x4cc   :  { %10793 = vmatpush3.msra.mxu1 %v7389_v1  ;;  %10829 = vmatprep.subr.mxu0 %v7436_v7  ;;  %v7461_v1 = vld [vmem:[%s17643_s7 + $0xf58] sm:$0xff]  ;;  %v7508_v7 = vld [vmem:[%s17643_s7 + $0x10d0] sm:$0xff] }
 0x4cd   :  { %10794 = vmatprep.subr.mxu1 %v7404_v33  ;;  %10830 = vmatpush3.msra.mxu0 %v7420_v52  ;;  %v7507_v33 = vld [vmem:[%s17643_s7 + $0x10c8] sm:$0xff]  ;;  %v7485_v27 = vld [vmem:[%s17643_s7 + $0x1018] sm:$0xff] }
 0x4ce   :  { %10795 = vmatpush3.msra.mxu1 %v7388_v31  ;;  %10831 = vmatprep.subr.mxu0 %v7435_v25  ;;  %v7475_v52 = vld [vmem:[%s17643_s7 + $0xfc8] sm:$0xff] }
 0x4cf   :  { %10796 = vmatprep.subr.mxu1 %v7403_v5  ;;  %10832 = vmatpush3.msra.mxu0 %v7419_v40  ;;  %v7491_v31 = vld [vmem:[%s17643_s7 + $0x1048] sm:$0xff]  ;;  %v7505_v5 = vld [vmem:[%s17643_s7 + $0x10b8] sm:$0xff] }
 0x4d0   :  { %10797 = vmatpush3.msra.mxu1 %v7387_v38  ;;  %10833 = vmatprep.subr.mxu0 %v7434_v59  ;;  %v7459_v25 = vld [vmem:[%s17643_s7 + $0xf48] sm:$0xff]  ;;  %v7473_v40 = vld [vmem:[%s17643_s7 + $0xfb8] sm:$0xff]  ;;  %v12145_v39 = vpop.eup %12144  ;;  %v7504_v59 = vld [vmem:[%s17643_s7 + $0x10b0] sm:$0xff] }
 0x4d1   :  { %10798 = vmatprep.subr.mxu1 %v7402_v34  ;;  %10834 = vmatpush3.msra.mxu0 %v7418_v57  ;;  %v7457_v38 = vld [vmem:[%s17643_s7 + $0xf38] sm:$0xff]  ;;  %v7488_v34 = vld [vmem:[%s17643_s7 + $0x1030] sm:$0xff]  ;;  %v6174_v49 = vmul.f32 %v12145_v39, %v17060_v12 }
 0x4d2   :  { %10799 = vmatpush3.msra.mxu1 %v7386_v61  ;;  %9085 = vmatmul.mubr.f32.vlgmr.msra.gmra.mxu0 %v6648_v54  ;;  %v7503_v61 = vld [vmem:[%s17643_s7 + $0x10a8] sm:$0xff]  ;;  %v7524_v39 = vld [vmem:[%s17643_s7 + $0x1150] sm:$0xff] }
 0x4d3   :  { %10873 = vmatprep.subr.mxu0 %v7513_v8  ;;  %9015 = vmatmul.mubr.f32.vlgmr.msra.gmra.mxu1 %v6646_v14  ;;  %v7471_v54 = vld [vmem:[%s17643_s7 + $0xfa8] sm:$0xff]  ;;  %v12160_v14 = vld [vmem:[%s17639_s3 + $0x18] sm:$0xff] }
 0x4d4   :  { %10838 = vmatprep.subr.mxu1 %v7481_v44  ;;  %10874 = vmatpush3.msra.mxu0 %v7497_v4  ;;  %v7487_v8 = vld [vmem:[%s17643_s7 + $0x1028] sm:$0xff]  ;;  %v6306_v12 = vrot.slane %v12160_v14, %v13788_v21  ;;  %v7502_v4 = vld [vmem:[%s17643_s7 + $0x10a0] sm:$0xff]  ;;  %v7517_v14 = vld [vmem:[%s17643_s7 + $0x1118] sm:$0xff] }
 0x4d5   :  { %9224 = vmatprep.mubr.f32.mxu0 %v6653_v43  ;;  %10839 = vmatpush3.msra.mxu1 %v7465_v30  ;;  %v12147_v62 = vpop.eup %12146  ;;  %v7455_v44 = vld [vmem:[%s17643_s7 + $0xf28] sm:$0xff]  ;;  %v7486_v30 = vld [vmem:[%s17643_s7 + $0x1020] sm:$0xff] }
 0x4d6   :  { %9154 = vmatprep.mubr.f32.mxu1 %v6651_v51  ;;  %10875 = vmatprep.subr.mxu0 %v7512_v32  ;;  %v12149_v57 = vpop.eup %12148  ;;  %v6172_v20 = vmul.f32 %v12147_v62, %v17056_v6  ;;  %v7470_v6 = vld [vmem:[%s17643_s7 + $0xfa0] sm:$0xff]  ;;  %v6395_v32 = vmul.f32 %v6314_v46, %v6174_v49  ;;  %v6535_v51 = vrot.slane %v17285_v45, %v14881_v15  ;;  %v7468_v15 = vld [vmem:[%s17643_s7 + $0xf90] sm:$0xff]  ;;  %v7535_v49 = vld [vmem:[%s17643_s7 + $0x11a8] sm:$0xff] }
 0x4d7   :  { %10840 = vmatprep.subr.mxu1 %v7480_v29  ;;  %10876 = vmatpush3.msra.mxu0 %v7496_v13  ;;  %v6177_v26 = vmul.f32 %v12149_v57, %v17076_v60  ;;  %v7454_v43 = vld [vmem:[%s17643_s7 + $0xf20] sm:$0xff]  ;;  %v7501_v60 = vld [vmem:[%s17643_s7 + $0x1098] sm:$0xff]  ;;  %v7519_v46 = vld [vmem:[%s17643_s7 + $0x1128] sm:$0xff] }
 0x4d8   :  { %10841 = vmatpush3.msra.mxu1 %v7464_v36  ;;  %10877 = vmatprep.subr.mxu0 %v7511_v22  ;;  %v6393_v29 = vmul.f32 %v6306_v12, %v6172_v20  ;;  %v7453_v13 = vld [vmem:[%s17643_s7 + $0xf18] sm:$0xff]  ;;  %v7500_v36 = vld [vmem:[%s17643_s7 + $0x1090] sm:$0xff]  ;;  %v7538_v62 = vld [vmem:[%s17643_s7 + $0x11c0] sm:$0xff] }
 0x4d9   :  { %10842 = vmatprep.subr.mxu1 %v7479_v23  ;;  %10878 = vmatpush3.msra.mxu0 %v7495_v42  ;;  %v12161_v22 = vld [vmem:[%s17640_s4 + $0x18] sm:$0xff]  ;;  %v7484_v42 = vld [vmem:[%s17643_s7 + $0x1010] sm:$0xff] }
 0x4da   :  { %10843 = vmatpush3.msra.mxu1 %v7463_v17  ;;  %10879 = vmatprep.subr.mxu0 %v7510_v41  ;;  %v6527_v23 = vrot.slane %v12161_v22, %v13788_v21  ;;  %v6398_v17 = vmul.f32 %v6326_v10, %v6177_v26  ;;  %v6547_v41 = vrot.slane %v17285_v45, %v14904_v48  ;;  %v7452_v21 = vld [vmem:[%s17643_s7 + $0xf10] sm:$0xff]  ;;  %v7483_v48 = vld [vmem:[%s17643_s7 + $0x1008] sm:$0xff]  ;;  %v7521_v57 = vld [vmem:[%s17643_s7 + $0x1138] sm:$0xff] }
 0x4db   :  { %10844 = vmatprep.subr.mxu1 %v7478_v16  ;;  %10880 = vmatpush3.msra.mxu0 %v7494_v37  ;;  %v7499_v16 = vld [vmem:[%s17643_s7 + $0x1088] sm:$0xff]  ;;  %v6616_v45 = vadd.f32 %v6535_v51, %v6395_v32  ;;  %v7533_v20 = vld [vmem:[%s17643_s7 + $0x1198] sm:$0xff]  ;;  %v7532_v12 = vld [vmem:[%s17643_s7 + $0x1190] sm:$0xff]  ;;  %v10345_v32 = vpop.f32.mrf.mxu0 }
 0x4dc   :  { %10845 = vmatpush3.msra.mxu1 %v7462_v3  ;;  %10881 = vmatprep.subr.mxu0 %v7509_v58  ;;  %v7467_v37 = vld [vmem:[%s17643_s7 + $0xf88] sm:$0xff]  ;;  %v7498_v58 = vld [vmem:[%s17643_s7 + $0x1080] sm:$0xff] }
 0x4dd   :  { %10846 = vmatprep.subr.mxu1 %v7477_v28  ;;  %10882 = vmatpush3.msra.mxu0 %v7493_v63  ;;  %v7451_v3 = vld [vmem:[%s17643_s7 + $0xf08] sm:$0xff]  ;;  %v6614_v28 = vadd.f32 %v6527_v23, %v6393_v29  ;;  %v7466_v63 = vld [vmem:[%s17643_s7 + $0xf80] sm:$0xff] }
 0x4de   :  { %10847 = vmatpush3.msra.mxu1 %v7461_v1  ;;  %10883 = vmatprep.subr.mxu0 %v7508_v7  ;;  %v7482_v1 = vld [vmem:[%s17643_s7 + $0x1000] sm:$0xff]  ;;  %v6619_v7 = vadd.f32 %v6547_v41, %v6398_v17  ;;  %v7515_v26 = vld [vmem:[%s17643_s7 + $0x1108] sm:$0xff] }
 0x4df   :  { %10848 = vmatprep.subr.mxu1 %v7476_v56  ;;  %10884 = vmatpush3.msra.mxu0 %v7492_v55  ;;  %v7450_v56 = vld [vmem:[%s17643_s7 + $0xf00] sm:$0xff]  ;;  %v6652_v55 = vmax.f32 %v6616_v45, 0.0 }
 0x4e0   :  { %10849 = vmatpush3.msra.mxu1 %v7460_v19  ;;  %10885 = vmatprep.subr.mxu0 %v7507_v33  ;;  %v7545_v19 = vld [vmem:[%s17643_s7 + $0x11f8] sm:$0xff]  ;;  %v6650_v33 = vmax.f32 %v6614_v28, 0.0 }
 0x4e1   :  { %10850 = vmatprep.subr.mxu1 %v7475_v52  ;;  %10886 = vmatpush3.msra.mxu0 %v7491_v31  ;;  %v7529_v52 = vld [vmem:[%s17643_s7 + $0x1178] sm:$0xff]  ;;  %v6655_v31 = vmax.f32 %v6619_v7, 0.0 }
 0x4e2   :  { %10851 = vmatpush3.msra.mxu1 %v7459_v25  ;;  %10887 = vmatprep.subr.mxu0 %v7506_v50  ;;  %v7544_v25 = vld [vmem:[%s17643_s7 + $0x11f0] sm:$0xff]  ;;  %v17723_v10 = vld [vmem:[#allocation24_spill] sm:$0xff] }
 0x4e3   :  { %10852 = vmatprep.subr.mxu1 %v7474_v2  ;;  %10888 = vmatpush3.msra.mxu0 %v7490_v53  ;;  %v7528_v50 = vld [vmem:[%s17643_s7 + $0x1170] sm:$0xff]  ;;  %v7543_v2 = vld [vmem:[%s17643_s7 + $0x11e8] sm:$0xff] }
 0x4e4   :  { %10853 = vmatpush3.msra.mxu1 %v7458_v24  ;;  %10889 = vmatprep.subr.mxu0 %v7505_v5  ;;  %v7527_v53 = vld [vmem:[%s17643_s7 + $0x1168] sm:$0xff]  ;;  %v7542_v24 = vld [vmem:[%s17643_s7 + $0x11e0] sm:$0xff] }
 0x4e5   :  { %10854 = vmatprep.subr.mxu1 %v7473_v40  ;;  %10890 = vmatpush3.msra.mxu0 %v7489_v47  ;;  %v7526_v5 = vld [vmem:[%s17643_s7 + $0x1160] sm:$0xff]  ;;  %v7541_v40 = vld [vmem:[%s17643_s7 + $0x11d8] sm:$0xff] }
 0x4e6   :  { %10855 = vmatpush3.msra.mxu1 %v7457_v38  ;;  %10891 = vmatprep.subr.mxu0 %v7504_v59  ;;  %v7525_v47 = vld [vmem:[%s17643_s7 + $0x1158] sm:$0xff]  ;;  %v7539_v38 = vld [vmem:[%s17643_s7 + $0x11c8] sm:$0xff] }
 0x4e7   :  { %10856 = vmatprep.subr.mxu1 %v7472_v0  ;;  %10892 = vmatpush3.msra.mxu0 %v7488_v34  ;;  %v7523_v59 = vld [vmem:[%s17643_s7 + $0x1148] sm:$0xff]  ;;  %v7522_v0 = vld [vmem:[%s17643_s7 + $0x1140] sm:$0xff]  ;;  %v7537_v34 = vld [vmem:[%s17643_s7 + $0x11b8] sm:$0xff] }
 0x4e8   :  { %10857 = vmatpush3.msra.mxu1 %v7456_v9  ;;  %10893 = vmatprep.subr.mxu0 %v7503_v61  ;;  %v7536_v9 = vld [vmem:[%s17643_s7 + $0x11b0] sm:$0xff] }
 0x4e9   :  { %10858 = vmatprep.subr.mxu1 %v7471_v54  ;;  %10894 = vmatpush3.msra.mxu0 %v7487_v8  ;;  %v7520_v61 = vld [vmem:[%s17643_s7 + $0x1130] sm:$0xff]  ;;  %v7534_v54 = vld [vmem:[%s17643_s7 + $0x11a0] sm:$0xff] }
 0x4ea   :  { %10859 = vmatpush3.msra.mxu1 %v7455_v44  ;;  %10895 = vmatprep.subr.mxu0 %v7502_v4  ;;  %v7518_v8 = vld [vmem:[%s17643_s7 + $0x1120] sm:$0xff]  ;;  %v7516_v44 = vld [vmem:[%s17643_s7 + $0x1110] sm:$0xff]  ;;  %v7531_v4 = vld [vmem:[%s17643_s7 + $0x1188] sm:$0xff] }
 0x4eb   :  { %10860 = vmatprep.subr.mxu1 %v7470_v6  ;;  %10896 = vmatpush3.msra.mxu0 %v7486_v30  ;;  %v7530_v6 = vld [vmem:[%s17643_s7 + $0x1180] sm:$0xff] }
 0x4ec   :  { %10861 = vmatpush3.msra.mxu1 %v7454_v43  ;;  %10897 = vmatprep.subr.mxu0 %v7501_v60  ;;  %v7514_v30 = vld [vmem:[%s17643_s7 + $0x1100] sm:$0xff]  ;;  %v6654_v43 = vmax.f32 %v17723_v10, 0.0 }
 0x4ed   :  { %10862 = vmatprep.subr.mxu1 %v7469_v35  ;;  %10898 = vmatpush3.msra.mxu0 %v7485_v27  ;;  %v9309_v60 = vld [vmem:[%s17646_s10] sm:$0xff]  ;;  %v10380_v35 = vpop.f32.mrf.mxu1  ;;  %v10346_v27 = vpop.f32.mrf.mxu0 }
 0x4ee   :  { %10863 = vmatpush3.msra.mxu1 %v7453_v13  ;;  %10899 = vmatprep.subr.mxu0 %v7500_v36  ;;  %v10347_v29 = vadd.f32 %v10346_v27, %v10345_v32 }
 0x4ef   :  { %10864 = vmatprep.subr.mxu1 %v7468_v15  ;;  %10900 = vmatpush3.msra.mxu0 %v7484_v42  ;;  %v10381_v51 = vpop.f32.mrf.mxu1  ;;  %v10415_v13 = vpop.f32.mrf.mxu0 }
 0x4f0   :  { %10865 = vmatpush3.msra.mxu1 %v7452_v21  ;;  %10901 = vmatprep.subr.mxu0 %v7499_v16  ;;  %v10382_v22 = vadd.f32 %v10381_v51, %v10380_v35  ;;  %v8107_v23 = vadd.f32 %v10347_v29, %v17034_v11 }
 0x4f1   :  { %10866 = vmatprep.subr.mxu1 %v7467_v37  ;;  %10902 = vmatpush3.msra.mxu0 %v7483_v48  ;;  %v10450_v36 = vpop.f32.mrf.mxu1  ;;  %v10416_v15 = vpop.f32.mrf.mxu0 }
 0x4f2   :  { %10867 = vmatpush3.msra.mxu1 %v7451_v3  ;;  %10903 = vmatprep.subr.mxu0 %v7498_v58  ;;  %v8177_v17 = vadd.f32 %v10382_v22, %v8107_v23  ;;  %v10417_v16 = vadd.f32 %v10416_v15, %v10415_v13  ;;  %v10131_v22 = vld [vmem:[%s17645_s9] ss:$0 sm:$0xff] }
 0x4f3   :  { %10868 = vmatprep.subr.mxu1 %v7466_v63  ;;  %10904 = vmatpush3.msra.mxu0 %v7482_v1  ;;  %v10451_v42 = vpop.f32.mrf.mxu1  ;;  %v10485_v41 = vpop.f32.mrf.mxu0 }
 0x4f4   :  { %10869 = vmatpush3.msra.mxu1 %v7450_v56  ;;  %9225 = vmatmul.mubr.f32.vlgmr.msra.gmra.mxu0 %v6652_v55  ;;  %v10452_v37 = vadd.f32 %v10451_v42, %v10450_v36  ;;  %v8247_v48 = vadd.f32 %v10417_v16, %v8177_v17  ;;  %v10132_v17 = vld [vmem:[%s17647_s11] ss:$0 sm:$0xff] }
 0x4f5   :  { %9155 = vmatmul.mubr.f32.vlgmr.msra.gmra.mxu1 %v6650_v33  ;;  %10908 = vmatprep.subr.mxu1 %v7545_v19  ;;  %v10486_v45 = vpop.f32.mrf.mxu0 }
 0x4f6   :  { %10909 = vmatpush3.msra.mxu1 %v7529_v52  ;;  %9294 = vmatprep.mubr.f32.mxu1 %v6655_v31  ;;  %v8317_v58 = vadd.f32 %v10452_v37, %v8247_v48  ;;  %v10487_v1 = vadd.f32 %v10486_v45, %v10485_v41 }
 0x4f7   :  { %10910 = vmatprep.subr.mxu1 %v7544_v25  ;;  %10980 = vmatprep.subr.mxu0 %v12184_v18 }
 0x4f8   :  { %10911 = vmatpush3.msra.mxu1 %v7528_v50  ;;  %10982 = vmatprep.mubr.msk.f32.mxu0 %vm12185_vm1, %v12184_v18  ;;  %v7540_v18 = vld [vmem:[%s17643_s7 + $0x11d0] sm:$0xff]  ;;  %v8387_v56 = vadd.f32 %v10487_v1, %v8317_v58 }
 0x4f9   :  { %10912 = vmatprep.subr.mxu1 %v7543_v2  ;;  %10981 = vmatpush3.msra.mxu0 %v9309_v60 }
 0x4fa   :  { %10913 = vmatpush3.msra.mxu1 %v7527_v53 }
 0x4fb   :  { %10914 = vmatprep.subr.mxu1 %v7542_v24 }
 0x4fc   :  { %10915 = vmatpush3.msra.mxu1 %v7526_v5 }
 0x4fd   :  { %10916 = vmatprep.subr.mxu1 %v7541_v40 }
 0x4fe   :  { %10917 = vmatpush3.msra.mxu1 %v7525_v47 }
 0x4ff   :  { %10918 = vmatprep.subr.mxu1 %v7540_v18 }
 0x500   :  { %10919 = vmatpush3.msra.mxu1 %v7524_v39 }
 0x501   :  { %10920 = vmatprep.subr.mxu1 %v7539_v38 }
 0x502   :  { %10921 = vmatpush3.msra.mxu1 %v7523_v59 }
 0x503   :  { %10922 = vmatprep.subr.mxu1 %v7538_v62 }
 0x504   :  { %10923 = vmatpush3.msra.mxu1 %v7522_v0 }
 0x505   :  { %10924 = vmatprep.subr.mxu1 %v7537_v34 }
 0x506   :  { %10925 = vmatpush3.msra.mxu1 %v7521_v57 }
 0x507   :  { %10926 = vmatprep.subr.mxu1 %v7536_v9 }
 0x508   :  { %10927 = vmatpush3.msra.mxu1 %v7520_v61 }
 0x509   :  { %10928 = vmatprep.subr.mxu1 %v7535_v49 }
 0x50a   :  { %10929 = vmatpush3.msra.mxu1 %v7519_v46  ;;  %v10555_v28 = vpop.f32.mrf.mxu0 }
 0x50b   :  { %10930 = vmatprep.subr.mxu1 %v7534_v54  ;;  %v10520_v21 = vpop.f32.mrf.mxu1 }
 0x50c   :  { %10931 = vmatpush3.msra.mxu1 %v7518_v8  ;;  %v10556_v55 = vpop.f32.mrf.mxu0 }
 0x50d   :  { %10932 = vmatprep.subr.mxu1 %v7533_v20  ;;  %v10521_v3 = vpop.f32.mrf.mxu1  ;;  %v10557_v31 = vadd.f32 %v10556_v55, %v10555_v28 }
 0x50e   :  { %10933 = vmatpush3.msra.mxu1 %v7517_v14  ;;  %v10522_v7 = vadd.f32 %v10521_v3, %v10520_v21 }
 0x50f   :  { %10934 = vmatprep.subr.mxu1 %v7532_v12 }
 0x510   :  { %10935 = vmatpush3.msra.mxu1 %v7516_v44  ;;  %v8457_v33 = vadd.f32 %v10522_v7, %v8387_v56 }
 0x511   :  { %10936 = vmatprep.subr.mxu1 %v7531_v4 }
 0x512   :  { %10937 = vmatpush3.msra.mxu1 %v7515_v26  ;;  %v8527_v50 = vadd.f32 %v10557_v31, %v8457_v33 }
 0x513   :  { %10938 = vmatprep.subr.mxu1 %v7530_v6 }
 0x514   :  { %10939 = vmatpush3.msra.mxu1 %v7514_v30 }
 0x515   :  { %9295 = vmatmul.mubr.f32.vlgmr.msra.gmra.mxu1 %v6654_v43 }
 0x52c   :  { %v10625_v11 = vpop.f32.mrf.mxu0 }
 0x52d   :  { %v10590_v63 = vpop.f32.mrf.mxu1 }
 0x52e   :  { %v10626_v2 = vpop.f32.mrf.mxu0 }
 0x52f   :  { %v10591_v19 = vpop.f32.mrf.mxu1  ;;  %v10627_v47 = vadd.f32 %v10626_v2, %v10625_v11 }
 0x530   :  { %v10592_v25 = vadd.f32 %v10591_v19, %v10590_v63 }
 0x532   :  { %v8597_v24 = vadd.f32 %v10592_v25, %v8527_v50 }
 0x534   :  { %v8667_v39 = vadd.f32 %v10627_v47, %v8597_v24 }
 0x54e   :  { %v10695_v5 = vpop.f32.mrf.mxu0 }
 0x54f   :  { %v10660_v52 = vpop.f32.mrf.mxu1 }
 0x550   :  { %v10696_v38 = vpop.f32.mrf.mxu0 }
 0x551   :  { %v10661_v53 = vpop.f32.mrf.mxu1  ;;  %v10697_v57 = vadd.f32 %v10696_v38, %v10695_v5 }
 0x552   :  { %v10662_v18 = vadd.f32 %v10661_v53, %v10660_v52 }
 0x554   :  { %v8737_v62 = vadd.f32 %v10662_v18, %v8667_v39 }
 0x556   :  { %v8807_v61 = vadd.f32 %v10697_v57, %v8737_v62 }
 0x570   :  { %v10765_v0 = vpop.f32.mrf.mxu0 }
 0x571   :  { %v10730_v40 = vpop.f32.mrf.mxu1 }
 0x572   :  { %v10766_v49 = vpop.f32.mrf.mxu0 }
 0x573   :  { %v10731_v59 = vpop.f32.mrf.mxu1  ;;  %v10767_v14 = vadd.f32 %v10766_v49, %v10765_v0 }
 0x574   :  { %v10732_v9 = vadd.f32 %v10731_v59, %v10730_v40 }
 0x576   :  { %v8877_v54 = vadd.f32 %v10732_v9, %v8807_v61 }
 0x578   :  { %v8947_v44 = vadd.f32 %v10767_v14, %v8877_v54 }
 0x592   :  { %v10835_v8 = vpop.f32.mrf.mxu0 }
 0x593   :  { %v10800_v34 = vpop.f32.mrf.mxu1 }
 0x594   :  { %v10836_v4 = vpop.f32.mrf.mxu0 }
 0x595   :  { %v10801_v46 = vpop.f32.mrf.mxu1  ;;  %v10837_v10 = vadd.f32 %v10836_v4, %v10835_v8 }
 0x596   :  { %v10802_v12 = vadd.f32 %v10801_v46, %v10800_v34 }
 0x598   :  { %v9017_v6 = vadd.f32 %v10802_v12, %v8947_v44 }
 0x59a   :  { %v9087_v60 = vadd.f32 %v10837_v10, %v9017_v6 }
 0x5b4   :  { %v10905_v30 = vpop.f32.mrf.mxu0 }
 0x5b5   :  { %v10870_v20 = vpop.f32.mrf.mxu1 }
 0x5b6   :  { %v10906_v32 = vpop.f32.mrf.mxu0 }
 0x5b7   :  { %v10871_v26 = vpop.f32.mrf.mxu1  ;;  %v10907_v51 = vadd.f32 %v10906_v32, %v10905_v30 }
 0x5b8   :  { %v10872_v43 = vadd.f32 %v10871_v26, %v10870_v20 }
 0x5ba   :  { %v9157_v35 = vadd.f32 %v10872_v43, %v9087_v60 }
 0x5bc   :  { %v9227_v13 = vadd.f32 %v10907_v51, %v9157_v35 }
 0x5d5   :  { %v10940_v27 = vpop.f32.mrf.mxu1 }
 0x5d7   :  { %v10941_v29 = vpop.f32.mrf.mxu1 }
 0x5d8   :  { %v10942_v36 = vadd.f32 %v10941_v29, %v10940_v27 }
 0x5da   :  { %v9297_v23 = vadd.f32 %v10942_v36, %v9227_v13 }
 0x5dc   :  { %v9307_v15 = vadd.f32 %v10131_v22, %v9297_v23 }
 0x5de   :  { %v9308_v42 = vmax.f32 %v9307_v15, 0.0 }
 0x5e0   :  { %10983 = vmatmul.mubr.msk.f32.vlgmr.msra.gmra.mxu0 %vm9317_vm2, %v9308_v42 }
 0x6a0   :  { %v9387_v41 = vpop.f32.mrf.mxu0 }
 0x6a1   :  { %v9388_v21 = vadd.f32 %v10132_v17, %v9387_v41 }
 0x6a2   :  { %v10984_v16 = vpop.f32.mrf.mxu0 }
 0x6a3   :  { %12150 = vtanh.f32 %v9388_v21 }
 0x6b0   :  { %v12151_v37 = vpop.eup %12150 }
 0x6b1   :  { %9392 = vst [vmem:[#allocation2] sm:$0x3] %v12151_v37 }
 0x6b2   :  { %12173 = shalt.err (!%p12170_p4)
}
 0x6b3   :  { %9402 = dma.vmem_to_hbm [thread:$0]  %s9400_s14, 32, %s17648_s12, [#allocation3]  }
 0x6b4   :  { %12182 = dma.done.wait [#allocation3], 32  }
 0x6b5   :  { %12183 = vsyncadd [#allocation3], 4294967264 }
 0x6b6   :  { %9406 = vsyncpa [#allocation3], 1 }

</bundles_post_ra>
